<compile_context>
chip_gen: v7x
topology: tpu7x:2x2x1
jax: 0.10.0
libtpu: 0.0.40
codegen_flags: <defaults>
</compile_context>

<pallas_src>
import jax
import jax.numpy as jnp
from jax.experimental import pallas as pl
from jax.experimental.pallas import tpu as pltpu

BN_EPS = 1e-5
LANES = 128        # channel (lane) padding target -> lane-dense stores / full MXU cols
ROW_TILE = 512     # epilogue row tile (mem-bound roofline ~85% at 512-1024)

_VMEM_LIMIT = None


def _vmem_limit_bytes():
    """Per-chip VMEM budget: ~3/4 of per-core VMEM, capped at 96 MiB."""
    global _VMEM_LIMIT
    if _VMEM_LIMIT is None:
        cap = 128 * 1024 * 1024
        try:
            info = pltpu.get_tpu_info()
            cap_attr = getattr(info, "vmem_capacity_bytes", None)
            if cap_attr:
                cap = int(cap_attr)
        except Exception:
            pass
        _VMEM_LIMIT = int(min((3 * cap) // 4, 96 * 1024 * 1024))
    return _VMEM_LIMIT


def _compiler_params():
    return pltpu.CompilerParams(
        dimension_semantics=("parallel",),
        vmem_limit_bytes=_vmem_limit_bytes(),
    )


# ----------------------------- Pallas kernels -------------------------------

def _conv_stats_call(x_sp, w_p, H, W):
    """Per-image 3x3 conv: im2col into VMEM + one (HW,9CP)x(9CP,CP) bf16 matmul
    (f32 accumulation).  Emits y1 (bf16) and per-channel [sum, M2] partials."""
    N = x_sp.shape[0]
    CP = x_sp.shape[-1]
    Hp, Wp = H + 2, W + 2
    HW = H * W
    K = 9 * CP

    def kernel(xp_ref, w_ref, y_ref, s_ref, col_ref):
        xp = xp_ref[0]                                       # (Hp, Wp, CP) bf16
        # Build the im2col slab once (9 explicit shifted-slice copies); one
        # big-K matmul then replaces 9 separate accumulate steps.
        for k in range(9):                                   # static unroll
            dy, dx = divmod(k, 3)
            col_ref[:, k * CP:(k + 1) * CP] = (
                xp[dy:dy + H, dx:dx + W, :].reshape(HW, CP))
        acc = jnp.dot(col_ref[...], w_ref[...],
                      preferred_element_type=jnp.float32)    # (HW, CP) f32
        y_ref[0] = acc.astype(y_ref.dtype)                   # bf16 to HBM
        # Per-image centered partial stats (exactly combinable across images).
        s = jnp.sum(acc, axis=0, keepdims=True)
        d = acc - s * (1.0 / HW)
        m2 = jnp.sum(d * d, axis=0, keepdims=True)
        s_ref[0] = jnp.concatenate([s, m2], axis=0)

    return pl.pallas_call(
        kernel,
        out_shape=(jax.ShapeDtypeStruct((N, HW, CP), jnp.bfloat16),
                   jax.ShapeDtypeStruct((N, 2, CP), jnp.float32)),
        grid_spec=pltpu.PrefetchScalarGridSpec(
            num_scalar_prefetch=0,
            grid=(N,),
            in_specs=[
                pl.BlockSpec((1, Hp, Wp, CP), lambda n: (n, 0, 0, 0)),
                # Grid-invariant weight block: constant index_map -> DMA'd once.
                pl.BlockSpec((K, CP), lambda n: (0, 0)),
            ],
            out_specs=(
                pl.BlockSpec((1, HW, CP), lambda n: (n, 0, 0)),
                pl.BlockSpec((1, 2, CP), lambda n: (n, 0, 0)),
            ),
            scratch_shapes=[pltpu.VMEM((HW, K), jnp.bfloat16)]),
        compiler_params=_compiler_params(),
    )(x_sp, w_p)


def _bn_relu_conv_stats_call(y1, scale1, shift1, w_p, H, W):
    """Per-image fused BN1 + ReLU + conv2 (+ stats); h never leaves VMEM."""
    N, HW, CP = y1.shape
    Hp, Wp = H + 2, W + 2
    K = 9 * CP

    def kernel(y1_ref, sc_ref, sh_ref, w_ref, y2_ref, s_ref, hp_ref, col_ref):
        # BN1 + ReLU in f32 on the VPU; cast to bf16 ONCE on the halo-buffer write.
        h = jnp.maximum(
            y1_ref[0].astype(jnp.float32) * sc_ref[...] + sh_ref[...], 0.0)
        # Zero only the 1-pixel halo strips; the interior is overwritten below.
        hp_ref[0:1, :, :] = jnp.zeros((1, Wp, CP), jnp.bfloat16)
        hp_ref[H + 1:Hp, :, :] = jnp.zeros((1, Wp, CP), jnp.bfloat16)
        hp_ref[1:H + 1, 0:1, :] = jnp.zeros((H, 1, CP), jnp.bfloat16)
        hp_ref[1:H + 1, W + 1:Wp, :] = jnp.zeros((H, 1, CP), jnp.bfloat16)
        hp_ref[1:H + 1, 1:W + 1, :] = h.reshape(H, W, CP).astype(jnp.bfloat16)
        hp = hp_ref[...]
        for k in range(9):
            dy, dx = divmod(k, 3)
            col_ref[:, k * CP:(k + 1) * CP] = (
                hp[dy:dy + H, dx:dx + W, :].reshape(HW, CP))
        acc = jnp.dot(col_ref[...], w_ref[...],
                      preferred_element_type=jnp.float32)
        y2_ref[0] = acc.astype(y2_ref.dtype)
        s = jnp.sum(acc, axis=0, keepdims=True)
        d = acc - s * (1.0 / HW)
        m2 = jnp.sum(d * d, axis=0, keepdims=True)
        s_ref[0] = jnp.concatenate([s, m2], axis=0)

    return pl.pallas_call(
        kernel,
        out_shape=(jax.ShapeDtypeStruct((N, HW, CP), jnp.bfloat16),
                   jax.ShapeDtypeStruct((N, 2, CP), jnp.float32)),
        grid_spec=pltpu.PrefetchScalarGridSpec(
            num_scalar_prefetch=0,
            grid=(N,),
            in_specs=[
                pl.BlockSpec((1, HW, CP), lambda n: (n, 0, 0)),
                pl.BlockSpec((1, CP), lambda n: (0, 0)),
                pl.BlockSpec((1, CP), lambda n: (0, 0)),
                pl.BlockSpec((K, CP), lambda n: (0, 0)),
            ],
            out_specs=(
                pl.BlockSpec((1, HW, CP), lambda n: (n, 0, 0)),
                pl.BlockSpec((1, 2, CP), lambda n: (n, 0, 0)),
            ),
            scratch_shapes=[pltpu.VMEM((Hp, Wp, CP), jnp.bfloat16),
                            pltpu.VMEM((HW, K), jnp.bfloat16)]),
        compiler_params=_compiler_params(),
    )(y1, scale1, shift1, w_p)


def _bn_add_relu_call(y2_flat, res_flat, scale2, shift2):
    """Row-tiled, lane-dense epilogue: relu(y2*scale2 + shift2 + residual)."""
    M, CP = y2_flat.shape
    assert M % ROW_TILE == 0, "wrapper pads M to a ROW_TILE multiple"
    tm = ROW_TILE

    def kernel(y_ref, r_ref, sc_ref, sh_ref, o_ref):
        o_ref[...] = jnp.maximum(
            y_ref[...].astype(jnp.float32) * sc_ref[...] + sh_ref[...]
            + r_ref[...].astype(jnp.float32), 0.0)

    return pl.pallas_call(
        kernel,
        out_shape=jax.ShapeDtypeStruct((M, CP), jnp.float32),
        grid_spec=pltpu.PrefetchScalarGridSpec(
            num_scalar_prefetch=0,
            grid=(M // tm,),
            in_specs=[
                pl.BlockSpec((tm, CP), lambda i: (i, 0)),
                pl.BlockSpec((tm, CP), lambda i: (i, 0)),
                pl.BlockSpec((1, CP), lambda i: (0, 0)),
                pl.BlockSpec((1, CP), lambda i: (0, 0)),
            ],
            out_specs=pl.BlockSpec((tm, CP), lambda i: (i, 0))),
        compiler_params=_compiler_params(),
    )(y2_flat, res_flat, scale2, shift2)


# ------------------------------ JAX glue -------------------------------------

def _pack_conv_weight(w_oihw, cp):
    """Torch (Cout, Cin, 3, 3) -> (9*CP, CP) bf16; rows are tap-major, cin-minor
    (matches the im2col column order)."""
    cout, cin = w_oihw.shape[0], w_oihw.shape[1]
    w = jnp.transpose(w_oihw, (2, 3, 1, 0)).reshape(9, cin, cout)
    w = jnp.pad(w, ((0, 0), (0, cp - cin), (0, cp - cout)))
    return w.reshape(9 * cp, cp).astype(jnp.bfloat16)


def _bn_fold(stats, gamma, beta, hw, cp):
    """Combine per-image [sum, M2] partials with the exact parallel-variance
    identity, fold training-mode BN (biased var) into per-channel (scale, shift)."""
    n = stats.shape[0]
    count = n * hw
    sum_n = stats[:, 0, :]                          # (N, CP)
    m2_n = stats[:, 1, :]                           # (N, CP)
    mean = jnp.sum(sum_n, axis=0) / count
    mean_n = sum_n / hw
    m2 = jnp.sum(m2_n, axis=0) + hw * jnp.sum((mean_n - mean) ** 2, axis=0)
    var = jnp.maximum(m2 / count, 0.0)
    rstd = jax.lax.rsqrt(var + BN_EPS)
    g = jnp.pad(gamma, (0, cp - gamma.shape[0]))    # padded channels: scale=shift=0
    b = jnp.pad(beta, (0, cp - beta.shape[0]))
    scale = g * rstd
    shift = b - mean * scale
    return scale.reshape(1, cp), shift.reshape(1, cp)


@jax.jit
def basic_block_forward(x_nchw, params):
    """BasicBlock forward (stride=1, downsample=None), training-mode batch-stat BN."""
    # TODO(synk): stride != 1 / downsample branch of BasicBlock is not implemented.
    w1, g1, b1, w2, g2, b2 = params
    N, C, H, W = x_nchw.shape
    planes = w1.shape[0]
    CP = LANES
    HW = H * W
    M = N * HW

    x_nhwc = jnp.transpose(x_nchw, (0, 2, 3, 1)).astype(jnp.float32)
    x_cp = jnp.pad(x_nhwc, ((0, 0), (0, 0), (0, 0), (0, CP - C)))     # lane pad
    x_b = x_cp.astype(jnp.bfloat16)                                   # bf16 residual / conv input
    x_sp = jnp.pad(x_b, ((0, 0), (1, 1), (1, 1), (0, 0)))             # spatial halo

    w1p = _pack_conv_weight(w1, CP)
    w2p = _pack_conv_weight(w2, CP)

    # Pass 1: conv1 (single big-K matmul) + per-channel stat partials.
    y1, s1 = _conv_stats_call(x_sp, w1p, H, W)
    scale1, shift1 = _bn_fold(s1, g1, b1, HW, CP)

    # Pass 2: BN1 + ReLU + conv2 fused (h stays in VMEM) + stat partials.
    y2, s2 = _bn_relu_conv_stats_call(y1, scale1, shift1, w2p, H, W)
    scale2, shift2 = _bn_fold(s2, g2, b2, HW, CP)

    # Pass 3: BN2 + residual add + ReLU; pad M up to a full tile multiple.
    m_pad = pl.cdiv(M, ROW_TILE) * ROW_TILE
    y2f = jnp.pad(y2.reshape(M, CP), ((0, m_pad - M), (0, 0)))
    rsf = jnp.pad(x_b.reshape(M, CP), ((0, m_pad - M), (0, 0)))
    out_flat = _bn_add_relu_call(y2f, rsf, scale2, shift2)[:M]

    out = out_flat.reshape(N, H, W, CP)[..., :planes]
    return jnp.transpose(out, (0, 3, 1, 2))                           # back to NCHW


# ------------------------------ references -----------------------------------

def _conv_ref(x_nhwc, w_oihw, dtype):
    w_hwio = jnp.transpose(w_oihw, (2, 3, 1, 0))
    return jax.lax.conv_general_dilated(
        x_nhwc.astype(dtype), w_hwio.astype(dtype), (1, 1), "SAME",
        dimension_numbers=("NHWC", "HWIO", "NHWC"),
        preferred_element_type=jnp.float32)


def _bn_fold_ref(y, g, b):
    m = y.mean(axis=(0, 1, 2))
    v = ((y - m) ** 2).mean(axis=(0, 1, 2))
    scale = g * jax.lax.rsqrt(v + BN_EPS)
    return scale, b - m * scale


def _ref_basic_block_f32(x_nchw, params):
    """Pure-f32 XLA reference."""
    w1, g1, b1, w2, g2, b2 = params
    x = jnp.transpose(x_nchw, (0, 2, 3, 1)).astype(jnp.float32)
    y1 = _conv_ref(x, w1, jnp.float32)
    sc1, sh1 = _bn_fold_ref(y1, g1, b1)
    h = jnp.maximum(y1 * sc1 + sh1, 0.0)
    y2 = _conv_ref(h, w2, jnp.float32)
    sc2, sh2 = _bn_fold_ref(y2, g2, b2)
    o = jnp.maximum(y2 * sc2 + sh2 + x, 0.0)
    return jnp.transpose(o, (0, 3, 1, 2))


def _ref_basic_block_mixed(x_nchw, params):
    """Reference mirroring the kernel's precision policy: bf16 conv inputs /
    residual / stored intermediates, f32 accumulation and f32 BN statistics."""
    w1, g1, b1, w2, g2, b2 = params
    x = jnp.transpose(x_nchw, (0, 2, 3, 1)).astype(jnp.float32)
    x_b = x.astype(jnp.bfloat16)
    y1 = _conv_ref(x_b.astype(jnp.float32), w1, jnp.bfloat16)     # f32 out
    sc1, sh1 = _bn_fold_ref(y1, g1, b1)                            # stats from f32
    y1_b = y1.astype(jnp.bfloat16).astype(jnp.float32)             # bf16 round-trip
    h = jnp.maximum(y1_b * sc1 + sh1, 0.0)
    y2 = _conv_ref(h.astype(jnp.bfloat16).astype(jnp.float32), w2, jnp.bfloat16)
    sc2, sh2 = _bn_fold_ref(y2, g2, b2)
    y2_b = y2.astype(jnp.bfloat16).astype(jnp.float32)
    o = jnp.maximum(y2_b * sc2 + sh2 + x_b.astype(jnp.float32), 0.0)
    return jnp.transpose(o, (0, 3, 1, 2))


# --------------------------------- main ---------------------------------------

if __name__ == "__main__":
    N, C, H, W = 2, 4, 16, 16          # inplanes = planes = 4, stride = 1
    planes = C

    key = jax.random.PRNGKey(0)
    kx, kw1, kw2 = jax.random.split(key, 3)

    x = jax.random.normal(kx, (N, C, H, W), dtype=jnp.float32)
    w1 = jax.random.normal(kw1, (planes, C, 3, 3), dtype=jnp.float32) / jnp.sqrt(9.0 * C)
    w2 = jax.random.normal(kw2, (planes, planes, 3, 3), dtype=jnp.float32) / jnp.sqrt(9.0 * planes)
    gamma1 = 1.0 + 0.10 * jnp.arange(planes, dtype=jnp.float32)
    beta1 = 0.02 * jnp.arange(planes, dtype=jnp.float32)
    gamma2 = 1.0 - 0.05 * jnp.arange(planes, dtype=jnp.float32)
    beta2 = -0.01 * jnp.arange(planes, dtype=jnp.float32)
    params = (w1, gamma1, beta1, w2, gamma2, beta2)

    out = jax.block_until_ready(basic_block_forward(x, params))
    assert out.shape == (N, planes, H, W), out.shape

    # Structural check vs a reference sharing the kernel's precision policy
    # (bf16 MXU inputs + bf16 stored intermediates, f32 accumulation / stats).
    ref_mixed = jax.block_until_ready(_ref_basic_block_mixed(x, params))
    err_mixed = float(jnp.max(jnp.abs(out - ref_mixed)))
    assert jnp.allclose(out, ref_mixed, atol=5e-2, rtol=5e-2), err_mixed

    # Sanity check vs the pure-f32 reference (bf16-intermediate-appropriate tol).
    ref_f32 = jax.block_until_ready(_ref_basic_block_f32(x, params))
    err_f32 = float(jnp.max(jnp.abs(out - ref_f32)))
    assert jnp.allclose(out, ref_f32, atol=1e-1, rtol=1e-1), err_f32

    print("KERNEL_OK")
</pallas_src>

<mosaic_0001>
module attributes {stable_mosaic.version = 11 : i64} {
  func.func @kernel(%arg0: i32, %arg1: memref<1x18x18x128xbf16, #tpu.memory_space<vmem>>, %arg2: memref<1152x128xbf16, #tpu.memory_space<vmem>>, %arg3: memref<1x256x128xbf16, #tpu.memory_space<vmem>>, %arg4: memref<1x2x128xf32, #tpu.memory_space<vmem>>, %arg5: memref<256x1152xbf16, #tpu.memory_space<vmem>>) attributes {dimension_semantics = [#tpu.dimension_semantics<parallel>], iteration_bounds = array<i64: 2>, scalar_prefetch = 0 : i64, scratch_operands = 1 : i64, tpu.core_type = #tpu.core_type<tc>, window_params = [{transform_indices = @transform_0, window_bounds = array<i64: 1, 18, 18, 128>}, {pipeline_mode = #tpu.pipeline_mode<synchronous>, transform_indices = @transform_1, window_bounds = array<i64: 1152, 128>}, {transform_indices = @transform_2, window_bounds = array<i64: 1, 256, 128>}, {transform_indices = @transform_3, window_bounds = array<i64: 1, 2, 128>}]} {
    %c0 = arith.constant 0 : index
    %c0_0 = arith.constant 0 : index
    %c0_1 = arith.constant 0 : index
    %c0_2 = arith.constant 0 : index
    %0 = vector.load %arg1[%c0, %c0_0, %c0_1, %c0_2] : memref<1x18x18x128xbf16, #tpu.memory_space<vmem>>, vector<1x18x18x128xbf16>
    %1 = vector.shape_cast %0 : vector<1x18x18x128xbf16> to vector<18x18x128xbf16>
    %2 = vector.extract_strided_slice %1 {offsets = [0, 0, 0], sizes = [16, 16, 128], strides = [1, 1, 1]} : vector<18x18x128xbf16> to vector<16x16x128xbf16>
    %3 = vector.shape_cast %2 : vector<16x16x128xbf16> to vector<256x128xbf16>
    %c0_3 = arith.constant 0 : index
    %c0_4 = arith.constant 0 : index
    %4 = vector.load %arg5[%c0_3, %c0_4] : memref<256x1152xbf16, #tpu.memory_space<vmem>>, vector<256x128xbf16>
    tpu.vector_store %arg5[%c0_3, %c0_4], %3 {strides = array<i32>} : memref<256x1152xbf16, #tpu.memory_space<vmem>>, vector<256x128xbf16>,
    %5 = vector.extract_strided_slice %1 {offsets = [0, 1, 0], sizes = [16, 16, 128], strides = [1, 1, 1]} : vector<18x18x128xbf16> to vector<16x16x128xbf16>
    %6 = vector.shape_cast %5 : vector<16x16x128xbf16> to vector<256x128xbf16>
    %c0_5 = arith.constant 0 : index
    %c128 = arith.constant 128 : index
    %7 = vector.load %arg5[%c0_5, %c128] : memref<256x1152xbf16, #tpu.memory_space<vmem>>, vector<256x128xbf16>
    tpu.vector_store %arg5[%c0_5, %c128], %6 {strides = array<i32>} : memref<256x1152xbf16, #tpu.memory_space<vmem>>, vector<256x128xbf16>,
    %8 = vector.extract_strided_slice %1 {offsets = [0, 2, 0], sizes = [16, 16, 128], strides = [1, 1, 1]} : vector<18x18x128xbf16> to vector<16x16x128xbf16>
    %9 = vector.shape_cast %8 : vector<16x16x128xbf16> to vector<256x128xbf16>
    %c0_6 = arith.constant 0 : index
    %c256 = arith.constant 256 : index
    %10 = vector.load %arg5[%c0_6, %c256] : memref<256x1152xbf16, #tpu.memory_space<vmem>>, vector<256x128xbf16>
    tpu.vector_store %arg5[%c0_6, %c256], %9 {strides = array<i32>} : memref<256x1152xbf16, #tpu.memory_space<vmem>>, vector<256x128xbf16>,
    %11 = vector.extract_strided_slice %1 {offsets = [1, 0, 0], sizes = [16, 16, 128], strides = [1, 1, 1]} : vector<18x18x128xbf16> to vector<16x16x128xbf16>
    %12 = vector.shape_cast %11 : vector<16x16x128xbf16> to vector<256x128xbf16>
    %c0_7 = arith.constant 0 : index
    %c384 = arith.constant 384 : index
    %13 = vector.load %arg5[%c0_7, %c384] : memref<256x1152xbf16, #tpu.memory_space<vmem>>, vector<256x128xbf16>
    tpu.vector_store %arg5[%c0_7, %c384], %12 {strides = array<i32>} : memref<256x1152xbf16, #tpu.memory_space<vmem>>, vector<256x128xbf16>,
    %14 = vector.extract_strided_slice %1 {offsets = [1, 1, 0], sizes = [16, 16, 128], strides = [1, 1, 1]} : vector<18x18x128xbf16> to vector<16x16x128xbf16>
    %15 = vector.shape_cast %14 : vector<16x16x128xbf16> to vector<256x128xbf16>
    %c0_8 = arith.constant 0 : index
    %c512 = arith.constant 512 : index
    %16 = vector.load %arg5[%c0_8, %c512] : memref<256x1152xbf16, #tpu.memory_space<vmem>>, vector<256x128xbf16>
    tpu.vector_store %arg5[%c0_8, %c512], %15 {strides = array<i32>} : memref<256x1152xbf16, #tpu.memory_space<vmem>>, vector<256x128xbf16>,
    %17 = vector.extract_strided_slice %1 {offsets = [1, 2, 0], sizes = [16, 16, 128], strides = [1, 1, 1]} : vector<18x18x128xbf16> to vector<16x16x128xbf16>
    %18 = vector.shape_cast %17 : vector<16x16x128xbf16> to vector<256x128xbf16>
    %c0_9 = arith.constant 0 : index
    %c640 = arith.constant 640 : index
    %19 = vector.load %arg5[%c0_9, %c640] : memref<256x1152xbf16, #tpu.memory_space<vmem>>, vector<256x128xbf16>
    tpu.vector_store %arg5[%c0_9, %c640], %18 {strides = array<i32>} : memref<256x1152xbf16, #tpu.memory_space<vmem>>, vector<256x128xbf16>,
    %20 = vector.extract_strided_slice %1 {offsets = [2, 0, 0], sizes = [16, 16, 128], strides = [1, 1, 1]} : vector<18x18x128xbf16> to vector<16x16x128xbf16>
    %21 = vector.shape_cast %20 : vector<16x16x128xbf16> to vector<256x128xbf16>
    %c0_10 = arith.constant 0 : index
    %c768 = arith.constant 768 : index
    %22 = vector.load %arg5[%c0_10, %c768] : memref<256x1152xbf16, #tpu.memory_space<vmem>>, vector<256x128xbf16>
    tpu.vector_store %arg5[%c0_10, %c768], %21 {strides = array<i32>} : memref<256x1152xbf16, #tpu.memory_space<vmem>>, vector<256x128xbf16>,
    %23 = vector.extract_strided_slice %1 {offsets = [2, 1, 0], sizes = [16, 16, 128], strides = [1, 1, 1]} : vector<18x18x128xbf16> to vector<16x16x128xbf16>
    %24 = vector.shape_cast %23 : vector<16x16x128xbf16> to vector<256x128xbf16>
    %c0_11 = arith.constant 0 : index
    %c896 = arith.constant 896 : index
    %25 = vector.load %arg5[%c0_11, %c896] : memref<256x1152xbf16, #tpu.memory_space<vmem>>, vector<256x128xbf16>
    tpu.vector_store %arg5[%c0_11, %c896], %24 {strides = array<i32>} : memref<256x1152xbf16, #tpu.memory_space<vmem>>, vector<256x128xbf16>,
    %26 = vector.extract_strided_slice %1 {offsets = [2, 2, 0], sizes = [16, 16, 128], strides = [1, 1, 1]} : vector<18x18x128xbf16> to vector<16x16x128xbf16>
    %27 = vector.shape_cast %26 : vector<16x16x128xbf16> to vector<256x128xbf16>
    %c0_12 = arith.constant 0 : index
    %c1024 = arith.constant 1024 : index
    %28 = vector.load %arg5[%c0_12, %c1024] : memref<256x1152xbf16, #tpu.memory_space<vmem>>, vector<256x128xbf16>
    tpu.vector_store %arg5[%c0_12, %c1024], %27 {strides = array<i32>} : memref<256x1152xbf16, #tpu.memory_space<vmem>>, vector<256x128xbf16>,
    %c0_13 = arith.constant 0 : index
    %c0_14 = arith.constant 0 : index
    %29 = vector.load %arg5[%c0_13, %c0_14] : memref<256x1152xbf16, #tpu.memory_space<vmem>>, vector<256x1152xbf16>
    %c0_15 = arith.constant 0 : index
    %c0_16 = arith.constant 0 : index
    %30 = vector.load %arg2[%c0_15, %c0_16] : memref<1152x128xbf16, #tpu.memory_space<vmem>>, vector<1152x128xbf16>
    %cst = arith.constant dense<0.000000e+00> : vector<256x128xf32>
    %31 = tpu.matmul %29, %30, %cst {dimension_numbers = #tpu.dot_dimension_numbers<[1], [0], [0], [1], [0, 0, 1, 1], [], []>} : vector<256x1152xbf16>, vector<1152x128xbf16>, vector<256x128xf32> -> vector<256x128xf32>
    %32 = arith.truncf %31 : vector<256x128xf32> to vector<256x128xbf16>
    %c0_17 = arith.constant 0 : index
    %c0_18 = arith.constant 0 : index
    %c0_19 = arith.constant 0 : index
    %33 = vector.load %arg3[%c0_17, %c0_18, %c0_19] : memref<1x256x128xbf16, #tpu.memory_space<vmem>>, vector<1x256x128xbf16>
    %34 = vector.shape_cast %33 : vector<1x256x128xbf16> to vector<256x128xbf16>
    %35 = vector.shape_cast %32 : vector<256x128xbf16> to vector<1x256x128xbf16>
    tpu.vector_store %arg3[%c0_17, %c0_18, %c0_19], %35 {strides = array<i32>} : memref<1x256x128xbf16, #tpu.memory_space<vmem>>, vector<1x256x128xbf16>,
    %cst_20 = arith.constant dense<0.000000e+00> : vector<128xf32>
    %36 = vector.multi_reduction <add>, %31, %cst_20 [0] : vector<256x128xf32> to vector<128xf32>
    %37 = vector.shape_cast %36 : vector<128xf32> to vector<1x128xf32>
    %cst_21 = arith.constant 3.906250e-03 : f32
    %38 = vector.broadcast %cst_21 : f32 to vector<1x128xf32>
    %39 = arith.mulf %37, %38 : vector<1x128xf32>
    %40 = vector.broadcast %39 : vector<1x128xf32> to vector<256x128xf32>
    %41 = arith.subf %31, %40 : vector<256x128xf32>
    %42 = arith.mulf %41, %41 : vector<256x128xf32>
    %cst_22 = arith.constant dense<0.000000e+00> : vector<128xf32>
    %43 = vector.multi_reduction <add>, %42, %cst_22 [0] : vector<256x128xf32> to vector<128xf32>
    %44 = vector.shape_cast %43 : vector<128xf32> to vector<1x128xf32>
    %45 = tpu.concatenate %37, %44 in 0 : vector<1x128xf32>, vector<1x128xf32> -> vector<2x128xf32>
    %c0_23 = arith.constant 0 : index
    %c0_24 = arith.constant 0 : index
    %c0_25 = arith.constant 0 : index
    %46 = vector.load %arg4[%c0_23, %c0_24, %c0_25] : memref<1x2x128xf32, #tpu.memory_space<vmem>>, vector<1x2x128xf32>
    %47 = vector.shape_cast %46 : vector<1x2x128xf32> to vector<2x128xf32>
    %48 = vector.shape_cast %45 : vector<2x128xf32> to vector<1x2x128xf32>
    tpu.vector_store %arg4[%c0_23, %c0_24, %c0_25], %48 {strides = array<i32>} : memref<1x2x128xf32, #tpu.memory_space<vmem>>, vector<1x2x128xf32>,
    return
  }
  func.func @transform_0(%arg0: i32) -> (i32, i32, i32, i32) {
    %c0_i32 = arith.constant 0 : i32
    %c0_i32_0 = arith.constant 0 : i32
    %c0_i32_1 = arith.constant 0 : i32
    %c0_i32_2 = arith.constant 0 : i32
    return %arg0, %c0_i32, %c0_i32_0, %c0_i32_1 : i32, i32, i32, i32
  }
  func.func @transform_1(%arg0: i32) -> (i32, i32) {
    %c0_i32 = arith.constant 0 : i32
    %c0_i32_0 = arith.constant 0 : i32
    %c0_i32_1 = arith.constant 0 : i32
    return %c0_i32, %c0_i32_0 : i32, i32
  }
  func.func @transform_2(%arg0: i32) -> (i32, i32, i32) {
    %c0_i32 = arith.constant 0 : i32
    %c0_i32_0 = arith.constant 0 : i32
    %c0_i32_1 = arith.constant 0 : i32
    return %arg0, %c0_i32, %c0_i32_0 : i32, i32, i32
  }
  func.func @transform_3(%arg0: i32) -> (i32, i32, i32) {
    %c0_i32 = arith.constant 0 : i32
    %c0_i32_0 = arith.constant 0 : i32
    %c0_i32_1 = arith.constant 0 : i32
    return %arg0, %c0_i32, %c0_i32_0 : i32, i32, i32
  }
}

module attributes {stable_mosaic.version = 11 : i64} {
  func.func @kernel(%arg0: i32, %arg1: memref<512x128xbf16, #tpu.memory_space<vmem>>, %arg2: memref<512x128xbf16, #tpu.memory_space<vmem>>, %arg3: memref<1x128xf32, #tpu.memory_space<vmem>>, %arg4: memref<1x128xf32, #tpu.memory_space<vmem>>, %arg5: memref<512x128xf32, #tpu.memory_space<vmem>>) attributes {dimension_semantics = [#tpu.dimension_semantics<parallel>], iteration_bounds = array<i64: 1>, scalar_prefetch = 0 : i64, scratch_operands = 0 : i64, tpu.core_type = #tpu.core_type<tc>, window_params = [{transform_indices = @transform_0, window_bounds = array<i64: 512, 128>}, {transform_indices = @transform_1, window_bounds = array<i64: 512, 128>}, {pipeline_mode = #tpu.pipeline_mode<synchronous>, transform_indices = @transform_2, window_bounds = array<i64: 1, 128>}, {pipeline_mode = #tpu.pipeline_mode<synchronous>, transform_indices = @transform_3, window_bounds = array<i64: 1, 128>}, {transform_indices = @transform_4, window_bounds = array<i64: 512, 128>}]} {
    %c0 = arith.constant 0 : index
    %c0_0 = arith.constant 0 : index
    %0 = vector.load %arg1[%c0, %c0_0] : memref<512x128xbf16, #tpu.memory_space<vmem>>, vector<512x128xbf16>
    %1 = arith.extf %0 : vector<512x128xbf16> to vector<512x128xf32>
    %c0_1 = arith.constant 0 : index
    %c0_2 = arith.constant 0 : index
    %2 = vector.load %arg3[%c0_1, %c0_2] : memref<1x128xf32, #tpu.memory_space<vmem>>, vector<1x128xf32>
    %3 = vector.broadcast %2 : vector<1x128xf32> to vector<512x128xf32>
    %4 = arith.mulf %1, %3 : vector<512x128xf32>
    %c0_3 = arith.constant 0 : index
    %c0_4 = arith.constant 0 : index
    %5 = vector.load %arg4[%c0_3, %c0_4] : memref<1x128xf32, #tpu.memory_space<vmem>>, vector<1x128xf32>
    %6 = vector.broadcast %5 : vector<1x128xf32> to vector<512x128xf32>
    %7 = arith.addf %4, %6 : vector<512x128xf32>
    %c0_5 = arith.constant 0 : index
    %c0_6 = arith.constant 0 : index
    %8 = vector.load %arg2[%c0_5, %c0_6] : memref<512x128xbf16, #tpu.memory_space<vmem>>, vector<512x128xbf16>
    %9 = arith.extf %8 : vector<512x128xbf16> to vector<512x128xf32>
    %10 = arith.addf %7, %9 : vector<512x128xf32>
    %cst = arith.constant 0.000000e+00 : f32
    %11 = vector.broadcast %cst : f32 to vector<512x128xf32>
    %12 = arith.maximumf %10, %11 : vector<512x128xf32>
    %c0_7 = arith.constant 0 : index
    %c0_8 = arith.constant 0 : index
    %13 = vector.load %arg5[%c0_7, %c0_8] : memref<512x128xf32, #tpu.memory_space<vmem>>, vector<512x128xf32>
    tpu.vector_store %arg5[%c0_7, %c0_8], %12 {strides = array<i32>} : memref<512x128xf32, #tpu.memory_space<vmem>>, vector<512x128xf32>,
    return
  }
  func.func @transform_0(%arg0: i32) -> (i32, i32) {
    %c0_i32 = arith.constant 0 : i32
    %c0_i32_0 = arith.constant 0 : i32
    return %arg0, %c0_i32 : i32, i32
  }
  func.func @transform_1(%arg0: i32) -> (i32, i32) {
    %c0_i32 = arith.constant 0 : i32
    %c0_i32_0 = arith.constant 0 : i32
    return %arg0, %c0_i32 : i32, i32
  }
  func.func @transform_2(%arg0: i32) -> (i32, i32) {
    %c0_i32 = arith.constant 0 : i32
    %c0_i32_0 = arith.constant 0 : i32
    %c0_i32_1 = arith.constant 0 : i32
    return %c0_i32, %c0_i32_0 : i32, i32
  }
  func.func @transform_3(%arg0: i32) -> (i32, i32) {
    %c0_i32 = arith.constant 0 : i32
    %c0_i32_0 = arith.constant 0 : i32
    %c0_i32_1 = arith.constant 0 : i32
    return %c0_i32, %c0_i32_0 : i32, i32
  }
  func.func @transform_4(%arg0: i32) -> (i32, i32) {
    %c0_i32 = arith.constant 0 : i32
    %c0_i32_0 = arith.constant 0 : i32
    return %arg0, %c0_i32 : i32, i32
  }
}

module attributes {stable_mosaic.version = 11 : i64} {
  func.func @kernel(%arg0: i32, %arg1: memref<1x256x128xbf16, #tpu.memory_space<vmem>>, %arg2: memref<1x128xf32, #tpu.memory_space<vmem>>, %arg3: memref<1x128xf32, #tpu.memory_space<vmem>>, %arg4: memref<1152x128xbf16, #tpu.memory_space<vmem>>, %arg5: memref<1x256x128xbf16, #tpu.memory_space<vmem>>, %arg6: memref<1x2x128xf32, #tpu.memory_space<vmem>>, %arg7: memref<18x18x128xbf16, #tpu.memory_space<vmem>>, %arg8: memref<256x1152xbf16, #tpu.memory_space<vmem>>) attributes {dimension_semantics = [#tpu.dimension_semantics<parallel>], iteration_bounds = array<i64: 2>, scalar_prefetch = 0 : i64, scratch_operands = 2 : i64, tpu.core_type = #tpu.core_type<tc>, window_params = [{transform_indices = @transform_0, window_bounds = array<i64: 1, 256, 128>}, {pipeline_mode = #tpu.pipeline_mode<synchronous>, transform_indices = @transform_1, window_bounds = array<i64: 1, 128>}, {pipeline_mode = #tpu.pipeline_mode<synchronous>, transform_indices = @transform_2, window_bounds = array<i64: 1, 128>}, {pipeline_mode = #tpu.pipeline_mode<synchronous>, transform_indices = @transform_3, window_bounds = array<i64: 1152, 128>}, {transform_indices = @transform_4, window_bounds = array<i64: 1, 256, 128>}, {transform_indices = @transform_5, window_bounds = array<i64: 1, 2, 128>}]} {
    %c0 = arith.constant 0 : index
    %c0_0 = arith.constant 0 : index
    %c0_1 = arith.constant 0 : index
    %0 = vector.load %arg1[%c0, %c0_0, %c0_1] : memref<1x256x128xbf16, #tpu.memory_space<vmem>>, vector<1x256x128xbf16>
    %1 = vector.shape_cast %0 : vector<1x256x128xbf16> to vector<256x128xbf16>
    %2 = arith.extf %1 : vector<256x128xbf16> to vector<256x128xf32>
    %c0_2 = arith.constant 0 : index
    %c0_3 = arith.constant 0 : index
    %3 = vector.load %arg2[%c0_2, %c0_3] : memref<1x128xf32, #tpu.memory_space<vmem>>, vector<1x128xf32>
    %4 = vector.broadcast %3 : vector<1x128xf32> to vector<256x128xf32>
    %5 = arith.mulf %2, %4 : vector<256x128xf32>
    %c0_4 = arith.constant 0 : index
    %c0_5 = arith.constant 0 : index
    %6 = vector.load %arg3[%c0_4, %c0_5] : memref<1x128xf32, #tpu.memory_space<vmem>>, vector<1x128xf32>
    %7 = vector.broadcast %6 : vector<1x128xf32> to vector<256x128xf32>
    %8 = arith.addf %5, %7 : vector<256x128xf32>
    %cst = arith.constant 0.000000e+00 : f32
    %9 = vector.broadcast %cst : f32 to vector<256x128xf32>
    %10 = arith.maximumf %8, %9 : vector<256x128xf32>
    %cst_6 = arith.constant 0.000000e+00 : bf16
    %11 = vector.broadcast %cst_6 : bf16 to vector<1x18x128xbf16>
    %c0_7 = arith.constant 0 : index
    %c0_8 = arith.constant 0 : index
    %c0_9 = arith.constant 0 : index
    %12 = vector.load %arg7[%c0_7, %c0_8, %c0_9] : memref<18x18x128xbf16, #tpu.memory_space<vmem>>, vector<1x18x128xbf16>
    tpu.vector_store %arg7[%c0_7, %c0_8, %c0_9], %11 {strides = array<i32>} : memref<18x18x128xbf16, #tpu.memory_space<vmem>>, vector<1x18x128xbf16>,
    %cst_10 = arith.constant 0.000000e+00 : bf16
    %13 = vector.broadcast %cst_10 : bf16 to vector<1x18x128xbf16>
    %c17 = arith.constant 17 : index
    %c0_11 = arith.constant 0 : index
    %c0_12 = arith.constant 0 : index
    %14 = vector.load %arg7[%c17, %c0_11, %c0_12] : memref<18x18x128xbf16, #tpu.memory_space<vmem>>, vector<1x18x128xbf16>
    tpu.vector_store %arg7[%c17, %c0_11, %c0_12], %13 {strides = array<i32>} : memref<18x18x128xbf16, #tpu.memory_space<vmem>>, vector<1x18x128xbf16>,
    %cst_13 = arith.constant 0.000000e+00 : bf16
    %15 = vector.broadcast %cst_13 : bf16 to vector<16x1x128xbf16>
    %c1 = arith.constant 1 : index
    %c0_14 = arith.constant 0 : index
    %c0_15 = arith.constant 0 : index
    %16 = vector.load %arg7[%c1, %c0_14, %c0_15] : memref<18x18x128xbf16, #tpu.memory_space<vmem>>, vector<16x1x128xbf16>
    tpu.vector_store %arg7[%c1, %c0_14, %c0_15], %15 {strides = array<i32>} : memref<18x18x128xbf16, #tpu.memory_space<vmem>>, vector<16x1x128xbf16>,
    %cst_16 = arith.constant 0.000000e+00 : bf16
    %17 = vector.broadcast %cst_16 : bf16 to vector<16x1x128xbf16>
    %c1_17 = arith.constant 1 : index
    %c17_18 = arith.constant 17 : index
    %c0_19 = arith.constant 0 : index
    %18 = vector.load %arg7[%c1_17, %c17_18, %c0_19] : memref<18x18x128xbf16, #tpu.memory_space<vmem>>, vector<16x1x128xbf16>
    tpu.vector_store %arg7[%c1_17, %c17_18, %c0_19], %17 {strides = array<i32>} : memref<18x18x128xbf16, #tpu.memory_space<vmem>>, vector<16x1x128xbf16>,
    %19 = vector.shape_cast %10 : vector<256x128xf32> to vector<16x16x128xf32>
    %20 = arith.truncf %19 : vector<16x16x128xf32> to vector<16x16x128xbf16>
    %c1_20 = arith.constant 1 : index
    %c1_21 = arith.constant 1 : index
    %c0_22 = arith.constant 0 : index
    %21 = vector.load %arg7[%c1_20, %c1_21, %c0_22] : memref<18x18x128xbf16, #tpu.memory_space<vmem>>, vector<16x16x128xbf16>
    tpu.vector_store %arg7[%c1_20, %c1_21, %c0_22], %20 {strides = array<i32>} : memref<18x18x128xbf16, #tpu.memory_space<vmem>>, vector<16x16x128xbf16>,
    %c0_23 = arith.constant 0 : index
    %c0_24 = arith.constant 0 : index
    %c0_25 = arith.constant 0 : index
    %22 = vector.load %arg7[%c0_23, %c0_24, %c0_25] : memref<18x18x128xbf16, #tpu.memory_space<vmem>>, vector<18x18x128xbf16>
    %23 = vector.extract_strided_slice %22 {offsets = [0, 0, 0], sizes = [16, 16, 128], strides = [1, 1, 1]} : vector<18x18x128xbf16> to vector<16x16x128xbf16>
    %24 = vector.shape_cast %23 : vector<16x16x128xbf16> to vector<256x128xbf16>
    %c0_26 = arith.constant 0 : index
    %c0_27 = arith.constant 0 : index
    %25 = vector.load %arg8[%c0_26, %c0_27] : memref<256x1152xbf16, #tpu.memory_space<vmem>>, vector<256x128xbf16>
    tpu.vector_store %arg8[%c0_26, %c0_27], %24 {strides = array<i32>} : memref<256x1152xbf16, #tpu.memory_space<vmem>>, vector<256x128xbf16>,
    %26 = vector.extract_strided_slice %22 {offsets = [0, 1, 0], sizes = [16, 16, 128], strides = [1, 1, 1]} : vector<18x18x128xbf16> to vector<16x16x128xbf16>
    %27 = vector.shape_cast %26 : vector<16x16x128xbf16> to vector<256x128xbf16>
    %c0_28 = arith.constant 0 : index
    %c128 = arith.constant 128 : index
    %28 = vector.load %arg8[%c0_28, %c128] : memref<256x1152xbf16, #tpu.memory_space<vmem>>, vector<256x128xbf16>
    tpu.vector_store %arg8[%c0_28, %c128], %27 {strides = array<i32>} : memref<256x1152xbf16, #tpu.memory_space<vmem>>, vector<256x128xbf16>,
    %29 = vector.extract_strided_slice %22 {offsets = [0, 2, 0], sizes = [16, 16, 128], strides = [1, 1, 1]} : vector<18x18x128xbf16> to vector<16x16x128xbf16>
    %30 = vector.shape_cast %29 : vector<16x16x128xbf16> to vector<256x128xbf16>
    %c0_29 = arith.constant 0 : index
    %c256 = arith.constant 256 : index
    %31 = vector.load %arg8[%c0_29, %c256] : memref<256x1152xbf16, #tpu.memory_space<vmem>>, vector<256x128xbf16>
    tpu.vector_store %arg8[%c0_29, %c256], %30 {strides = array<i32>} : memref<256x1152xbf16, #tpu.memory_space<vmem>>, vector<256x128xbf16>,
    %32 = vector.extract_strided_slice %22 {offsets = [1, 0, 0], sizes = [16, 16, 128], strides = [1, 1, 1]} : vector<18x18x128xbf16> to vector<16x16x128xbf16>
    %33 = vector.shape_cast %32 : vector<16x16x128xbf16> to vector<256x128xbf16>
    %c0_30 = arith.constant 0 : index
    %c384 = arith.constant 384 : index
    %34 = vector.load %arg8[%c0_30, %c384] : memref<256x1152xbf16, #tpu.memory_space<vmem>>, vector<256x128xbf16>
    tpu.vector_store %arg8[%c0_30, %c384], %33 {strides = array<i32>} : memref<256x1152xbf16, #tpu.memory_space<vmem>>, vector<256x128xbf16>,
    %35 = vector.extract_strided_slice %22 {offsets = [1, 1, 0], sizes = [16, 16, 128], strides = [1, 1, 1]} : vector<18x18x128xbf16> to vector<16x16x128xbf16>
    %36 = vector.shape_cast %35 : vector<16x16x128xbf16> to vector<256x128xbf16>
    %c0_31 = arith.constant 0 : index
    %c512 = arith.constant 512 : index
    %37 = vector.load %arg8[%c0_31, %c512] : memref<256x1152xbf16, #tpu.memory_space<vmem>>, vector<256x128xbf16>
    tpu.vector_store %arg8[%c0_31, %c512], %36 {strides = array<i32>} : memref<256x1152xbf16, #tpu.memory_space<vmem>>, vector<256x128xbf16>,
    %38 = vector.extract_strided_slice %22 {offsets = [1, 2, 0], sizes = [16, 16, 128], strides = [1, 1, 1]} : vector<18x18x128xbf16> to vector<16x16x128xbf16>
    %39 = vector.shape_cast %38 : vector<16x16x128xbf16> to vector<256x128xbf16>
    %c0_32 = arith.constant 0 : index
    %c640 = arith.constant 640 : index
    %40 = vector.load %arg8[%c0_32, %c640] : memref<256x1152xbf16, #tpu.memory_space<vmem>>, vector<256x128xbf16>
    tpu.vector_store %arg8[%c0_32, %c640], %39 {strides = array<i32>} : memref<256x1152xbf16, #tpu.memory_space<vmem>>, vector<256x128xbf16>,
    %41 = vector.extract_strided_slice %22 {offsets = [2, 0, 0], sizes = [16, 16, 128], strides = [1, 1, 1]} : vector<18x18x128xbf16> to vector<16x16x128xbf16>
    %42 = vector.shape_cast %41 : vector<16x16x128xbf16> to vector<256x128xbf16>
    %c0_33 = arith.constant 0 : index
    %c768 = arith.constant 768 : index
    %43 = vector.load %arg8[%c0_33, %c768] : memref<256x1152xbf16, #tpu.memory_space<vmem>>, vector<256x128xbf16>
    tpu.vector_store %arg8[%c0_33, %c768], %42 {strides = array<i32>} : memref<256x1152xbf16, #tpu.memory_space<vmem>>, vector<256x128xbf16>,
    %44 = vector.extract_strided_slice %22 {offsets = [2, 1, 0], sizes = [16, 16, 128], strides = [1, 1, 1]} : vector<18x18x128xbf16> to vector<16x16x128xbf16>
    %45 = vector.shape_cast %44 : vector<16x16x128xbf16> to vector<256x128xbf16>
    %c0_34 = arith.constant 0 : index
    %c896 = arith.constant 896 : index
    %46 = vector.load %arg8[%c0_34, %c896] : memref<256x1152xbf16, #tpu.memory_space<vmem>>, vector<256x128xbf16>
    tpu.vector_store %arg8[%c0_34, %c896], %45 {strides = array<i32>} : memref<256x1152xbf16, #tpu.memory_space<vmem>>, vector<256x128xbf16>,
    %47 = vector.extract_strided_slice %22 {offsets = [2, 2, 0], sizes = [16, 16, 128], strides = [1, 1, 1]} : vector<18x18x128xbf16> to vector<16x16x128xbf16>
    %48 = vector.shape_cast %47 : vector<16x16x128xbf16> to vector<256x128xbf16>
    %c0_35 = arith.constant 0 : index
    %c1024 = arith.constant 1024 : index
    %49 = vector.load %arg8[%c0_35, %c1024] : memref<256x1152xbf16, #tpu.memory_space<vmem>>, vector<256x128xbf16>
    tpu.vector_store %arg8[%c0_35, %c1024], %48 {strides = array<i32>} : memref<256x1152xbf16, #tpu.memory_space<vmem>>, vector<256x128xbf16>,
    %c0_36 = arith.constant 0 : index
    %c0_37 = arith.constant 0 : index
    %50 = vector.load %arg8[%c0_36, %c0_37] : memref<256x1152xbf16, #tpu.memory_space<vmem>>, vector<256x1152xbf16>
    %c0_38 = arith.constant 0 : index
    %c0_39 = arith.constant 0 : index
    %51 = vector.load %arg4[%c0_38, %c0_39] : memref<1152x128xbf16, #tpu.memory_space<vmem>>, vector<1152x128xbf16>
    %cst_40 = arith.constant dense<0.000000e+00> : vector<256x128xf32>
    %52 = tpu.matmul %50, %51, %cst_40 {dimension_numbers = #tpu.dot_dimension_numbers<[1], [0], [0], [1], [0, 0, 1, 1], [], []>} : vector<256x1152xbf16>, vector<1152x128xbf16>, vector<256x128xf32> -> vector<256x128xf32>
    %53 = arith.truncf %52 : vector<256x128xf32> to vector<256x128xbf16>
    %c0_41 = arith.constant 0 : index
    %c0_42 = arith.constant 0 : index
    %c0_43 = arith.constant 0 : index
    %54 = vector.load %arg5[%c0_41, %c0_42, %c0_43] : memref<1x256x128xbf16, #tpu.memory_space<vmem>>, vector<1x256x128xbf16>
    %55 = vector.shape_cast %54 : vector<1x256x128xbf16> to vector<256x128xbf16>
    %56 = vector.shape_cast %53 : vector<256x128xbf16> to vector<1x256x128xbf16>
    tpu.vector_store %arg5[%c0_41, %c0_42, %c0_43], %56 {strides = array<i32>} : memref<1x256x128xbf16, #tpu.memory_space<vmem>>, vector<1x256x128xbf16>,
    %cst_44 = arith.constant dense<0.000000e+00> : vector<128xf32>
    %57 = vector.multi_reduction <add>, %52, %cst_44 [0] : vector<256x128xf32> to vector<128xf32>
    %58 = vector.shape_cast %57 : vector<128xf32> to vector<1x128xf32>
    %cst_45 = arith.constant 3.906250e-03 : f32
    %59 = vector.broadcast %cst_45 : f32 to vector<1x128xf32>
    %60 = arith.mulf %58, %59 : vector<1x128xf32>
    %61 = vector.broadcast %60 : vector<1x128xf32> to vector<256x128xf32>
    %62 = arith.subf %52, %61 : vector<256x128xf32>
    %63 = arith.mulf %62, %62 : vector<256x128xf32>
    %cst_46 = arith.constant dense<0.000000e+00> : vector<128xf32>
    %64 = vector.multi_reduction <add>, %63, %cst_46 [0] : vector<256x128xf32> to vector<128xf32>
    %65 = vector.shape_cast %64 : vector<128xf32> to vector<1x128xf32>
    %66 = tpu.concatenate %58, %65 in 0 : vector<1x128xf32>, vector<1x128xf32> -> vector<2x128xf32>
    %c0_47 = arith.constant 0 : index
    %c0_48 = arith.constant 0 : index
    %c0_49 = arith.constant 0 : index
    %67 = vector.load %arg6[%c0_47, %c0_48, %c0_49] : memref<1x2x128xf32, #tpu.memory_space<vmem>>, vector<1x2x128xf32>
    %68 = vector.shape_cast %67 : vector<1x2x128xf32> to vector<2x128xf32>
    %69 = vector.shape_cast %66 : vector<2x128xf32> to vector<1x2x128xf32>
    tpu.vector_store %arg6[%c0_47, %c0_48, %c0_49], %69 {strides = array<i32>} : memref<1x2x128xf32, #tpu.memory_space<vmem>>, vector<1x2x128xf32>,
    return
  }
  func.func @transform_0(%arg0: i32) -> (i32, i32, i32) {
    %c0_i32 = arith.constant 0 : i32
    %c0_i32_0 = arith.constant 0 : i32
    %c0_i32_1 = arith.constant 0 : i32
    return %arg0, %c0_i32, %c0_i32_0 : i32, i32, i32
  }
  func.func @transform_1(%arg0: i32) -> (i32, i32) {
    %c0_i32 = arith.constant 0 : i32
    %c0_i32_0 = arith.constant 0 : i32
    %c0_i32_1 = arith.constant 0 : i32
    return %c0_i32, %c0_i32_0 : i32, i32
  }
  func.func @transform_2(%arg0: i32) -> (i32, i32) {
    %c0_i32 = arith.constant 0 : i32
    %c0_i32_0 = arith.constant 0 : i32
    %c0_i32_1 = arith.constant 0 : i32
    return %c0_i32, %c0_i32_0 : i32, i32
  }
  func.func @transform_3(%arg0: i32) -> (i32, i32) {
    %c0_i32 = arith.constant 0 : i32
    %c0_i32_0 = arith.constant 0 : i32
    %c0_i32_1 = arith.constant 0 : i32
    return %c0_i32, %c0_i32_0 : i32, i32
  }
  func.func @transform_4(%arg0: i32) -> (i32, i32, i32) {
    %c0_i32 = arith.constant 0 : i32
    %c0_i32_0 = arith.constant 0 : i32
    %c0_i32_1 = arith.constant 0 : i32
    return %arg0, %c0_i32, %c0_i32_0 : i32, i32, i32
  }
  func.func @transform_5(%arg0: i32) -> (i32, i32, i32) {
    %c0_i32 = arith.constant 0 : i32
    %c0_i32_0 = arith.constant 0 : i32
    %c0_i32_1 = arith.constant 0 : i32
    return %arg0, %c0_i32, %c0_i32_0 : i32, i32, i32
  }
}

</mosaic_0001>

<bundles_post_ra>
// kernel: basic_block_forward.5
= control target key start
LH: loop header
LB: loop body
LE: loop exit
PB: predicated region body
PF: predicated region fallthrough
CT: control target
= control target key end

     0   :  { %9 = vsyncpa [#allocation3], 0  ;;  %s1358_s0 = inlined_call_operand.hbm [shape: bf16[512,128], index: 0, kind: input, shape index: {}]   ;;  %s1359_s1 = inlined_call_operand.hbm [shape: bf16[512,128], index: 1, kind: input, shape index: {}]   ;;  %s1360_s2 = inlined_call_operand.hbm [shape: f32[1,128], index: 2, kind: input, shape index: {}]   ;;  %s1361_s3 = inlined_call_operand.hbm [shape: f32[1,128], index: 3, kind: input, shape index: {}]   ;;  %s1362_s4 = inlined_call_operand.hbm [shape: f32[512,128], index: 4, kind: output, shape index: {}]  }
   0x1   :  { %10 = vsyncpa [#allocation6], 0 }
   0x2   :  { %11 = vsyncpa [#allocation9], 0 }
   0x3   :  { %12 = vsyncpa [#allocation4], 0  ;;  %s1125_s15 = smov [#allocation5]   ;;  %s1126_s17 = smov [#allocation2]  }
   0x4   :  { %s30_s16 = sshll.u32 %s1125_s15, 4  ;;  %s18_s18 = sshll.u32 %s1126_s17, 4  ;;  %s31_s16 = int_to_ptr.vmem [resolvable:$true] %s30_s16  ;;  %s1159_s18 = int_to_ptr.vmem [resolvable:$true] %s18_s18 }
   0x5   :  { %s1007_s21 = scalar_lea.hbm %s1359_s1, 4096 }
   0x6   :  { %p1008_p0 = scmp.ne.s32.totalorder %s1359_s1, %s1007_s21  ;;  %p1011_p1 = scmp.lt.u32.totalorder %s1007_s21, %s1359_s1 }
   0x8   :  { %p1013_p2 = pnand %p1011_p1, %p1008_p0 }
   0xa   :  { %1016 = shalt.err (!%p1013_p2)
}
   0xb   :  { %s1017_s26 = scalar_lea.vmem %s31_s16, 4096  ;;  %p1022_p4 = scmp.lt.s32.totalorder %s31_s16, %s31_s16 }
   0xc   :  { %p1018_p3 = scmp.ne.s32.totalorder %s31_s16, %s1017_s26  ;;  %p1023_p5 = scmp.lt.s32.totalorder %s1017_s26, %s1017_s26 }
   0xe   :  { %p1024_p6 = por %p1023_p5, %p1022_p4 }
  0x10   :  { %p1025_p7 = pnand %p1024_p6, %p1018_p3 }
  0x12   :  { %1028 = shalt.err (!%p1025_p7)
}
  0x13   :  { %s1127_s27 = smov 64   ;;  %s1128_s28 = smov 4  }
  0x14   :  { %36 = dma.hbm_to_vmem [thread:$0]  %s1359_s1, 4096, %s31_s16, [#allocation6], %s1127_s27, %s1127_s27, %s1128_s28  }
  0x15   :  { %s1029_s7 = scalar_lea.hbm %s1358_s0, 4096 }
  0x16   :  { %p1030_p8 = scmp.ne.s32.totalorder %s1358_s0, %s1029_s7  ;;  %p1033_p9 = scmp.lt.u32.totalorder %s1029_s7, %s1358_s0 }
  0x18   :  { %p1035_p10 = pnand %p1033_p9, %p1030_p8 }
  0x1a   :  { %1038 = shalt.err (!%p1035_p10)
}
  0x1b   :  { %s1039_s12 = scalar_lea.vmem %s1159_s18, 4096  ;;  %p1044_p12 = scmp.lt.s32.totalorder %s1159_s18, %s1159_s18 }
  0x1c   :  { %p1040_p11 = scmp.ne.s32.totalorder %s1159_s18, %s1039_s12  ;;  %p1045_p13 = scmp.lt.s32.totalorder %s1039_s12, %s1039_s12 }
  0x1e   :  { %p1046_p0 = por %p1045_p13, %p1044_p12 }
  0x20   :  { %p1047_p1 = pnand %p1046_p0, %p1040_p11 }
  0x22   :  { %1050 = shalt.err (!%p1047_p1)
}
  0x23   :  { %24 = dma.hbm_to_vmem [thread:$0]  %s1358_s0, 4096, %s1159_s18, [#allocation3], %s1127_s27, %s1127_s27, %s1128_s28  }
  0x24   :  { %s1129_s14 = smov [#allocation7]   ;;  %s1130_s16 = smov [#allocation8]  }
  0x25   :  { %s43_s15 = sshll.u32 %s1129_s14, 4  ;;  %s53_s17 = sshll.u32 %s1130_s16, 4  ;;  %s44_s15 = int_to_ptr.vmem [resolvable:$true] %s43_s15  ;;  %s54_s17 = int_to_ptr.vmem [resolvable:$true] %s53_s17 }
  0x26   :  { %s1051_s21 = scalar_lea.hbm %s1360_s2, 16 }
  0x27   :  { %p1052_p2 = scmp.ne.s32.totalorder %s1360_s2, %s1051_s21  ;;  %p1055_p3 = scmp.lt.u32.totalorder %s1051_s21, %s1360_s2 }
  0x29   :  { %p1057_p4 = pnand %p1055_p3, %p1052_p2 }
  0x2b   :  { %1060 = shalt.err (!%p1057_p4)
}
  0x2c   :  { %s1061_s0 = scalar_lea.vmem %s44_s15, 16  ;;  %s1065_s18 = scalar_lea.vmem %s44_s15, 32 }
  0x2d   :  { %p1062_p5 = scmp.ne.s32.totalorder %s44_s15, %s1061_s0  ;;  %p1066_p6 = scmp.lt.s32.totalorder %s44_s15, %s44_s15 }
  0x2e   :  { %p1067_p7 = scmp.lt.s32.totalorder %s1065_s18, %s1061_s0 }
  0x30   :  { %p1068_p8 = por %p1067_p7, %p1066_p6 }
  0x32   :  { %p1069_p9 = pnand %p1068_p8, %p1062_p5 }
  0x34   :  { %1072 = shalt.err (!%p1069_p9)
}
  0x35   :  { %46 = dma.hbm_to_vmem [thread:$0]  %s1360_s2, 16, %s44_s15, [#allocation6]  }
  0x36   :  { %s1073_s30 = scalar_lea.hbm %s1361_s3, 16 }
  0x37   :  { %p1074_p10 = scmp.ne.s32.totalorder %s1361_s3, %s1073_s30  ;;  %p1077_p11 = scmp.lt.u32.totalorder %s1073_s30, %s1361_s3 }
  0x39   :  { %p1079_p12 = pnand %p1077_p11, %p1074_p10 }
  0x3b   :  { %1082 = shalt.err (!%p1079_p12)
}
  0x3c   :  { %s1083_s9 = scalar_lea.vmem %s54_s17, 16  ;;  %s1087_s10 = scalar_lea.vmem %s54_s17, 32 }
  0x3d   :  { %p1084_p13 = scmp.ne.s32.totalorder %s54_s17, %s1083_s9  ;;  %p1088_p0 = scmp.lt.s32.totalorder %s54_s17, %s54_s17 }
  0x3e   :  { %p1089_p1 = scmp.lt.s32.totalorder %s1087_s10, %s1083_s9 }
  0x40   :  { %p1090_p2 = por %p1089_p1, %p1088_p0 }
  0x42   :  { %p1091_p3 = pnand %p1090_p2, %p1084_p13 }
  0x44   :  { %1094 = shalt.err (!%p1091_p3)
}
  0x45   :  { %56 = dma.hbm_to_vmem [thread:$0]  %s1361_s3, 16, %s54_s17, [#allocation9]  }
  0x46   :  { %1117 = dma.done.wait [#allocation3], 4096  }
  0x47   :  { %1118 = vsyncadd [#allocation3], 4294963200 }
  0x48   :  { %1119 = dma.done.wait [#allocation6], 4112  }
  0x49   :  { %1120 = vsyncadd [#allocation6], 4294963184 }
  0x4a   :  { %1121 = dma.done.wait [#allocation9], 16  }
  0x4b   :  { %1122 = vsyncadd [#allocation9], 4294967280  ;;  %v681_v0 = vld [vmem:[#allocation2] sm:$0xff]   ;;  %v936_v5 = vld [vmem:[#allocation2 + $0x8] sm:$0xff]   ;;  %s1131_s3 = smov [#allocation10]  }
  0x4c   :  { %v1214_v1 = vld [vmem:[#allocation7] ss:$0 sm:$0xff]  ;;  %v682_v2 = vunpack.c.l.bf16 %v681_v0  ;;  %v683_v4 = vunpack.c.h.bf16 %v681_v0  ;;  %v967_v6 = vld [vmem:[#allocation5 + $0x8] sm:$0xff]   ;;  %v1216_v7 = vld [vmem:[#allocation8] ss:$0 sm:$0xff]  ;;  %v686_v10 = vunpack.c.l.bf16 %v936_v5  ;;  %v687_v16 = vunpack.c.h.bf16 %v936_v5  ;;  %s664_s12 = sshll.u32 %s1131_s3, 4  ;;  %s665_s12 = int_to_ptr.vmem [resolvable:$true] %s664_s12 }
  0x4d   :  { %v809_v3 = vld [vmem:[#allocation5] sm:$0xff]   ;;  %v814_v11 = vunpack.c.l.bf16 %v967_v6  ;;  %v937_v12 = vld [vmem:[#allocation2 + $0x10] sm:$0xff]   ;;  %v815_v17 = vunpack.c.h.bf16 %v967_v6  ;;  %v938_v18 = vld [vmem:[#allocation2 + $0x18] sm:$0xff]   ;;  %s1095_s1 = scalar_lea.vmem %s665_s12, 8192  ;;  %p1100_p5 = scmp.lt.s32.totalorder %s665_s12, %s665_s12 }
  0x4e   :  { %v810_v8 = vunpack.c.l.bf16 %v809_v3  ;;  %v811_v9 = vunpack.c.h.bf16 %v809_v3  ;;  %v968_v13 = vld [vmem:[#allocation5 + $0x10] sm:$0xff]   ;;  %v204_v14 = vmul.f32 %v682_v2, %v1214_v1  ;;  %v205_v15 = vmul.f32 %v683_v4, %v1214_v1  ;;  %v969_v23 = vld [vmem:[#allocation5 + $0x18] sm:$0xff]   ;;  %v939_v40 = vld [vmem:[#allocation2 + $0x20] sm:$0xff]   ;;  %p1096_p4 = scmp.ne.s32.totalorder %s665_s12, %s1095_s1  ;;  %p1101_p6 = scmp.lt.s32.totalorder %s1095_s1, %s1095_s1 }
  0x4f   :  { %v206_v19 = vmul.f32 %v686_v10, %v1214_v1  ;;  %v690_v20 = vunpack.c.l.bf16 %v937_v12  ;;  %v818_v21 = vunpack.c.l.bf16 %v968_v13  ;;  %v691_v22 = vunpack.c.h.bf16 %v937_v12  ;;  %v970_v45 = vld [vmem:[#allocation5 + $0x20] sm:$0xff]   ;;  %v940_v54 = vld [vmem:[#allocation2 + $0x28] sm:$0xff]   ;;  %v941_v0 = vld [vmem:[#allocation2 + $0x30] sm:$0xff]  }
  0x50   :  { %v275_v24 = vadd.f32 %v1216_v7, %v204_v14  ;;  %v276_v25 = vadd.f32 %v1216_v7, %v205_v15  ;;  %v207_v26 = vmul.f32 %v687_v16, %v1214_v1  ;;  %v819_v27 = vunpack.c.h.bf16 %v968_v13  ;;  %v971_v55 = vld [vmem:[#allocation5 + $0x28] sm:$0xff]   ;;  %v972_v2 = vld [vmem:[#allocation5 + $0x30] sm:$0xff]   ;;  %v942_v16 = vld [vmem:[#allocation2 + $0x38] sm:$0xff]   ;;  %p1102_p7 = por %p1101_p6, %p1100_p5 }
  0x51   :  { %v277_v28 = vadd.f32 %v1216_v7, %v206_v19  ;;  %v208_v29 = vmul.f32 %v690_v20, %v1214_v1  ;;  %v209_v30 = vmul.f32 %v691_v22, %v1214_v1  ;;  %v694_v31 = vunpack.c.l.bf16 %v938_v18 }
  0x52   :  { %v467_v32 = vadd.f32 %v810_v8, %v275_v24  ;;  %v468_v33 = vadd.f32 %v811_v9, %v276_v25  ;;  %v278_v34 = vadd.f32 %v1216_v7, %v207_v26  ;;  %v822_v35 = vunpack.c.l.bf16 %v969_v23  ;;  %p1103_p8 = pnand %p1102_p7, %p1096_p4 }
  0x53   :  { %v469_v36 = vadd.f32 %v814_v11, %v277_v28  ;;  %v279_v37 = vadd.f32 %v1216_v7, %v208_v29  ;;  %v280_v38 = vadd.f32 %v1216_v7, %v209_v30  ;;  %v210_v39 = vmul.f32 %v694_v31, %v1214_v1 }
  0x54   :  { %v531_v41 = vmax.f32 %v467_v32, 0.0  ;;  %v532_v42 = vmax.f32 %v468_v33, 0.0  ;;  %v470_v43 = vadd.f32 %v815_v17, %v278_v34  ;;  %v695_v44 = vunpack.c.h.bf16 %v938_v18  ;;  %v943_v34 = vld [vmem:[#allocation2 + $0x40] sm:$0xff]  }
  0x55   :  { %v533_v46 = vmax.f32 %v469_v36, 0.0  ;;  %v471_v47 = vadd.f32 %v818_v21, %v279_v37  ;;  %v472_v48 = vadd.f32 %v819_v27, %v280_v38  ;;  %v281_v49 = vadd.f32 %v1216_v7, %v210_v39  ;;  %v973_v21 = vld [vmem:[#allocation5 + $0x38] sm:$0xff]   ;;  %v974_v39 = vld [vmem:[#allocation5 + $0x40] sm:$0xff]  }
  0x56   :  { %595 = vst [vmem:[#allocation10] sm:$0xff] %v531_v41  ;;  %596 = vst [vmem:[#allocation10 + $0x8] sm:$0xff] %v532_v42  ;;  %v534_v50 = vmax.f32 %v470_v43, 0.0  ;;  %v211_v51 = vmul.f32 %v695_v44, %v1214_v1  ;;  %v823_v52 = vunpack.c.h.bf16 %v969_v23  ;;  %v698_v53 = vunpack.c.l.bf16 %v939_v40 }
  0x57   :  { %597 = vst [vmem:[#allocation10 + $0x10] sm:$0xff] %v533_v46  ;;  %v535_v56 = vmax.f32 %v471_v47, 0.0  ;;  %v536_v57 = vmax.f32 %v472_v48, 0.0  ;;  %v473_v58 = vadd.f32 %v822_v35, %v281_v49  ;;  %v826_v59 = vunpack.c.l.bf16 %v970_v45  ;;  %v944_v48 = vld [vmem:[#allocation2 + $0x48] sm:$0xff]  }
  0x58   :  { %598 = vst [vmem:[#allocation10 + $0x18] sm:$0xff] %v534_v50  ;;  %v282_v60 = vadd.f32 %v1216_v7, %v211_v51  ;;  %v212_v61 = vmul.f32 %v698_v53, %v1214_v1  ;;  %v699_v62 = vunpack.c.h.bf16 %v939_v40  ;;  %v827_v63 = vunpack.c.h.bf16 %v970_v45  ;;  %v975_v49 = vld [vmem:[#allocation5 + $0x48] sm:$0xff]  }
  0x59   :  { %599 = vst [vmem:[#allocation10 + $0x20] sm:$0xff] %v535_v56  ;;  %600 = vst [vmem:[#allocation10 + $0x28] sm:$0xff] %v536_v57  ;;  %v537_v3 = vmax.f32 %v473_v58, 0.0  ;;  %v702_v4 = vunpack.c.l.bf16 %v940_v54  ;;  %v830_v5 = vunpack.c.l.bf16 %v971_v55  ;;  %v703_v6 = vunpack.c.h.bf16 %v940_v54  ;;  %v945_v58 = vld [vmem:[#allocation2 + $0x50] sm:$0xff]  }
  0x5a   :  { %v474_v8 = vadd.f32 %v823_v52, %v282_v60  ;;  %v283_v9 = vadd.f32 %v1216_v7, %v212_v61  ;;  %v213_v10 = vmul.f32 %v699_v62, %v1214_v1  ;;  %v831_v11 = vunpack.c.h.bf16 %v971_v55 }
  0x5b   :  { %601 = vst [vmem:[#allocation10 + $0x30] sm:$0xff] %v537_v3  ;;  %v214_v12 = vmul.f32 %v702_v4, %v1214_v1  ;;  %v215_v13 = vmul.f32 %v703_v6, %v1214_v1  ;;  %v706_v14 = vunpack.c.l.bf16 %v941_v0  ;;  %v834_v15 = vunpack.c.l.bf16 %v972_v2 }
  0x5c   :  { %v538_v17 = vmax.f32 %v474_v8, 0.0  ;;  %v475_v18 = vadd.f32 %v826_v59, %v283_v9  ;;  %v284_v19 = vadd.f32 %v1216_v7, %v213_v10  ;;  %v707_v20 = vunpack.c.h.bf16 %v941_v0  ;;  %v946_v10 = vld [vmem:[#allocation2 + $0x58] sm:$0xff]  }
  0x5d   :  { %v285_v22 = vadd.f32 %v1216_v7, %v214_v12  ;;  %v286_v23 = vadd.f32 %v1216_v7, %v215_v13  ;;  %v216_v24 = vmul.f32 %v706_v14, %v1214_v1  ;;  %v835_v25 = vunpack.c.h.bf16 %v972_v2 }
  0x5e   :  { %602 = vst [vmem:[#allocation10 + $0x38] sm:$0xff] %v538_v17  ;;  %v539_v26 = vmax.f32 %v475_v18, 0.0  ;;  %v476_v27 = vadd.f32 %v827_v63, %v284_v19  ;;  %v217_v28 = vmul.f32 %v707_v20, %v1214_v1  ;;  %v710_v29 = vunpack.c.l.bf16 %v942_v16  ;;  %v976_v63 = vld [vmem:[#allocation5 + $0x50] sm:$0xff]   ;;  %v977_v19 = vld [vmem:[#allocation5 + $0x58] sm:$0xff]  }
  0x5f   :  { %v477_v30 = vadd.f32 %v830_v5, %v285_v22  ;;  %v478_v31 = vadd.f32 %v831_v11, %v286_v23  ;;  %v287_v32 = vadd.f32 %v1216_v7, %v216_v24  ;;  %v838_v33 = vunpack.c.l.bf16 %v973_v21 }
  0x60   :  { %603 = vst [vmem:[#allocation10 + $0x40] sm:$0xff] %v539_v26  ;;  %v540_v35 = vmax.f32 %v476_v27, 0.0  ;;  %v288_v36 = vadd.f32 %v1216_v7, %v217_v28  ;;  %v218_v37 = vmul.f32 %v710_v29, %v1214_v1  ;;  %v711_v38 = vunpack.c.h.bf16 %v942_v16  ;;  %v947_v28 = vld [vmem:[#allocation2 + $0x60] sm:$0xff]  }
  0x61   :  { %v541_v40 = vmax.f32 %v477_v30, 0.0  ;;  %v542_v41 = vmax.f32 %v478_v31, 0.0  ;;  %v479_v42 = vadd.f32 %v834_v15, %v287_v32  ;;  %v839_v43 = vunpack.c.h.bf16 %v973_v21 }
  0x62   :  { %604 = vst [vmem:[#allocation10 + $0x48] sm:$0xff] %v540_v35  ;;  %v480_v44 = vadd.f32 %v835_v25, %v288_v36  ;;  %v289_v45 = vadd.f32 %v1216_v7, %v218_v37  ;;  %v219_v46 = vmul.f32 %v711_v38, %v1214_v1  ;;  %v714_v47 = vunpack.c.l.bf16 %v943_v34 }
  0x63   :  { %605 = vst [vmem:[#allocation10 + $0x50] sm:$0xff] %v541_v40  ;;  %606 = vst [vmem:[#allocation10 + $0x58] sm:$0xff] %v542_v41  ;;  %v543_v50 = vmax.f32 %v479_v42, 0.0  ;;  %v842_v51 = vunpack.c.l.bf16 %v974_v39  ;;  %v715_v52 = vunpack.c.h.bf16 %v943_v34  ;;  %v843_v53 = vunpack.c.h.bf16 %v974_v39  ;;  %v948_v42 = vld [vmem:[#allocation2 + $0x68] sm:$0xff]  }
  0x64   :  { %v544_v54 = vmax.f32 %v480_v44, 0.0  ;;  %v481_v55 = vadd.f32 %v838_v33, %v289_v45  ;;  %v290_v56 = vadd.f32 %v1216_v7, %v219_v46  ;;  %v220_v57 = vmul.f32 %v714_v47, %v1214_v1  ;;  %v978_v33 = vld [vmem:[#allocation5 + $0x60] sm:$0xff]  }
  0x65   :  { %607 = vst [vmem:[#allocation10 + $0x60] sm:$0xff] %v543_v50  ;;  %v221_v59 = vmul.f32 %v715_v52, %v1214_v1  ;;  %v718_v60 = vunpack.c.l.bf16 %v944_v48  ;;  %v846_v61 = vunpack.c.l.bf16 %v975_v49  ;;  %v719_v62 = vunpack.c.h.bf16 %v944_v48  ;;  %v949_v52 = vld [vmem:[#allocation2 + $0x70] sm:$0xff]  }
  0x66   :  { %608 = vst [vmem:[#allocation10 + $0x68] sm:$0xff] %v544_v54  ;;  %v545_v0 = vmax.f32 %v481_v55, 0.0  ;;  %v482_v2 = vadd.f32 %v839_v43, %v290_v56  ;;  %v291_v3 = vadd.f32 %v1216_v7, %v220_v57  ;;  %v847_v4 = vunpack.c.h.bf16 %v975_v49  ;;  %v979_v43 = vld [vmem:[#allocation5 + $0x68] sm:$0xff]   ;;  %v980_v57 = vld [vmem:[#allocation5 + $0x70] sm:$0xff]  }
  0x67   :  { %v292_v5 = vadd.f32 %v1216_v7, %v221_v59  ;;  %v222_v6 = vmul.f32 %v718_v60, %v1214_v1  ;;  %v223_v8 = vmul.f32 %v719_v62, %v1214_v1  ;;  %v722_v9 = vunpack.c.l.bf16 %v945_v58 }
  0x68   :  { %609 = vst [vmem:[#allocation10 + $0x70] sm:$0xff] %v545_v0  ;;  %v546_v11 = vmax.f32 %v482_v2, 0.0  ;;  %v483_v12 = vadd.f32 %v842_v51, %v291_v3  ;;  %v850_v13 = vunpack.c.l.bf16 %v976_v63  ;;  %v723_v14 = vunpack.c.h.bf16 %v945_v58  ;;  %v950_v3 = vld [vmem:[#allocation2 + $0x78] sm:$0xff]  }
  0x69   :  { %v484_v15 = vadd.f32 %v843_v53, %v292_v5  ;;  %v293_v16 = vadd.f32 %v1216_v7, %v222_v6  ;;  %v294_v17 = vadd.f32 %v1216_v7, %v223_v8  ;;  %v224_v18 = vmul.f32 %v722_v9, %v1214_v1 }
  0x6a   :  { %610 = vst [vmem:[#allocation10 + $0x78] sm:$0xff] %v546_v11  ;;  %v547_v20 = vmax.f32 %v483_v12, 0.0  ;;  %v225_v21 = vmul.f32 %v723_v14, %v1214_v1  ;;  %v851_v22 = vunpack.c.h.bf16 %v976_v63  ;;  %v726_v23 = vunpack.c.l.bf16 %v946_v10 }
  0x6b   :  { %v548_v24 = vmax.f32 %v484_v15, 0.0  ;;  %v485_v25 = vadd.f32 %v846_v61, %v293_v16  ;;  %v486_v26 = vadd.f32 %v847_v4, %v294_v17  ;;  %v295_v27 = vadd.f32 %v1216_v7, %v224_v18 }
  0x6c   :  { %611 = vst [vmem:[#allocation10 + $0x80] sm:$0xff] %v547_v20  ;;  %v296_v29 = vadd.f32 %v1216_v7, %v225_v21  ;;  %v226_v30 = vmul.f32 %v726_v23, %v1214_v1  ;;  %v854_v31 = vunpack.c.l.bf16 %v977_v19  ;;  %v727_v32 = vunpack.c.h.bf16 %v946_v10 }
  0x6d   :  { %612 = vst [vmem:[#allocation10 + $0x88] sm:$0xff] %v548_v24  ;;  %v549_v34 = vmax.f32 %v485_v25, 0.0  ;;  %v550_v35 = vmax.f32 %v486_v26, 0.0  ;;  %v487_v36 = vadd.f32 %v850_v13, %v295_v27  ;;  %v855_v37 = vunpack.c.h.bf16 %v977_v19  ;;  %v981_v13 = vld [vmem:[#allocation5 + $0x78] sm:$0xff]   ;;  %v982_v27 = vld [vmem:[#allocation5 + $0x80] sm:$0xff]  }
  0x6e   :  { %v488_v38 = vadd.f32 %v851_v22, %v296_v29  ;;  %v297_v39 = vadd.f32 %v1216_v7, %v226_v30  ;;  %v227_v40 = vmul.f32 %v727_v32, %v1214_v1  ;;  %v730_v41 = vunpack.c.l.bf16 %v947_v28  ;;  %v951_v22 = vld [vmem:[#allocation2 + $0x80] sm:$0xff]  }
  0x6f   :  { %613 = vst [vmem:[#allocation10 + $0x90] sm:$0xff] %v549_v34  ;;  %614 = vst [vmem:[#allocation10 + $0x98] sm:$0xff] %v550_v35  ;;  %v551_v44 = vmax.f32 %v487_v36, 0.0  ;;  %v858_v45 = vunpack.c.l.bf16 %v978_v33  ;;  %v731_v46 = vunpack.c.h.bf16 %v947_v28  ;;  %v859_v47 = vunpack.c.h.bf16 %v978_v33  ;;  %v952_v36 = vld [vmem:[#allocation2 + $0x88] sm:$0xff]  }
  0x70   :  { %v552_v48 = vmax.f32 %v488_v38, 0.0  ;;  %v489_v49 = vadd.f32 %v854_v31, %v297_v39  ;;  %v298_v50 = vadd.f32 %v1216_v7, %v227_v40  ;;  %v228_v51 = vmul.f32 %v730_v41, %v1214_v1 }
  0x71   :  { %615 = vst [vmem:[#allocation10 + $0xa0] sm:$0xff] %v551_v44  ;;  %v229_v53 = vmul.f32 %v731_v46, %v1214_v1  ;;  %v734_v54 = vunpack.c.l.bf16 %v948_v42  ;;  %v862_v55 = vunpack.c.l.bf16 %v979_v43  ;;  %v735_v56 = vunpack.c.h.bf16 %v948_v42  ;;  %v953_v46 = vld [vmem:[#allocation2 + $0x90] sm:$0xff]  }
  0x72   :  { %616 = vst [vmem:[#allocation10 + $0xa8] sm:$0xff] %v552_v48  ;;  %v553_v58 = vmax.f32 %v489_v49, 0.0  ;;  %v490_v59 = vadd.f32 %v855_v37, %v298_v50  ;;  %v299_v60 = vadd.f32 %v1216_v7, %v228_v51  ;;  %v863_v61 = vunpack.c.h.bf16 %v979_v43  ;;  %v983_v37 = vld [vmem:[#allocation5 + $0x88] sm:$0xff]   ;;  %v984_v51 = vld [vmem:[#allocation5 + $0x90] sm:$0xff]  }
  0x73   :  { %v300_v62 = vadd.f32 %v1216_v7, %v229_v53  ;;  %v230_v63 = vmul.f32 %v734_v54, %v1214_v1  ;;  %v231_v0 = vmul.f32 %v735_v56, %v1214_v1  ;;  %v738_v2 = vunpack.c.l.bf16 %v949_v52 }
  0x74   :  { %617 = vst [vmem:[#allocation10 + $0xb0] sm:$0xff] %v553_v58  ;;  %v554_v4 = vmax.f32 %v490_v59, 0.0  ;;  %v491_v5 = vadd.f32 %v858_v45, %v299_v60  ;;  %v866_v6 = vunpack.c.l.bf16 %v980_v57  ;;  %v739_v8 = vunpack.c.h.bf16 %v949_v52  ;;  %v954_v60 = vld [vmem:[#allocation2 + $0x98] sm:$0xff]  }
  0x75   :  { %v492_v9 = vadd.f32 %v859_v47, %v300_v62  ;;  %v301_v10 = vadd.f32 %v1216_v7, %v230_v63  ;;  %v302_v11 = vadd.f32 %v1216_v7, %v231_v0  ;;  %v232_v12 = vmul.f32 %v738_v2, %v1214_v1 }
  0x76   :  { %618 = vst [vmem:[#allocation10 + $0xb8] sm:$0xff] %v554_v4  ;;  %v555_v14 = vmax.f32 %v491_v5, 0.0  ;;  %v233_v15 = vmul.f32 %v739_v8, %v1214_v1  ;;  %v867_v16 = vunpack.c.h.bf16 %v980_v57  ;;  %v742_v17 = vunpack.c.l.bf16 %v950_v3 }
  0x77   :  { %v556_v18 = vmax.f32 %v492_v9, 0.0  ;;  %v493_v19 = vadd.f32 %v862_v55, %v301_v10  ;;  %v494_v20 = vadd.f32 %v863_v61, %v302_v11  ;;  %v303_v21 = vadd.f32 %v1216_v7, %v232_v12 }
  0x78   :  { %619 = vst [vmem:[#allocation10 + $0xc0] sm:$0xff] %v555_v14  ;;  %v304_v23 = vadd.f32 %v1216_v7, %v233_v15  ;;  %v234_v24 = vmul.f32 %v742_v17, %v1214_v1  ;;  %v870_v25 = vunpack.c.l.bf16 %v981_v13  ;;  %v743_v26 = vunpack.c.h.bf16 %v950_v3 }
  0x79   :  { %620 = vst [vmem:[#allocation10 + $0xc8] sm:$0xff] %v556_v18  ;;  %v557_v28 = vmax.f32 %v493_v19, 0.0  ;;  %v558_v29 = vmax.f32 %v494_v20, 0.0  ;;  %v495_v30 = vadd.f32 %v866_v6, %v303_v21  ;;  %v871_v31 = vunpack.c.h.bf16 %v981_v13  ;;  %v985_v6 = vld [vmem:[#allocation5 + $0x98] sm:$0xff]   ;;  %v986_v21 = vld [vmem:[#allocation5 + $0xa0] sm:$0xff]  }
  0x7a   :  { %v496_v32 = vadd.f32 %v867_v16, %v304_v23  ;;  %v305_v33 = vadd.f32 %v1216_v7, %v234_v24  ;;  %v235_v34 = vmul.f32 %v743_v26, %v1214_v1  ;;  %v746_v35 = vunpack.c.l.bf16 %v951_v22  ;;  %v955_v16 = vld [vmem:[#allocation2 + $0xa0] sm:$0xff]  }
  0x7b   :  { %621 = vst [vmem:[#allocation10 + $0xd0] sm:$0xff] %v557_v28  ;;  %622 = vst [vmem:[#allocation10 + $0xd8] sm:$0xff] %v558_v29  ;;  %v559_v38 = vmax.f32 %v495_v30, 0.0  ;;  %v874_v39 = vunpack.c.l.bf16 %v982_v27  ;;  %v747_v40 = vunpack.c.h.bf16 %v951_v22  ;;  %v875_v41 = vunpack.c.h.bf16 %v982_v27  ;;  %v956_v30 = vld [vmem:[#allocation2 + $0xa8] sm:$0xff]  }
  0x7c   :  { %v560_v42 = vmax.f32 %v496_v32, 0.0  ;;  %v497_v43 = vadd.f32 %v870_v25, %v305_v33  ;;  %v306_v44 = vadd.f32 %v1216_v7, %v235_v34  ;;  %v236_v45 = vmul.f32 %v746_v35, %v1214_v1 }
  0x7d   :  { %623 = vst [vmem:[#allocation10 + $0xe0] sm:$0xff] %v559_v38  ;;  %v237_v47 = vmul.f32 %v747_v40, %v1214_v1  ;;  %v750_v48 = vunpack.c.l.bf16 %v952_v36  ;;  %v878_v49 = vunpack.c.l.bf16 %v983_v37  ;;  %v751_v50 = vunpack.c.h.bf16 %v952_v36  ;;  %v957_v40 = vld [vmem:[#allocation2 + $0xb0] sm:$0xff]  }
  0x7e   :  { %624 = vst [vmem:[#allocation10 + $0xe8] sm:$0xff] %v560_v42  ;;  %v561_v52 = vmax.f32 %v497_v43, 0.0  ;;  %v498_v53 = vadd.f32 %v871_v31, %v306_v44  ;;  %v307_v54 = vadd.f32 %v1216_v7, %v236_v45  ;;  %v879_v55 = vunpack.c.h.bf16 %v983_v37  ;;  %v987_v31 = vld [vmem:[#allocation5 + $0xa8] sm:$0xff]   ;;  %v988_v45 = vld [vmem:[#allocation5 + $0xb0] sm:$0xff]  }
  0x7f   :  { %v308_v56 = vadd.f32 %v1216_v7, %v237_v47  ;;  %v238_v57 = vmul.f32 %v750_v48, %v1214_v1  ;;  %v239_v58 = vmul.f32 %v751_v50, %v1214_v1  ;;  %v754_v59 = vunpack.c.l.bf16 %v953_v46 }
  0x80   :  { %625 = vst [vmem:[#allocation10 + $0xf0] sm:$0xff] %v561_v52  ;;  %v562_v61 = vmax.f32 %v498_v53, 0.0  ;;  %v499_v62 = vadd.f32 %v874_v39, %v307_v54  ;;  %v882_v63 = vunpack.c.l.bf16 %v984_v51  ;;  %v755_v0 = vunpack.c.h.bf16 %v953_v46  ;;  %v958_v54 = vld [vmem:[#allocation2 + $0xb8] sm:$0xff]  }
  0x81   :  { %v500_v2 = vadd.f32 %v875_v41, %v308_v56  ;;  %v309_v3 = vadd.f32 %v1216_v7, %v238_v57  ;;  %v310_v4 = vadd.f32 %v1216_v7, %v239_v58  ;;  %v240_v5 = vmul.f32 %v754_v59, %v1214_v1 }
  0x82   :  { %626 = vst [vmem:[#allocation10 + $0xf8] sm:$0xff] %v562_v61  ;;  %v563_v8 = vmax.f32 %v499_v62, 0.0  ;;  %v241_v9 = vmul.f32 %v755_v0, %v1214_v1  ;;  %v883_v10 = vunpack.c.h.bf16 %v984_v51  ;;  %v758_v11 = vunpack.c.l.bf16 %v954_v60 }
  0x83   :  { %v564_v12 = vmax.f32 %v500_v2, 0.0  ;;  %v501_v13 = vadd.f32 %v878_v49, %v309_v3  ;;  %v502_v14 = vadd.f32 %v879_v55, %v310_v4  ;;  %v311_v15 = vadd.f32 %v1216_v7, %v240_v5 }
  0x84   :  { %627 = vst [vmem:[#allocation10 + $0x100] sm:$0xff] %v563_v8  ;;  %v312_v17 = vadd.f32 %v1216_v7, %v241_v9  ;;  %v242_v18 = vmul.f32 %v758_v11, %v1214_v1  ;;  %v886_v19 = vunpack.c.l.bf16 %v985_v6  ;;  %v759_v20 = vunpack.c.h.bf16 %v954_v60 }
  0x85   :  { %628 = vst [vmem:[#allocation10 + $0x108] sm:$0xff] %v564_v12  ;;  %v565_v22 = vmax.f32 %v501_v13, 0.0  ;;  %v566_v23 = vmax.f32 %v502_v14, 0.0  ;;  %v503_v24 = vadd.f32 %v882_v63, %v311_v15  ;;  %v887_v25 = vunpack.c.h.bf16 %v985_v6  ;;  %v989_v63 = vld [vmem:[#allocation5 + $0xb8] sm:$0xff]   ;;  %v990_v15 = vld [vmem:[#allocation5 + $0xc0] sm:$0xff]  }
  0x86   :  { %v504_v26 = vadd.f32 %v883_v10, %v312_v17  ;;  %v313_v27 = vadd.f32 %v1216_v7, %v242_v18  ;;  %v243_v28 = vmul.f32 %v759_v20, %v1214_v1  ;;  %v762_v29 = vunpack.c.l.bf16 %v955_v16  ;;  %v959_v10 = vld [vmem:[#allocation2 + $0xc0] sm:$0xff]  }
  0x87   :  { %629 = vst [vmem:[#allocation10 + $0x110] sm:$0xff] %v565_v22  ;;  %630 = vst [vmem:[#allocation10 + $0x118] sm:$0xff] %v566_v23  ;;  %v567_v32 = vmax.f32 %v503_v24, 0.0  ;;  %v890_v33 = vunpack.c.l.bf16 %v986_v21  ;;  %v763_v34 = vunpack.c.h.bf16 %v955_v16  ;;  %v891_v35 = vunpack.c.h.bf16 %v986_v21  ;;  %v960_v24 = vld [vmem:[#allocation2 + $0xc8] sm:$0xff]  }
  0x88   :  { %v568_v36 = vmax.f32 %v504_v26, 0.0  ;;  %v505_v37 = vadd.f32 %v886_v19, %v313_v27  ;;  %v314_v38 = vadd.f32 %v1216_v7, %v243_v28  ;;  %v244_v39 = vmul.f32 %v762_v29, %v1214_v1 }
  0x89   :  { %631 = vst [vmem:[#allocation10 + $0x120] sm:$0xff] %v567_v32  ;;  %v245_v41 = vmul.f32 %v763_v34, %v1214_v1  ;;  %v766_v42 = vunpack.c.l.bf16 %v956_v30  ;;  %v894_v43 = vunpack.c.l.bf16 %v987_v31  ;;  %v767_v44 = vunpack.c.h.bf16 %v956_v30  ;;  %v961_v34 = vld [vmem:[#allocation2 + $0xd0] sm:$0xff]  }
  0x8a   :  { %632 = vst [vmem:[#allocation10 + $0x128] sm:$0xff] %v568_v36  ;;  %v569_v46 = vmax.f32 %v505_v37, 0.0  ;;  %v506_v47 = vadd.f32 %v887_v25, %v314_v38  ;;  %v315_v48 = vadd.f32 %v1216_v7, %v244_v39  ;;  %v895_v49 = vunpack.c.h.bf16 %v987_v31  ;;  %v991_v25 = vld [vmem:[#allocation5 + $0xc8] sm:$0xff]   ;;  %v992_v39 = vld [vmem:[#allocation5 + $0xd0] sm:$0xff]  }
  0x8b   :  { %v316_v50 = vadd.f32 %v1216_v7, %v245_v41  ;;  %v246_v51 = vmul.f32 %v766_v42, %v1214_v1  ;;  %v247_v52 = vmul.f32 %v767_v44, %v1214_v1  ;;  %v770_v53 = vunpack.c.l.bf16 %v957_v40 }
  0x8c   :  { %633 = vst [vmem:[#allocation10 + $0x130] sm:$0xff] %v569_v46  ;;  %v570_v55 = vmax.f32 %v506_v47, 0.0  ;;  %v507_v56 = vadd.f32 %v890_v33, %v315_v48  ;;  %v898_v57 = vunpack.c.l.bf16 %v988_v45  ;;  %v771_v58 = vunpack.c.h.bf16 %v957_v40  ;;  %v962_v48 = vld [vmem:[#allocation2 + $0xd8] sm:$0xff]  }
  0x8d   :  { %v508_v59 = vadd.f32 %v891_v35, %v316_v50  ;;  %v317_v60 = vadd.f32 %v1216_v7, %v246_v51  ;;  %v318_v61 = vadd.f32 %v1216_v7, %v247_v52  ;;  %v248_v62 = vmul.f32 %v770_v53, %v1214_v1 }
  0x8e   :  { %634 = vst [vmem:[#allocation10 + $0x138] sm:$0xff] %v570_v55  ;;  %v571_v0 = vmax.f32 %v507_v56, 0.0  ;;  %v249_v2 = vmul.f32 %v771_v58, %v1214_v1  ;;  %v899_v3 = vunpack.c.h.bf16 %v988_v45  ;;  %v774_v4 = vunpack.c.l.bf16 %v958_v54 }
  0x8f   :  { %v572_v5 = vmax.f32 %v508_v59, 0.0  ;;  %v509_v6 = vadd.f32 %v894_v43, %v317_v60  ;;  %v510_v8 = vadd.f32 %v895_v49, %v318_v61  ;;  %v319_v9 = vadd.f32 %v1216_v7, %v248_v62 }
  0x90   :  { %635 = vst [vmem:[#allocation10 + $0x140] sm:$0xff] %v571_v0  ;;  %v320_v11 = vadd.f32 %v1216_v7, %v249_v2  ;;  %v250_v12 = vmul.f32 %v774_v4, %v1214_v1  ;;  %v902_v13 = vunpack.c.l.bf16 %v989_v63  ;;  %v775_v14 = vunpack.c.h.bf16 %v958_v54 }
  0x91   :  { %636 = vst [vmem:[#allocation10 + $0x148] sm:$0xff] %v572_v5  ;;  %v573_v16 = vmax.f32 %v509_v6, 0.0  ;;  %v574_v17 = vmax.f32 %v510_v8, 0.0  ;;  %v511_v18 = vadd.f32 %v898_v57, %v319_v9  ;;  %v903_v19 = vunpack.c.h.bf16 %v989_v63  ;;  %v993_v57 = vld [vmem:[#allocation5 + $0xd8] sm:$0xff]   ;;  %v994_v9 = vld [vmem:[#allocation5 + $0xe0] sm:$0xff]  }
  0x92   :  { %v512_v20 = vadd.f32 %v899_v3, %v320_v11  ;;  %v321_v21 = vadd.f32 %v1216_v7, %v250_v12  ;;  %v251_v22 = vmul.f32 %v775_v14, %v1214_v1  ;;  %v778_v23 = vunpack.c.l.bf16 %v959_v10  ;;  %v963_v3 = vld [vmem:[#allocation2 + $0xe0] sm:$0xff]  }
  0x93   :  { %637 = vst [vmem:[#allocation10 + $0x150] sm:$0xff] %v573_v16  ;;  %638 = vst [vmem:[#allocation10 + $0x158] sm:$0xff] %v574_v17  ;;  %v575_v26 = vmax.f32 %v511_v18, 0.0  ;;  %v906_v27 = vunpack.c.l.bf16 %v990_v15  ;;  %v779_v28 = vunpack.c.h.bf16 %v959_v10  ;;  %v907_v29 = vunpack.c.h.bf16 %v990_v15  ;;  %v964_v18 = vld [vmem:[#allocation2 + $0xe8] sm:$0xff]  }
  0x94   :  { %v576_v30 = vmax.f32 %v512_v20, 0.0  ;;  %v513_v31 = vadd.f32 %v902_v13, %v321_v21  ;;  %v322_v32 = vadd.f32 %v1216_v7, %v251_v22  ;;  %v252_v33 = vmul.f32 %v778_v23, %v1214_v1 }
  0x95   :  { %639 = vst [vmem:[#allocation10 + $0x160] sm:$0xff] %v575_v26  ;;  %v253_v35 = vmul.f32 %v779_v28, %v1214_v1  ;;  %v782_v36 = vunpack.c.l.bf16 %v960_v24  ;;  %v910_v37 = vunpack.c.l.bf16 %v991_v25  ;;  %v783_v38 = vunpack.c.h.bf16 %v960_v24  ;;  %v965_v28 = vld [vmem:[#allocation2 + $0xf0] sm:$0xff]  }
  0x96   :  { %640 = vst [vmem:[#allocation10 + $0x168] sm:$0xff] %v576_v30  ;;  %v577_v40 = vmax.f32 %v513_v31, 0.0  ;;  %v514_v41 = vadd.f32 %v903_v19, %v322_v32  ;;  %v323_v42 = vadd.f32 %v1216_v7, %v252_v33  ;;  %v911_v43 = vunpack.c.h.bf16 %v991_v25  ;;  %v995_v19 = vld [vmem:[#allocation5 + $0xe8] sm:$0xff]   ;;  %v996_v33 = vld [vmem:[#allocation5 + $0xf0] sm:$0xff]  }
  0x97   :  { %v324_v44 = vadd.f32 %v1216_v7, %v253_v35  ;;  %v254_v45 = vmul.f32 %v782_v36, %v1214_v1  ;;  %v255_v46 = vmul.f32 %v783_v38, %v1214_v1  ;;  %v786_v47 = vunpack.c.l.bf16 %v961_v34 }
  0x98   :  { %641 = vst [vmem:[#allocation10 + $0x170] sm:$0xff] %v577_v40  ;;  %v578_v49 = vmax.f32 %v514_v41, 0.0  ;;  %v515_v50 = vadd.f32 %v906_v27, %v323_v42  ;;  %v914_v51 = vunpack.c.l.bf16 %v992_v39  ;;  %v787_v52 = vunpack.c.h.bf16 %v961_v34  ;;  %v966_v42 = vld [vmem:[#allocation2 + $0xf8] sm:$0xff]  }
  0x99   :  { %v516_v53 = vadd.f32 %v907_v29, %v324_v44  ;;  %v325_v54 = vadd.f32 %v1216_v7, %v254_v45  ;;  %v326_v55 = vadd.f32 %v1216_v7, %v255_v46  ;;  %v256_v56 = vmul.f32 %v786_v47, %v1214_v1 }
  0x9a   :  { %642 = vst [vmem:[#allocation10 + $0x178] sm:$0xff] %v578_v49  ;;  %v579_v58 = vmax.f32 %v515_v50, 0.0  ;;  %v257_v59 = vmul.f32 %v787_v52, %v1214_v1  ;;  %v915_v60 = vunpack.c.h.bf16 %v992_v39  ;;  %v790_v61 = vunpack.c.l.bf16 %v962_v48 }
  0x9b   :  { %v580_v62 = vmax.f32 %v516_v53, 0.0  ;;  %v517_v63 = vadd.f32 %v910_v37, %v325_v54  ;;  %v518_v0 = vadd.f32 %v911_v43, %v326_v55  ;;  %v327_v2 = vadd.f32 %v1216_v7, %v256_v56 }
  0x9c   :  { %643 = vst [vmem:[#allocation10 + $0x180] sm:$0xff] %v579_v58  ;;  %v328_v4 = vadd.f32 %v1216_v7, %v257_v59  ;;  %v258_v5 = vmul.f32 %v790_v61, %v1214_v1  ;;  %v918_v6 = vunpack.c.l.bf16 %v993_v57  ;;  %v791_v8 = vunpack.c.h.bf16 %v962_v48 }
  0x9d   :  { %644 = vst [vmem:[#allocation10 + $0x188] sm:$0xff] %v580_v62  ;;  %v581_v10 = vmax.f32 %v517_v63, 0.0  ;;  %v582_v11 = vmax.f32 %v518_v0, 0.0  ;;  %v519_v12 = vadd.f32 %v914_v51, %v327_v2  ;;  %v919_v13 = vunpack.c.h.bf16 %v993_v57  ;;  %v997_v51 = vld [vmem:[#allocation5 + $0xf8] sm:$0xff]  }
  0x9e   :  { %v520_v14 = vadd.f32 %v915_v60, %v328_v4  ;;  %v329_v15 = vadd.f32 %v1216_v7, %v258_v5  ;;  %v259_v16 = vmul.f32 %v791_v8, %v1214_v1  ;;  %v794_v17 = vunpack.c.l.bf16 %v963_v3 }
  0x9f   :  { %645 = vst [vmem:[#allocation10 + $0x190] sm:$0xff] %v581_v10  ;;  %646 = vst [vmem:[#allocation10 + $0x198] sm:$0xff] %v582_v11  ;;  %v583_v20 = vmax.f32 %v519_v12, 0.0  ;;  %v922_v21 = vunpack.c.l.bf16 %v994_v9  ;;  %v795_v22 = vunpack.c.h.bf16 %v963_v3  ;;  %v923_v23 = vunpack.c.h.bf16 %v994_v9 }
  0xa0   :  { %v584_v24 = vmax.f32 %v520_v14, 0.0  ;;  %v521_v25 = vadd.f32 %v918_v6, %v329_v15  ;;  %v330_v26 = vadd.f32 %v1216_v7, %v259_v16  ;;  %v260_v27 = vmul.f32 %v794_v17, %v1214_v1 }
  0xa1   :  { %647 = vst [vmem:[#allocation10 + $0x1a0] sm:$0xff] %v583_v20  ;;  %v261_v29 = vmul.f32 %v795_v22, %v1214_v1  ;;  %v798_v30 = vunpack.c.l.bf16 %v964_v18  ;;  %v926_v31 = vunpack.c.l.bf16 %v995_v19  ;;  %v799_v32 = vunpack.c.h.bf16 %v964_v18 }
  0xa2   :  { %648 = vst [vmem:[#allocation10 + $0x1a8] sm:$0xff] %v584_v24  ;;  %v585_v34 = vmax.f32 %v521_v25, 0.0  ;;  %v522_v35 = vadd.f32 %v919_v13, %v330_v26  ;;  %v331_v36 = vadd.f32 %v1216_v7, %v260_v27  ;;  %v927_v37 = vunpack.c.h.bf16 %v995_v19 }
  0xa3   :  { %v332_v38 = vadd.f32 %v1216_v7, %v261_v29  ;;  %v262_v39 = vmul.f32 %v798_v30, %v1214_v1  ;;  %v263_v40 = vmul.f32 %v799_v32, %v1214_v1  ;;  %v802_v41 = vunpack.c.l.bf16 %v965_v28 }
  0xa4   :  { %649 = vst [vmem:[#allocation10 + $0x1b0] sm:$0xff] %v585_v34  ;;  %v586_v43 = vmax.f32 %v522_v35, 0.0  ;;  %v523_v44 = vadd.f32 %v922_v21, %v331_v36  ;;  %v930_v45 = vunpack.c.l.bf16 %v996_v33  ;;  %v803_v46 = vunpack.c.h.bf16 %v965_v28 }
  0xa5   :  { %v524_v47 = vadd.f32 %v923_v23, %v332_v38  ;;  %v333_v48 = vadd.f32 %v1216_v7, %v262_v39  ;;  %v334_v49 = vadd.f32 %v1216_v7, %v263_v40  ;;  %v264_v50 = vmul.f32 %v802_v41, %v1214_v1 }
  0xa6   :  { %650 = vst [vmem:[#allocation10 + $0x1b8] sm:$0xff] %v586_v43  ;;  %v587_v52 = vmax.f32 %v523_v44, 0.0  ;;  %v265_v53 = vmul.f32 %v803_v46, %v1214_v1  ;;  %v931_v54 = vunpack.c.h.bf16 %v996_v33  ;;  %v806_v55 = vunpack.c.l.bf16 %v966_v42 }
  0xa7   :  { %v588_v56 = vmax.f32 %v524_v47, 0.0  ;;  %v525_v57 = vadd.f32 %v926_v31, %v333_v48  ;;  %v526_v58 = vadd.f32 %v927_v37, %v334_v49  ;;  %v335_v59 = vadd.f32 %v1216_v7, %v264_v50 }
  0xa8   :  { %651 = vst [vmem:[#allocation10 + $0x1c0] sm:$0xff] %v587_v52  ;;  %v336_v60 = vadd.f32 %v1216_v7, %v265_v53  ;;  %v266_v61 = vmul.f32 %v806_v55, %v1214_v1  ;;  %v934_v62 = vunpack.c.l.bf16 %v997_v51  ;;  %v807_v63 = vunpack.c.h.bf16 %v966_v42 }
  0xa9   :  { %652 = vst [vmem:[#allocation10 + $0x1c8] sm:$0xff] %v588_v56  ;;  %v589_v0 = vmax.f32 %v525_v57, 0.0  ;;  %v590_v2 = vmax.f32 %v526_v58, 0.0  ;;  %v527_v3 = vadd.f32 %v930_v45, %v335_v59  ;;  %v935_v8 = vunpack.c.h.bf16 %v997_v51 }
  0xaa   :  { %v528_v4 = vadd.f32 %v931_v54, %v336_v60  ;;  %v337_v5 = vadd.f32 %v1216_v7, %v266_v61  ;;  %v267_v6 = vmul.f32 %v807_v63, %v1214_v1 }
  0xab   :  { %653 = vst [vmem:[#allocation10 + $0x1d0] sm:$0xff] %v589_v0  ;;  %654 = vst [vmem:[#allocation10 + $0x1d8] sm:$0xff] %v590_v2  ;;  %v591_v9 = vmax.f32 %v527_v3, 0.0 }
  0xac   :  { %v592_v10 = vmax.f32 %v528_v4, 0.0  ;;  %v529_v11 = vadd.f32 %v934_v62, %v337_v5  ;;  %v338_v12 = vadd.f32 %v1216_v7, %v267_v6 }
  0xad   :  { %655 = vst [vmem:[#allocation10 + $0x1e0] sm:$0xff] %v591_v9 }
  0xae   :  { %656 = vst [vmem:[#allocation10 + $0x1e8] sm:$0xff] %v592_v10  ;;  %v593_v13 = vmax.f32 %v529_v11, 0.0  ;;  %v530_v14 = vadd.f32 %v935_v8, %v338_v12 }
  0xb0   :  { %657 = vst [vmem:[#allocation10 + $0x1f0] sm:$0xff] %v593_v13  ;;  %v594_v15 = vmax.f32 %v530_v14, 0.0 }
  0xb2   :  { %658 = vst [vmem:[#allocation10 + $0x1f8] sm:$0xff] %v594_v15 }
  0xb3   :  { %1106 = shalt.err (!%p1103_p8)
}
  0xb4   :  { %s1107_s15 = scalar_lea.hbm %s1362_s4, 8192 }
  0xb5   :  { %p1108_p9 = scmp.ne.s32.totalorder %s1362_s4, %s1107_s15  ;;  %p1111_p10 = scmp.lt.u32.totalorder %s1107_s15, %s1362_s4 }
  0xb7   :  { %p1113_p11 = pnand %p1111_p10, %p1108_p9 }
  0xb9   :  { %1116 = shalt.err (!%p1113_p11)
}
  0xba   :  { %s1132_s21 = smov 128   ;;  %s1133_s22 = smov 8  }
  0xbb   :  { %670 = dma.vmem_to_hbm [thread:$0]  %s665_s12, 8192, %s1362_s4, [#allocation4], %s1132_s21, %s1132_s21, %s1133_s22  }
  0xbc   :  { %1123 = dma.done.wait [#allocation4], 8192  }
  0xbd   :  { %1124 = vsyncadd [#allocation4], 4294959104 }
  0xbe   :  { %674 = vsyncpa [#allocation3], 1 }
  0xbf   :  { %675 = vsyncpa [#allocation6], 1 }
  0xc0   :  { %676 = vsyncpa [#allocation9], 1 }
  0xc1   :  { %677 = vsyncpa [#allocation4], 1 }

// kernel: basic_block_forward.3
= control target key start
LH: loop header
LB: loop body
LE: loop exit
PB: predicated region body
PF: predicated region fallthrough
CT: control target
= control target key end

     0   :  { %9 = vsyncpa [#allocation4], 0  ;;  %s5945_s0 = inlined_call_operand.hbm [shape: bf16[2,18,18,128], index: 0, kind: input, shape index: {}]   ;;  %s5946_s1 = inlined_call_operand.hbm [shape: bf16[1152,128], index: 1, kind: input, shape index: {}]   ;;  %s5947_s2 = inlined_call_operand.hbm [shape: bf16[2,256,128], index: 2, kind: output, shape index: {0}]   ;;  %s5948_s3 = inlined_call_operand.hbm [shape: f32[2,2,128], index: 3, kind: output, shape index: {1}]  }
   0x1   :  { %11 = vsyncpa [#allocation4 + $0x1], 0 }
   0x2   :  { %12 = vsyncpa [#allocation7], 0 }
   0x3   :  { %13 = vsyncpa [#allocation5], 0 }
   0x4   :  { %15 = vsyncpa [#allocation5 + $0x1], 0 }
   0x5   :  { %16 = vsyncpa [#allocation10], 0 }
   0x6   :  { %18 = vsyncpa [#allocation10 + $0x1], 0  ;;  %s4439_s12 = smov 0   ;;  %s4441_s13 = smov 0  }
   0x7   :  { %s4443_s14 = smov 0   ;;  %s4445_s15 = smov 0  }
   0x8 LB: > { %s4460_s16 = sadd.s32 4294967295, %s4409_s15   ;;  %s3222_s17 = sadd.s32 4294967294, %s4409_s15   ;;  %s4409_s15 = sphi %s4445_s15, %s5997_s15   ;;  %s4405_s14 = sphi %s4443_s14, %s5996_s14   ;;  %s4401_s13 = sphi %s4441_s13, %s5995_s13   ;;  %s4397_s12 = sphi %s4439_s12, %s5994_s12  }
   0x9   : > { %p44_p0 = scmp.ne.s32.totalorder %s4401_s13, %s4397_s12  ;;  %p5949_p1 = scmp.eq.s32.totalorder %s4460_s16, 0 }
   0xa   : > { %p95_p3 = scmp.eq.s32.totalorder %s3222_s17, 1  ;;  %p3223_p5 = scmp.ge.s32.totalorder %s4409_s15, 1 }
   0xb   : > { %p4469_p4 = por %p5949_p1, %p44_p0  ;;  %p128_p7 = scmp.lt.s32.totalorder %s4409_s15, 3 }
   0xc   : > { %p4474_p6 = por %p95_p3, %p44_p0  ;;  %s4411_s21 = smov [#allocation6]  }
   0xd   : > { %s5963_s18 = scalar_select %p4469_p4, 1, 0 }
   0xe   : > { %s5964_s19 = scalar_select %p4474_p6, 1, 0 }
   0xf   : > { %p4479_p8 = pnand %p3223_p5, %p128_p7  ;;  %s140_s22 = sshll.u32 %s4411_s21, 4  ;;  %s4483_s22 = int_to_ptr.vmem [resolvable:$true] %s140_s22 }
  0x10   : > { %s4495_s24 = sadd.s32 1, %s4409_s15   ;;  %s31_s25 = sadd.s32 1, %s4405_s14 }
  0x11   : > { %s5965_s20 = scalar_select %p4479_p8, 1, 0 }
  0x12   : > { %p4091_p9 = pneg %p4479_p8  ;;  %s28_s26 = ssub.s32 %s4409_s15, %s4495_s24 }
  0x13   : > { %s4249_s29 = scalar_lea.hbm %s5946_s1, 9216 }
  0x14   : > { %p4490_p11 = pnand %p4091_p9, %p5949_p1  ;;  %p4250_p12 = scmp.ne.s32.totalorder %s5946_s1, %s4249_s29 }
  0x15   : > { %p4256_p5 = scmp.lt.u32.totalorder %s4249_s29, %s5946_s1 }
  0x16   : > { %p4251_p13 = pneg %p4490_p11 }
  0x18   : > { %p4252_p0 = pnand %p4251_p13, %p4250_p12 }
  0x1a   : > { %p4253_p3 = pneg %p4252_p0 }
  0x1c   : > { %p4258_p7 = pnand %p4256_p5, %p4253_p3 }
  0x1e   : > { %4261 = shalt.err (!%p4258_p7)
}
  0x1f   : > { %s4262_s7 = scalar_lea.vmem %s4483_s22, 9216  ;;  %p4270_p2 = scmp.lt.s32.totalorder %s4483_s22, %s4483_s22 }
  0x20   : > { %p4263_p9 = scmp.ne.s32.totalorder %s4483_s22, %s4262_s7  ;;  %p4271_p6 = scmp.lt.s32.totalorder %s4262_s7, %s4262_s7 }
  0x22   : > { %p4265_p10 = pnand %p4263_p9, %p4251_p13  ;;  %p4272_p4 = por %p4271_p6, %p4270_p2 }
  0x24   : > { %p4266_p1 = pneg %p4265_p10 }
  0x26   : > { %p4273_p8 = pnand %p4272_p4, %p4266_p1 }
  0x28   : > { %4276 = shalt.err (!%p4273_p8)
}
  0x29   : > { %s4412_s8 = smov 64   ;;  %s4413_s9 = smov 4  }
  0x2a   : > { %4094 = dma.hbm_to_vmem [thread:$0]  (!%p4490_p11), %s5946_s1, 9216, %s4483_s22, [#allocation7], %s4412_s8, %s4412_s8, %s4413_s9  }
  0x2b   : > { %p29_p1 = scmp.eq.s32.totalorder %s28_s26, 0  ;;  %p38_p2 = scmp.ne.s32.totalorder %s4405_s14, %s4401_s13 }
  0x2c   : > { %p39_p4 = scmp.eq.s32.totalorder %s4409_s15, 0  ;;  %p4107_p6 = scmp.lt.s32.totalorder %s4409_s15, 2 }
  0x2d   : > { %s4529_s17 = scalar_select %p29_p1, %s4405_s14, %s31_s25  }
  0x2e   : > { %p40_p8 = por %p39_p4, %p38_p2  ;;  %p5967_p10 = scmp.eq.s32.totalorder %s4460_s16, 1 }
  0x2f   : > { %s154_s23 = sand.u32 1, %s4405_s14   ;;  %s4079_s27 = smul.u32 3456, %s4409_s15 }
  0x30   : > { %p4533_p12 = por %p5967_p10, %p38_p2  ;;  %s4078_s28 = smul.u32 216, %s154_s23 }
  0x31   : > { %p4539_p13 = pnand %p4107_p6, %p40_p8  ;;  %s4546_s25 = scalar_lea.hbm %s5945_s0, %s4079_s27 }
  0x32   : > { %s158_s30 = scalar_lea.vmem [#allocation3], %s4078_s28  ;;  %s4550_s5 = scalar_lea.sflag [#allocation4], %s154_s23 }
  0x33   : > { %s165_s4 = sshll.u32 %s158_s30, 4  ;;  %s4277_s6 = scalar_lea.hbm %s4546_s25, 3456  ;;  %s4548_s4 = int_to_ptr.vmem [resolvable:$true] %s165_s4 }
  0x34   : > { %p4278_p11 = scmp.ne.s32.totalorder %s4546_s25, %s4277_s6  ;;  %p4279_p0 = pneg %p4539_p13 }
  0x35   : > { %s4282_s11 = scalar_lea.hbm %s5945_s0, 6912  ;;  %p4283_p7 = scmp.lt.u32.totalorder %s4546_s25, %s5945_s0 }
  0x36   : > { %p4280_p3 = pnand %p4279_p0, %p4278_p11  ;;  %p4284_p9 = scmp.lt.u32.totalorder %s4282_s11, %s4277_s6 }
  0x37   : > { %p4286_p2 = scmp.lt.u32.totalorder %s4277_s6, %s4546_s25 }
  0x38   : > { %p4281_p5 = pneg %p4280_p3  ;;  %p4285_p1 = por %p4284_p9, %p4283_p7 }
  0x3a   : > { %p4287_p4 = por %p4286_p2, %p4285_p1 }
  0x3c   : > { %p4288_p6 = pnand %p4287_p4, %p4281_p5 }
  0x3e   : > { %4291 = shalt.err (!%p4288_p6)
}
  0x3f   : > { %s4292_s23 = scalar_lea.vmem %s4548_s4, 3456  ;;  %s4414_s28 = smov [#allocation3]  }
  0x40   : > { %p4293_p8 = scmp.ne.s32.totalorder %s4548_s4, %s4292_s23  ;;  %s4297_s26 = sshll.u32 %s4414_s28, 4  ;;  %s4298_s26 = int_to_ptr.vmem [resolvable:$false] %s4297_s26 }
  0x41   : > { %s4299_s30 = scalar_lea.vmem %s4298_s26, 6912  ;;  %p4300_p3 = scmp.lt.s32.totalorder %s4548_s4, %s4298_s26 }
  0x42   : > { %p4295_p10 = pnand %p4293_p8, %p4279_p0  ;;  %p4301_p7 = scmp.lt.s32.totalorder %s4299_s30, %s4292_s23 }
  0x44   : > { %p4296_p11 = pneg %p4295_p10  ;;  %p4302_p9 = por %p4301_p7, %p4300_p3 }
  0x46   : > { %p4303_p1 = pnand %p4302_p9, %p4296_p11 }
  0x48   : > { %4306 = shalt.err (!%p4303_p1)
}
  0x49   : > { %4098 = dma.hbm_to_vmem [thread:$0]  (!%p4539_p13), %s4546_s25, 3456, %s4548_s4, %s4550_s5, %s4412_s8, %s4412_s8, %s4413_s9  }
  0x4a   : > { %p5970_p0 = scmp.ne.s32.totalorder %s5965_s20, 0 }
  0x4c   : > { %177 = sbr.rel (%p5970_p0) target bundleno = 748 (0x2ec), region = 28 }
  0x53   : > { %s4584_s6 = sand.u32 1, %s4401_s13   ;;  %p5971_p5 = scmp.ne.s32.totalorder %s5963_s18, 0 }
  0x54   : > { %s4080_s7 = smul.u32 216, %s4584_s6  ;;  %s180_s10 = scalar_lea.sflag [#allocation4], %s4584_s6 }
  0x56   : > { %s4588_s11 = scalar_lea.vmem [#allocation3], %s4080_s7 }
  0x57   : > { %4380 = dma.done.wait (%p5971_p5), %s180_s10, 3456  }
  0x58   : > { %4382 = vsyncadd (%p5971_p5), %s180_s10, 4294963840  ;;  %p5972_p13 = scmp.eq.s32.totalorder %s4460_s16, 0 }
  0x5a   : > { %4384 = dma.done.wait (%p5972_p13), [#allocation7], 9216   ;;  %p5973_p2 = pmov %p5972_p13 }
  0x5b   : > { %v4147_v0 = vld [vmem:[#allocation6 + $0x40] sm:$0xff]   ;;  %v4149_v2 = vld [vmem:[#allocation6 + $0x48] sm:$0xff]   ;;  %v4151_v4 = vld [vmem:[#allocation6 + $0x50] sm:$0xff]   ;;  %vm382_vm0 = vsmask.f32 3328  ;;  %vm865_vm3 = vcmask 1042432  }
  0x5c   : > { %4386 = vsyncadd (%p5973_p2), [#allocation7], 4294958080  ;;  %v4148_v1 = vld [vmem:[#allocation6] sm:$0xff]   ;;  %3542 = vmatprep.subr.bf16.mxu0 %v4147_v0  ;;  %4062 = vmatprep.subr.bf16.mxu1 %v4147_v0  ;;  %v4150_v3 = vld [vmem:[#allocation6 + $0x8] sm:$0xff]   ;;  %vm383_vm1 = vsmask.f32 7440 }
  0x5d   : > { %3543 = vmatpush3.bf16.msra.mxu0 %v4148_v1  ;;  %4070 = vmatpush3.bf16.msra.mxu1 %v4148_v1  ;;  %v4152_v5 = vld [vmem:[#allocation6 + $0x10] sm:$0xff]   ;;  %v4153_v6 = vld [vmem:[#allocation6 + $0x58] sm:$0xff]   ;;  %v4155_v8 = vld [vmem:[#allocation6 + $0x60] sm:$0xff]   ;;  %vm866_vm4 = vcmask 1046532   ;;  %s3229_s18 = sshll.u32 %s4584_s6, 7  ;;  %s3446_s8 = sshll.u32 %s4460_s16, 11 }
  0x5e   : > { %3544 = vmatprep.subr.bf16.mxu0 %v4149_v2  ;;  %4063 = vmatprep.subr.bf16.mxu1 %v4149_v2  ;;  %v4154_v7 = vld [vmem:[#allocation6 + $0x18] sm:$0xff]   ;;  %v4156_v9 = vld [vmem:[#allocation6 + $0x20] sm:$0xff]   ;;  %v4157_v10 = vld [vmem:[#allocation6 + $0x68] sm:$0xff]   ;;  %s5627_s20 = scalar_lea.vmem [#allocation8], %s3229_s18  ;;  %s5794_s4 = scalar_lea.hbm %s5947_s2, %s3446_s8 }
  0x5f   : > { %v4599_v11 = vld [vmem:[%s4588_s11] sm:$0xf]  ;;  %v4602_v12 = vld [vmem:[%s4588_s11 + $0x4] sm:$0xf]  ;;  %v4605_v13 = vld [vmem:[%s4588_s11 + $0x8] sm:$0x1] }
  0x60   : > { %v386_v14 = vshrl.u32 %v4599_v11, 16  ;;  %v389_v15 = vshll.u32 %v4599_v11, 16  ;;  %v395_v16 = vshll.u32 %v4602_v12, 16  ;;  %v399_v17 = vshrl.u32 %v4602_v12, 16  ;;  %v4612_v18 = vld [vmem:[%s4588_s11 + $0x90] sm:$0xf]  ;;  %vm4626_vm2 = vmor %vm382_vm0, %vm383_vm1 }
  0x61   : > { %3545 = vmatpush3.bf16.msra.mxu0 %v4150_v3  ;;  %4071 = vmatpush3.bf16.msra.mxu1 %v4150_v3  ;;  %v4158_v19 = vld [vmem:[#allocation6 + $0x28] sm:$0xff]   ;;  %v4159_v20 = vld [vmem:[#allocation6 + $0x70] sm:$0xff]   ;;  %v405_v21 = vshll.u32 %v4605_v13, 16  ;;  %v4616_v22 = vld [vmem:[%s4588_s11 + $0x94] sm:$0xf]  ;;  %v3263_v29 = vrot.slane %v4599_v11, 9  ;;  %v3231_v61 = vcombine.low %v4599_v11, %v4602_v12 }
  0x62   : > { %3546 = vmatprep.subr.bf16.mxu0 %v4151_v4  ;;  %4064 = vmatprep.subr.bf16.mxu1 %v4151_v4  ;;  %v388_v23 = vrot.slane %v386_v14, 4  ;;  %v391_v24 = vrot.slane %v389_v15, 5  ;;  %v397_v25 = vrot.slane %v395_v16, 5  ;;  %v401_v26 = vrot.slane %v399_v17, 4  ;;  %v254_v27 = vld [vmem:[%s4588_s11 + $0x98] sm:$0x1]  ;;  %vm4759_vm5 = vmor %vm865_vm3, %vm866_vm4 }
  0x63   : > { %v407_v28 = vrot.slane %v405_v21, 5  ;;  %v674_v30 = vshrl.u32 %v4612_v18, 16  ;;  %v677_v31 = vshll.u32 %v4612_v18, 16  ;;  %v4160_v32 = vld [vmem:[#allocation6 + $0x30] sm:$0xff]   ;;  %v683_v35 = vshll.u32 %v4616_v22, 16  ;;  %v4161_v37 = vld [vmem:[#allocation6 + $0x78] sm:$0xff]  }
  0x64   : > { %v392_v33 = vor.u32 %v391_v24, %v388_v23  ;;  %v402_v34 = vor.u32 %v401_v26, %v397_v25  ;;  %v687_v36 = vshrl.u32 %v4616_v22, 16  ;;  %v870_v39 = vrot.slane %v4602_v12, 5  ;;  %v4162_v50 = vld [vmem:[#allocation6 + $0x38] sm:$0xff]   ;;  %v4165_v56 = vld [vmem:[#allocation6 + $0xc0] sm:$0xff]   ;;  %v256_v16 = vld [vmem:[%s4588_s11 + $0xa0] sm:$0xf] }
  0x65   : > { %3547 = vmatpush3.bf16.msra.mxu0 %v4152_v5  ;;  %4072 = vmatpush3.bf16.msra.mxu1 %v4152_v5  ;;  %v676_v40 = vrot.slane %v674_v30, 4  ;;  %v679_v41 = vrot.slane %v677_v31, 5  ;;  %v693_v42 = vshll.u32 %v254_v27, 16  ;;  %v685_v45 = vrot.slane %v683_v35, 5  ;;  %v4166_v58 = vld [vmem:[#allocation6 + $0x140] sm:$0xff]   ;;  %v4169_v24 = vld [vmem:[#allocation6 + $0xc8] sm:$0xff]  }
  0x66   : > { %3548 = vmatprep.subr.bf16.mxu0 %v4153_v6  ;;  %4065 = vmatprep.subr.bf16.mxu1 %v4153_v6  ;;  %v393_v43 = vrot.slane %v392_v33, 4  ;;  %v403_v44 = vrot.slane %v402_v34, 4  ;;  %v689_v46 = vrot.slane %v687_v36, 4  ;;  %v873_v47 = vrot.slane %v4605_v13, 5  ;;  %v4637_v59 = vld [vmem:[%s4588_s11 + $0xc] sm:$0xf] }
  0x67   : > { %v680_v48 = vor.u32 %v679_v41, %v676_v40  ;;  %v695_v49 = vrot.slane %v693_v42, 5  ;;  %v4644_v62 = vld [vmem:[%s4588_s11 + $0x10] sm:$0xf]  ;;  %v4647_v63 = vld [vmem:[%s4588_s11 + $0x14] sm:$0x1]  ;;  %v410_v0 = vshrl.u32 %v4637_v59, 16 }
  0x68   : > { %v398_v51 = vsel %vm4626_vm2, %v393_v43, %v397_v25  ;;  %v408_v52 = vsel %vm4626_vm2, %v403_v44, %v407_v28  ;;  %v690_v53 = vor.u32 %v689_v46, %v685_v45  ;;  %v413_v1 = vshll.u32 %v4637_v59, 16  ;;  %v4167_v3 = vld [vmem:[#allocation6 + $0x80] sm:$0xff]   ;;  %v257_v17 = vld [vmem:[%s4588_s11 + $0xa4] sm:$0x1]  ;;  %s3094_s9 = sshll.u32 %s5627_s20, 4  ;;  %s3076_s5 = scalar_lea.sflag [#allocation5], %s4584_s6  ;;  %s5796_s9 = int_to_ptr.vmem [resolvable:$true] %s3094_s9 }
  0x69   : > { %3549 = vmatpush3.bf16.msra.mxu0 %v4154_v7  ;;  %4073 = vmatpush3.bf16.msra.mxu1 %v4154_v7  ;;  %v3247_v54 = vcombine.low %v398_v51, %v408_v52  ;;  %v681_v55 = vrot.slane %v680_v48, 4  ;;  %v4168_v4 = vld [vmem:[#allocation6 + $0x100] sm:$0xff]   ;;  %v419_v5 = vshll.u32 %v4644_v62, 16  ;;  %v423_v6 = vshrl.u32 %v4644_v62, 16  ;;  %v4173_v40 = vld [vmem:[#allocation6 + $0xd0] sm:$0xff]   ;;  %v4176_v41 = vld [vmem:[#allocation6 + $0x148] sm:$0xff]  }
  0x6a   : > { %3550 = vmatprep.subr.bf16.mxu0 %v4155_v8  ;;  %4066 = vmatprep.subr.bf16.mxu1 %v4155_v8  ;;  %v691_v57 = vrot.slane %v690_v53, 4  ;;  %v429_v7 = vshll.u32 %v4647_v63, 16  ;;  %v255_v8 = vld [vmem:[%s4588_s11 + $0x9c] sm:$0xf]  ;;  %v412_v14 = vrot.slane %v410_v0, 4  ;;  %v415_v15 = vrot.slane %v413_v1, 5 }
  0x6b   : > { %v686_v60 = vsel %vm4626_vm2, %v681_v55, %v685_v45  ;;  %2000 = vmatprep.mubr.bf16.mxu0 %v3247_v54  ;;  %v698_v23 = vshrl.u32 %v255_v8, 16  ;;  %v701_v26 = vshll.u32 %v255_v8, 16  ;;  %v707_v27 = vshll.u32 %v256_v16, 16  ;;  %v4175_v53 = vld [vmem:[#allocation6 + $0xd8] sm:$0xff]   ;;  %v4178_v54 = vld [vmem:[#allocation6 + $0x108] sm:$0xff]   ;;  %s4307_s27 = scalar_lea.vmem %s5796_s9, 2048 }
  0x6c   : > { %v696_v2 = vsel %vm4626_vm2, %v691_v57, %v695_v49  ;;  %v431_v21 = vrot.slane %v429_v7, 5  ;;  %v416_v25 = vor.u32 %v415_v15, %v412_v14  ;;  %v711_v28 = vshrl.u32 %v256_v16, 16  ;;  %v4174_v49 = vld [vmem:[#allocation6 + $0x90] sm:$0xff]   ;;  %v4685_v57 = vld [vmem:[%s4588_s11 + $0x18] sm:$0xf]  ;;  %p4308_p4 = scmp.ne.s32.totalorder %s5796_s9, %s4307_s27  ;;  %s4415_s22 = smov [#allocation8]  }
  0x6d   : > { %3551 = vmatpush3.bf16.msra.mxu0 %v4156_v9  ;;  %4074 = vmatpush3.bf16.msra.mxu1 %v4156_v9  ;;  %v4657_v9 = vcombine.low %v686_v60, %v696_v2  ;;  %v700_v30 = vrot.slane %v698_v23, 4  ;;  %v717_v31 = vshll.u32 %v257_v17, 16  ;;  %v703_v33 = vrot.slane %v701_v26, 5  ;;  %v4691_v60 = vld [vmem:[%s4588_s11 + $0x20] sm:$0x1]  ;;  %s4311_s23 = sshll.u32 %s4415_s22, 4  ;;  %s4312_s23 = int_to_ptr.vmem [resolvable:$false] %s4311_s23 }
  0x6e   : > { %3552 = vmatprep.subr.bf16.mxu0 %v4157_v10  ;;  %4067 = vmatprep.subr.bf16.mxu1 %v4157_v10  ;;  %v4661_v10 = vcombine.low %v4612_v18, %v4616_v22  ;;  %v4170_v18 = vld [vmem:[#allocation6 + $0x88] sm:$0xff]   ;;  %v709_v34 = vrot.slane %v707_v27, 5  ;;  %v713_v35 = vrot.slane %v711_v28, 4  ;;  %v4671_v45 = vrot.slane %v870_v39, 4  ;;  %v260_v15 = vld [vmem:[%s4588_s11 + $0xb0] sm:$0x1]  ;;  %p4309_p6 = pnand %p4308_p4, %p4533_p12  ;;  %p4314_p10 = scmp.lt.s32.totalorder %s5796_s9, %s4312_s23 }
  0x6f   : > { %5976 = vst [vmem:[#allocation15_spill] sm:$0xff] %v4657_v9  ;;  %2096 = vmatprep.mubr.bf16.mxu1 %v4657_v9  ;;  %v704_v43 = vor.u32 %v703_v33, %v700_v30  ;;  %v4677_v48 = vcombine.low %v4637_v59, %v4644_v62  ;;  %v3264_v55 = vrot.slane %v4637_v59, 9  ;;  %v434_v1 = vshrl.u32 %v4685_v57, 16  ;;  %v4881_v59 = vld [vmem:[%s4588_s11 + $0x58] sm:$0xf]  ;;  %s4313_s28 = scalar_lea.vmem %s4312_s23, 4096 }
  0x70   : > { %v714_v44 = vor.u32 %v713_v35, %v709_v34  ;;  %v437_v2 = vshll.u32 %v4685_v57, 16  ;;  %v453_v14 = vshll.u32 %v4691_v60, 16  ;;  %p4310_p8 = pneg %p4309_p6  ;;  %p4315_p11 = scmp.lt.s32.totalorder %s4313_s28, %s4307_s27 }
  0x71   : > { %3553 = vmatpush3.bf16.msra.mxu0 %v4158_v19  ;;  %4075 = vmatpush3.bf16.msra.mxu1 %v4158_v19  ;;  %v421_v19 = vrot.slane %v419_v5, 5  ;;  %v705_v51 = vrot.slane %v704_v43, 4 }
  0x72   : > { %3554 = vmatprep.subr.bf16.mxu0 %v4159_v20  ;;  %4068 = vmatprep.subr.bf16.mxu1 %v4159_v20  ;;  %v425_v20 = vrot.slane %v423_v6, 4  ;;  %v715_v52 = vrot.slane %v714_v44, 4  ;;  %v4177_v6 = vld [vmem:[#allocation6 + $0x98] sm:$0xff]   ;;  %v439_v17 = vrot.slane %v437_v2, 5  ;;  %p4316_p3 = por %p4315_p11, %p4314_p10 }
  0x74   : > { %v426_v22 = vor.u32 %v425_v20, %v421_v19  ;;  %p4317_p7 = pnand %p4316_p3, %p4310_p8 }
  0x75   : > { %3555 = vmatpush3.bf16.msra.mxu0 %v4160_v32  ;;  %4076 = vmatpush3.bf16.msra.mxu1 %v4160_v32  ;;  %v417_v32 = vrot.slane %v416_v25, 4 }
  0x76   : > { %3556 = vmatprep.subr.bf16.mxu0 %v4161_v37  ;;  %4069 = vmatprep.subr.bf16.mxu1 %v4161_v37  ;;  %v427_v36 = vrot.slane %v426_v22, 4  ;;  %v719_v37 = vrot.slane %v717_v31, 5  ;;  %v4181_v22 = vld [vmem:[#allocation6 + $0xe0] sm:$0xff]  }
  0x77   : > { %v422_v42 = vsel %vm4626_vm2, %v417_v32, %v421_v19  ;;  %v741_v32 = vshll.u32 %v260_v15, 16  ;;  %v4742_v15 = vld [vmem:[%s4588_s11 + $0xb8] sm:$0xf] }
  0x78   : > { %v432_v46 = vsel %vm4626_vm2, %v427_v36, %v431_v21  ;;  %v720_v0 = vsel %vm4626_vm2, %v715_v52, %v719_v37  ;;  %v4723_v52 = vld [vmem:[%s4588_s11 + $0x28] sm:$0xf] }
  0x79   : > { %3557 = vmatpush3.bf16.msra.mxu0 %v4162_v50  ;;  %4077 = vmatpush3.bf16.msra.mxu1 %v4162_v50  ;;  %v4679_v50 = vcombine.low %v422_v42, %v432_v46  ;;  %v743_v37 = vrot.slane %v741_v32, 5  ;;  %v4183_v42 = vld [vmem:[#allocation6 + $0xe8] sm:$0xff]  }
  0x7a   : > { %3654 = vmatprep.subr.bf16.mxu1 %v4165_v56  ;;  %3766 = vmatprep.subr.bf16.mxu0 %v4166_v58  ;;  %v4682_v56 = vcombine.low %v255_v8, %v256_v16  ;;  %v4688_v58 = vld [vmem:[%s4588_s11 + $0x1c] sm:$0xf]  ;;  %v436_v16 = vrot.slane %v434_v1, 4 }
  0x7b   : > { %v443_v7 = vshll.u32 %v4688_v58, 16  ;;  %v447_v8 = vshrl.u32 %v4688_v58, 16 }
  0x7c   : > { %2001 = vmatmul.mubr.bf16.vlgmr.msra.gmra.mrb[0].mxu0 %v3231_v61  ;;  %2097 = vmatmul.mubr.bf16.vlgmr.msra.gmra.mrb[0].mxu1 %v4661_v10  ;;  %v710_v61 = vsel %vm4626_vm2, %v705_v51, %v709_v34  ;;  %v440_v26 = vor.u32 %v439_v17, %v436_v16  ;;  %v4720_v51 = vld [vmem:[%s4588_s11 + $0x24] sm:$0xf] }
  0x7d   : > { %3655 = vmatpush3.bf16.msra.mxu1 %v4167_v3  ;;  %3767 = vmatpush3.bf16.msra.mxu0 %v4168_v4  ;;  %v258_v3 = vld [vmem:[%s4588_s11 + $0xa8] sm:$0xf]  ;;  %v259_v4 = vld [vmem:[%s4588_s11 + $0xac] sm:$0xf]  ;;  %v4702_v5 = vcombine.low %v710_v61, %v720_v0  ;;  %v445_v21 = vrot.slane %v443_v7, 5  ;;  %v449_v23 = vrot.slane %v447_v8, 4 }
  0x7e   : > { %3656 = vmatprep.subr.bf16.mxu1 %v4169_v24  ;;  %3768 = vmatprep.subr.bf16.mxu0 %v4176_v41  ;;  %v722_v19 = vshrl.u32 %v258_v3, 16  ;;  %v725_v20 = vshll.u32 %v258_v3, 16  ;;  %v455_v24 = vrot.slane %v453_v14, 5  ;;  %v731_v25 = vshll.u32 %v259_v4, 16  ;;  %v4182_v41 = vld [vmem:[#allocation6 + $0xa0] sm:$0xff]   ;;  %v4184_v61 = vld [vmem:[#allocation6 + $0xa8] sm:$0xff]  }
  0x7f   : > { %2008 = vmatprep.mubr.bf16.mxu0 %v4679_v50  ;;  %5977 = vst [vmem:[#allocation16_spill] sm:$0xff] %v4702_v5  ;;  %2104 = vmatprep.mubr.bf16.mxu1 %v4702_v5  ;;  %v450_v30 = vor.u32 %v449_v23, %v445_v21  ;;  %v441_v33 = vrot.slane %v440_v26, 4  ;;  %v4728_v0 = vld [vmem:[%s4588_s11 + $0x2c] sm:$0x1]  ;;  %v458_v1 = vshrl.u32 %v4720_v51, 16  ;;  %v461_v2 = vshll.u32 %v4720_v51, 16 }
  0x80   : > { %v724_v27 = vrot.slane %v722_v19, 4  ;;  %v727_v28 = vrot.slane %v725_v20, 5  ;;  %v733_v31 = vrot.slane %v731_v25, 5  ;;  %v471_v8 = vshrl.u32 %v4723_v52, 16  ;;  %v4739_v14 = vld [vmem:[%s4588_s11 + $0xb4] sm:$0xf] }
  0x81   : > { %3657 = vmatpush3.bf16.msra.mxu1 %v4170_v18  ;;  %3769 = vmatpush3.bf16.msra.mxu0 %v4178_v54  ;;  %v735_v18 = vshrl.u32 %v259_v4, 16  ;;  %v451_v36 = vrot.slane %v450_v30, 4  ;;  %v446_v43 = vsel %vm4626_vm2, %v441_v33, %v445_v21  ;;  %v4187_v16 = vld [vmem:[#allocation6 + $0xf0] sm:$0xff]   ;;  %v460_v17 = vrot.slane %v458_v1, 4  ;;  %v263_v23 = vld [vmem:[%s4588_s11 + $0xbc] sm:$0x1] }
  0x82   : > { %3658 = vmatprep.subr.bf16.mxu1 %v4173_v40  ;;  %v728_v34 = vor.u32 %v727_v28, %v724_v27  ;;  %v4713_v40 = vcombine.low %v4685_v57, %v4688_v58  ;;  %v463_v19 = vrot.slane %v461_v2, 5  ;;  %v477_v21 = vshll.u32 %v4728_v0, 16  ;;  %v4190_v28 = vld [vmem:[#allocation6 + $0x110] sm:$0xff]   ;;  %v4192_v2 = vld [vmem:[#allocation6 + $0xb8] sm:$0xff]  }
  0x83   : > { %v737_v35 = vrot.slane %v735_v18, 4  ;;  %v456_v54 = vsel %vm4626_vm2, %v451_v36, %v455_v24  ;;  %v473_v25 = vrot.slane %v471_v8, 4  ;;  %v746_v26 = vshrl.u32 %v4739_v14, 16  ;;  %v4189_v36 = vld [vmem:[#allocation6 + $0xb0] sm:$0xff]  }
  0x84   : > { %2009 = vmatmul.mubr.bf16.gmra.mrb[4].mxu0 %v4677_v48  ;;  %2105 = vmatmul.mubr.bf16.gmra.mrb[4].mxu1 %v4682_v56  ;;  %v729_v44 = vrot.slane %v728_v34, 4  ;;  %v749_v27 = vshll.u32 %v4739_v14, 16  ;;  %v479_v30 = vrot.slane %v477_v21, 5  ;;  %v4770_v8 = vcombine.low %v4720_v51, %v4723_v52  ;;  %v4785_v21 = vld [vmem:[%s4588_s11 + $0x34] sm:$0xf] }
  0x85   : > { %3659 = vmatpush3.bf16.msra.mxu1 %v4174_v49  ;;  %v738_v46 = vor.u32 %v737_v35, %v733_v31  ;;  %v4717_v49 = vcombine.low %v258_v3, %v259_v4  ;;  %v467_v3 = vshll.u32 %v4723_v52, 16  ;;  %v4733_v4 = vcombine.low %v446_v43, %v456_v54  ;;  %v4191_v43 = vld [vmem:[#allocation6 + $0xf8] sm:$0xff]  }
  0x86   : > { %3660 = vmatprep.subr.bf16.mxu1 %v4175_v53  ;;  %v4188_v53 = vld [vmem:[#allocation6 + $0x150] sm:$0xff]   ;;  %v748_v33 = vrot.slane %v746_v26, 4  ;;  %v751_v34 = vrot.slane %v749_v27, 5  ;;  %v759_v35 = vshrl.u32 %v4742_v15, 16  ;;  %5981 = vst [vmem:[#allocation18_spill] sm:$0xff] %v4770_v8  ;;  %v495_v27 = vshrl.u32 %v4785_v21, 16 }
  0x87   : > { %v739_v7 = vrot.slane %v738_v46, 4  ;;  %3770 = vmatprep.subr.bf16.mxu0 %v4188_v53  ;;  %v469_v20 = vrot.slane %v467_v3, 5  ;;  %2016 = vmatprep.mubr.bf16.mxu0 %v4733_v4 }
  0x88   : > { %3771 = vmatpush3.bf16.msra.mxu0 %v4190_v28  ;;  %v752_v53 = vor.u32 %v751_v34, %v748_v33  ;;  %v761_v54 = vrot.slane %v759_v35, 4  ;;  %v4200_v35 = vld [vmem:[#allocation6 + $0x160] sm:$0xff]  }
  0x89   : > { %3661 = vmatpush3.bf16.msra.mxu1 %v4177_v6  ;;  %v734_v6 = vsel %vm4626_vm2, %v729_v44, %v733_v31  ;;  %v744_v24 = vsel %vm4626_vm2, %v739_v7, %v743_v37  ;;  %v755_v31 = vshll.u32 %v4742_v15, 16  ;;  %v474_v32 = vor.u32 %v473_v25, %v469_v20  ;;  %v4790_v25 = vld [vmem:[%s4588_s11 + $0x38] sm:$0x1] }
  0x8a   : > { %3662 = vmatprep.subr.bf16.mxu1 %v4181_v22  ;;  %v4751_v18 = vcombine.low %v734_v6, %v744_v24  ;;  %v464_v22 = vor.u32 %v463_v19, %v460_v17  ;;  %v753_v6 = vrot.slane %v752_v53, 4  ;;  %v4194_v17 = vld [vmem:[#allocation6 + $0x1c0] sm:$0xff]   ;;  %v501_v28 = vshll.u32 %v4790_v25, 16 }
  0x8b   : > { %v475_v46 = vrot.slane %v474_v32, 4  ;;  %v4811_v32 = vcombine.low %v4739_v14, %v4742_v15 }
  0x8c   : > { %5978 = vst [vmem:[#allocation17_spill] sm:$0xff] %v4751_v18  ;;  %2017 = vmatmul.mubr.bf16.gmra.mrb[8].mxu0 %v4713_v40  ;;  %2112 = vmatprep.mubr.bf16.mxu1 %v4751_v18  ;;  %v465_v37 = vrot.slane %v464_v22, 4  ;;  %v4804_v22 = vsel %vm4759_vm5, %v3263_v29, %v870_v39  ;;  %v497_v39 = vrot.slane %v495_v27, 4  ;;  %v503_v34 = vrot.slane %v501_v28, 5  ;;  %v4850_v28 = vld [vmem:[%s4588_s11 + $0x50] sm:$0x1] }
  0x8d   : > { %3663 = vmatpush3.bf16.msra.mxu1 %v4182_v41  ;;  %v757_v41 = vrot.slane %v755_v31, 5  ;;  %v480_v3 = vsel %vm4626_vm2, %v475_v46, %v479_v30  ;;  %v4197_v30 = vld [vmem:[#allocation6 + $0x118] sm:$0xff]   ;;  %v877_v27 = vrot.slane %v4644_v62, 5  ;;  %v4974_v18 = vld [vmem:[%s4588_s11 + $0x7c] sm:$0xf] }
  0x8e   : > { %3664 = vmatprep.subr.bf16.mxu1 %v4183_v42  ;;  %v765_v42 = vshll.u32 %v263_v23, 16  ;;  %2113 = vmatmul.mubr.bf16.gmra.mrb[8].mxu1 %v4717_v49 }
  0x8f   : > { %v762_v7 = vor.u32 %v761_v54, %v757_v41  ;;  %v758_v23 = vsel %vm4626_vm2, %v753_v6, %v757_v41  ;;  %v4822_v41 = vld [vmem:[%s4588_s11 + $0x40] sm:$0xf]  ;;  %v4839_v6 = vld [vmem:[%s4588_s11 + $0x48] sm:$0xf] }
  0x90   : > { %v767_v1 = vrot.slane %v765_v42, 5  ;;  %v515_v54 = vshll.u32 %v4822_v41, 16 }
  0x91   : > { %3665 = vmatpush3.bf16.msra.mxu1 %v4184_v61  ;;  %v470_v61 = vsel %vm4626_vm2, %v465_v37, %v469_v20  ;;  %v4782_v20 = vld [vmem:[%s4588_s11 + $0x30] sm:$0xf]  ;;  %v763_v24 = vrot.slane %v762_v7, 4  ;;  %v4819_v37 = vld [vmem:[%s4588_s11 + $0x3c] sm:$0xf] }
  0x92   : > { %3666 = vmatprep.subr.bf16.mxu1 %v4187_v16  ;;  %v4777_v16 = vsel %vm4759_vm5, %v4671_v45, %v873_v47  ;;  %v4779_v19 = vcombine.low %v470_v61, %v480_v3  ;;  %v482_v13 = vshrl.u32 %v4782_v20, 16  ;;  %v485_v26 = vshll.u32 %v4782_v20, 16  ;;  %v4196_v47 = vld [vmem:[#allocation6 + $0x158] sm:$0xff]  }
  0x93   : > { %v491_v45 = vshll.u32 %v4785_v21, 16  ;;  %v768_v31 = vsel %vm4626_vm2, %v763_v24, %v767_v1  ;;  %3772 = vmatprep.subr.bf16.mxu0 %v4196_v47  ;;  %v3279_v15 = vcombine.low %v4804_v22, %v4777_v16  ;;  %v506_v46 = vshrl.u32 %v4819_v37, 16  ;;  %v4844_v24 = vld [vmem:[%s4588_s11 + $0x4c] sm:$0xf] }
  0x94   : > { %2024 = vmatprep.mubr.bf16.mxu0 %v4779_v19  ;;  %v484_v33 = vrot.slane %v482_v13, 4  ;;  %v487_v12 = vrot.slane %v485_v26, 5  ;;  %v4813_v11 = vcombine.low %v758_v23, %v768_v31  ;;  %3773 = vmatpush3.bf16.msra.mxu0 %v4197_v30  ;;  %v509_v53 = vshll.u32 %v4819_v37, 16  ;;  %v4195_v26 = vld [vmem:[#allocation6 + $0x180] sm:$0xff]  }
  0x95   : > { %3667 = vmatpush3.bf16.msra.mxu1 %v4189_v36  ;;  %2025 = vmatmul.mubr.bf16.gmra.mrb[12].mxu0 %v4770_v8  ;;  %v493_v29 = vrot.slane %v491_v45, 5  ;;  %v4834_v1 = vcombine.low %v4782_v20, %v4785_v21  ;;  %v517_v23 = vrot.slane %v515_v54, 5  ;;  %v880_v31 = vrot.slane %v4647_v63, 5  ;;  %v4203_v54 = vld [vmem:[#allocation6 + $0x188] sm:$0xff]  }
  0x96   : > { %3668 = vmatprep.subr.bf16.mxu1 %v4191_v43  ;;  %5982 = vst [vmem:[#allocation19_spill] sm:$0xff] %v4813_v11  ;;  %v488_v36 = vor.u32 %v487_v12, %v484_v33  ;;  %2120 = vmatprep.mubr.bf16.mxu1 %v4813_v11  ;;  %v4826_v43 = vld [vmem:[%s4588_s11 + $0x44] sm:$0x1]  ;;  %v511_v16 = vrot.slane %v509_v53, 5  ;;  %v530_v33 = vshrl.u32 %v4839_v6, 16  ;;  %v539_v62 = vshll.u32 %v4844_v24, 16 }
  0x97   : > { %v498_v14 = vor.u32 %v497_v39, %v493_v29  ;;  %3774 = vmatprep.subr.bf16.mxu0 %v4200_v35  ;;  %2121 = vmatmul.mubr.bf16.gmra.mrb[12].mxu1 %v4811_v32  ;;  %5983 = vst [vmem:[#allocation20_spill] sm:$0xff] %v4834_v1  ;;  %v525_v3 = vshll.u32 %v4826_v43, 16  ;;  %v4201_v12 = vld [vmem:[#allocation6 + $0x1c8] sm:$0xff]   ;;  %v879_v39 = vrot.slane %v877_v27, 4  ;;  %v4863_v63 = vcombine.low %v4819_v37, %v4822_v41 }
  0x98   : > { %v489_v42 = vrot.slane %v488_v36, 4  ;;  %2161 = vmatprep.mubr.bf16.mxu1 %v4677_v48  ;;  %v4202_v48 = vld [vmem:[#allocation6 + $0x120] sm:$0xff]   ;;  %v532_v36 = vrot.slane %v530_v33, 4  ;;  %v549_v53 = vshll.u32 %v4850_v28, 16 }
  0x99   : > { %3669 = vmatpush3.bf16.msra.mxu1 %v4192_v2  ;;  %v499_v61 = vrot.slane %v498_v14, 4  ;;  %v519_v2 = vshrl.u32 %v4822_v41, 16  ;;  %v527_v45 = vrot.slane %v525_v3, 5  ;;  %3775 = vmatpush3.bf16.msra.mxu0 %v4202_v48  ;;  %v543_v14 = vshrl.u32 %v4844_v24, 16  ;;  %5984 = vst [vmem:[#allocation21_spill] sm:$0xff] %v4863_v63 }
  0x9a   : > { %3878 = vmatprep.subr.bf16.mxu1 %v4194_v17  ;;  %v494_v7 = vsel %vm4626_vm2, %v489_v42, %v493_v29  ;;  %v508_v17 = vrot.slane %v506_v46, 4  ;;  %v878_v3 = vsel %vm4759_vm5, %v3264_v55, %v877_v27 }
  0x9b   : > { %v504_v13 = vsel %vm4626_vm2, %v499_v61, %v503_v34  ;;  %v521_v47 = vrot.slane %v519_v2, 4  ;;  %v533_v34 = vshll.u32 %v4839_v6, 16  ;;  %v4205_v61 = vld [vmem:[#allocation6 + $0x168] sm:$0xff]  }
  0x9c   : > { %v4852_v22 = vcombine.low %v494_v7, %v504_v13  ;;  %v512_v30 = vor.u32 %v511_v16, %v508_v17  ;;  %v541_v7 = vrot.slane %v539_v62, 5  ;;  %v545_v17 = vrot.slane %v543_v14, 4  ;;  %3776 = vmatprep.subr.bf16.mxu0 %v4205_v61 }
  0x9d   : > { %v522_v29 = vor.u32 %v521_v47, %v517_v23  ;;  %v535_v46 = vrot.slane %v533_v34, 5  ;;  %v551_v13 = vrot.slane %v549_v53, 5  ;;  %v4206_v47 = vld [vmem:[#allocation6 + $0x128] sm:$0xff]   ;;  %v567_v14 = vshrl.u32 %v4881_v59, 16 }
  0x9e   : > { %2032 = vmatprep.mubr.bf16.mxu0 %v4852_v22  ;;  %v513_v35 = vrot.slane %v512_v30, 4  ;;  %v546_v27 = vor.u32 %v545_v17, %v541_v7  ;;  %v884_v30 = vrot.slane %v4688_v58, 5  ;;  %3777 = vmatpush3.bf16.msra.mxu0 %v4206_v47  ;;  %v563_v58 = vshll.u32 %v4881_v59, 16 }
  0x9f   : > { %2033 = vmatmul.mubr.bf16.gmra.mrb[16].mxu0 %v4834_v1  ;;  %v523_v42 = vrot.slane %v522_v29, 4  ;;  %2162 = vmatmul.mubr.bf16.vlgmr.msra.gmra.mrb[16].mxu1 %v3279_v15  ;;  %v881_v15 = vsel %vm4759_vm5, %v879_v39, %v880_v31  ;;  %v536_v48 = vor.u32 %v535_v46, %v532_v36  ;;  %v887_v31 = vrot.slane %v4691_v60, 5 }
  0xa0   : > { %v518_v2 = vsel %vm4626_vm2, %v513_v35, %v517_v23  ;;  %3879 = vmatpush3.bf16.msra.mxu1 %v4195_v26  ;;  %2169 = vmatprep.mubr.bf16.mxu1 %v4713_v40  ;;  %v4878_v23 = vld [vmem:[%s4588_s11 + $0x54] sm:$0xf]  ;;  %v3265_v26 = vrot.slane %v4685_v57, 9  ;;  %v4894_v34 = vcombine.low %v878_v3, %v881_v15  ;;  %v547_v57 = vrot.slane %v546_v27, 4  ;;  %v4209_v3 = vld [vmem:[#allocation6 + $0x190] sm:$0xff]  }
  0xa1   : > { %v528_v16 = vsel %vm4626_vm2, %v523_v42, %v527_v45  ;;  %3880 = vmatprep.subr.bf16.mxu1 %v4201_v12  ;;  %v4888_v45 = vld [vmem:[%s4588_s11 + $0x5c] sm:$0x1]  ;;  %v537_v33 = vrot.slane %v536_v48, 4  ;;  %v554_v29 = vshrl.u32 %v4878_v23, 16  ;;  %v557_v39 = vshll.u32 %v4878_v23, 16  ;;  %v4208_v12 = vld [vmem:[#allocation6 + $0x1d0] sm:$0xff]  }
  0xa2   : > { %v4883_v55 = vcombine.low %v518_v2, %v528_v16  ;;  %v886_v35 = vrot.slane %v884_v30, 4  ;;  %v552_v42 = vsel %vm4626_vm2, %v547_v57, %v551_v13  ;;  %v885_v46 = vsel %vm4759_vm5, %v3265_v26, %v884_v30  ;;  %v4906_v2 = vld [vmem:[%s4588_s11 + $0x60] sm:$0xf]  ;;  %v4914_v15 = vld [vmem:[%s4588_s11 + $0x64] sm:$0xf] }
  0xa3   : > { %v542_v36 = vsel %vm4626_vm2, %v537_v33, %v541_v7  ;;  %v556_v60 = vrot.slane %v554_v29, 4  ;;  %v559_v62 = vrot.slane %v557_v39, 5  ;;  %v565_v53 = vrot.slane %v563_v58, 5  ;;  %v4211_v48 = vld [vmem:[#allocation6 + $0x170] sm:$0xff]   ;;  %v4214_v39 = vld [vmem:[#allocation6 + $0x1d8] sm:$0xff]  }
  0xa4   : > { %2040 = vmatprep.mubr.bf16.mxu0 %v4883_v55  ;;  %3881 = vmatpush3.bf16.msra.mxu1 %v4203_v54  ;;  %v573_v61 = vshll.u32 %v4888_v45, 16  ;;  %v4909_v54 = vcombine.low %v542_v36, %v552_v42  ;;  %v888_v7 = vsel %vm4759_vm5, %v886_v35, %v887_v31  ;;  %v569_v16 = vrot.slane %v567_v14, 4  ;;  %v4922_v27 = vld [vmem:[%s4588_s11 + $0x68] sm:$0x1]  ;;  %v4937_v42 = vld [vmem:[%s4588_s11 + $0x6c] sm:$0xf] }
  0xa5   : > { %3882 = vmatprep.subr.bf16.mxu1 %v4208_v12  ;;  %v560_v17 = vor.u32 %v559_v62, %v556_v60  ;;  %v4919_v13 = vcombine.low %v4839_v6, %v4844_v24  ;;  %v4212_v26 = vld [vmem:[#allocation6 + $0x130] sm:$0xff]   ;;  %v891_v31 = vrot.slane %v4723_v52, 5  ;;  %v578_v29 = vshrl.u32 %v4906_v2, 16  ;;  %3778 = vmatprep.subr.bf16.mxu0 %v4211_v48  ;;  %v4215_v36 = vld [vmem:[#allocation6 + $0x198] sm:$0xff]  }
  0xa6   : > { %v575_v47 = vrot.slane %v573_v61, 5  ;;  %v570_v33 = vor.u32 %v569_v16, %v565_v53  ;;  %v4928_v57 = vcombine.low %v885_v46, %v888_v7  ;;  %v3266_v35 = vrot.slane %v4720_v51, 9  ;;  %3779 = vmatpush3.bf16.msra.mxu0 %v4212_v26  ;;  %v4216_v51 = vld [vmem:[#allocation6 + $0x178] sm:$0xff]  }
  0xa7   : > { %2041 = vmatmul.mubr.bf16.gmra.mrb[20].mxu0 %v4863_v63  ;;  %2170 = vmatmul.mubr.bf16.gmra.mrb[20].mxu1 %v4894_v34  ;;  %v561_v30 = vrot.slane %v560_v17, 4  ;;  %v581_v58 = vshll.u32 %v4906_v2, 16  ;;  %v587_v12 = vshll.u32 %v4914_v15, 16  ;;  %v580_v52 = vrot.slane %v578_v29, 4  ;;  %v4942_v17 = vld [vmem:[%s4588_s11 + $0x70] sm:$0xf] }
  0xa8   : > { %2048 = vmatprep.mubr.bf16.mxu0 %v4909_v54  ;;  %2177 = vmatprep.mubr.bf16.mxu1 %v4770_v8  ;;  %v571_v62 = vrot.slane %v570_v33, 4  ;;  %v591_v14 = vshrl.u32 %v4914_v15, 16  ;;  %v894_v46 = vrot.slane %v4728_v0, 5  ;;  %v893_v16 = vrot.slane %v891_v31, 4  ;;  %v4219_v33 = vld [vmem:[#allocation6 + $0x1e0] sm:$0xff]  }
  0xa9   : > { %3883 = vmatpush3.bf16.msra.mxu1 %v4209_v3  ;;  %v566_v60 = vsel %vm4626_vm2, %v561_v30, %v565_v53  ;;  %v583_v61 = vrot.slane %v581_v58, 5  ;;  %v589_v7 = vrot.slane %v587_v12, 5  ;;  %v597_v3 = vshll.u32 %v4922_v27, 16  ;;  %3780 = vmatprep.subr.bf16.mxu0 %v4216_v51  ;;  %v4217_v30 = vld [vmem:[#allocation6 + $0x138] sm:$0xff]  }
  0xaa   : > { %3884 = vmatprep.subr.bf16.mxu1 %v4214_v39  ;;  %v576_v53 = vsel %vm4626_vm2, %v571_v62, %v575_v47  ;;  %v593_v48 = vrot.slane %v591_v14, 4  ;;  %v892_v0 = vsel %vm4759_vm5, %v3266_v35, %v891_v31  ;;  %v3267_v12 = vrot.slane %v4782_v20, 9  ;;  %v4954_v14 = vld [vmem:[#allocation6 + $0x200] sm:$0xff]   ;;  %3781 = vmatpush3.bf16.msra.mxu0 %v4217_v30 }
  0xab   : > { %v4946_v26 = vcombine.low %v566_v60, %v576_v53  ;;  %v584_v29 = vor.u32 %v583_v61, %v580_v52  ;;  %v599_v39 = vrot.slane %v597_v3, 5  ;;  %v898_v47 = vrot.slane %v4785_v21, 5  ;;  %v4959_v35 = vld [vmem:[%s4588_s11 + $0x74] sm:$0x1]  ;;  %v4969_v3 = vld [vmem:[%s4588_s11 + $0x78] sm:$0xf]  ;;  %4014 = vmatprep.subr.bf16.mxu0 %v4954_v14 }
  0xac   : > { %v594_v58 = vor.u32 %v593_v48, %v589_v7  ;;  %v602_v62 = vshrl.u32 %v4937_v42, 16  ;;  %v611_v20 = vshll.u32 %v4942_v17, 16  ;;  %v615_v21 = vshrl.u32 %v4942_v17, 16  ;;  %v4221_v53 = vld [vmem:[#allocation6 + $0x1a0] sm:$0xff]  }
  0xad   : > { %3885 = vmatpush3.bf16.msra.mxu1 %v4215_v36  ;;  %v585_v31 = vrot.slane %v584_v29, 4  ;;  %v605_v36 = vshll.u32 %v4937_v42, 16  ;;  %v895_v60 = vsel %vm4759_vm5, %v893_v16, %v894_v46  ;;  %v901_v51 = vrot.slane %v4790_v25, 5  ;;  %v4222_v46 = vld [vmem:[#allocation6 + $0x1e8] sm:$0xff]  }
  0xae   : > { %3886 = vmatprep.subr.bf16.mxu1 %v4219_v33  ;;  %v595_v52 = vrot.slane %v594_v58, 4  ;;  %v604_v61 = vrot.slane %v602_v62, 4  ;;  %v613_v29 = vrot.slane %v611_v20, 5  ;;  %v617_v11 = vrot.slane %v615_v21, 4  ;;  %v4989_v21 = vld [vmem:[%s4588_s11 + $0x80] sm:$0x1] }
  0xaf   : > { %2049 = vmatmul.mubr.bf16.gmra.mrb[24].mxu0 %v4919_v13  ;;  %2178 = vmatmul.mubr.bf16.gmra.mrb[24].mxu1 %v4928_v57  ;;  %v590_v48 = vsel %vm4626_vm2, %v585_v31, %v589_v7  ;;  %v607_v33 = vrot.slane %v605_v36, 5  ;;  %v4979_v25 = vcombine.low %v4878_v23, %v4881_v59  ;;  %v900_v30 = vrot.slane %v898_v47, 4 }
  0xb0   : > { %2056 = vmatprep.mubr.bf16.mxu0 %v4946_v26  ;;  %2185 = vmatprep.mubr.bf16.mxu1 %v4834_v1  ;;  %v600_v16 = vsel %vm4626_vm2, %v595_v52, %v599_v39  ;;  %v621_v58 = vshll.u32 %v4959_v35, 16  ;;  %v4984_v7 = vcombine.low %v892_v0, %v895_v60  ;;  %v618_v36 = vor.u32 %v617_v11, %v613_v29 }
  0xb1   : > { %3887 = vmatpush3.bf16.msra.mxu1 %v4221_v53  ;;  %v4986_v62 = vcombine.low %v590_v48, %v600_v16  ;;  %v608_v31 = vor.u32 %v607_v33, %v604_v61  ;;  %v626_v1 = vshrl.u32 %v4969_v3, 16  ;;  %v629_v39 = vshll.u32 %v4969_v3, 16  ;;  %v4224_v61 = vld [vmem:[#allocation6 + $0x1a8] sm:$0xff]  }
  0xb2   : > { %3888 = vmatprep.subr.bf16.mxu1 %v4222_v46  ;;  %v623_v20 = vrot.slane %v621_v58, 5  ;;  %v619_v9 = vrot.slane %v618_v36, 4  ;;  %v899_v0 = vsel %vm4759_vm5, %v3267_v12, %v898_v47  ;;  %v905_v60 = vrot.slane %v4822_v41, 5  ;;  %v5005_v12 = vld [vmem:[%s4588_s11 + $0x84] sm:$0xf] }
  0xb3   : > { %v609_v5 = vrot.slane %v608_v31, 4  ;;  %v635_v11 = vshll.u32 %v4974_v18, 16  ;;  %v639_v52 = vshrl.u32 %v4974_v18, 16  ;;  %v902_v53 = vsel %vm4759_vm5, %v900_v30, %v901_v51  ;;  %v5013_v31 = vld [vmem:[%s4588_s11 + $0x88] sm:$0xf] }
  0xb4   : > { %v3268_v48 = vrot.slane %v4819_v37, 9  ;;  %v628_v33 = vrot.slane %v626_v1, 4  ;;  %v631_v46 = vrot.slane %v629_v39, 5  ;;  %v624_v47 = vsel %vm4626_vm2, %v619_v9, %v623_v20  ;;  %v4225_v30 = vld [vmem:[#allocation6 + $0x1f0] sm:$0xff]  }
  0xb5   : > { %v614_v41 = vsel %vm4626_vm2, %v609_v5, %v613_v29  ;;  %v637_v16 = vrot.slane %v635_v11, 5  ;;  %v641_v58 = vrot.slane %v639_v52, 4  ;;  %3889 = vmatpush3.bf16.msra.mxu1 %v4224_v61  ;;  %v5017_v37 = vcombine.low %v4906_v2, %v4914_v15  ;;  %v5024_v9 = vld [vmem:[%s4588_s11 + $0x8c] sm:$0x1] }
  0xb6   : > { %v632_v1 = vor.u32 %v631_v46, %v628_v33  ;;  %v645_v51 = vshll.u32 %v4989_v21, 16  ;;  %v5020_v36 = vcombine.low %v899_v0, %v902_v53  ;;  %v907_v39 = vrot.slane %v905_v60, 4  ;;  %3890 = vmatprep.subr.bf16.mxu1 %v4225_v30  ;;  %v4227_v0 = vld [vmem:[#allocation6 + $0x1b0] sm:$0xff]  }
  0xb7   : > { %2057 = vmatmul.mubr.bf16.gmra.mrb[28].mxu0 %v4979_v25  ;;  %2186 = vmatmul.mubr.bf16.gmra.mrb[28].mxu1 %v4984_v7  ;;  %v908_v5 = vrot.slane %v4826_v43, 5  ;;  %v642_v29 = vor.u32 %v641_v58, %v637_v16  ;;  %v5026_v20 = vcombine.low %v614_v41, %v624_v47  ;;  %v650_v52 = vshrl.u32 %v5005_v12, 16  ;;  %v4228_v58 = vld [vmem:[#allocation6 + $0x1f8] sm:$0xff]  }
  0xb8   : > { %2064 = vmatprep.mubr.bf16.mxu0 %v4986_v62  ;;  %2193 = vmatprep.mubr.bf16.mxu1 %v4863_v63  ;;  %v633_v11 = vrot.slane %v632_v1, 4  ;;  %v653_v61 = vshll.u32 %v5005_v12, 16  ;;  %v647_v46 = vrot.slane %v645_v51, 5  ;;  %v659_v63 = vshll.u32 %v5013_v31, 16 }
  0xb9   : > { %v643_v33 = vrot.slane %v642_v29, 4  ;;  %v652_v53 = vrot.slane %v650_v52, 4  ;;  %v663_v43 = vshrl.u32 %v5013_v31, 16  ;;  %v912_v41 = vrot.slane %v4844_v24, 5  ;;  %3891 = vmatpush3.bf16.msra.mxu1 %v4227_v0 }
  0xba   : > { %v655_v8 = vrot.slane %v653_v61, 5  ;;  %v661_v47 = vrot.slane %v659_v63, 5  ;;  %v906_v1 = vsel %vm4759_vm5, %v3268_v48, %v905_v60  ;;  %v909_v51 = vsel %vm4759_vm5, %v907_v39, %v908_v5  ;;  %3892 = vmatprep.subr.bf16.mxu1 %v4228_v58  ;;  %v4230_v61 = vld [vmem:[#allocation6 + $0x1b8] sm:$0xff]  }
  0xbb   : > { %v665_v30 = vrot.slane %v663_v43, 4  ;;  %v669_v29 = vshll.u32 %v5024_v9, 16  ;;  %v638_v24 = vsel %vm4626_vm2, %v633_v11, %v637_v16  ;;  %v648_v63 = vsel %vm4626_vm2, %v643_v33, %v647_v46 }
  0xbc   : > { %v656_v52 = vor.u32 %v655_v8, %v652_v53  ;;  %v5048_v60 = vcombine.low %v4937_v42, %v4942_v17  ;;  %v5050_v48 = vcombine.low %v906_v1, %v909_v51  ;;  %v3269_v39 = vrot.slane %v4839_v6, 9 }
  0xbd   : > { %v666_v0 = vor.u32 %v665_v30, %v661_v47  ;;  %3893 = vmatpush3.bf16.msra.mxu1 %v4230_v61  ;;  %v5053_v5 = vcombine.low %v638_v24, %v648_v63  ;;  %v914_v43 = vrot.slane %v912_v41, 4  ;;  %v915_v16 = vrot.slane %v4850_v28, 5 }
  0xbe   : > { %v671_v11 = vrot.slane %v669_v29, 5  ;;  %v657_v33 = vrot.slane %v656_v52, 4  ;;  %v913_v46 = vsel %vm4759_vm5, %v3269_v39, %v912_v41  ;;  %v919_v58 = vrot.slane %v4881_v59, 5 }
  0xbf   : > { %2065 = vmatmul.mubr.bf16.gmra.mrb[32].mxu0 %v5017_v37  ;;  %2194 = vmatmul.mubr.bf16.gmra.mrb[32].mxu1 %v5020_v36  ;;  %v667_v8 = vrot.slane %v666_v0, 4  ;;  %v916_v6 = vsel %vm4759_vm5, %v914_v43, %v915_v16  ;;  %v5071_v1 = vcombine.low %v4969_v3, %v4974_v18  ;;  %v3270_v30 = vrot.slane %v4878_v23, 9 }
  0xc0   : > { %2072 = vmatprep.mubr.bf16.mxu0 %v5026_v20  ;;  %2201 = vmatprep.mubr.bf16.mxu1 %v4919_v13  ;;  %v662_v28 = vsel %vm4626_vm2, %v657_v33, %v661_v47  ;;  %v5073_v51 = vcombine.low %v913_v46, %v916_v6  ;;  %v921_v29 = vrot.slane %v919_v58, 4  ;;  %v922_v24 = vrot.slane %v4888_v45, 5  ;;  %v4223_v33 = vld [vmem:[#allocation6 + $0x208] sm:$0xff]   ;;  %v4229_v6 = vld [vmem:[#allocation6 + $0x218] sm:$0xff]  }
  0xc1   : > { %v672_v53 = vsel %vm4626_vm2, %v667_v8, %v671_v11  ;;  %v920_v59 = vsel %vm4759_vm5, %v3270_v30, %v919_v58  ;;  %v926_v63 = vrot.slane %v4914_v15, 5  ;;  %v5090_v23 = vcombine.low %v5005_v12, %v5013_v31 }
  0xc2   : > { %v5075_v41 = vcombine.low %v662_v28, %v672_v53  ;;  %v923_v47 = vsel %vm4759_vm5, %v921_v29, %v922_v24  ;;  %v3271_v52 = vrot.slane %v4906_v2, 9  ;;  %v929_v0 = vrot.slane %v4922_v27, 5  ;;  %v4233_v24 = vld [vmem:[#allocation6 + $0x228] sm:$0xff]  }
  0xc3   : > { %v5092_v45 = vcombine.low %v920_v59, %v923_v47  ;;  %v928_v61 = vrot.slane %v926_v63, 4  ;;  %v933_v43 = vrot.slane %v4942_v17, 5  ;;  %v3272_v27 = vrot.slane %v4937_v42, 9  ;;  %v4234_v47 = vld [vmem:[#allocation6 + $0x230] sm:$0xff]  }
  0xc4   : > { %v927_v15 = vsel %vm4759_vm5, %v3271_v52, %v926_v63  ;;  %v936_v11 = vrot.slane %v4959_v35, 5  ;;  %v940_v17 = vrot.slane %v4974_v18, 5  ;;  %v4226_v35 = vld [vmem:[#allocation6 + $0x210] sm:$0xff]   ;;  %v943_v46 = vrot.slane %v4989_v21, 5  ;;  %v4232_v21 = vld [vmem:[#allocation6 + $0x220] sm:$0xff]  }
  0xc5   : > { %v930_v39 = vsel %vm4759_vm5, %v928_v61, %v929_v0  ;;  %v935_v16 = vrot.slane %v933_v43, 4  ;;  %v3274_v58 = vrot.slane %v5005_v12, 9  ;;  %v950_v29 = vrot.slane %v5024_v9, 5  ;;  %v4237_v9 = vld [vmem:[%s4588_s11 + $0x94] sm:$0xf] }
  0xc6   : > { %v5105_v2 = vcombine.low %v927_v15, %v930_v39  ;;  %v954_v59 = vrot.slane %v4237_v9, 5  ;;  %v4238_v52 = vld [vmem:[%s4588_s11 + $0x90] sm:$0xf]  ;;  %v4239_v15 = vld [vmem:[%s4588_s11 + $0x98] sm:$0x1] }
  0xc7   : > { %2073 = vmatmul.mubr.bf16.gmra.mrb[36].mxu0 %v5048_v60  ;;  %2202 = vmatmul.mubr.bf16.gmra.mrb[36].mxu1 %v5050_v48  ;;  %v937_v42 = vsel %vm4759_vm5, %v935_v16, %v936_v11  ;;  %v3275_v61 = vrot.slane %v4238_v52, 9  ;;  %v957_v39 = vrot.slane %v4239_v15, 5  ;;  %v4240_v11 = vld [vmem:[%s4588_s11 + $0xa0] sm:$0xf]  ;;  %v4246_v9 = vld [vmem:[%s4588_s11 + $0xb8] sm:$0xf] }
  0xc8   : > { %2080 = vmatprep.mubr.bf16.mxu0 %v5053_v5  ;;  %2209 = vmatprep.mubr.bf16.mxu1 %v4979_v25  ;;  %v956_v0 = vrot.slane %v954_v59, 4  ;;  %v265_v52 = vld [vmem:[%s4588_s11 + $0xc4] sm:$0xf]  ;;  %v4247_v15 = vld [vmem:[%s4588_s11 + $0xb4] sm:$0xf] }
  0xca   : > { %v958_v16 = vsel %vm4759_vm5, %v956_v0, %v957_v39  ;;  %v3278_v39 = vrot.slane %v4247_v15, 9 }
  0xcf   : > { %2081 = vmatmul.mubr.bf16.gmra.mrb[40].mxu0 %v5071_v1  ;;  %2210 = vmatmul.mubr.bf16.gmra.mrb[40].mxu1 %v5073_v51 }
  0xd0   : > { %2088 = vmatprep.mubr.bf16.mxu0 %v5075_v41  ;;  %2217 = vmatprep.mubr.bf16.mxu1 %v5017_v37 }
  0xd7   : > { %2089 = vmatmul.mubr.bf16.gmra.mrb[44].mxu0 %v5090_v23  ;;  %2218 = vmatmul.mubr.bf16.gmra.mrb[44].mxu1 %v5092_v45 }
  0xd8   : > { %2322 = vmatprep.mubr.bf16.mxu0 %v4894_v34  ;;  %2225 = vmatprep.mubr.bf16.mxu1 %v5048_v60  ;;  %v934_v34 = vsel %vm4759_vm5, %v3272_v27, %v933_v43  ;;  %v4235_v43 = vld [vmem:[#allocation6 + $0x238] sm:$0xff]   ;;  %v955_v27 = vsel %vm4759_vm5, %v3275_v61, %v954_v59  ;;  %v975_v59 = vrot.slane %v4246_v9, 5 }
  0xd9   : > { %v5119_v8 = vcombine.low %v934_v34, %v937_v42  ;;  %v5158_v34 = vcombine.low %v955_v27, %v958_v16  ;;  %v4241_v42 = vld [vmem:[%s4588_s11 + $0x9c] sm:$0xf] }
  0xda   : > { %v4248_v27 = vld [vmem:[%s4588_s11 + $0xbc] sm:$0x1] }
  0xdb   : > { %v978_v16 = vrot.slane %v4248_v27, 5 }
  0xdf   : > { %2323 = vmatmul.mubr.bf16.vlgmr.msra.gmra.mrb[48].mxu0 %v4679_v50  ;;  %2226 = vmatmul.mubr.bf16.gmra.mrb[48].mxu1 %v5105_v2  ;;  %v3273_v50 = vrot.slane %v4969_v3, 9  ;;  %v947_v3 = vrot.slane %v5013_v31, 5 }
  0xe0   : > { %4015 = vmatpush3.bf16.msra.mxu0 %v4954_v14  ;;  %2233 = vmatprep.mubr.bf16.mxu1 %v5071_v1  ;;  %v942_v14 = vrot.slane %v940_v17, 4 }
  0xe1   : > { %2330 = vmatprep.mubr.bf16.mxu0 %v4928_v57  ;;  %4016 = vmatprep.subr.bf16.mxu0 %v4223_v33  ;;  %v941_v18 = vsel %vm4759_vm5, %v3273_v50, %v940_v17  ;;  %v949_v30 = vrot.slane %v947_v3, 4  ;;  %v948_v31 = vsel %vm4759_vm5, %v3274_v58, %v947_v3  ;;  %v3276_v17 = vrot.slane %v4241_v42, 9  ;;  %v4242_v50 = vld [vmem:[%s4588_s11 + $0xa4] sm:$0x1] }
  0xe2   : > { %v944_v28 = vsel %vm4759_vm5, %v942_v14, %v943_v46  ;;  %v964_v14 = vrot.slane %v4242_v50, 5 }
  0xe3   : > { %v5132_v53 = vcombine.low %v941_v18, %v944_v28  ;;  %v951_v12 = vsel %vm4759_vm5, %v949_v30, %v950_v29  ;;  %v4243_v18 = vld [vmem:[%s4588_s11 + $0xac] sm:$0xf]  ;;  %v4245_v29 = vld [vmem:[%s4588_s11 + $0xb0] sm:$0x1] }
  0xe4   : > { %4017 = vmatpush3.bf16.msra.mxu0 %v4223_v33  ;;  %v5145_v63 = vcombine.low %v948_v31, %v951_v12  ;;  %v961_v33 = vrot.slane %v4240_v11, 5  ;;  %v968_v28 = vrot.slane %v4243_v18, 5  ;;  %v976_v11 = vsel %vm4759_vm5, %v3278_v39, %v975_v59 }
  0xe5   : > { %4018 = vmatprep.subr.bf16.mxu0 %v4226_v35 }
  0xe6   : > { %v962_v46 = vsel %vm4759_vm5, %v3276_v17, %v961_v33  ;;  %v970_v30 = vrot.slane %v968_v28, 4  ;;  %v5985_v17 = vld [vmem:[#allocation18_spill] sm:$0xff] }
  0xe7   : > { %2331 = vmatmul.mubr.bf16.gmra.mrb[52].mxu0 %v4733_v4  ;;  %2234 = vmatmul.mubr.bf16.gmra.mrb[52].mxu1 %v5119_v8 }
  0xe8   : > { %2338 = vmatprep.mubr.bf16.mxu0 %v4984_v7  ;;  %2241 = vmatprep.mubr.bf16.mxu1 %v5090_v23 }
  0xe9   : > { %4019 = vmatpush3.bf16.msra.mxu0 %v4226_v35  ;;  %v963_v35 = vrot.slane %v961_v33, 4 }
  0xea   : > { %4020 = vmatprep.subr.bf16.mxu0 %v4229_v6 }
  0xed   : > { %4021 = vmatpush3.bf16.msra.mxu0 %v4229_v6  ;;  %v965_v6 = vsel %vm4759_vm5, %v963_v35, %v964_v14  ;;  %v5986_v35 = vld [vmem:[#allocation20_spill] sm:$0xff]  ;;  %v1096_v14 = vshrl.u32 %v265_v52, 16 }
  0xee   : > { %4022 = vmatprep.subr.bf16.mxu0 %v4232_v21  ;;  %v5171_v3 = vcombine.low %v962_v46, %v965_v6  ;;  %v1092_v46 = vshll.u32 %v265_v52, 16  ;;  %v266_v6 = vld [vmem:[%s4588_s11 + $0xc8] sm:$0x1] }
  0xef   : > { %2339 = vmatmul.mubr.bf16.gmra.mrb[56].mxu0 %v4779_v19  ;;  %2242 = vmatmul.mubr.bf16.gmra.mrb[56].mxu1 %v5132_v53 }
  0xf0   : > { %2346 = vmatprep.mubr.bf16.mxu0 %v5020_v36  ;;  %2249 = vmatprep.mubr.bf16.mxu1 %v4661_v10 }
  0xf1   : > { %4023 = vmatpush3.bf16.msra.mxu0 %v4232_v21  ;;  %v4244_v21 = vld [vmem:[%s4588_s11 + $0xa8] sm:$0xf] }
  0xf2   : > { %4024 = vmatprep.subr.bf16.mxu0 %v4233_v24  ;;  %v3277_v58 = vrot.slane %v4244_v21, 9  ;;  %v1094_v21 = vrot.slane %v1092_v46, 5 }
  0xf4   : > { %v969_v31 = vsel %vm4759_vm5, %v3277_v58, %v968_v28  ;;  %v1098_v58 = vrot.slane %v1096_v14, 4 }
  0xf5   : > { %4025 = vmatpush3.bf16.msra.mxu0 %v4233_v24  ;;  %v971_v24 = vrot.slane %v4245_v29, 5  ;;  %v1132_v29 = vrot.slane %v266_v6, 5 }
  0xf6   : > { %4026 = vmatprep.subr.bf16.mxu0 %v4234_v47 }
  0xf7   : > { %2347 = vmatmul.mubr.bf16.gmra.mrb[60].mxu0 %v4852_v22  ;;  %2250 = vmatmul.mubr.bf16.gmra.mrb[60].mxu1 %v5145_v63  ;;  %v972_v12 = vsel %vm4759_vm5, %v970_v30, %v971_v24  ;;  %v5990_v24 = vld [vmem:[#allocation17_spill] sm:$0xff] }
  0xf8   : > { %2354 = vmatprep.mubr.bf16.mxu0 %v5050_v48  ;;  %2257 = vmatprep.mubr.bf16.mxu1 %v4682_v56  ;;  %v5186_v61 = vcombine.low %v969_v31, %v972_v12  ;;  %v1099_v31 = vor.u32 %v1098_v58, %v1094_v21  ;;  %v1102_v12 = vshll.u32 %v266_v6, 16 }
  0xf9   : > { %4027 = vmatpush3.bf16.msra.mxu0 %v4234_v47  ;;  %v264_v47 = vld [vmem:[%s4588_s11 + $0xc0] sm:$0xf] }
  0xfa   : > { %4028 = vmatprep.subr.bf16.mxu0 %v4235_v43  ;;  %v5188_v0 = vcombine.low %v264_v47, %v265_v52  ;;  %v1086_v50 = vshll.u32 %v264_v47, 16  ;;  %v3297_v30 = vrot.slane %v264_v47, 9  ;;  %v1104_v27 = vrot.slane %v1102_v12, 5 }
  0xfc   : > { %v1088_v28 = vrot.slane %v1086_v50, 5 }
  0xfd   : > { %4029 = vmatpush3.bf16.msra.mxu0 %v4235_v43  ;;  %v977_v43 = vrot.slane %v975_v59, 4 }
  0xff   : > { %2355 = vmatmul.mubr.bf16.gmra.mrb[64].mxu0 %v4883_v55  ;;  %2258 = vmatmul.mubr.bf16.gmra.mrb[64].mxu1 %v5158_v34  ;;  %v979_v33 = vsel %vm4759_vm5, %v977_v43, %v978_v16  ;;  %v1100_v43 = vrot.slane %v1099_v31, 4 }
 0x100   : > { %2362 = vmatprep.mubr.bf16.mxu0 %v5073_v51  ;;  %2265 = vmatprep.mubr.bf16.mxu1 %v4717_v49  ;;  %v5200_v42 = vcombine.low %v976_v11, %v979_v33 }
 0x101   : > { %v1105_v46 = vsel %vm4626_vm2, %v1100_v43, %v1104_v27 }
 0x107   : > { %2363 = vmatmul.mubr.bf16.gmra.mrb[68].mxu0 %v4909_v54  ;;  %2266 = vmatmul.mubr.bf16.gmra.mrb[68].mxu1 %v5171_v3 }
 0x108   : > { %2370 = vmatprep.mubr.bf16.mxu0 %v5092_v45  ;;  %2273 = vmatprep.mubr.bf16.mxu1 %v4811_v32 }
 0x10f   : > { %2371 = vmatmul.mubr.bf16.gmra.mrb[72].mxu0 %v4946_v26  ;;  %2274 = vmatmul.mubr.bf16.gmra.mrb[72].mxu1 %v5186_v61 }
 0x110   : > { %2378 = vmatprep.mubr.bf16.mxu0 %v5105_v2  ;;  %2281 = vmatprep.mubr.bf16.mxu1 %v5188_v0 }
 0x117   : > { %2379 = vmatmul.mubr.bf16.gmra.mrb[76].mxu0 %v4986_v62  ;;  %2282 = vmatmul.mubr.bf16.gmra.mrb[76].mxu1 %v5200_v42 }
 0x118   : > { %2386 = vmatprep.mubr.bf16.mxu0 %v5119_v8  ;;  %2483 = vmatprep.mubr.bf16.mxu1 %v4733_v4  ;;  %v5988_v4 = vld [vmem:[#allocation21_spill] sm:$0xff] }
 0x11f   : > { %2387 = vmatmul.mubr.bf16.gmra.mrb[80].mxu0 %v5026_v20  ;;  %2484 = vmatmul.mubr.bf16.vlgmr.msra.gmra.mrb[80].mxu1 %v4713_v40  ;;  %v5987_v40 = vld [vmem:[#allocation15_spill] sm:$0xff] }
 0x120   : > { %2394 = vmatprep.mubr.bf16.mxu0 %v5132_v53  ;;  %2491 = vmatprep.mubr.bf16.mxu1 %v4779_v19  ;;  %v5989_v19 = vld [vmem:[#allocation16_spill] sm:$0xff] }
 0x127   : > { %2395 = vmatmul.mubr.bf16.gmra.mrb[84].mxu0 %v5053_v5  ;;  %2492 = vmatmul.mubr.bf16.gmra.mrb[84].mxu1 %v5985_v17 }
 0x128   : > { %2402 = vmatprep.mubr.bf16.mxu0 %v5145_v63  ;;  %2499 = vmatprep.mubr.bf16.mxu1 %v4852_v22  ;;  %v1083_v22 = vshrl.u32 %v264_v47, 16 }
 0x12a   : > { %v1085_v18 = vrot.slane %v1083_v22, 4 }
 0x12f   : > { %2403 = vmatmul.mubr.bf16.gmra.mrb[88].mxu0 %v5075_v41  ;;  %2500 = vmatmul.mubr.bf16.gmra.mrb[88].mxu1 %v5986_v35 }
 0x130   : > { %2410 = vmatprep.mubr.bf16.mxu0 %v5158_v34  ;;  %2507 = vmatprep.mubr.bf16.mxu1 %v4883_v55  ;;  %v1129_v55 = vrot.slane %v265_v52, 5 }
 0x137   : > { %2411 = vmatmul.mubr.bf16.gmra.mrb[92].mxu0 %v5987_v40  ;;  %2508 = vmatmul.mubr.bf16.gmra.mrb[92].mxu1 %v5988_v4  ;;  %v5991_v4 = vld [vmem:[#allocation19_spill] sm:$0xff] }
 0x138   : > { %2418 = vmatprep.mubr.bf16.mxu0 %v5171_v3  ;;  %2515 = vmatprep.mubr.bf16.mxu1 %v4909_v54  ;;  %v1131_v54 = vrot.slane %v1129_v55, 4 }
 0x13a   : > { %v1133_v9 = vsel %vm4759_vm5, %v1131_v54, %v1132_v29 }
 0x13f   : > { %2419 = vmatmul.mubr.bf16.gmra.mrb[96].mxu0 %v5989_v19  ;;  %2516 = vmatmul.mubr.bf16.gmra.mrb[96].mxu1 %v4919_v13  ;;  %v1089_v13 = vor.u32 %v1088_v28, %v1085_v18 }
 0x140   : > { %2426 = vmatprep.mubr.bf16.mxu0 %v5186_v61  ;;  %2523 = vmatprep.mubr.bf16.mxu1 %v4946_v26  ;;  %v1130_v26 = vsel %vm4759_vm5, %v3297_v30, %v1129_v55 }
 0x141   : > { %v5235_v39 = vcombine.low %v1130_v26, %v1133_v9 }
 0x147   : > { %2427 = vmatmul.mubr.bf16.gmra.mrb[100].mxu0 %v5990_v24  ;;  %2524 = vmatmul.mubr.bf16.gmra.mrb[100].mxu1 %v4979_v25  ;;  %v1090_v25 = vrot.slane %v1089_v13, 4 }
 0x148   : > { %2434 = vmatprep.mubr.bf16.mxu0 %v5200_v42  ;;  %2531 = vmatprep.mubr.bf16.mxu1 %v4986_v62 }
 0x149   : > { %v1095_v14 = vsel %vm4626_vm2, %v1090_v25, %v1094_v21 }
 0x14a   : > { %v5253_v55 = vcombine.low %v1095_v14, %v1105_v46 }
 0x14f   : > { %v3558_v59 = vpop.f32.mrb[0].mxu0  ;;  %v3630_v47 = vpop.f32.mrb[0].mxu1  ;;  %2435 = vmatmul.mubr.bf16.gmra.mrb[104].mxu0 %v5991_v4  ;;  %2532 = vmatmul.mubr.bf16.gmra.mrb[104].mxu1 %v5017_v37 }
 0x150   : > { %v3559_v52 = vpop.f32.mrb[1].mxu0  ;;  %v3631_v15 = vpop.f32.mrb[1].mxu1  ;;  %2442 = vmatprep.mubr.bf16.mxu0 %v5235_v39  ;;  %2539 = vmatprep.mubr.bf16.mxu1 %v5026_v20 }
 0x151   : > { %v5237_v16 = vadd.f32 %v3559_v52, %v3558_v59  ;;  %v5239_v11 = vadd.f32 %v3631_v15, %v3630_v47  ;;  %v3561_v62 = vpop.f32.mrb[2].mxu0  ;;  %v3633_v33 = vpop.f32.mrb[2].mxu1 }
 0x152   : > { %v3562_v17 = vpop.f32.mrb[3].mxu0  ;;  %v3634_v35 = vpop.f32.mrb[3].mxu1 }
 0x153   : > { %v5242_v22 = vadd.f32 %v3562_v17, %v3561_v62  ;;  %v5244_v50 = vadd.f32 %v3634_v35, %v3633_v33 }
 0x157   : > { %v3564_v6 = vpop.f32.mrb[4].mxu0  ;;  %v3636_v28 = vpop.f32.mrb[4].mxu1  ;;  %2443 = vmatmul.mubr.bf16.gmra.mrb[108].mxu0 %v5253_v55  ;;  %2540 = vmatmul.mubr.bf16.gmra.mrb[108].mxu1 %v5048_v60 }
 0x158   : > { %v3565_v18 = vpop.f32.mrb[5].mxu0  ;;  %v3637_v54 = vpop.f32.mrb[5].mxu1  ;;  %4030 = vmatprep.mubr.bf16.mxu0 %v4928_v57  ;;  %2547 = vmatprep.mubr.bf16.mxu1 %v5053_v5 }
 0x159   : > { %v5255_v58 = vadd.f32 %v3565_v18, %v3564_v6  ;;  %v3567_v30 = vpop.f32.mrb[6].mxu0  ;;  %v5258_v29 = vadd.f32 %v3637_v54, %v3636_v28  ;;  %v3639_v21 = vpop.f32.mrb[6].mxu1 }
 0x15a   : > { %v3568_v37 = vpop.f32.mrb[7].mxu0  ;;  %v3640_v20 = vpop.f32.mrb[7].mxu1 }
 0x15b   : > { %v5260_v13 = vadd.f32 %v3568_v37, %v3567_v30  ;;  %v5264_v31 = vadd.f32 %v3640_v20, %v3639_v21  ;;  %v5300_v20 = vld [vmem:[%s4588_s11 + $0xcc] sm:$0xf] }
 0x15f   : > { %v3570_v12 = vpop.f32.mrb[8].mxu0  ;;  %4031 = vmatmul.mubr.bf16.vlgmr.msra.gmra.mrb[112].mxu0 %v4984_v7  ;;  %2548 = vmatmul.mubr.bf16.gmra.mrb[112].mxu1 %v5071_v1 }
 0x160   : > { %v3571_v26 = vpop.f32.mrb[9].mxu0  ;;  %4034 = vmatprep.mubr.bf16.mxu0 %v5020_v36  ;;  %2555 = vmatprep.mubr.bf16.mxu1 %v5075_v41 }
 0x161   : > { %v5269_v9 = vadd.f32 %v3571_v26, %v3570_v12  ;;  %v3573_v59 = vpop.f32.mrb[10].mxu0  ;;  %v3642_v47 = vpop.f32.mrb[8].mxu1  ;;  %v1177_v26 = vshrl.u32 %v5300_v20, 16 }
 0x162   : > { %v3574_v60 = vpop.f32.mrb[11].mxu0  ;;  %v3643_v57 = vpop.f32.mrb[9].mxu1 }
 0x163   : > { %v5273_v52 = vadd.f32 %v3574_v60, %v3573_v59  ;;  %v5275_v15 = vadd.f32 %v3643_v57, %v3642_v47  ;;  %v3645_v5 = vpop.f32.mrb[10].mxu1 }
 0x164   : > { %v3646_v25 = vpop.f32.mrb[11].mxu1 }
 0x165   : > { %v5277_v7 = vadd.f32 %v3646_v25, %v3645_v5 }
 0x167   : > { %4035 = vmatmul.mubr.bf16.gmra.mrb[116].mxu0 %v5050_v48  ;;  %2556 = vmatmul.mubr.bf16.gmra.mrb[116].mxu1 %v5090_v23 }
 0x168   : > { %v3576_v1 = vpop.f32.mrb[12].mxu0  ;;  %4038 = vmatprep.mubr.bf16.mxu0 %v5073_v51  ;;  %2563 = vmatprep.mubr.bf16.mxu1 %v5987_v40 }
 0x169   : > { %v3577_v43 = vpop.f32.mrb[13].mxu0 }
 0x16a   : > { %v5282_v36 = vadd.f32 %v3577_v43, %v3576_v1  ;;  %v3579_v41 = vpop.f32.mrb[14].mxu0  ;;  %v3648_v62 = vpop.f32.mrb[12].mxu1 }
 0x16b   : > { %v3580_v27 = vpop.f32.mrb[15].mxu0  ;;  %v3649_v17 = vpop.f32.mrb[13].mxu1 }
 0x16c   : > { %v5285_v33 = vadd.f32 %v3580_v27, %v3579_v41  ;;  %v5287_v35 = vadd.f32 %v3649_v17, %v3648_v62  ;;  %v3651_v14 = vpop.f32.mrb[14].mxu1 }
 0x16d   : > { %v3652_v48 = vpop.f32.mrb[15].mxu1 }
 0x16e   : > { %v5289_v46 = vadd.f32 %v3652_v48, %v3651_v14 }
 0x16f   : > { %4039 = vmatmul.mubr.bf16.gmra.mrb[120].mxu0 %v5092_v45  ;;  %2564 = vmatmul.mubr.bf16.gmra.mrb[120].mxu1 %v4661_v10 }
 0x170   : > { %4042 = vmatprep.mubr.bf16.mxu0 %v5105_v2  ;;  %2571 = vmatprep.mubr.bf16.mxu1 %v5989_v19  ;;  %v5307_v19 = vld [vmem:[%s4588_s11 + $0xd0] sm:$0xf] }
 0x171   : > { %v1186_v47 = vshll.u32 %v5307_v19, 16 }
 0x172   : > { %v3582_v51 = vpop.f32.mrb[16].mxu0  ;;  %v3670_v23 = vpop.f32.mrb[16].mxu1 }
 0x173   : > { %v3583_v40 = vpop.f32.mrb[17].mxu0  ;;  %v3671_v18 = vpop.f32.mrb[17].mxu1  ;;  %v1188_v62 = vrot.slane %v1186_v47, 5 }
 0x174   : > { %v5295_v6 = vadd.f32 %v3583_v40, %v3582_v51  ;;  %v3585_v28 = vpop.f32.mrb[18].mxu0  ;;  %v3672_v30 = vadd.f32 %v3671_v18, %v3670_v23  ;;  %v3673_v54 = vpop.f32.mrb[18].mxu1  ;;  %v269_v51 = vld [vmem:[%s4588_s11 + $0xd4] sm:$0x1] }
 0x175   : > { %v3586_v37 = vpop.f32.mrb[19].mxu0  ;;  %v3674_v45 = vpop.f32.mrb[19].mxu1 }
 0x176   : > { %v5297_v21 = vadd.f32 %v3586_v37, %v3585_v28  ;;  %v5303_v10 = vadd.f32 %v3672_v30, %v5237_v16  ;;  %v3675_v2 = vadd.f32 %v3674_v45, %v3673_v54  ;;  %v1180_v16 = vshll.u32 %v5300_v20, 16 }
 0x177   : > { %4043 = vmatmul.mubr.bf16.gmra.mrb[124].mxu0 %v5119_v8  ;;  %2572 = vmatmul.mubr.bf16.gmra.mrb[124].mxu1 %v4682_v56  ;;  %v1190_v8 = vshrl.u32 %v5307_v19, 16  ;;  %v1196_v30 = vshll.u32 %v269_v51, 16 }
 0x178   : > { %4046 = vmatprep.mubr.bf16.mxu0 %v5132_v53  ;;  %v5312_v12 = vadd.f32 %v3675_v2, %v5242_v22  ;;  %2579 = vmatprep.mubr.bf16.mxu1 %v5990_v24  ;;  %v1179_v24 = vrot.slane %v1177_v26, 4  ;;  %v1182_v27 = vrot.slane %v1180_v16, 5 }
 0x179   : > { %v1192_v17 = vrot.slane %v1190_v8, 4  ;;  %v1198_v47 = vrot.slane %v1196_v30, 5 }
 0x17a   : > { %v3588_v59 = vpop.f32.mrb[20].mxu0  ;;  %v3676_v60 = vpop.f32.mrb[20].mxu1  ;;  %v1183_v18 = vor.u32 %v1182_v27, %v1179_v24 }
 0x17b   : > { %v3589_v57 = vpop.f32.mrb[21].mxu0  ;;  %v3677_v53 = vpop.f32.mrb[21].mxu1  ;;  %v1193_v28 = vor.u32 %v1192_v17, %v1188_v62 }
 0x17c   : > { %v5319_v56 = vadd.f32 %v3589_v57, %v3588_v59  ;;  %v3591_v5 = vpop.f32.mrb[22].mxu0  ;;  %v3678_v22 = vadd.f32 %v3677_v53, %v3676_v60  ;;  %v3679_v25 = vpop.f32.mrb[22].mxu1  ;;  %v1223_v60 = vrot.slane %v5307_v19, 5 }
 0x17d   : > { %v3592_v1 = vpop.f32.mrb[23].mxu0  ;;  %v3680_v41 = vpop.f32.mrb[23].mxu1  ;;  %v1194_v16 = vrot.slane %v1193_v28, 4 }
 0x17e   : > { %v5321_v43 = vadd.f32 %v3592_v1, %v3591_v5  ;;  %v5324_v14 = vadd.f32 %v3678_v22, %v5255_v58  ;;  %v3681_v48 = vadd.f32 %v3680_v41, %v3679_v25  ;;  %v3301_v1 = vrot.slane %v5300_v20, 9 }
 0x17f   : > { %4047 = vmatmul.mubr.bf16.gmra.mrb[128].mxu0 %v5145_v63  ;;  %2580 = vmatmul.mubr.bf16.gmra.mrb[128].mxu1 %v4717_v49  ;;  %v1225_v24 = vrot.slane %v1223_v60, 4 }
 0x180   : > { %4050 = vmatprep.mubr.bf16.mxu0 %v5158_v34  ;;  %v5331_v23 = vadd.f32 %v3681_v48, %v5260_v13  ;;  %2587 = vmatprep.mubr.bf16.mxu1 %v5991_v4  ;;  %v1184_v13 = vrot.slane %v1183_v18, 4 }
 0x182   : > { %v3594_v40 = vpop.f32.mrb[24].mxu0  ;;  %v3682_v54 = vpop.f32.mrb[24].mxu1  ;;  %v1189_v5 = vsel %vm4626_vm2, %v1184_v13, %v1188_v62 }
 0x183   : > { %v3595_v58 = vpop.f32.mrb[25].mxu0  ;;  %v3683_v45 = vpop.f32.mrb[25].mxu1 }
 0x184   : > { %v5334_v37 = vadd.f32 %v3595_v58, %v3594_v40  ;;  %v3597_v63 = vpop.f32.mrb[26].mxu0  ;;  %v3684_v2 = vadd.f32 %v3683_v45, %v3682_v54  ;;  %v3685_v26 = vpop.f32.mrb[26].mxu1 }
 0x185   : > { %v3598_v49 = vpop.f32.mrb[27].mxu0  ;;  %v3686_v34 = vpop.f32.mrb[27].mxu1 }
 0x186   : > { %v5336_v59 = vadd.f32 %v3598_v49, %v3597_v63  ;;  %v5339_v4 = vadd.f32 %v3684_v2, %v5269_v9  ;;  %v3687_v8 = vadd.f32 %v3686_v34, %v3685_v26  ;;  %v1199_v9 = vsel %vm4626_vm2, %v1194_v16, %v1198_v47 }
 0x187   : > { %4051 = vmatmul.mubr.bf16.gmra.mrb[132].mxu0 %v5171_v3  ;;  %2588 = vmatmul.mubr.bf16.gmra.mrb[132].mxu1 %v4811_v32  ;;  %v3300_v17 = vcombine.low %v1189_v5, %v1199_v9 }
 0x188   : > { %4054 = vmatprep.mubr.bf16.mxu0 %v5186_v61  ;;  %v5346_v57 = vadd.f32 %v3687_v8, %v5273_v52  ;;  %2595 = vmatprep.mubr.bf16.mxu1 %v5253_v55  ;;  %v1226_v52 = vrot.slane %v269_v51, 5  ;;  %v1224_v51 = vsel %vm4759_vm5, %v3301_v1, %v1223_v60 }
 0x18a   : > { %v3600_v53 = vpop.f32.mrb[28].mxu0  ;;  %v3688_v22 = vpop.f32.mrb[28].mxu1  ;;  %v1227_v18 = vsel %vm4759_vm5, %v1225_v24, %v1226_v52 }
 0x18b   : > { %v3601_v3 = vpop.f32.mrb[29].mxu0  ;;  %v3689_v32 = vpop.f32.mrb[29].mxu1  ;;  %v3302_v58 = vcombine.low %v1224_v51, %v1227_v18 }
 0x18c   : > { %v5353_v25 = vadd.f32 %v3601_v3, %v3600_v53  ;;  %v3603_v61 = vpop.f32.mrb[30].mxu0  ;;  %v3690_v41 = vadd.f32 %v3689_v32, %v3688_v22  ;;  %v3691_v27 = vpop.f32.mrb[30].mxu1 }
 0x18d   : > { %v3604_v55 = vpop.f32.mrb[31].mxu0  ;;  %v3692_v62 = vpop.f32.mrb[31].mxu1 }
 0x18e   : > { %v5356_v48 = vadd.f32 %v3604_v55, %v3603_v61  ;;  %v5359_v38 = vadd.f32 %v3690_v41, %v5282_v36  ;;  %v3693_v40 = vadd.f32 %v3692_v62, %v3691_v27 }
 0x18f   : > { %4055 = vmatmul.mubr.bf16.gmra.mrb[136].mxu0 %v5200_v42  ;;  %2596 = vmatmul.mubr.bf16.gmra.mrb[136].mxu1 %v5188_v0 }
 0x190   : > { %4058 = vmatprep.mubr.bf16.mxu0 %v5235_v39  ;;  %v5369_v28 = vadd.f32 %v3693_v40, %v5285_v33  ;;  %2603 = vmatprep.mubr.bf16.mxu1 %v3300_v17  ;;  %v3299_v39 = vcombine.low %v5300_v20, %v5307_v19 }
 0x192   : > { %v3606_v30 = vpop.f32.mrb[32].mxu0  ;;  %v3694_v36 = vpop.f32.mrb[32].mxu1 }
 0x193   : > { %v3607_v54 = vpop.f32.mrb[33].mxu0  ;;  %v3695_v42 = vpop.f32.mrb[33].mxu1 }
 0x194   : > { %v5371_v45 = vadd.f32 %v3607_v54, %v3606_v30  ;;  %v3609_v0 = vpop.f32.mrb[34].mxu0  ;;  %v3696_v63 = vadd.f32 %v3695_v42, %v3694_v36  ;;  %v3697_v2 = vpop.f32.mrb[34].mxu1 }
 0x195   : > { %v3610_v26 = vpop.f32.mrb[35].mxu0  ;;  %v3698_v49 = vpop.f32.mrb[35].mxu1 }
 0x196   : > { %v5375_v44 = vadd.f32 %v3610_v26, %v3609_v0  ;;  %v5378_v33 = vadd.f32 %v3696_v63, %v5295_v6  ;;  %v3699_v34 = vadd.f32 %v3698_v49, %v3697_v2 }
 0x197   : > { %4059 = vmatmul.mubr.bf16.gmra.mrb[140].mxu0 %v3302_v58  ;;  %2604 = vmatmul.mubr.bf16.gmra.mrb[140].mxu1 %v3299_v39 }
 0x198   : > { %v5381_v13 = vadd.f32 %v3699_v34, %v5297_v21 }
 0x19a   : > { %v3612_v16 = vpop.f32.mrb[36].mxu0  ;;  %v3700_v47 = vpop.f32.mrb[36].mxu1 }
 0x19b   : > { %v3613_v8 = vpop.f32.mrb[37].mxu0  ;;  %v3701_v20 = vpop.f32.mrb[37].mxu1 }
 0x19c   : > { %v5383_v60 = vadd.f32 %v3613_v8, %v3612_v16  ;;  %v3615_v19 = vpop.f32.mrb[38].mxu0  ;;  %v3702_v53 = vadd.f32 %v3701_v20, %v3700_v47  ;;  %v3703_v5 = vpop.f32.mrb[38].mxu1 }
 0x19d   : > { %v3616_v9 = vpop.f32.mrb[39].mxu0  ;;  %v3704_v6 = vpop.f32.mrb[39].mxu1 }
 0x19e   : > { %v5385_v22 = vadd.f32 %v3616_v9, %v3615_v19  ;;  %v5388_v3 = vadd.f32 %v3702_v53, %v5319_v56  ;;  %v3705_v32 = vadd.f32 %v3704_v6, %v3703_v5 }
 0x1a0   : > { %v5391_v21 = vadd.f32 %v3705_v32, %v5321_v43 }
 0x1a2   : > { %v3618_v61 = vpop.f32.mrb[40].mxu0  ;;  %v3706_v1 = vpop.f32.mrb[40].mxu1 }
 0x1a3   : > { %v3619_v24 = vpop.f32.mrb[41].mxu0  ;;  %v3707_v41 = vpop.f32.mrb[41].mxu1 }
 0x1a4   : > { %v5393_v52 = vadd.f32 %v3619_v24, %v3618_v61  ;;  %v3621_v27 = vpop.f32.mrb[42].mxu0  ;;  %v3708_v55 = vadd.f32 %v3707_v41, %v3706_v1  ;;  %v3709_v17 = vpop.f32.mrb[42].mxu1 }
 0x1a5   : > { %v3622_v62 = vpop.f32.mrb[43].mxu0  ;;  %v3710_v51 = vpop.f32.mrb[43].mxu1 }
 0x1a6   : > { %v5395_v40 = vadd.f32 %v3622_v62, %v3621_v27  ;;  %v5398_v56 = vadd.f32 %v3708_v55, %v5334_v37  ;;  %v3711_v18 = vadd.f32 %v3710_v51, %v3709_v17 }
 0x1a8   : > { %v5401_v43 = vadd.f32 %v3711_v18, %v5336_v59 }
 0x1aa   : > { %v3624_v30 = vpop.f32.mrb[44].mxu0  ;;  %v3712_v36 = vpop.f32.mrb[44].mxu1 }
 0x1ab   : > { %v3625_v54 = vpop.f32.mrb[45].mxu0  ;;  %v3713_v42 = vpop.f32.mrb[45].mxu1 }
 0x1ac   : > { %v5403_v58 = vadd.f32 %v3625_v54, %v3624_v30  ;;  %v3627_v0 = vpop.f32.mrb[46].mxu0  ;;  %v3714_v39 = vadd.f32 %v3713_v42, %v3712_v36  ;;  %v3715_v63 = vpop.f32.mrb[46].mxu1 }
 0x1ad   : > { %v3628_v2 = vpop.f32.mrb[47].mxu0  ;;  %v3716_v49 = vpop.f32.mrb[47].mxu1 }
 0x1ae   : > { %v5405_v26 = vadd.f32 %v3628_v2, %v3627_v0  ;;  %v5408_v37 = vadd.f32 %v3714_v39, %v5353_v25  ;;  %v3717_v34 = vadd.f32 %v3716_v49, %v3715_v63 }
 0x1b0   : > { %v5411_v59 = vadd.f32 %v3717_v34, %v5356_v48 }
 0x1b2   : > { %v3782_v16 = vpop.f32.mrb[48].mxu0  ;;  %v3718_v47 = vpop.f32.mrb[48].mxu1 }
 0x1b3   : > { %v3783_v8 = vpop.f32.mrb[49].mxu0  ;;  %v3719_v20 = vpop.f32.mrb[49].mxu1 }
 0x1b4   : > { %v3784_v19 = vadd.f32 %v3783_v8, %v3782_v16  ;;  %v3785_v53 = vpop.f32.mrb[50].mxu0  ;;  %v3720_v5 = vadd.f32 %v3719_v20, %v3718_v47  ;;  %v3721_v9 = vpop.f32.mrb[50].mxu1 }
 0x1b5   : > { %v3786_v6 = vpop.f32.mrb[51].mxu0  ;;  %v3722_v61 = vpop.f32.mrb[51].mxu1 }
 0x1b6   : > { %v5414_v32 = vadd.f32 %v3784_v19, %v5303_v10  ;;  %v3787_v1 = vadd.f32 %v3786_v6, %v3785_v53  ;;  %v5417_v25 = vadd.f32 %v3720_v5, %v5371_v45  ;;  %v3723_v24 = vadd.f32 %v3722_v61, %v3721_v9 }
 0x1b8   : > { %v5420_v48 = vadd.f32 %v3787_v1, %v5312_v12  ;;  %v5423_v41 = vadd.f32 %v3723_v24, %v5375_v44 }
 0x1ba   : > { %v3788_v27 = vpop.f32.mrb[52].mxu0  ;;  %v3724_v55 = vpop.f32.mrb[52].mxu1 }
 0x1bb   : > { %v3789_v17 = vpop.f32.mrb[53].mxu0  ;;  %v3725_v62 = vpop.f32.mrb[53].mxu1 }
 0x1bc   : > { %v3790_v51 = vadd.f32 %v3789_v17, %v3788_v27  ;;  %v3791_v18 = vpop.f32.mrb[54].mxu0  ;;  %v3726_v10 = vadd.f32 %v3725_v62, %v3724_v55  ;;  %v3727_v30 = vpop.f32.mrb[54].mxu1 }
 0x1bd   : > { %v3792_v36 = vpop.f32.mrb[55].mxu0  ;;  %v3728_v45 = vpop.f32.mrb[55].mxu1 }
 0x1be   : > { %v5426_v54 = vadd.f32 %v3790_v51, %v5324_v14  ;;  %v3793_v42 = vadd.f32 %v3792_v36, %v3791_v18  ;;  %v5429_v12 = vadd.f32 %v3726_v10, %v5383_v60  ;;  %v3729_v0 = vadd.f32 %v3728_v45, %v3727_v30 }
 0x1c0   : > { %v5432_v44 = vadd.f32 %v3793_v42, %v5331_v23  ;;  %v5435_v39 = vadd.f32 %v3729_v0, %v5385_v22 }
 0x1c2   : > { %v3794_v63 = vpop.f32.mrb[56].mxu0  ;;  %v3730_v2 = vpop.f32.mrb[56].mxu1 }
 0x1c3   : > { %v3795_v49 = vpop.f32.mrb[57].mxu0  ;;  %v3731_v34 = vpop.f32.mrb[57].mxu1 }
 0x1c4   : > { %v3796_v16 = vadd.f32 %v3795_v49, %v3794_v63  ;;  %v3797_v47 = vpop.f32.mrb[58].mxu0  ;;  %v3732_v14 = vadd.f32 %v3731_v34, %v3730_v2  ;;  %v3733_v8 = vpop.f32.mrb[58].mxu1 }
 0x1c5   : > { %v3798_v20 = vpop.f32.mrb[59].mxu0  ;;  %v3734_v60 = vpop.f32.mrb[59].mxu1 }
 0x1c6   : > { %v5438_v19 = vadd.f32 %v3796_v16, %v5339_v4  ;;  %v3799_v53 = vadd.f32 %v3798_v20, %v3797_v47  ;;  %v5441_v23 = vadd.f32 %v3732_v14, %v5393_v52  ;;  %v3735_v5 = vadd.f32 %v3734_v60, %v3733_v8 }
 0x1c8   : > { %v5444_v22 = vadd.f32 %v3799_v53, %v5346_v57  ;;  %v5447_v9 = vadd.f32 %v3735_v5, %v5395_v40 }
 0x1ca   : > { %v3800_v6 = vpop.f32.mrb[60].mxu0  ;;  %v3736_v61 = vpop.f32.mrb[60].mxu1 }
 0x1cb   : > { %v3801_v1 = vpop.f32.mrb[61].mxu0  ;;  %v3737_v24 = vpop.f32.mrb[61].mxu1 }
 0x1cc   : > { %v3802_v27 = vadd.f32 %v3801_v1, %v3800_v6  ;;  %v3803_v55 = vpop.f32.mrb[62].mxu0  ;;  %v3738_v4 = vadd.f32 %v3737_v24, %v3736_v61  ;;  %v3739_v17 = vpop.f32.mrb[62].mxu1 }
 0x1cd   : > { %v3804_v62 = vpop.f32.mrb[63].mxu0  ;;  %v3740_v52 = vpop.f32.mrb[63].mxu1 }
 0x1ce   : > { %v5450_v51 = vadd.f32 %v3802_v27, %v5359_v38  ;;  %v3805_v18 = vadd.f32 %v3804_v62, %v3803_v55  ;;  %v5453_v57 = vadd.f32 %v3738_v4, %v5403_v58  ;;  %v3741_v10 = vadd.f32 %v3740_v52, %v3739_v17 }
 0x1d0   : > { %v5456_v40 = vadd.f32 %v3805_v18, %v5369_v28  ;;  %v5459_v30 = vadd.f32 %v3741_v10, %v5405_v26 }
 0x1d2   : > { %v3806_v36 = vpop.f32.mrb[64].mxu0  ;;  %v3742_v45 = vpop.f32.mrb[64].mxu1 }
 0x1d3   : > { %v3807_v42 = vpop.f32.mrb[65].mxu0  ;;  %v3743_v0 = vpop.f32.mrb[65].mxu1 }
 0x1d4   : > { %v3808_v63 = vadd.f32 %v3807_v42, %v3806_v36  ;;  %v3809_v2 = vpop.f32.mrb[66].mxu0  ;;  %v3744_v38 = vadd.f32 %v3743_v0, %v3742_v45  ;;  %v3745_v49 = vpop.f32.mrb[66].mxu1 }
 0x1d5   : > { %v3810_v34 = vpop.f32.mrb[67].mxu0  ;;  %v3746_v58 = vpop.f32.mrb[67].mxu1 }
 0x1d6   : > { %v5462_v16 = vadd.f32 %v3808_v63, %v5378_v33  ;;  %v3811_v47 = vadd.f32 %v3810_v34, %v3809_v2  ;;  %v5465_v28 = vadd.f32 %v3744_v38, %v5239_v11  ;;  %v3747_v14 = vadd.f32 %v3746_v58, %v3745_v49 }
 0x1d8   : > { %v5468_v26 = vadd.f32 %v3811_v47, %v5381_v13  ;;  %v5471_v8 = vadd.f32 %v3747_v14, %v5244_v50 }
 0x1da   : > { %v3812_v20 = vpop.f32.mrb[68].mxu0  ;;  %v3748_v60 = vpop.f32.mrb[68].mxu1 }
 0x1db   : > { %v3813_v53 = vpop.f32.mrb[69].mxu0  ;;  %v3749_v5 = vpop.f32.mrb[69].mxu1 }
 0x1dc   : > { %v3814_v6 = vadd.f32 %v3813_v53, %v3812_v20  ;;  %v3815_v61 = vpop.f32.mrb[70].mxu0  ;;  %v3750_v33 = vadd.f32 %v3749_v5, %v3748_v60  ;;  %v3751_v1 = vpop.f32.mrb[70].mxu1 }
 0x1dd   : > { %v3816_v24 = vpop.f32.mrb[71].mxu0  ;;  %v3752_v11 = vpop.f32.mrb[71].mxu1 }
 0x1de   : > { %v5474_v27 = vadd.f32 %v3814_v6, %v5388_v3  ;;  %v3817_v55 = vadd.f32 %v3816_v24, %v3815_v61  ;;  %v5477_v13 = vadd.f32 %v3750_v33, %v5258_v29  ;;  %v3753_v4 = vadd.f32 %v3752_v11, %v3751_v1 }
 0x1e0   : > { %v5480_v50 = vadd.f32 %v3817_v55, %v5391_v21  ;;  %v5483_v17 = vadd.f32 %v3753_v4, %v5264_v31 }
 0x1e2   : > { %v3818_v62 = vpop.f32.mrb[72].mxu0  ;;  %v3754_v52 = vpop.f32.mrb[72].mxu1 }
 0x1e3   : > { %v3819_v18 = vpop.f32.mrb[73].mxu0  ;;  %v3755_v10 = vpop.f32.mrb[73].mxu1 }
 0x1e4   : > { %v3820_v36 = vadd.f32 %v3819_v18, %v3818_v62  ;;  %v3821_v45 = vpop.f32.mrb[74].mxu0  ;;  %v3756_v3 = vadd.f32 %v3755_v10, %v3754_v52  ;;  %v3757_v42 = vpop.f32.mrb[74].mxu1 }
 0x1e5   : > { %v3822_v0 = vpop.f32.mrb[75].mxu0  ;;  %v3758_v29 = vpop.f32.mrb[75].mxu1 }
 0x1e6   : > { %v5486_v63 = vadd.f32 %v3820_v36, %v5398_v56  ;;  %v3823_v2 = vadd.f32 %v3822_v0, %v3821_v45  ;;  %v5489_v21 = vadd.f32 %v3756_v3, %v5275_v15  ;;  %v3759_v38 = vadd.f32 %v3758_v29, %v3757_v42 }
 0x1e8   : > { %v5492_v31 = vadd.f32 %v3823_v2, %v5401_v43  ;;  %v5495_v49 = vadd.f32 %v3759_v38, %v5277_v7 }
 0x1ea   : > { %v3824_v34 = vpop.f32.mrb[76].mxu0  ;;  %v3760_v58 = vpop.f32.mrb[76].mxu1 }
 0x1eb   : > { %v3825_v47 = vpop.f32.mrb[77].mxu0  ;;  %v3761_v14 = vpop.f32.mrb[77].mxu1 }
 0x1ec   : > { %v3826_v20 = vadd.f32 %v3825_v47, %v3824_v34  ;;  %v3827_v60 = vpop.f32.mrb[78].mxu0  ;;  %v3762_v56 = vadd.f32 %v3761_v14, %v3760_v58  ;;  %v3763_v53 = vpop.f32.mrb[78].mxu1 }
 0x1ed   : > { %v3828_v5 = vpop.f32.mrb[79].mxu0  ;;  %v3764_v15 = vpop.f32.mrb[79].mxu1 }
 0x1ee   : > { %v5498_v6 = vadd.f32 %v3826_v20, %v5408_v37  ;;  %v3829_v61 = vadd.f32 %v3828_v5, %v3827_v60  ;;  %v5501_v43 = vadd.f32 %v3762_v56, %v5287_v35  ;;  %v3765_v33 = vadd.f32 %v3764_v15, %v3763_v53 }
 0x1f0   : > { %v5504_v7 = vadd.f32 %v3829_v61, %v5411_v59  ;;  %v5507_v1 = vadd.f32 %v3765_v33, %v5289_v46 }
 0x1f2   : > { %v3830_v24 = vpop.f32.mrb[80].mxu0  ;;  %v3894_v11 = vpop.f32.mrb[80].mxu1 }
 0x1f3   : > { %v3831_v55 = vpop.f32.mrb[81].mxu0  ;;  %v3895_v62 = vpop.f32.mrb[81].mxu1 }
 0x1f4   : > { %v3832_v4 = vadd.f32 %v3831_v55, %v3830_v24  ;;  %v3833_v52 = vpop.f32.mrb[82].mxu0  ;;  %v3896_v37 = vadd.f32 %v3895_v62, %v3894_v11  ;;  %v3897_v18 = vpop.f32.mrb[82].mxu1 }
 0x1f5   : > { %v3834_v10 = vpop.f32.mrb[83].mxu0  ;;  %v3898_v45 = vpop.f32.mrb[83].mxu1 }
 0x1f6   : > { %v5510_v36 = vadd.f32 %v3832_v4, %v5417_v25  ;;  %v3835_v35 = vadd.f32 %v3834_v10, %v3833_v52  ;;  %v3899_v3 = vadd.f32 %v3898_v45, %v3897_v18  ;;  %v5513_v59 = vadd.f32 %v3896_v37, %v5414_v32 }
 0x1f8   : > { %v5516_v46 = vadd.f32 %v3835_v35, %v5423_v41  ;;  %v5519_v42 = vadd.f32 %v3899_v3, %v5420_v48 }
 0x1fa   : > { %v3836_v0 = vpop.f32.mrb[84].mxu0  ;;  %v3900_v29 = vpop.f32.mrb[84].mxu1 }
 0x1fb   : > { %v3837_v2 = vpop.f32.mrb[85].mxu0  ;;  %v3901_v34 = vpop.f32.mrb[85].mxu1 }
 0x1fc   : > { %v3838_v38 = vadd.f32 %v3837_v2, %v3836_v0  ;;  %v3839_v58 = vpop.f32.mrb[86].mxu0  ;;  %v3902_v25 = vadd.f32 %v3901_v34, %v3900_v29  ;;  %v3903_v47 = vpop.f32.mrb[86].mxu1 }
 0x1fd   : > { %v3840_v14 = vpop.f32.mrb[87].mxu0  ;;  %v3904_v60 = vpop.f32.mrb[87].mxu1 }
 0x1fe   : > { %v5522_v20 = vadd.f32 %v3838_v38, %v5429_v12  ;;  %v3841_v32 = vadd.f32 %v3840_v14, %v3839_v58  ;;  %v3905_v56 = vadd.f32 %v3904_v60, %v3903_v47  ;;  %v5525_v41 = vadd.f32 %v3902_v25, %v5426_v54 }
 0x200   : > { %v5528_v48 = vadd.f32 %v3841_v32, %v5435_v39  ;;  %v5531_v53 = vadd.f32 %v3905_v56, %v5432_v44 }
 0x202   : > { %v3842_v5 = vpop.f32.mrb[88].mxu0  ;;  %v3906_v15 = vpop.f32.mrb[88].mxu1 }
 0x203   : > { %v3843_v61 = vpop.f32.mrb[89].mxu0  ;;  %v3907_v24 = vpop.f32.mrb[89].mxu1 }
 0x204   : > { %v3844_v33 = vadd.f32 %v3843_v61, %v3842_v5  ;;  %v3845_v11 = vpop.f32.mrb[90].mxu0  ;;  %v3908_v12 = vadd.f32 %v3907_v24, %v3906_v15  ;;  %v3909_v55 = vpop.f32.mrb[90].mxu1 }
 0x205   : > { %v3846_v4 = vpop.f32.mrb[91].mxu0  ;;  %v3910_v52 = vpop.f32.mrb[91].mxu1 }
 0x206   : > { %v5534_v62 = vadd.f32 %v3844_v33, %v5441_v23  ;;  %v3847_v54 = vadd.f32 %v3846_v4, %v3845_v11  ;;  %v3911_v37 = vadd.f32 %v3910_v52, %v3909_v55  ;;  %v5537_v39 = vadd.f32 %v3908_v12, %v5438_v19 }
 0x208   : > { %v5540_v44 = vadd.f32 %v3847_v54, %v5447_v9  ;;  %v5543_v18 = vadd.f32 %v3911_v37, %v5444_v22 }
 0x20a   : > { %v3848_v10 = vpop.f32.mrb[92].mxu0  ;;  %v3912_v35 = vpop.f32.mrb[92].mxu1 }
 0x20b   : > { %v3849_v45 = vpop.f32.mrb[93].mxu0  ;;  %v3913_v0 = vpop.f32.mrb[93].mxu1 }
 0x20c   : > { %v3850_v3 = vadd.f32 %v3849_v45, %v3848_v10  ;;  %v3851_v29 = vpop.f32.mrb[94].mxu0  ;;  %v3914_v23 = vadd.f32 %v3913_v0, %v3912_v35  ;;  %v3915_v2 = vpop.f32.mrb[94].mxu1 }
 0x20d   : > { %v3852_v38 = vpop.f32.mrb[95].mxu0  ;;  %v3916_v58 = vpop.f32.mrb[95].mxu1 }
 0x20e   : > { %v5546_v34 = vadd.f32 %v3850_v3, %v5453_v57  ;;  %v3853_v19 = vadd.f32 %v3852_v38, %v3851_v29  ;;  %v3917_v25 = vadd.f32 %v3916_v58, %v3915_v2  ;;  %v5549_v9 = vadd.f32 %v3914_v23, %v5450_v51 }
 0x210   : > { %v5552_v22 = vadd.f32 %v3853_v19, %v5459_v30  ;;  %v5555_v47 = vadd.f32 %v3917_v25, %v5456_v40 }
 0x212   : > { %v3854_v14 = vpop.f32.mrb[96].mxu0  ;;  %v3918_v32 = vpop.f32.mrb[96].mxu1 }
 0x213   : > { %v3855_v60 = vpop.f32.mrb[97].mxu0  ;;  %v3919_v5 = vpop.f32.mrb[97].mxu1 }
 0x214   : > { %v3856_v56 = vadd.f32 %v3855_v60, %v3854_v14  ;;  %v3857_v15 = vpop.f32.mrb[98].mxu0  ;;  %v3920_v57 = vadd.f32 %v3919_v5, %v3918_v32  ;;  %v3921_v61 = vpop.f32.mrb[98].mxu1 }
 0x215   : > { %v3858_v33 = vpop.f32.mrb[99].mxu0  ;;  %v3922_v11 = vpop.f32.mrb[99].mxu1 }
 0x216   : > { %v5558_v24 = vadd.f32 %v3856_v56, %v5465_v28  ;;  %v3859_v51 = vadd.f32 %v3858_v33, %v3857_v15  ;;  %v3923_v12 = vadd.f32 %v3922_v11, %v3921_v61  ;;  %v5561_v30 = vadd.f32 %v3920_v57, %v5462_v16 }
 0x218   : > { %v5564_v40 = vadd.f32 %v3859_v51, %v5471_v8  ;;  %v5567_v55 = vadd.f32 %v3923_v12, %v5468_v26 }
 0x21a   : > { %v3860_v4 = vpop.f32.mrb[100].mxu0  ;;  %v3924_v54 = vpop.f32.mrb[100].mxu1 }
 0x21b   : > { %v3861_v52 = vpop.f32.mrb[101].mxu0  ;;  %v3925_v10 = vpop.f32.mrb[101].mxu1 }
 0x21c   : > { %v3862_v37 = vadd.f32 %v3861_v52, %v3860_v4  ;;  %v3863_v35 = vpop.f32.mrb[102].mxu0  ;;  %v3926_v28 = vadd.f32 %v3925_v10, %v3924_v54  ;;  %v3927_v45 = vpop.f32.mrb[102].mxu1 }
 0x21d   : > { %v3864_v3 = vpop.f32.mrb[103].mxu0  ;;  %v3928_v29 = vpop.f32.mrb[103].mxu1 }
 0x21e   : > { %v5570_v0 = vadd.f32 %v3862_v37, %v5477_v13  ;;  %v3865_v16 = vadd.f32 %v3864_v3, %v3863_v35  ;;  %v3929_v23 = vadd.f32 %v3928_v29, %v3927_v45  ;;  %v5573_v8 = vadd.f32 %v3926_v28, %v5474_v27 }
 0x220   : > { %v5576_v26 = vadd.f32 %v3865_v16, %v5483_v17  ;;  %v5579_v2 = vadd.f32 %v3929_v23, %v5480_v50 }
 0x222   : > { %v3866_v38 = vpop.f32.mrb[104].mxu0  ;;  %v3930_v19 = vpop.f32.mrb[104].mxu1 }
 0x223   : > { %v3867_v58 = vpop.f32.mrb[105].mxu0  ;;  %v3931_v14 = vpop.f32.mrb[105].mxu1 }
 0x224   : > { %v3868_v25 = vadd.f32 %v3867_v58, %v3866_v38  ;;  %v3869_v32 = vpop.f32.mrb[106].mxu0  ;;  %v3932_v13 = vadd.f32 %v3931_v14, %v3930_v19  ;;  %v3933_v60 = vpop.f32.mrb[106].mxu1 }
 0x225   : > { %v3870_v56 = vpop.f32.mrb[107].mxu0  ;;  %v3934_v15 = vpop.f32.mrb[107].mxu1 }
 0x226   : > { %v5582_v5 = vadd.f32 %v3868_v25, %v5489_v21  ;;  %v3871_v27 = vadd.f32 %v3870_v56, %v3869_v32  ;;  %v3935_v57 = vadd.f32 %v3934_v15, %v3933_v60  ;;  %v5585_v17 = vadd.f32 %v3932_v13, %v5486_v63 }
 0x228   : > { %v5588_v50 = vadd.f32 %v3871_v27, %v5495_v49  ;;  %v5591_v61 = vadd.f32 %v3935_v57, %v5492_v31 }
 0x22a   : > { %v3872_v33 = vpop.f32.mrb[108].mxu0  ;;  %v3936_v51 = vpop.f32.mrb[108].mxu1 }
 0x22b   : > { %v3873_v11 = vpop.f32.mrb[109].mxu0  ;;  %v3937_v4 = vpop.f32.mrb[109].mxu1 }
 0x22c   : > { %v3874_v12 = vadd.f32 %v3873_v11, %v3872_v33  ;;  %v3875_v21 = vpop.f32.mrb[110].mxu0  ;;  %v3938_v54 = vadd.f32 %v3937_v4, %v3936_v51  ;;  %v3939_v52 = vpop.f32.mrb[110].mxu1 }
 0x22d   : > { %v3876_v37 = vpop.f32.mrb[111].mxu0  ;;  %v3940_v35 = vpop.f32.mrb[111].mxu1 }
 0x22e   : > { %v5594_v10 = vadd.f32 %v3874_v12, %v5501_v43  ;;  %v3877_v63 = vadd.f32 %v3876_v37, %v3875_v21  ;;  %v3941_v49 = vadd.f32 %v3940_v35, %v3939_v52  ;;  %v5597_v28 = vadd.f32 %v3938_v54, %v5498_v6 }
 0x230   : > { %v5600_v31 = vadd.f32 %v3877_v63, %v5507_v1  ;;  %v5603_v45 = vadd.f32 %v3941_v49, %v5504_v7 }
 0x232   : > { %v4032_v3 = vpop.f32.mrb[112].mxu0  ;;  %v3942_v16 = vpop.f32.mrb[112].mxu1 }
 0x233   : > { %v5606_v29 = vadd.f32 %v4032_v3, %v5525_v41  ;;  %v2646_v23 = vpop.f32.mrb[113].mxu0  ;;  %v3943_v43 = vpop.f32.mrb[113].mxu1 }
 0x234   : > { %v5610_v38 = vadd.f32 %v2646_v23, %v5513_v59  ;;  %v4033_v19 = vpop.f32.mrb[114].mxu0  ;;  %v3944_v6 = vadd.f32 %v3943_v43, %v3942_v16  ;;  %v3945_v58 = vpop.f32.mrb[114].mxu1 }
 0x235   : > { %v5613_v1 = vadd.f32 %v4033_v19, %v5531_v53  ;;  %v2649_v25 = vpop.f32.mrb[115].mxu0  ;;  %v3946_v7 = vpop.f32.mrb[115].mxu1 }
 0x236   : > { %v5616_v14 = vadd.f32 %v2649_v25, %v5519_v42  ;;  %v3947_v32 = vadd.f32 %v3946_v7, %v3945_v58  ;;  %v5621_v13 = vadd.f32 %v3944_v6, %v5510_v36 }
 0x237   : > { %v3455_v41 = vpack.c.bf16 %v5613_v1, %v5606_v29 }
 0x238   : > { %v3450_v59 = vpack.c.bf16 %v5616_v14, %v5610_v38  ;;  %v2933_v60 = vadd.f32 %v5616_v14, %v5610_v38  ;;  %v5631_v42 = vadd.f32 %v3947_v32, %v5516_v46 }
 0x239   : > { %3527 = vst [vmem:[%s5627_s20 + $0x8] sm:$0xff] %v3455_v41  }
 0x23a   : > { %3451 = vst [vmem:[%s5627_s20] sm:$0xff] %v3450_v59   ;;  %v2934_v53 = vadd.f32 %v2933_v60, %v5606_v29  ;;  %v4036_v56 = vpop.f32.mrb[116].mxu0  ;;  %v3948_v36 = vpop.f32.mrb[116].mxu1 }
 0x23b   : > { %v5636_v27 = vadd.f32 %v4036_v56, %v5549_v9  ;;  %v2662_v15 = vpop.f32.mrb[117].mxu0  ;;  %v3949_v57 = vpop.f32.mrb[117].mxu1 }
 0x23c   : > { %v5639_v33 = vadd.f32 %v2662_v15, %v5537_v39  ;;  %v2935_v51 = vadd.f32 %v2934_v53, %v5613_v1  ;;  %v4037_v11 = vpop.f32.mrb[118].mxu0  ;;  %v3950_v46 = vadd.f32 %v3949_v57, %v3948_v36  ;;  %v3951_v12 = vpop.f32.mrb[118].mxu1 }
 0x23d   : > { %v5643_v4 = vadd.f32 %v4037_v11, %v5555_v47  ;;  %v2665_v21 = vpop.f32.mrb[119].mxu0  ;;  %v3952_v9 = vpop.f32.mrb[119].mxu1 }
 0x23e   : > { %v2936_v54 = vadd.f32 %v2935_v51, %v5639_v33  ;;  %v5647_v52 = vadd.f32 %v2665_v21, %v5543_v18  ;;  %v3953_v37 = vadd.f32 %v3952_v9, %v3951_v12  ;;  %v2558_v63 = vadd.f32 %v3950_v46, %v5522_v20 }
 0x23f   : > { %v3465_v39 = vpack.c.bf16 %v5643_v4, %v5636_v27 }
 0x240   : > { %v3460_v35 = vpack.c.bf16 %v5647_v52, %v5639_v33  ;;  %v2937_v49 = vadd.f32 %v2936_v54, %v5647_v52  ;;  %v2561_v47 = vadd.f32 %v3953_v37, %v5528_v48 }
 0x241   : > { %3529 = vst [vmem:[%s5627_s20 + $0x18] sm:$0xff] %v3465_v39  }
 0x242   : > { %3528 = vst [vmem:[%s5627_s20 + $0x10] sm:$0xff] %v3460_v35   ;;  %v2938_v3 = vadd.f32 %v2937_v49, %v5636_v27  ;;  %v4040_v16 = vpop.f32.mrb[120].mxu0  ;;  %v3954_v18 = vpop.f32.mrb[120].mxu1 }
 0x243   : > { %v5660_v23 = vadd.f32 %v4040_v16, %v5573_v8  ;;  %v2678_v43 = vpop.f32.mrb[121].mxu0  ;;  %v3955_v19 = vpop.f32.mrb[121].mxu1 }
 0x244   : > { %v5663_v20 = vadd.f32 %v2678_v43, %v5561_v30  ;;  %v2939_v6 = vadd.f32 %v2938_v3, %v5643_v4  ;;  %v4041_v58 = vpop.f32.mrb[122].mxu0  ;;  %v3956_v25 = vadd.f32 %v3955_v19, %v3954_v18  ;;  %v3957_v48 = vpop.f32.mrb[122].mxu1 }
 0x245   : > { %v5667_v7 = vadd.f32 %v4041_v58, %v5579_v2  ;;  %v2681_v41 = vpop.f32.mrb[123].mxu0  ;;  %v3958_v8 = vpop.f32.mrb[123].mxu1 }
 0x246   : > { %v2940_v32 = vadd.f32 %v2939_v6, %v5663_v20  ;;  %v5671_v59 = vadd.f32 %v2681_v41, %v5567_v55  ;;  %v3959_v60 = vadd.f32 %v3958_v8, %v3957_v48  ;;  %v2566_v53 = vadd.f32 %v3956_v25, %v5534_v62 }
 0x247   : > { %v3475_v30 = vpack.c.bf16 %v5667_v7, %v5660_v23 }
 0x248   : > { %v3470_v56 = vpack.c.bf16 %v5671_v59, %v5663_v20  ;;  %v2941_v36 = vadd.f32 %v2940_v32, %v5671_v59  ;;  %v5681_v2 = vadd.f32 %v3959_v60, %v5540_v44 }
 0x249   : > { %3531 = vst [vmem:[%s5627_s20 + $0x28] sm:$0xff] %v3475_v30  }
 0x24a   : > { %3530 = vst [vmem:[%s5627_s20 + $0x20] sm:$0xff] %v3470_v56   ;;  %v2942_v15 = vadd.f32 %v2941_v36, %v5660_v23  ;;  %v4044_v55 = vpop.f32.mrb[124].mxu0  ;;  %v3960_v57 = vpop.f32.mrb[124].mxu1 }
 0x24b   : > { %v5686_v51 = vadd.f32 %v4044_v55, %v5597_v28  ;;  %v2694_v11 = vpop.f32.mrb[125].mxu0  ;;  %v3961_v46 = vpop.f32.mrb[125].mxu1 }
 0x24c   : > { %v5689_v62 = vadd.f32 %v2694_v11, %v5585_v17  ;;  %v2943_v12 = vadd.f32 %v2942_v15, %v5667_v7  ;;  %v4045_v21 = vpop.f32.mrb[126].mxu0  ;;  %v3962_v44 = vadd.f32 %v3961_v46, %v3960_v57  ;;  %v3963_v54 = vpop.f32.mrb[126].mxu1 }
 0x24d   : > { %v5693_v9 = vadd.f32 %v4045_v21, %v5603_v45  ;;  %v2697_v39 = vpop.f32.mrb[127].mxu0  ;;  %v3964_v28 = vpop.f32.mrb[127].mxu1 }
 0x24e   : > { %v2944_v37 = vadd.f32 %v2943_v12, %v5689_v62  ;;  %v5697_v35 = vadd.f32 %v2697_v39, %v5591_v61  ;;  %v3965_v49 = vadd.f32 %v3964_v28, %v3963_v54  ;;  %v2574_v3 = vadd.f32 %v3962_v44, %v5546_v34 }
 0x24f   : > { %v3485_v17 = vpack.c.bf16 %v5693_v9, %v5686_v51 }
 0x250   : > { %v3480_v16 = vpack.c.bf16 %v5697_v35, %v5689_v62  ;;  %v2945_v18 = vadd.f32 %v2944_v37, %v5697_v35  ;;  %v2577_v45 = vadd.f32 %v3965_v49, %v5552_v22 }
 0x251   : > { %3533 = vst [vmem:[%s5627_s20 + $0x38] sm:$0xff] %v3485_v17  }
 0x252   : > { %3532 = vst [vmem:[%s5627_s20 + $0x30] sm:$0xff] %v3480_v16   ;;  %v2946_v43 = vadd.f32 %v2945_v18, %v5686_v51  ;;  %v4048_v19 = vpop.f32.mrb[128].mxu0  ;;  %v3966_v61 = vpop.f32.mrb[128].mxu1 }
 0x253   : > { %v5709_v6 = vadd.f32 %v4048_v19, %v2558_v63  ;;  %v2710_v58 = vpop.f32.mrb[129].mxu0  ;;  %v3967_v25 = vpop.f32.mrb[129].mxu1 }
 0x254   : > { %v5712_v34 = vadd.f32 %v2710_v58, %v5621_v13  ;;  %v2947_v48 = vadd.f32 %v2946_v43, %v5693_v9  ;;  %v4049_v41 = vpop.f32.mrb[130].mxu0  ;;  %v3968_v32 = vadd.f32 %v3967_v25, %v3966_v61  ;;  %v3969_v8 = vpop.f32.mrb[130].mxu1 }
 0x255   : > { %v5715_v22 = vadd.f32 %v4049_v41, %v2561_v47  ;;  %v2713_v30 = vpop.f32.mrb[131].mxu0  ;;  %v3970_v56 = vpop.f32.mrb[131].mxu1 }
 0x256   : > { %v2948_v60 = vadd.f32 %v2947_v48, %v5712_v34  ;;  %v5719_v63 = vadd.f32 %v2713_v30, %v5631_v42  ;;  %v3971_v13 = vadd.f32 %v3970_v56, %v3969_v8  ;;  %v2582_v15 = vadd.f32 %v3968_v32, %v5558_v24 }
 0x257   : > { %v3495_v36 = vpack.c.bf16 %v5715_v22, %v5709_v6 }
 0x258   : > { %v3490_v55 = vpack.c.bf16 %v5719_v63, %v5712_v34  ;;  %v2949_v57 = vadd.f32 %v2948_v60, %v5719_v63  ;;  %v2585_v47 = vadd.f32 %v3971_v13, %v5564_v40 }
 0x259   : > { %3535 = vst [vmem:[%s5627_s20 + $0x48] sm:$0xff] %v3495_v36  }
 0x25a   : > { %3534 = vst [vmem:[%s5627_s20 + $0x40] sm:$0xff] %v3490_v55   ;;  %v2950_v11 = vadd.f32 %v2949_v57, %v5709_v6  ;;  %v4052_v46 = vpop.f32.mrb[132].mxu0  ;;  %v3972_v42 = vpop.f32.mrb[132].mxu1 }
 0x25b   : > { %v5731_v12 = vadd.f32 %v4052_v46, %v2574_v3  ;;  %v2726_v21 = vpop.f32.mrb[133].mxu0  ;;  %v3973_v44 = vpop.f32.mrb[133].mxu1 }
 0x25c   : > { %v5733_v54 = vadd.f32 %v2726_v21, %v2566_v53  ;;  %v2951_v24 = vadd.f32 %v2950_v11, %v5715_v22  ;;  %v4053_v39 = vpop.f32.mrb[134].mxu0  ;;  %v3974_v37 = vadd.f32 %v3973_v44, %v3972_v42  ;;  %v3975_v28 = vpop.f32.mrb[134].mxu1 }
 0x25d   : > { %v5736_v17 = vadd.f32 %v4053_v39, %v2577_v45  ;;  %v2729_v40 = vpop.f32.mrb[135].mxu0  ;;  %v3976_v16 = vpop.f32.mrb[135].mxu1 }
 0x25e   : > { %v2952_v49 = vadd.f32 %v2951_v24, %v5733_v54  ;;  %v5740_v3 = vadd.f32 %v2729_v40, %v5681_v2  ;;  %v3977_v53 = vadd.f32 %v3976_v16, %v3975_v28  ;;  %v2590_v43 = vadd.f32 %v3974_v37, %v5570_v0 }
 0x25f   : > { %v3505_v18 = vpack.c.bf16 %v5736_v17, %v5731_v12 }
 0x260   : > { %v3500_v19 = vpack.c.bf16 %v5740_v3, %v5733_v54  ;;  %v2953_v61 = vadd.f32 %v2952_v49, %v5740_v3  ;;  %v2593_v45 = vadd.f32 %v3977_v53, %v5576_v26 }
 0x261   : > { %3537 = vst [vmem:[%s5627_s20 + $0x58] sm:$0xff] %v3505_v18  }
 0x262   : > { %3536 = vst [vmem:[%s5627_s20 + $0x50] sm:$0xff] %v3500_v19   ;;  %v2954_v58 = vadd.f32 %v2953_v61, %v5731_v12  ;;  %v4056_v25 = vpop.f32.mrb[136].mxu0  ;;  %v3978_v2 = vpop.f32.mrb[136].mxu1 }
 0x263   : > { %v5752_v48 = vadd.f32 %v4056_v25, %v2590_v43  ;;  %v2742_v41 = vpop.f32.mrb[137].mxu0  ;;  %v3979_v32 = vpop.f32.mrb[137].mxu1 }
 0x264   : > { %v5754_v8 = vadd.f32 %v2742_v41, %v2582_v15  ;;  %v2955_v0 = vadd.f32 %v2954_v58, %v5736_v17  ;;  %v4057_v30 = vpop.f32.mrb[138].mxu0  ;;  %v3980_v60 = vadd.f32 %v3979_v32, %v3978_v2  ;;  %v3981_v56 = vpop.f32.mrb[138].mxu1 }
 0x265   : > { %v5757_v36 = vadd.f32 %v4057_v30, %v2593_v45  ;;  %v2745_v26 = vpop.f32.mrb[139].mxu0  ;;  %v3982_v55 = vpop.f32.mrb[139].mxu1 }
 0x266   : > { %v2956_v13 = vadd.f32 %v2955_v0, %v5754_v8  ;;  %v5760_v57 = vadd.f32 %v2745_v26, %v2585_v47  ;;  %v3983_v46 = vadd.f32 %v3982_v55, %v3981_v56  ;;  %v2598_v15 = vadd.f32 %v3980_v60, %v5582_v5 }
 0x267   : > { %v3515_v11 = vpack.c.bf16 %v5757_v36, %v5752_v48 }
 0x268   : > { %v3510_v42 = vpack.c.bf16 %v5760_v57, %v5754_v8  ;;  %v2957_v21 = vadd.f32 %v2956_v13, %v5760_v57  ;;  %v2601_v44 = vadd.f32 %v3983_v46, %v5588_v50 }
 0x269   : > { %3539 = vst [vmem:[%s5627_s20 + $0x68] sm:$0xff] %v3515_v11  }
 0x26a   : > { %3538 = vst [vmem:[%s5627_s20 + $0x60] sm:$0xff] %v3510_v42   ;;  %v2958_v24 = vadd.f32 %v2957_v21, %v5752_v48  ;;  %v4060_v39 = vpop.f32.mrb[140].mxu0  ;;  %v3984_v47 = vpop.f32.mrb[140].mxu1 }
 0x26b   : > { %v2758_v37 = vpop.f32.mrb[141].mxu0  ;;  %v3985_v28 = vpop.f32.mrb[141].mxu1 }
 0x26c   : > { %v5772_v40 = vadd.f32 %v2758_v37, %v2598_v15  ;;  %v2959_v5 = vadd.f32 %v2958_v24, %v5757_v36  ;;  %v4061_v49 = vpop.f32.mrb[142].mxu0  ;;  %v3986_v16 = vadd.f32 %v3985_v28, %v3984_v47  ;;  %v3987_v18 = vpop.f32.mrb[142].mxu1 }
 0x26d   : > { %v2761_v53 = vpop.f32.mrb[143].mxu0  ;;  %v3988_v43 = vpop.f32.mrb[143].mxu1 }
 0x26e   : > { %v2960_v50 = vadd.f32 %v2959_v5, %v5772_v40  ;;  %v5776_v19 = vadd.f32 %v2761_v53, %v2601_v44  ;;  %v2606_v61 = vadd.f32 %v3986_v16, %v5594_v10  ;;  %v3989_v45 = vadd.f32 %v3988_v43, %v3987_v18 }
 0x270   : > { %v3520_v58 = vpack.c.bf16 %v5776_v19, %v5772_v40  ;;  %v2961_v25 = vadd.f32 %v2960_v50, %v5776_v19  ;;  %v5782_v2 = vadd.f32 %v4060_v39, %v2606_v61  ;;  %v2609_v41 = vadd.f32 %v3989_v45, %v5600_v31 }
 0x272   : > { %3540 = vst [vmem:[%s5627_s20 + $0x70] sm:$0xff] %v3520_v58   ;;  %v5788_v32 = vadd.f32 %v4061_v49, %v2609_v41  ;;  %v2962_v0 = vadd.f32 %v2961_v25, %v5782_v2 }
 0x274   : > { %v3525_v10 = vpack.c.bf16 %v5788_v32, %v5782_v2  ;;  %v2963_v31 = vadd.f32 %v2962_v0, %v5788_v32 }
 0x276   : > { %3541 = vst [vmem:[%s5627_s20 + $0x78] sm:$0xff] %v3525_v10   ;;  %v2964_v30 = vrot.slane %v2963_v31, 4 }
 0x277   : > { %4320 = shalt.err (!%p4317_p7)
}
 0x278   : > { %s4321_s26 = scalar_lea.hbm %s5794_s4, 2048  ;;  %s4325_s10 = scalar_lea.hbm %s5947_s2, 4096 }
 0x279   : > { %p4322_p9 = scmp.ne.s32.totalorder %s5794_s4, %s4321_s26  ;;  %p4326_p5 = scmp.lt.u32.totalorder %s5794_s4, %s5947_s2 }
 0x27a   : > { %p4327_p13 = scmp.lt.u32.totalorder %s4325_s10, %s4321_s26  ;;  %p4329_p4 = scmp.lt.u32.totalorder %s4321_s26, %s5794_s4 }
 0x27b   : > { %p4323_p1 = pnand %p4322_p9, %p4533_p12 }
 0x27c   : > { %p4328_p2 = por %p4327_p13, %p4326_p5 }
 0x27d   : > { %p4324_p0 = pneg %p4323_p1 }
 0x27e   : > { %p4330_p6 = por %p4329_p4, %p4328_p2 }
 0x280   : > { %p4331_p8 = pnand %p4330_p6, %p4324_p0 }
 0x282   : > { %4334 = shalt.err (!%p4331_p8)
}
 0x283   : > { %s4416_s20 = smov 64   ;;  %s4417_s8 = smov 4   ;;  %v2965_v60 = vadd.f32 %v2964_v30, %v2963_v31  ;;  %vm3072_vm6 = vcmask 1040384  }
 0x284   : > { %4087 = dma.vmem_to_hbm [thread:$0]  (%p4533_p12), %s5796_s9, 2048, %s5794_s4, %s3076_s5, %s4416_s20, %s4416_s20, %s4417_s8  }
 0x285   : > { %v2966_v56 = vrot.slane %v2965_v60, 2  ;;  %s3230_s9 = sshll.u32 %s4584_s6, 1  ;;  %s3411_s29 = sshll.u32 %s4460_s16, 5 }
 0x286   : > { %s214_s25 = scalar_lea.vmem [#allocation9], %s3230_s9  ;;  %s5900_s22 = scalar_lea.hbm %s5948_s3, %s3411_s29 }
 0x287   : > { %v2967_v26 = vadd.f32 %v2966_v56, %v2965_v60  ;;  %s3110_s4 = sshll.u32 %s214_s25, 4  ;;  %s3081_s23 = scalar_lea.sflag [#allocation10], %s4584_s6  ;;  %s5902_s4 = int_to_ptr.vmem [resolvable:$true] %s3110_s4 }
 0x288   : > { %s4335_s28 = scalar_lea.vmem %s5902_s4, 32  ;;  %s4418_s16 = smov [#allocation9]  }
 0x289   : > { %v2968_v13 = vrot.slane %v2967_v26, 1  ;;  %p4336_p10 = scmp.ne.s32.totalorder %s5902_s4, %s4335_s28  ;;  %s4339_s26 = sshll.u32 %s4418_s16, 4  ;;  %s4340_s26 = int_to_ptr.vmem [resolvable:$false] %s4339_s26 }
 0x28a   : > { %s4341_s30 = scalar_lea.vmem %s4340_s26, 64  ;;  %p4342_p7 = scmp.lt.s32.totalorder %s5902_s4, %s4340_s26 }
 0x28b   : > { %v5826_v55 = vadd.f32 %v2968_v13, %v2967_v26  ;;  %p4337_p11 = pnand %p4336_p10, %p4533_p12  ;;  %p4343_p9 = scmp.lt.s32.totalorder %s4341_s30, %s4335_s28 }
 0x28d   : > { %v5829_v11 = vmul.f32 0.00390625, %v5826_v55  ;;  %p4338_p3 = pneg %p4337_p11  ;;  %p4344_p1 = por %p4343_p9, %p4342_p7 }
 0x28f   : > { %v2971_v46 = vsub.f32 %v5610_v38, %v5829_v11  ;;  %v2972_v15 = vsub.f32 %v5616_v14, %v5829_v11  ;;  %v2973_v42 = vsub.f32 %v5606_v29, %v5829_v11  ;;  %v2974_v24 = vsub.f32 %v5613_v1, %v5829_v11  ;;  %p4345_p0 = pnand %p4344_p1, %p4338_p3 }
 0x290   : > { %v2975_v39 = vsub.f32 %v5639_v33, %v5829_v11  ;;  %v2976_v28 = vsub.f32 %v5647_v52, %v5829_v11  ;;  %v2977_v14 = vsub.f32 %v5636_v27, %v5829_v11  ;;  %v2978_v16 = vsub.f32 %v5643_v4, %v5829_v11 }
 0x291   : > { %v3003_v21 = vmul.f32 %v2971_v46, %v2971_v46  ;;  %v3004_v44 = vmul.f32 %v2972_v15, %v2972_v15  ;;  %v3005_v47 = vmul.f32 %v2973_v42, %v2973_v42  ;;  %v3006_v38 = vmul.f32 %v2974_v24, %v2974_v24 }
 0x292   : > { %v3007_v49 = vmul.f32 %v2975_v39, %v2975_v39  ;;  %v3008_v18 = vmul.f32 %v2976_v28, %v2976_v28  ;;  %v2979_v33 = vsub.f32 %v5663_v20, %v5829_v11  ;;  %v3009_v53 = vmul.f32 %v2977_v14, %v2977_v14 }
 0x293   : > { %v3035_v37 = vadd.f32 %v3004_v44, %v3003_v21  ;;  %v2980_v52 = vsub.f32 %v5671_v59, %v5829_v11  ;;  %v3010_v43 = vmul.f32 %v2978_v16, %v2978_v16  ;;  %v2981_v27 = vsub.f32 %v5660_v23, %v5829_v11 }
 0x294   : > { %v3011_v45 = vmul.f32 %v2979_v33, %v2979_v33  ;;  %v2982_v4 = vsub.f32 %v5667_v7, %v5829_v11  ;;  %v2983_v20 = vsub.f32 %v5689_v62, %v5829_v11  ;;  %v2984_v59 = vsub.f32 %v5697_v35, %v5829_v11 }
 0x295   : > { %v3036_v5 = vadd.f32 %v3035_v37, %v3005_v47  ;;  %v3012_v25 = vmul.f32 %v2980_v52, %v2980_v52  ;;  %v3013_v0 = vmul.f32 %v2981_v27, %v2981_v27  ;;  %v2985_v23 = vsub.f32 %v5686_v51, %v5829_v11 }
 0x296   : > { %v3014_v31 = vmul.f32 %v2982_v4, %v2982_v4  ;;  %v3015_v60 = vmul.f32 %v2983_v20, %v2983_v20  ;;  %v2986_v7 = vsub.f32 %v5693_v9, %v5829_v11  ;;  %v3016_v26 = vmul.f32 %v2984_v59, %v2984_v59 }
 0x297   : > { %v3037_v29 = vadd.f32 %v3036_v5, %v3006_v38  ;;  %v2987_v62 = vsub.f32 %v5712_v34, %v5829_v11  ;;  %v3017_v46 = vmul.f32 %v2985_v23, %v2985_v23  ;;  %v2988_v35 = vsub.f32 %v5719_v63, %v5829_v11 }
 0x298   : > { %v3018_v42 = vmul.f32 %v2986_v7, %v2986_v7  ;;  %v2989_v51 = vsub.f32 %v5709_v6, %v5829_v11  ;;  %v2990_v9 = vsub.f32 %v5715_v22, %v5829_v11  ;;  %v2991_v34 = vsub.f32 %v5733_v54, %v5829_v11 }
 0x299   : > { %v3038_v1 = vadd.f32 %v3037_v29, %v3007_v49  ;;  %v3019_v44 = vmul.f32 %v2987_v62, %v2987_v62  ;;  %v3020_v39 = vmul.f32 %v2988_v35, %v2988_v35  ;;  %v2992_v63 = vsub.f32 %v5740_v3, %v5829_v11 }
 0x29a   : > { %v3021_v37 = vmul.f32 %v2989_v51, %v2989_v51  ;;  %v3022_v38 = vmul.f32 %v2990_v9, %v2990_v9  ;;  %v2993_v6 = vsub.f32 %v5731_v12, %v5829_v11  ;;  %v3023_v14 = vmul.f32 %v2991_v34, %v2991_v34 }
 0x29b   : > { %v3039_v50 = vadd.f32 %v3038_v1, %v3008_v18  ;;  %v2994_v22 = vsub.f32 %v5736_v17, %v5829_v11  ;;  %v3024_v29 = vmul.f32 %v2992_v63, %v2992_v63  ;;  %v2995_v54 = vsub.f32 %v5754_v8, %v5829_v11 }
 0x29c   : > { %v3025_v18 = vmul.f32 %v2993_v6, %v2993_v6  ;;  %v2996_v3 = vsub.f32 %v5760_v57, %v5829_v11  ;;  %v2997_v12 = vsub.f32 %v5752_v48, %v5829_v11  ;;  %v2998_v17 = vsub.f32 %v5757_v36, %v5829_v11 }
 0x29d   : > { %v3040_v61 = vadd.f32 %v3039_v50, %v3009_v53  ;;  %v3026_v33 = vmul.f32 %v2994_v22, %v2994_v22  ;;  %v3027_v50 = vmul.f32 %v2995_v54, %v2995_v54  ;;  %v2999_v8 = vsub.f32 %v5772_v40, %v5829_v11 }
 0x29e   : > { %v3029_v27 = vmul.f32 %v2997_v12, %v2997_v12  ;;  %v3000_v57 = vsub.f32 %v5776_v19, %v5829_v11  ;;  %v3001_v48 = vsub.f32 %v5782_v2, %v5829_v11  ;;  %v3002_v36 = vsub.f32 %v5788_v32, %v5829_v11 }
 0x29f   : > { %v3041_v58 = vadd.f32 %v3040_v61, %v3010_v43  ;;  %v3028_v43 = vmul.f32 %v2996_v3, %v2996_v3 }
 0x2a0   : > { %v3032_v20 = vmul.f32 %v3000_v57, %v3000_v57  ;;  %v3033_v40 = vmul.f32 %v3001_v48, %v3001_v48  ;;  %v3034_v59 = vmul.f32 %v3002_v36, %v3002_v36 }
 0x2a1   : > { %v3042_v41 = vadd.f32 %v3041_v58, %v3011_v45  ;;  %v3030_v58 = vmul.f32 %v2998_v17, %v2998_v17 }
 0x2a3   : > { %v3043_v10 = vadd.f32 %v3042_v41, %v3012_v25  ;;  %v3031_v25 = vmul.f32 %v2999_v8, %v2999_v8 }
 0x2a5   : > { %v3044_v30 = vadd.f32 %v3043_v10, %v3013_v0 }
 0x2a7   : > { %v3045_v56 = vadd.f32 %v3044_v30, %v3014_v31 }
 0x2a9   : > { %v3046_v13 = vadd.f32 %v3045_v56, %v3015_v60 }
 0x2ab   : > { %v3047_v15 = vadd.f32 %v3046_v13, %v3016_v26 }
 0x2ad   : > { %v3048_v21 = vadd.f32 %v3047_v15, %v3017_v46 }
 0x2af   : > { %v3049_v24 = vadd.f32 %v3048_v21, %v3018_v42 }
 0x2b1   : > { %v3050_v47 = vadd.f32 %v3049_v24, %v3019_v44 }
 0x2b3   : > { %v3051_v28 = vadd.f32 %v3050_v47, %v3020_v39 }
 0x2b5   : > { %v3052_v5 = vadd.f32 %v3051_v28, %v3021_v37 }
 0x2b7   : > { %v3053_v49 = vadd.f32 %v3052_v5, %v3022_v38 }
 0x2b9   : > { %v3054_v16 = vadd.f32 %v3053_v49, %v3023_v14 }
 0x2bb   : > { %v3055_v1 = vadd.f32 %v3054_v16, %v3024_v29 }
 0x2bd   : > { %v3056_v53 = vadd.f32 %v3055_v1, %v3025_v18 }
 0x2bf   : > { %v3057_v52 = vadd.f32 %v3056_v53, %v3026_v33 }
 0x2c1   : > { %v3058_v61 = vadd.f32 %v3057_v52, %v3027_v50 }
 0x2c3   : > { %v3059_v45 = vadd.f32 %v3058_v61, %v3028_v43 }
 0x2c5   : > { %v3060_v4 = vadd.f32 %v3059_v45, %v3029_v27 }
 0x2c7   : > { %v3061_v41 = vadd.f32 %v3060_v4, %v3030_v58 }
 0x2c9   : > { %v3062_v0 = vadd.f32 %v3061_v41, %v3031_v25 }
 0x2cb   : > { %v3063_v10 = vadd.f32 %v3062_v0, %v3032_v20 }
 0x2cd   : > { %v3064_v31 = vadd.f32 %v3063_v10, %v3033_v40 }
 0x2cf   : > { %v3065_v30 = vadd.f32 %v3064_v31, %v3034_v59 }
 0x2d1   : > { %v3066_v19 = vrot.slane %v3065_v30, 4 }
 0x2d3   : > { %v3067_v23 = vadd.f32 %v3066_v19, %v3065_v30 }
 0x2d5   : > { %v3068_v60 = vrot.slane %v3067_v23, 2 }
 0x2d7   : > { %v3069_v2 = vadd.f32 %v3068_v60, %v3067_v23 }
 0x2d9   : > { %v3070_v56 = vrot.slane %v3069_v2, 1 }
 0x2db   : > { %v3071_v32 = vadd.f32 %v3070_v56, %v3069_v2 }
 0x2dd   : > { %v3073_v11 = vsel %vm3072_vm6, %v5826_v55, %v3071_v32 }
 0x2de   : > { %3074 = vst [vmem:[%s214_s25] sm:$0x3] %v3073_v11 }
 0x2df   : > { %4348 = shalt.err (!%p4345_p0)
}
 0x2e0   : > { %s4349_s6 = scalar_lea.hbm %s5900_s22, 32  ;;  %s4353_s11 = scalar_lea.hbm %s5948_s3, 64 }
 0x2e1   : > { %p4350_p5 = scmp.ne.s32.totalorder %s5900_s22, %s4349_s6  ;;  %p4354_p4 = scmp.lt.u32.totalorder %s5900_s22, %s5948_s3 }
 0x2e2   : > { %p4355_p6 = scmp.lt.u32.totalorder %s4353_s11, %s4349_s6  ;;  %p4357_p10 = scmp.lt.u32.totalorder %s4349_s6, %s5900_s22 }
 0x2e3   : > { %p4351_p13 = pnand %p4350_p5, %p4533_p12 }
 0x2e4   : > { %p4356_p8 = por %p4355_p6, %p4354_p4 }
 0x2e5   : > { %p4352_p2 = pneg %p4351_p13 }
 0x2e6   : > { %p4358_p11 = por %p4357_p10, %p4356_p8 }
 0x2e8   : > { %p4359_p3 = pnand %p4358_p11, %p4352_p2 }
 0x2ea   : > { %4362 = shalt.err (!%p4359_p3)
}
 0x2eb   : > { %4088 = dma.vmem_to_hbm [thread:$0]  (%p4533_p12), %s5902_s4, 32, %s5900_s22, %s3081_s23  }
 0x2ec PF: > { %s3122_s8 = sand.u32 1, %s4397_s12   ;;  %p5992_p7 = scmp.ne.s32.totalorder %s5964_s19, 0 }
 0x2ed   : > { %p5993_p9 = scmp.ge.s32.totalorder %s4409_s15, 2  ;;  %s3123_s9 = scalar_lea.sflag [#allocation5], %s3122_s8 }
 0x2ef   : > { %p4100_p1 = pnand %p5993_p9, %p5992_p7 }
 0x2f1   : > { %4388 = dma.done.wait (!%p4100_p1), %s3123_s9, 2048  }
 0x2f2   : > { %4390 = vsyncadd (!%p4100_p1), %s3123_s9, 4294965248  ;;  %s3132_s29 = scalar_lea.sflag [#allocation10], %s3122_s8 }
 0x2f3   : > { %4392 = dma.done.wait (!%p4100_p1), %s3132_s29, 32  }
 0x2f4   : > { %4394 = vsyncadd (!%p4100_p1), %s3132_s29, 4294967264  ;;  %p21_p12 = scmp.ge.s32.totalorder %s4495_s24, 4   ;;  %s5994_s12 = smov %s4401_s13 }
 0x2f5   : > { %s5995_s13 = smov %s4405_s14  ;;  %s5996_s14 = smov %s4529_s17 }
 0x2f6   : > { %s5997_s15 = smov %s4495_s24  ;;  %23 = sbr.rel (!%p21_p12) target bundleno = 8 (0x8), region = 94 }
 0x2fd   :  { %3137 = vsyncpa [#allocation4], 1 }
 0x2fe   :  { %3139 = vsyncpa [#allocation4 + $0x1], 1 }
 0x2ff   :  { %3140 = vsyncpa [#allocation7], 1 }
 0x300   :  { %3141 = vsyncpa [#allocation5], 1 }
 0x301   :  { %3143 = vsyncpa [#allocation5 + $0x1], 1 }
 0x302   :  { %3144 = vsyncpa [#allocation10], 1 }
 0x303   :  { %3146 = vsyncpa [#allocation10 + $0x1], 1 }

// kernel: basic_block_forward.4
= control target key start
LH: loop header
LB: loop body
LE: loop exit
PB: predicated region body
PF: predicated region fallthrough
CT: control target
= control target key end

     0   :  { %11 = vsyncpa [#allocation5], 0  ;;  %s7386_s0 = inlined_call_operand.hbm [shape: bf16[2,256,128], index: 0, kind: input, shape index: {}]   ;;  %s7387_s1 = inlined_call_operand.hbm [shape: f32[1,128], index: 1, kind: input, shape index: {}]   ;;  %s7388_s2 = inlined_call_operand.hbm [shape: f32[1,128], index: 2, kind: input, shape index: {}]   ;;  %s7389_s3 = inlined_call_operand.hbm [shape: bf16[1152,128], index: 3, kind: input, shape index: {}]   ;;  %s7390_s4 = inlined_call_operand.hbm [shape: bf16[2,256,128], index: 4, kind: output, shape index: {0}]   ;;  %s7391_s5 = inlined_call_operand.hbm [shape: f32[2,2,128], index: 5, kind: output, shape index: {1}]  }
   0x1   :  { %13 = vsyncpa [#allocation5 + $0x1], 0 }
   0x2   :  { %14 = vsyncpa [#allocation8], 0 }
   0x3   :  { %15 = vsyncpa [#allocation11], 0 }
   0x4   :  { %16 = vsyncpa [#allocation6], 0 }
   0x5   :  { %18 = vsyncpa [#allocation6 + $0x1], 0 }
   0x6   :  { %19 = vsyncpa [#allocation14], 0 }
   0x7   :  { %21 = vsyncpa [#allocation14 + $0x1], 0  ;;  %s5601_s18 = smov 0   ;;  %s5603_s19 = smov 0  }
   0x8   :  { %s5605_s20 = smov 0   ;;  %s5607_s21 = smov 0  }
   0x9 LB: > { %s5622_s22 = sadd.s32 4294967295, %s5558_s21   ;;  %s4135_s23 = sadd.s32 4294967294, %s5558_s21   ;;  %s5558_s21 = sphi %s5607_s21, %s7468_s21   ;;  %s5554_s20 = sphi %s5605_s20, %s7467_s20   ;;  %s5550_s19 = sphi %s5603_s19, %s7466_s19   ;;  %s5546_s18 = sphi %s5601_s18, %s7465_s18  }
   0xa   : > { %p47_p0 = scmp.ne.s32.totalorder %s5550_s19, %s5546_s18  ;;  %p7392_p1 = scmp.eq.s32.totalorder %s5622_s22, 0 }
   0xb   : > { %p140_p3 = scmp.eq.s32.totalorder %s4135_s23, 1  ;;  %p4136_p5 = scmp.ge.s32.totalorder %s5558_s21, 1 }
   0xc   : > { %p5631_p4 = por %p7392_p1, %p47_p0  ;;  %p173_p7 = scmp.lt.s32.totalorder %s5558_s21, 3 }
   0xd   : > { %p5636_p6 = por %p140_p3, %p47_p0  ;;  %s5560_s27 = smov [#allocation7]  }
   0xe   : > { %s7413_s24 = scalar_select %p5631_p4, 1, 0 }
   0xf   : > { %s7414_s25 = scalar_select %p5636_p6, 1, 0 }
  0x10   : > { %p5641_p8 = pnand %p4136_p5, %p173_p7  ;;  %s186_s28 = sshll.u32 %s5560_s27, 4  ;;  %s187_s28 = int_to_ptr.vmem [resolvable:$true] %s186_s28 }
  0x11   : > { %s5561_s29 = smov [#allocation9]   ;;  %s5562_s7 = smov [#allocation10]  }
  0x12   : > { %s7415_s26 = scalar_select %p5641_p8, 1, 0 }
  0x13   : > { %p5162_p10 = pneg %p5641_p8  ;;  %s197_s30 = sshll.u32 %s5561_s29, 4  ;;  %s5654_s30 = int_to_ptr.vmem [resolvable:$true] %s197_s30 }
  0x14   : > { %s207_s8 = sshll.u32 %s5562_s7, 4  ;;  %s5338_s11 = scalar_lea.hbm %s7387_s1, 16  ;;  %s5656_s8 = int_to_ptr.vmem [resolvable:$true] %s207_s8 }
  0x15   : > { %p5650_p11 = pnand %p5162_p10, %p7392_p1  ;;  %p5339_p12 = scmp.ne.s32.totalorder %s7387_s1, %s5338_s11 }
  0x16   : > { %p5345_p5 = scmp.lt.u32.totalorder %s5338_s11, %s7387_s1 }
  0x17   : > { %p5666_p13 = pneg %p5650_p11 }
  0x19   : > { %p5341_p0 = pnand %p5666_p13, %p5339_p12 }
  0x1b   : > { %p5342_p3 = pneg %p5341_p0 }
  0x1d   : > { %p5347_p7 = pnand %p5345_p5, %p5342_p3 }
  0x1f   : > { %5350 = shalt.err (!%p5347_p7)
}
  0x20   : > { %s5351_s17 = scalar_lea.vmem %s187_s28, 16  ;;  %s5358_s23 = scalar_lea.vmem %s187_s28, 32 }
  0x21   : > { %p5352_p10 = scmp.ne.s32.totalorder %s187_s28, %s5351_s17  ;;  %p5359_p2 = scmp.lt.s32.totalorder %s187_s28, %s187_s28 }
  0x22   : > { %p5360_p6 = scmp.lt.s32.totalorder %s5358_s23, %s5351_s17 }
  0x23   : > { %p5354_p9 = pnand %p5352_p10, %p5666_p13 }
  0x24   : > { %p5361_p4 = por %p5360_p6, %p5359_p2 }
  0x25   : > { %p5355_p1 = pneg %p5354_p9 }
  0x27   : > { %p5362_p8 = pnand %p5361_p4, %p5355_p1 }
  0x29   : > { %5365 = shalt.err (!%p5362_p8)
}
  0x2a   : > { %5165 = dma.hbm_to_vmem [thread:$0]  (!%p5650_p11), %s7387_s1, 16, %s187_s28, [#allocation8]  }
  0x2b   : > { %s5366_s10 = scalar_lea.hbm %s7388_s2, 16 }
  0x2c   : > { %p5367_p9 = scmp.ne.s32.totalorder %s7388_s2, %s5366_s10  ;;  %p5373_p1 = scmp.lt.u32.totalorder %s5366_s10, %s7388_s2 }
  0x2e   : > { %p5369_p12 = pnand %p5367_p9, %p5666_p13 }
  0x30   : > { %p5370_p2 = pneg %p5369_p12 }
  0x32   : > { %p5375_p4 = pnand %p5373_p1, %p5370_p2 }
  0x34   : > { %5378 = shalt.err (!%p5375_p4)
}
  0x35   : > { %s5379_s28 = scalar_lea.vmem %s5654_s30, 16  ;;  %s5386_s16 = scalar_lea.vmem %s5654_s30, 32 }
  0x36   : > { %p5380_p6 = scmp.ne.s32.totalorder %s5654_s30, %s5379_s28  ;;  %p5387_p3 = scmp.lt.s32.totalorder %s5654_s30, %s5654_s30 }
  0x37   : > { %p5388_p5 = scmp.lt.s32.totalorder %s5386_s16, %s5379_s28 }
  0x38   : > { %p5382_p8 = pnand %p5380_p6, %p5666_p13 }
  0x39   : > { %p5389_p7 = por %p5388_p5, %p5387_p3 }
  0x3a   : > { %p5383_p0 = pneg %p5382_p8 }
  0x3c   : > { %p5390_p10 = pnand %p5389_p7, %p5383_p0 }
  0x3e   : > { %5393 = shalt.err (!%p5390_p10)
}
  0x3f   : > { %5168 = dma.hbm_to_vmem [thread:$0]  (!%p5650_p11), %s7388_s2, 16, %s5654_s30, [#allocation8]  }
  0x40   : > { %s5394_s7 = scalar_lea.hbm %s7389_s3, 9216 }
  0x41   : > { %p5395_p9 = scmp.ne.s32.totalorder %s7389_s3, %s5394_s7  ;;  %p5401_p1 = scmp.lt.u32.totalorder %s5394_s7, %s7389_s3 }
  0x43   : > { %p5397_p12 = pnand %p5395_p9, %p5666_p13 }
  0x45   : > { %p5398_p2 = pneg %p5397_p12 }
  0x47   : > { %p5403_p4 = pnand %p5401_p1, %p5398_p2 }
  0x49   : > { %5406 = shalt.err (!%p5403_p4)
}
  0x4a   : > { %s5407_s30 = scalar_lea.vmem %s5656_s8, 9216  ;;  %p5415_p3 = scmp.lt.s32.totalorder %s5656_s8, %s5656_s8 }
  0x4b   : > { %p5408_p6 = scmp.ne.s32.totalorder %s5656_s8, %s5407_s30  ;;  %p5416_p5 = scmp.lt.s32.totalorder %s5407_s30, %s5407_s30 }
  0x4d   : > { %p5410_p8 = pnand %p5408_p6, %p5666_p13  ;;  %p5417_p7 = por %p5416_p5, %p5415_p3 }
  0x4f   : > { %p5411_p0 = pneg %p5410_p8 }
  0x51   : > { %p5418_p10 = pnand %p5417_p7, %p5411_p0 }
  0x53   : > { %5421 = shalt.err (!%p5418_p10)
}
  0x54   : > { %s5563_s13 = smov 64   ;;  %s5564_s14 = smov 4  }
  0x55   : > { %5171 = dma.hbm_to_vmem [thread:$0]  (!%p5650_p11), %s7389_s3, 9216, %s5656_s8, [#allocation11], %s5563_s13, %s5563_s13, %s5564_s14  }
  0x56   : > { %s5733_s16 = sadd.s32 1, %s5558_s21   ;;  %s34_s23 = sadd.s32 1, %s5554_s20 }
  0x57   : > { %s31_s17 = ssub.s32 %s5558_s21, %s5733_s16  ;;  %p41_p9 = scmp.ne.s32.totalorder %s5554_s20, %s5550_s19 }
  0x58   : > { %p32_p13 = scmp.eq.s32.totalorder %s31_s17, 0  ;;  %p42_p12 = scmp.eq.s32.totalorder %s5558_s21, 0 }
  0x59   : > { %p5186_p2 = scmp.lt.s32.totalorder %s5558_s21, 2  ;;  %p7418_p4 = scmp.eq.s32.totalorder %s5622_s22, 1 }
  0x5a   : > { %s5743_s27 = scalar_select %p32_p13, %s5554_s20, %s34_s23  }
  0x5b   : > { %p43_p1 = por %p42_p12, %p41_p9  ;;  %p5747_p6 = por %p7418_p4, %p41_p9 }
  0x5c   : > { %s221_s29 = sand.u32 1, %s5554_s20   ;;  %s4368_s7 = sshll.u32 %s5558_s21, 11 }
  0x5d   : > { %s4141_s8 = sshll.u32 %s221_s29, 7  ;;  %s5756_s11 = scalar_lea.hbm %s7386_s0, %s4368_s7 }
  0x5e   : > { %s225_s12 = scalar_lea.vmem [#allocation4], %s4141_s8  ;;  %p5758_p11 = pnand %p5186_p2, %p43_p1 }
  0x5f   : > { %s232_s30 = sshll.u32 %s225_s12, 4  ;;  %s5764_s28 = scalar_lea.sflag [#allocation5], %s221_s29  ;;  %s5762_s30 = int_to_ptr.vmem [resolvable:$true] %s232_s30 }
  0x60   : > { %s5422_s17 = scalar_lea.hbm %s5756_s11, 2048  ;;  %p5424_p0 = pneg %p5758_p11 }
  0x61   : > { %p5423_p8 = scmp.ne.s32.totalorder %s5756_s11, %s5422_s17  ;;  %s5427_s8 = scalar_lea.hbm %s7386_s0, 4096 }
  0x62   : > { %p5428_p7 = scmp.lt.u32.totalorder %s5756_s11, %s7386_s0  ;;  %p5429_p10 = scmp.lt.u32.totalorder %s5427_s8, %s5422_s17 }
  0x63   : > { %p5425_p3 = pnand %p5424_p0, %p5423_p8  ;;  %p5431_p9 = scmp.lt.u32.totalorder %s5422_s17, %s5756_s11 }
  0x64   : > { %p5430_p13 = por %p5429_p10, %p5428_p7 }
  0x65   : > { %p5426_p5 = pneg %p5425_p3 }
  0x66   : > { %p5432_p12 = por %p5431_p9, %p5430_p13 }
  0x68   : > { %p5433_p2 = pnand %p5432_p12, %p5426_p5 }
  0x6a   : > { %5436 = shalt.err (!%p5433_p2)
}
  0x6b   : > { %s5437_s29 = scalar_lea.vmem %s5762_s30, 2048  ;;  %s5565_s12 = smov [#allocation4]  }
  0x6c   : > { %p5438_p1 = scmp.ne.s32.totalorder %s5762_s30, %s5437_s29  ;;  %s5442_s23 = sshll.u32 %s5565_s12, 4  ;;  %s5443_s23 = int_to_ptr.vmem [resolvable:$false] %s5442_s23 }
  0x6d   : > { %s5444_s7 = scalar_lea.vmem %s5443_s23, 4096  ;;  %p5445_p3 = scmp.lt.s32.totalorder %s5762_s30, %s5443_s23 }
  0x6e   : > { %p5440_p4 = pnand %p5438_p1, %p5424_p0  ;;  %p5446_p7 = scmp.lt.s32.totalorder %s5444_s7, %s5437_s29 }
  0x70   : > { %p5441_p8 = pneg %p5440_p4  ;;  %p5447_p10 = por %p5446_p7, %p5445_p3 }
  0x72   : > { %p5448_p13 = pnand %p5447_p10, %p5441_p8 }
  0x74   : > { %5451 = shalt.err (!%p5448_p13)
}
  0x75   : > { %5175 = dma.hbm_to_vmem [thread:$0]  (!%p5758_p11), %s5756_s11, 2048, %s5762_s30, %s5764_s28, %s5563_s13, %s5563_s13, %s5564_s14  }
  0x76   : > { %p7421_p0 = scmp.ne.s32.totalorder %s7415_s26, 0 }
  0x78   : > { %244 = sbr.rel (%p7421_p0) target bundleno = 879 (0x36f), region = 36 }
  0x7f   : > { %s5798_s17 = sand.u32 1, %s5550_s19   ;;  %p7422_p5 = scmp.ne.s32.totalorder %s7413_s24, 0 }
  0x80   : > { %s4145_s8 = sshll.u32 %s5798_s17, 7  ;;  %s247_s9 = scalar_lea.sflag [#allocation5], %s5798_s17 }
  0x81   : > { %s5804_s15 = scalar_lea.vmem [#allocation4], %s4145_s8 }
  0x82   : > { %5525 = dma.done.wait (%p7422_p5), %s247_s9, 2048  }
  0x83   : > { %5527 = vsyncadd (%p7422_p5), %s247_s9, 4294965248  ;;  %p7423_p11 = scmp.eq.s32.totalorder %s5622_s22, 0 }
  0x85   : > { %5529 = dma.done.wait (%p7423_p11), [#allocation8], 32   ;;  %p7424_p9 = pmov %p7423_p11 }
  0x87   : > { %5531 = vsyncadd (%p7424_p9), [#allocation8], 4294967264  ;;  %p7425_p12 = pmov %p7424_p9 }
  0x88   : > { %p7426_p2 = pmov %p7424_p9 }
  0x89   : > { %5533 = dma.done.wait (%p7425_p12), [#allocation11], 9216  }
  0x8a   : > { %5535 = vsyncadd (%p7426_p2), [#allocation11], 4294958080  ;;  %v5566_v0 = vmov 0   ;;  %v5231_v1 = vld [vmem:[#allocation10 + $0x40] sm:$0xff]   ;;  %v5233_v3 = vld [vmem:[#allocation10 + $0x48] sm:$0xff]   ;;  %vm1759_vm3 = vcmask 1042432  }
  0x8b   : > { %469 = vst [vmem:[#allocation2] sm:$0xf] %v5566_v0  ;;  %470 = vst [vmem:[#allocation2 + $0x4] sm:$0xf] %v5566_v0  ;;  %v5232_v2 = vld [vmem:[#allocation10] sm:$0xff]   ;;  %4608 = vmatprep.subr.bf16.mxu0 %v5231_v1  ;;  %5128 = vmatprep.subr.bf16.mxu1 %v5231_v1  ;;  %v5234_v4 = vld [vmem:[#allocation10 + $0x8] sm:$0xff]  }
  0x8c   : > { %471 = vst [vmem:[#allocation2 + $0x8] sm:$0x1] %v5566_v0  ;;  %473 = vst [vmem:[#allocation2 + $0xcc] sm:$0xf] %v5566_v0  ;;  %4609 = vmatpush3.bf16.msra.mxu0 %v5232_v2  ;;  %5136 = vmatpush3.bf16.msra.mxu1 %v5232_v2  ;;  %v5235_v5 = vld [vmem:[#allocation10 + $0x50] sm:$0xff]   ;;  %v5237_v7 = vld [vmem:[#allocation10 + $0x58] sm:$0xff]  }
  0x8d   : > { %474 = vst [vmem:[#allocation2 + $0xd0] sm:$0xf] %v5566_v0  ;;  %475 = vst [vmem:[#allocation2 + $0xd4] sm:$0x1] %v5566_v0  ;;  %4610 = vmatprep.subr.bf16.mxu0 %v5233_v3  ;;  %5129 = vmatprep.subr.bf16.mxu1 %v5233_v3  ;;  %v5236_v6 = vld [vmem:[#allocation10 + $0x10] sm:$0xff]   ;;  %v5238_v8 = vld [vmem:[#allocation10 + $0x18] sm:$0xff]  }
  0x8e   : > { %vm1276_vm0 = vsmask.f32 3328  ;;  %vm1277_vm1 = vsmask.f32 7440  ;;  %vm478_vm2 = vsmask.f32 256 }
  0x8f   : > { %v5239_v9 = vld [vmem:[#allocation10 + $0x60] sm:$0xff]   ;;  %vm528_vm4 = vsmask.f32 7938  ;;  %vm1760_vm5 = vcmask 1046532   ;;  %v5241_v11 = vld [vmem:[#allocation10 + $0x68] sm:$0xff]   ;;  %vm477_vm6 = vcmask 1040384   ;;  %vm5853_vm10 = vmor %vm1276_vm0, %vm1277_vm1 }
  0x90   : > { %4611 = vmatpush3.bf16.msra.mxu0 %v5234_v4  ;;  %5137 = vmatpush3.bf16.msra.mxu1 %v5234_v4  ;;  %v5240_v10 = vld [vmem:[#allocation10 + $0x20] sm:$0xff]   ;;  %v5242_v15 = vld [vmem:[#allocation10 + $0x28] sm:$0xff]   ;;  %vm5828_vm7 = vmor %vm1759_vm3, %vm1760_vm5  ;;  %vm674_vm11 = vsmask.f32 4368  ;;  %vm996_vm12 = vcmask 1043456   ;;  %s7055_s24 = scalar_lea.vmem [#allocation12], %s4145_s8 }
  0x91   : > { %4612 = vmatprep.subr.bf16.mxu0 %v5235_v5  ;;  %5130 = vmatprep.subr.bf16.mxu1 %v5235_v5  ;;  %v4588_v21 = vld [vmem:[%s5804_s15 + $0x58] sm:$0xff]   ;;  %v5835_v27 = vld [vmem:[#allocation7] ss:$0 sm:$0xff]  ;;  %vm5839_vm8 = vmand %vm477_vm6, %vm478_vm2  ;;  %s4433_s26 = sshll.u32 %s5622_s22, 11  ;;  %s3988_s13 = sshll.u32 %s7055_s24, 4  ;;  %s7233_s13 = int_to_ptr.vmem [resolvable:$true] %s3988_s13 }
  0x92   : > { %v5818_v12 = vld [vmem:[#allocation2] sm:$0xf]  ;;  %v5820_v13 = vld [vmem:[#allocation2 + $0x4] sm:$0xf]  ;;  %v5243_v22 = vld [vmem:[#allocation10 + $0x70] sm:$0xff]   ;;  %v4480_v37 = vunpack.c.l.bf16 %v4588_v21  ;;  %v4481_v43 = vunpack.c.h.bf16 %v4588_v21  ;;  %s7231_s30 = scalar_lea.hbm %s7390_s4, %s4433_s26  ;;  %s3970_s28 = scalar_lea.sflag [#allocation6], %s5798_s17 }
  0x93   : > { %v1112_v14 = vld [vmem:[#allocation2 + $0x8] sm:$0x1]  ;;  %v1280_v16 = vshrl.u32 %v5818_v12, 16  ;;  %v1283_v17 = vshll.u32 %v5818_v12, 16  ;;  %v1289_v18 = vshll.u32 %v5820_v13, 16  ;;  %v1293_v19 = vshrl.u32 %v5820_v13, 16  ;;  %vm5847_vm9 = vmand %vm477_vm6, %vm528_vm4 }
  0x94   : > { %4613 = vmatpush3.bf16.msra.mxu0 %v5236_v6  ;;  %5138 = vmatpush3.bf16.msra.mxu1 %v5236_v6  ;;  %v1299_v23 = vshll.u32 %v1112_v14, 16  ;;  %v4217_v24 = vrot.slane %v5818_v12, 9  ;;  %v1764_v25 = vrot.slane %v5820_v13, 5  ;;  %v1767_v26 = vrot.slane %v1112_v14, 5  ;;  %v5843_v33 = vld [vmem:[#allocation9] ss:$0 sm:$0xff]  ;;  %vm5895_vm13 = vmor %vm478_vm2, %vm674_vm11 }
  0x95   : > { %4614 = vmatprep.subr.bf16.mxu0 %v5237_v7  ;;  %5131 = vmatprep.subr.bf16.mxu1 %v5237_v7  ;;  %v1282_v29 = vrot.slane %v1280_v16, 4  ;;  %v1285_v30 = vrot.slane %v1283_v17, 5  ;;  %v1291_v31 = vrot.slane %v1289_v18, 5  ;;  %v1295_v32 = vrot.slane %v1293_v19, 4  ;;  %v513_v38 = vld [vmem:[#allocation2 + $0x90] sm:$0x1]  ;;  %vm5905_vm14 = vmand %vm996_vm12, %vm528_vm4 }
  0x96   : > { %v1301_v35 = vrot.slane %v1299_v23, 5  ;;  %v1766_v36 = vrot.slane %v1764_v25, 4  ;;  %v563_v39 = vld [vmem:[#allocation2 + $0x98] sm:$0x1]  ;;  %v514_v44 = vsel %vm5839_vm8, 0, %v513_v38  ;;  %v5244_v45 = vld [vmem:[#allocation10 + $0x30] sm:$0xff]   ;;  %v388_v47 = vmul.f32 %v4480_v37, %v5835_v27 }
  0x97   : > { %v1286_v41 = vor.u32 %v1285_v30, %v1282_v29  ;;  %v1296_v42 = vor.u32 %v1295_v32, %v1291_v31  ;;  %515 = vst [vmem:[#allocation2 + $0x90] sm:$0x1] %v514_v44  ;;  %v564_v48 = vsel %vm5847_vm9, 0, %v563_v39  ;;  %v5868_v49 = vsel %vm5828_vm7, %v4217_v24, %v1764_v25  ;;  %v5245_v54 = vld [vmem:[#allocation10 + $0x78] sm:$0xff]   ;;  %v5248_v62 = vld [vmem:[#allocation10 + $0xc0] sm:$0xff]   ;;  %s5452_s10 = scalar_lea.vmem %s7233_s13, 2048 }
  0x98   : > { %4615 = vmatpush3.bf16.msra.mxu0 %v5238_v8  ;;  %5139 = vmatpush3.bf16.msra.mxu1 %v5238_v8  ;;  %v5861_v46 = vsel %vm5828_vm7, %v1766_v36, %v1767_v26  ;;  %v389_v52 = vmul.f32 %v4481_v43, %v5835_v27  ;;  %565 = vst [vmem:[#allocation2 + $0x98] sm:$0x1] %v564_v48  ;;  %v5246_v56 = vld [vmem:[#allocation10 + $0x38] sm:$0xff]   ;;  %v480_v0 = vld [vmem:[#allocation2 + $0xc] sm:$0x1]  ;;  %v5249_v8 = vld [vmem:[#allocation10 + $0x140] sm:$0xff]   ;;  %p5453_p1 = scmp.ne.s32.totalorder %s7233_s13, %s5452_s10 }
  0x99   : > { %4616 = vmatprep.subr.bf16.mxu0 %v5239_v9  ;;  %5132 = vmatprep.subr.bf16.mxu1 %v5239_v9  ;;  %v1287_v50 = vrot.slane %v1286_v41, 4  ;;  %v1297_v51 = vrot.slane %v1296_v42, 4  ;;  %v4233_v53 = vcombine.low %v5868_v49, %v5861_v46  ;;  %v427_v55 = vadd.f32 %v5843_v33, %v388_v47  ;;  %v4435_v63 = vld [vmem:[%s5804_s15] sm:$0xff]   ;;  %v530_v1 = vld [vmem:[#allocation2 + $0x14] sm:$0x1]  ;;  %v5260_v43 = vld [vmem:[#allocation10 + $0x148] sm:$0xff]  }
  0x9a   : > { %v428_v59 = vadd.f32 %v5843_v33, %v389_v52  ;;  %v4436_v3 = vunpack.c.l.bf16 %v4435_v63  ;;  %v4437_v4 = vunpack.c.h.bf16 %v4435_v63  ;;  %v481_v5 = vsel %vm5839_vm8, 0, %v480_v0  ;;  %v566_v18 = vld [vmem:[#allocation2 + $0xa4] sm:$0x1]  ;;  %p5454_p4 = pnand %p5453_p1, %p5747_p6  ;;  %s5567_s29 = smov [#allocation12]  }
  0x9b   : > { %v1292_v57 = vsel %vm5853_vm10, %v1287_v50, %v1291_v31  ;;  %v1302_v58 = vsel %vm5853_vm10, %v1297_v51, %v1301_v35  ;;  %v459_v61 = vmax.f32 %v427_v55, 0.0  ;;  %v4185_v6 = vcombine.low %v5818_v12, %v5820_v13  ;;  %482 = vst [vmem:[#allocation2 + $0xc] sm:$0x1] %v481_v5  ;;  %v5252_v13 = vld [vmem:[#allocation10 + $0x100] sm:$0xff]   ;;  %s5456_s12 = sshll.u32 %s5567_s29, 4  ;;  %s5457_s12 = int_to_ptr.vmem [resolvable:$false] %s5456_s12 }
  0x9c   : > { %4617 = vmatpush3.bf16.msra.mxu0 %v5240_v10  ;;  %5140 = vmatpush3.bf16.msra.mxu1 %v5240_v10  ;;  %v4201_v60 = vcombine.low %v1292_v57, %v1302_v58  ;;  %v460_v2 = vmax.f32 %v428_v59, 0.0  ;;  %v531_v9 = vsel %vm5847_vm9, 0, %v530_v1  ;;  %v4589_v10 = vld [vmem:[%s5804_s15 + $0x60] sm:$0xff]   ;;  %v367_v16 = vmul.f32 %v4437_v4, %v5835_v27  ;;  %v4578_v50 = vld [vmem:[%s5804_s15 + $0x8] sm:$0xff]   ;;  %p5455_p8 = pneg %p5454_p4  ;;  %s5458_s23 = scalar_lea.vmem %s5457_s12, 4096 }
  0x9d   : > { %4618 = vmatprep.subr.bf16.mxu0 %v5241_v11  ;;  %5133 = vmatprep.subr.bf16.mxu1 %v5241_v11  ;;  %v4391_v7 = vpack.c.bf16 %v459_v61, %v459_v61  ;;  %v516_v11 = vld [vmem:[#allocation2 + $0x9c] sm:$0x1]  ;;  %532 = vst [vmem:[#allocation2 + $0x14] sm:$0x1] %v531_v9  ;;  %v4484_v17 = vunpack.c.l.bf16 %v4589_v10  ;;  %v4485_v21 = vunpack.c.h.bf16 %v4589_v10  ;;  %v567_v37 = vsel %vm5847_vm9, 0, %v566_v18  ;;  %p5459_p3 = scmp.lt.s32.totalorder %s7233_s13, %s5457_s12  ;;  %p5460_p7 = scmp.lt.s32.totalorder %s5458_s23, %s5452_s10 }
  0x9e   : > { %2894 = vmatprep.mubr.bf16.mxu0 %v4201_v60  ;;  %v4392_v14 = vpack.c.bf16 %v460_v2, %v460_v2  ;;  %v1075_v25 = vld [vmem:[#allocation2 + $0x90] sm:$0xf]  ;;  %v406_v29 = vadd.f32 %v5843_v33, %v367_v16  ;;  %568 = vst [vmem:[#allocation2 + $0xa4] sm:$0x1] %v567_v37  ;;  %v4440_v59 = vunpack.c.l.bf16 %v4578_v50  ;;  %v483_v60 = vld [vmem:[#allocation2 + $0x18] sm:$0x1] }
  0x9f   : > { %v864_v19 = vshrl.u32 %v4391_v7, 16  ;;  %v867_v12 = vshll.u32 %v4391_v7, 16  ;;  %v1079_v32 = vld [vmem:[#allocation2 + $0x98] sm:$0x1]  ;;  %v390_v35 = vmul.f32 %v4484_v17, %v5835_v27  ;;  %v391_v36 = vmul.f32 %v4485_v21, %v5835_v27  ;;  %v533_v16 = vld [vmem:[#allocation2 + $0x20] sm:$0x1]  ;;  %p5461_p10 = por %p5460_p7, %p5459_p3 }
  0xa0   : > { %4619 = vmatpush3.bf16.msra.mxu0 %v5242_v15  ;;  %5141 = vmatpush3.bf16.msra.mxu1 %v5242_v15  ;;  %v366_v15 = vmul.f32 %v4436_v3, %v5835_v27  ;;  %v872_v23 = vshrl.u32 %v4392_v14, 16  ;;  %v875_v24 = vshll.u32 %v4392_v14, 16  ;;  %v438_v42 = vmax.f32 %v406_v29, 0.0  ;;  %v5262_v21 = vld [vmem:[#allocation10 + $0x108] sm:$0xff]  }
  0xa1   : > { %4620 = vmatprep.subr.bf16.mxu0 %v5243_v22  ;;  %5134 = vmatprep.subr.bf16.mxu1 %v5243_v22  ;;  %v517_v22 = vsel %vm5839_vm8, 0, %v516_v11  ;;  %v866_v31 = vrot.slane %v864_v19, 7  ;;  %v429_v47 = vadd.f32 %v5843_v33, %v390_v35  ;;  %v430_v48 = vadd.f32 %v5843_v33, %v391_v36  ;;  %p5462_p13 = pnand %p5461_p10, %p5455_p8 }
  0xa2   : > { %v405_v26 = vadd.f32 %v5843_v33, %v366_v15  ;;  %518 = vst [vmem:[#allocation2 + $0x9c] sm:$0x1] %v517_v22  ;;  %v874_v38 = vrot.slane %v872_v23, 7  ;;  %v4370_v55 = vpack.c.bf16 %v438_v42, %v438_v42  ;;  %v998_v3 = vld [vmem:[#allocation2 + $0xc] sm:$0xf]  ;;  %v4441_v7 = vunpack.c.h.bf16 %v4578_v50 }
  0xa3   : > { %v869_v44 = vor.u32 %v867_v12, %v866_v31  ;;  %v461_v57 = vmax.f32 %v429_v47, 0.0  ;;  %v462_v58 = vmax.f32 %v430_v48, 0.0  ;;  %v484_v9 = vsel %vm5839_vm8, 0, %v483_v60 }
  0xa4   : > { %4621 = vmatpush3.bf16.msra.mxu0 %v5244_v45  ;;  %5142 = vmatpush3.bf16.msra.mxu1 %v5244_v45  ;;  %v437_v41 = vmax.f32 %v405_v26, 0.0  ;;  %v870_v45 = vrot.slane %v866_v31, 4  ;;  %v877_v51 = vor.u32 %v875_v24, %v874_v38  ;;  %v879_v52 = vrot.slane %v874_v38, 4  ;;  %485 = vst [vmem:[#allocation2 + $0x18] sm:$0x1] %v484_v9  ;;  %v4590_v26 = vld [vmem:[%s5804_s15 + $0x68] sm:$0xff]  }
  0xa5   : > { %4622 = vmatprep.subr.bf16.mxu0 %v5245_v54  ;;  %5135 = vmatprep.subr.bf16.mxu1 %v5245_v54  ;;  %v685_v1 = vshrl.u32 %v4370_v55, 16  ;;  %v688_v2 = vshll.u32 %v4370_v55, 16  ;;  %v4393_v4 = vpack.c.bf16 %v461_v57, %v461_v57  ;;  %v4394_v5 = vpack.c.bf16 %v462_v58, %v462_v58  ;;  %v1002_v19 = vld [vmem:[#allocation2 + $0x14] sm:$0x1] }
  0xa6   : > { %v4369_v54 = vpack.c.bf16 %v437_v41, %v437_v41  ;;  %v878_v61 = vsel %vm5895_vm13, %v870_v45, %v877_v51  ;;  %v534_v36 = vsel %vm5847_vm9, 0, %v533_v16  ;;  %v4489_v9 = vunpack.c.h.bf16 %v4590_v26 }
  0xa7   : > { %1078 = vst [vmem:[#allocation2 + $0x94] sm:$0xf] %v878_v61  ;;  %v687_v10 = vrot.slane %v685_v1, 7  ;;  %v881_v11 = vshrl.u32 %v4393_v4, 16  ;;  %v884_v14 = vshll.u32 %v4393_v4, 16  ;;  %v889_v15 = vshrl.u32 %v4394_v5, 16 }
  0xa8   : > { %4623 = vmatpush3.bf16.msra.mxu0 %v5246_v56  ;;  %5143 = vmatpush3.bf16.msra.mxu1 %v5246_v56  ;;  %v1076_v56 = vsel %vm5905_vm14, %v869_v44, %v1075_v25  ;;  %v677_v63 = vshrl.u32 %v4369_v54, 16  ;;  %v680_v0 = vshll.u32 %v4369_v54, 16  ;;  %v892_v12 = vshll.u32 %v4394_v5, 16  ;;  %v1086_v44 = vld [vmem:[#allocation2 + $0xa4] sm:$0x1] }
  0xa9   : > { %4720 = vmatprep.subr.bf16.mxu1 %v5248_v62  ;;  %4832 = vmatprep.subr.bf16.mxu0 %v5249_v8  ;;  %1077 = vst [vmem:[#allocation2 + $0x90] sm:$0xf] %v1076_v56  ;;  %v1080_v62 = vsel %vm5839_vm8, %v879_v52, %v1079_v32  ;;  %v368_v8 = vmul.f32 %v4440_v59, %v5835_v27  ;;  %v692_v23 = vrot.slane %v687_v10, 4  ;;  %v883_v24 = vrot.slane %v881_v11, 7  ;;  %v1082_v31 = vld [vmem:[#allocation2 + $0x9c] sm:$0xf] }
  0xaa   : > { %1081 = vst [vmem:[#allocation2 + $0x98] sm:$0x1] %v1080_v62  ;;  %v690_v22 = vor.u32 %v688_v2, %v687_v10  ;;  %v891_v25 = vrot.slane %v889_v15, 7  ;;  %535 = vst [vmem:[#allocation2 + $0x20] sm:$0x1] %v534_v36  ;;  %v4488_v52 = vunpack.c.l.bf16 %v4590_v26 }
  0xab   : > { %2895 = vmatmul.mubr.bf16.vlgmr.msra.gmra.mrb[0].mxu0 %v4185_v6  ;;  %v679_v6 = vrot.slane %v677_v63, 7  ;;  %v407_v32 = vadd.f32 %v5843_v33, %v368_v8  ;;  %v1003_v41 = vsel %vm5839_vm8, %v692_v23, %v1002_v19  ;;  %v886_v42 = vor.u32 %v884_v14, %v883_v24  ;;  %v519_v54 = vld [vmem:[#allocation2 + $0xa8] sm:$0x1]  ;;  %v569_v63 = vld [vmem:[#allocation2 + $0xb0] sm:$0x1] }
  0xac   : > { %4833 = vmatpush3.bf16.msra.mxu0 %v5252_v13  ;;  %v369_v13 = vmul.f32 %v4441_v7, %v5835_v27  ;;  %1004 = vst [vmem:[#allocation2 + $0x14] sm:$0x1] %v1003_v41  ;;  %v894_v51 = vor.u32 %v892_v12, %v891_v25  ;;  %v896_v62 = vrot.slane %v891_v25, 4  ;;  %v392_v10 = vmul.f32 %v4488_v52, %v5835_v27 }
  0xad   : > { %4834 = vmatprep.subr.bf16.mxu0 %v5260_v43  ;;  %v682_v17 = vor.u32 %v680_v0, %v679_v6  ;;  %v683_v18 = vrot.slane %v679_v6, 4  ;;  %v887_v43 = vrot.slane %v883_v24, 4  ;;  %v439_v6 = vmax.f32 %v407_v32, 0.0 }
  0xae   : > { %v408_v35 = vadd.f32 %v5843_v33, %v369_v13  ;;  %v1147_v45 = vld [vmem:[#allocation2 + $0x94] sm:$0xf]  ;;  %v1087_v5 = vsel %vm5839_vm8, %v896_v62, %v1086_v44  ;;  %v520_v11 = vsel %vm5839_vm8, 0, %v519_v54  ;;  %v5961_v23 = vadd.f32 %v5843_v33, %v392_v10  ;;  %v5256_v10 = vld [vmem:[#allocation10 + $0xd0] sm:$0xff]  }
  0xaf   : > { %v999_v29 = vsel %vm5905_vm14, %v682_v17, %v998_v3  ;;  %v691_v38 = vsel %vm5895_vm13, %v683_v18, %v690_v22  ;;  %v1577_v55 = vshll.u32 %v1147_v45, 16  ;;  %v1581_v56 = vshrl.u32 %v1147_v45, 16  ;;  %1088 = vst [vmem:[#allocation2 + $0xa4] sm:$0x1] %v1087_v5  ;;  %521 = vst [vmem:[#allocation2 + $0xa8] sm:$0x1] %v520_v11 }
  0xb0   : > { %4835 = vmatpush3.bf16.msra.mxu0 %v5262_v21  ;;  %v1146_v37 = vld [vmem:[#allocation2 + $0x90] sm:$0xf]  ;;  %1000 = vst [vmem:[#allocation2 + $0xc] sm:$0xf] %v999_v29  ;;  %1001 = vst [vmem:[#allocation2 + $0x10] sm:$0xf] %v691_v38  ;;  %v895_v61 = vsel %vm5895_vm13, %v887_v43, %v894_v51  ;;  %v1083_v3 = vsel %vm5905_vm14, %v886_v42, %v1082_v31  ;;  %v5946_v16 = vpack.c.bf16 %v439_v6, %v439_v6 }
  0xb1   : > { %v1148_v47 = vld [vmem:[#allocation2 + $0x98] sm:$0x1]  ;;  %v1568_v48 = vshrl.u32 %v1146_v37, 16  ;;  %v1571_v50 = vshll.u32 %v1146_v37, 16  ;;  %v5933_v58 = vcombine.low %v1146_v37, %v1147_v45  ;;  %v1579_v0 = vrot.slane %v1577_v55, 5  ;;  %v5271_v31 = vld [vmem:[#allocation10 + $0x150] sm:$0xff]  }
  0xb2   : > { %v1587_v57 = vshll.u32 %v1148_v47, 16  ;;  %v1583_v1 = vrot.slane %v1581_v56, 4  ;;  %1085 = vst [vmem:[#allocation2 + $0xa0] sm:$0xf] %v895_v61  ;;  %1084 = vst [vmem:[#allocation2 + $0x9c] sm:$0xf] %v1083_v3  ;;  %v5958_v22 = vmul.f32 %v4489_v9, %v5835_v27  ;;  %4836 = vmatprep.subr.bf16.mxu0 %v5271_v31 }
  0xb3   : > { %v1570_v59 = vrot.slane %v1568_v48, 4  ;;  %v1573_v60 = vrot.slane %v1571_v50, 5  ;;  %v440_v7 = vmax.f32 %v408_v35, 0.0  ;;  %v570_v18 = vsel %vm5847_vm9, 0, %v569_v63  ;;  %v5954_v13 = vld [vmem:[#allocation2 + $0x14] sm:$0x1] }
  0xb4   : > { %v1589_v2 = vrot.slane %v1587_v57, 5  ;;  %v1584_v8 = vor.u32 %v1583_v1, %v1579_v0  ;;  %571 = vst [vmem:[#allocation2 + $0xb0] sm:$0x1] %v570_v18  ;;  %v5251_v35 = vld [vmem:[#allocation10 + $0x80] sm:$0xff]   ;;  %v1323_v37 = vshll.u32 %v5954_v13, 16  ;;  %v5253_v42 = vld [vmem:[#allocation10 + $0xc8] sm:$0xff]  }
  0xb5   : > { %v1574_v4 = vor.u32 %v1573_v60, %v1570_v59  ;;  %v5948_v17 = vpack.c.bf16 %v440_v7, %v440_v7  ;;  %v694_v54 = vshrl.u32 %v5946_v16, 16  ;;  %v5254_v61 = vld [vmem:[#allocation10 + $0x88] sm:$0xff]   ;;  %v1005_v7 = vld [vmem:[#allocation2 + $0x18] sm:$0xf] }
  0xb6   : > { %v1585_v19 = vrot.slane %v1584_v8, 4  ;;  %v1325_v48 = vrot.slane %v1323_v37, 5  ;;  %v1151_v57 = vld [vmem:[#allocation2 + $0xa4] sm:$0x1] }
  0xb7   : > { %v1575_v14 = vrot.slane %v1574_v4, 4  ;;  %v5944_v15 = vld [vmem:[#allocation2 + $0xc] sm:$0xf]  ;;  %v5952_v12 = vld [vmem:[#allocation2 + $0x10] sm:$0xf]  ;;  %v696_v11 = vrot.slane %v694_v54, 7 }
  0xb8   : > { %v1304_v21 = vshrl.u32 %v5944_v15, 16  ;;  %v1307_v25 = vshll.u32 %v5944_v15, 16  ;;  %v1313_v26 = vshll.u32 %v5952_v12, 16  ;;  %v1317_v29 = vshrl.u32 %v5952_v12, 16 }
  0xb9   : > { %v1580_v24 = vsel %vm5853_vm10, %v1575_v14, %v1579_v0  ;;  %v1590_v32 = vsel %vm5853_vm10, %v1585_v19, %v1589_v2  ;;  %v5973_v38 = vcombine.low %v5944_v15, %v5952_v12  ;;  %v1150_v47 = vld [vmem:[#allocation2 + $0xa0] sm:$0xf]  ;;  %v1149_v50 = vld [vmem:[#allocation2 + $0x9c] sm:$0xf]  ;;  %v1611_v0 = vshll.u32 %v1151_v57, 16  ;;  %v5274_v2 = vld [vmem:[#allocation10 + $0x110] sm:$0xff]  }
  0xba   : > { %v1306_v36 = vrot.slane %v1304_v21, 4  ;;  %v5975_v41 = vcombine.low %v1580_v24, %v1590_v32  ;;  %v1309_v43 = vrot.slane %v1307_v25, 5  ;;  %v1315_v44 = vrot.slane %v1313_v26, 5  ;;  %4837 = vmatpush3.bf16.msra.mxu0 %v5274_v2  ;;  %v5258_v24 = vld [vmem:[#allocation10 + $0x90] sm:$0xff]  }
  0xbb   : > { %v1319_v45 = vrot.slane %v1317_v29, 4  ;;  %v1601_v51 = vshll.u32 %v1150_v47, 16  ;;  %v1605_v52 = vshrl.u32 %v1150_v47, 16  ;;  %v1592_v59 = vshrl.u32 %v1149_v50, 16  ;;  %v4579_v26 = vld [vmem:[%s5804_s15 + $0x10] sm:$0xff]  }
  0xbc   : > { %7439 = vst [vmem:[#allocation20_spill] sm:$0xff] %v5975_v41  ;;  %2990 = vmatprep.mubr.bf16.mxu1 %v5975_v41  ;;  %v1310_v55 = vor.u32 %v1309_v43, %v1306_v36  ;;  %v1595_v60 = vshll.u32 %v1149_v50, 16  ;;  %v5980_v1 = vcombine.low %v1149_v50, %v1150_v47  ;;  %v1613_v9 = vrot.slane %v1611_v0, 5  ;;  %v1009_v36 = vld [vmem:[#allocation2 + $0x20] sm:$0x1] }
  0xbd   : > { %v1320_v56 = vor.u32 %v1319_v45, %v1315_v44  ;;  %2991 = vmatmul.mubr.bf16.vlgmr.msra.gmra.mrb[0].mxu1 %v5933_v58  ;;  %v1603_v62 = vrot.slane %v1601_v51, 5  ;;  %v1607_v63 = vrot.slane %v1605_v52, 4  ;;  %v1594_v5 = vrot.slane %v1592_v59, 4  ;;  %v6001_v52 = vld [vmem:[%s5804_s15 + $0x70] sm:$0xff]   ;;  %v572_v0 = vld [vmem:[#allocation2 + $0xbc] sm:$0x1] }
  0xbe   : > { %4721 = vmatpush3.bf16.msra.mxu1 %v5251_v35  ;;  %v1311_v3 = vrot.slane %v1310_v55, 4  ;;  %v1597_v6 = vrot.slane %v1595_v60, 5  ;;  %v697_v14 = vshll.u32 %v5946_v16, 16  ;;  %v702_v25 = vshrl.u32 %v5948_v17, 16  ;;  %v486_v16 = vld [vmem:[#allocation2 + $0x24] sm:$0x1] }
  0xbf   : > { %v1321_v4 = vrot.slane %v1320_v56, 4  ;;  %4722 = vmatprep.subr.bf16.mxu1 %v5253_v42  ;;  %v1608_v8 = vor.u32 %v1607_v63, %v1603_v62  ;;  %v700_v35 = vrot.slane %v696_v11, 4  ;;  %v5259_v42 = vld [vmem:[#allocation10 + $0xd8] sm:$0xff]   ;;  %v432_v45 = vadd.f32 %v5843_v33, %v5958_v22  ;;  %v536_v57 = vld [vmem:[#allocation2 + $0x2c] sm:$0x1] }
  0xc0   : > { %v1316_v18 = vsel %vm5853_vm10, %v1311_v3, %v1315_v44  ;;  %v1598_v21 = vor.u32 %v1597_v6, %v1594_v5  ;;  %v699_v32 = vor.u32 %v697_v14, %v696_v11  ;;  %v704_v43 = vrot.slane %v702_v25, 7  ;;  %v5261_v55 = vld [vmem:[#allocation10 + $0x98] sm:$0xff]  }
  0xc1   : > { %v1326_v19 = vsel %vm5853_vm10, %v1321_v4, %v1325_v48  ;;  %v1609_v31 = vrot.slane %v1608_v8, 4  ;;  %v705_v44 = vshll.u32 %v5948_v17, 16  ;;  %v463_v50 = vmax.f32 %v5961_v23, 0.0  ;;  %v522_v63 = vld [vmem:[#allocation2 + $0xb4] sm:$0x1]  ;;  %v5264_v4 = vld [vmem:[#allocation10 + $0xe0] sm:$0xff]  }
  0xc2   : > { %v5989_v29 = vcombine.low %v1316_v18, %v1326_v19  ;;  %4723 = vmatpush3.bf16.msra.mxu1 %v5254_v61  ;;  %v1599_v37 = vrot.slane %v1598_v21, 4  ;;  %v1006_v48 = vsel %vm5905_vm14, %v699_v32, %v1005_v7  ;;  %v4444_v51 = vunpack.c.l.bf16 %v4579_v26  ;;  %v5280_v19 = vld [vmem:[#allocation10 + $0x158] sm:$0xff]  }
  0xc3   : > { %v1614_v47 = vsel %vm5853_vm10, %v1609_v31, %v1613_v9  ;;  %4724 = vmatprep.subr.bf16.mxu1 %v5256_v10  ;;  %v707_v22 = vor.u32 %v705_v44, %v704_v43  ;;  %v709_v54 = vrot.slane %v704_v43, 4  ;;  %1007 = vst [vmem:[#allocation2 + $0x18] sm:$0xf] %v1006_v48  ;;  %v464_v56 = vmax.f32 %v432_v45, 0.0  ;;  %v5281_v32 = vld [vmem:[#allocation10 + $0x118] sm:$0xff]   ;;  %4838 = vmatprep.subr.bf16.mxu0 %v5280_v19 }
  0xc4   : > { %2902 = vmatprep.mubr.bf16.mxu0 %v5989_v29  ;;  %v1604_v17 = vsel %vm5853_vm10, %v1599_v37, %v1603_v62  ;;  %v4395_v60 = vpack.c.bf16 %v463_v50, %v463_v50  ;;  %v4445_v61 = vunpack.c.h.bf16 %v4579_v26  ;;  %v370_v23 = vmul.f32 %v4444_v51, %v5835_v27  ;;  %v1093_v48 = vld [vmem:[#allocation2 + $0xb0] sm:$0x1]  ;;  %4839 = vmatpush3.bf16.msra.mxu0 %v5281_v32 }
  0xc5   : > { %2903 = vmatmul.mubr.bf16.gmra.mrb[4].mxu0 %v5973_v38  ;;  %v6006_v59 = vcombine.low %v1604_v17, %v1614_v47  ;;  %v708_v2 = vsel %vm5895_vm13, %v700_v35, %v707_v22  ;;  %v1010_v62 = vsel %vm5839_vm8, %v709_v54, %v1009_v36  ;;  %v4396_v3 = vpack.c.bf16 %v464_v56, %v464_v56  ;;  %v1089_v36 = vld [vmem:[#allocation2 + $0xa8] sm:$0xf]  ;;  %v6051_v19 = vld [vmem:[%s5804_s15 + $0x18] sm:$0xff]  }
  0xc6   : > { %4725 = vmatpush3.bf16.msra.mxu1 %v5258_v24  ;;  %v487_v5 = vsel %vm5839_vm8, 0, %v486_v16  ;;  %1008 = vst [vmem:[#allocation2 + $0x1c] sm:$0xf] %v708_v2  ;;  %1011 = vst [vmem:[#allocation2 + $0x20] sm:$0x1] %v1010_v62  ;;  %v898_v6 = vshrl.u32 %v4395_v60, 16  ;;  %v371_v8 = vmul.f32 %v4445_v61, %v5835_v27  ;;  %v409_v9 = vadd.f32 %v5843_v33, %v370_v23 }
  0xc7   : > { %7440 = vst [vmem:[#allocation21_spill] sm:$0xff] %v6006_v59  ;;  %2998 = vmatprep.mubr.bf16.mxu1 %v6006_v59  ;;  %4726 = vmatprep.subr.bf16.mxu1 %v5259_v42  ;;  %v901_v7 = vshll.u32 %v4395_v60, 16  ;;  %488 = vst [vmem:[#allocation2 + $0x24] sm:$0x1] %v487_v5  ;;  %v906_v10 = vshrl.u32 %v4396_v3, 16  ;;  %v909_v11 = vshll.u32 %v4396_v3, 16  ;;  %v4492_v18 = vunpack.c.l.bf16 %v6001_v52 }
  0xc8   : > { %2999 = vmatmul.mubr.bf16.gmra.mrb[4].mxu1 %v5980_v1  ;;  %v537_v14 = vsel %vm5847_vm9, 0, %v536_v57  ;;  %v900_v21 = vrot.slane %v898_v6, 7  ;;  %v5266_v24 = vld [vmem:[#allocation10 + $0xa0] sm:$0xff]   ;;  %v410_v25 = vadd.f32 %v5843_v33, %v371_v8  ;;  %v441_v26 = vmax.f32 %v409_v9, 0.0  ;;  %v5267_v16 = vld [vmem:[#allocation10 + $0xe8] sm:$0xff]   ;;  %v5270_v9 = vld [vmem:[#allocation10 + $0xf0] sm:$0xff]  }
  0xc9   : > { %538 = vst [vmem:[#allocation2 + $0x2c] sm:$0x1] %v537_v14  ;;  %v4493_v31 = vunpack.c.h.bf16 %v6001_v52  ;;  %v908_v35 = vrot.slane %v906_v10, 7  ;;  %v394_v37 = vmul.f32 %v4492_v18, %v5835_v27  ;;  %v523_v42 = vsel %vm5839_vm8, 0, %v522_v63  ;;  %v5268_v23 = vld [vmem:[#allocation10 + $0xa8] sm:$0xff]  }
  0xca   : > { %4727 = vmatpush3.bf16.msra.mxu1 %v5261_v55  ;;  %v573_v43 = vsel %vm5847_vm9, 0, %v572_v0  ;;  %v6029_v44 = vld [vmem:[#allocation2 + $0x18] sm:$0xf]  ;;  %v903_v45 = vor.u32 %v901_v7, %v900_v21  ;;  %v904_v47 = vrot.slane %v900_v21, 4  ;;  %v442_v50 = vmax.f32 %v410_v25, 0.0  ;;  %v5284_v55 = vld [vmem:[#allocation10 + $0x160] sm:$0xff]  }
  0xcb   : > { %4728 = vmatprep.subr.bf16.mxu1 %v5264_v4  ;;  %v4373_v51 = vpack.c.bf16 %v441_v26, %v441_v26  ;;  %524 = vst [vmem:[#allocation2 + $0xb4] sm:$0x1] %v523_v42  ;;  %574 = vst [vmem:[#allocation2 + $0xbc] sm:$0x1] %v573_v43  ;;  %v1328_v52 = vshrl.u32 %v6029_v44, 16  ;;  %v1331_v17 = vshll.u32 %v6029_v44, 16  ;;  %v911_v22 = vor.u32 %v909_v11, %v908_v35 }
  0xcc   : > { %v913_v54 = vrot.slane %v908_v35, 4  ;;  %v1090_v56 = vsel %vm5905_vm14, %v903_v45, %v1089_v36  ;;  %v4374_v57 = vpack.c.bf16 %v442_v50, %v442_v50  ;;  %4840 = vmatprep.subr.bf16.mxu0 %v5284_v55  ;;  %v5286_v21 = vld [vmem:[#allocation10 + $0x120] sm:$0xff]   ;;  %v395_v35 = vmul.f32 %v4493_v31, %v5835_v27  ;;  %v5308_v59 = vld [vmem:[#allocation10 + $0x1a8] sm:$0xff]  }
  0xcd   : > { %v711_v60 = vshrl.u32 %v4373_v51, 16  ;;  %v714_v61 = vshll.u32 %v4373_v51, 16  ;;  %v6035_v63 = vld [vmem:[#allocation2 + $0x1c] sm:$0xf]  ;;  %v6037_v0 = vld [vmem:[#allocation2 + $0x20] sm:$0x1]  ;;  %v912_v3 = vsel %vm5895_vm13, %v904_v47, %v911_v22  ;;  %4841 = vmatpush3.bf16.msra.mxu0 %v5286_v21  ;;  %v433_v51 = vadd.f32 %v5843_v33, %v394_v37 }
  0xce   : > { %v1330_v2 = vrot.slane %v1328_v52, 4  ;;  %v1333_v62 = vrot.slane %v1331_v17, 5  ;;  %1091 = vst [vmem:[#allocation2 + $0xa8] sm:$0xf] %v1090_v56  ;;  %v1094_v4 = vsel %vm5839_vm8, %v913_v54, %v1093_v48  ;;  %4729 = vmatpush3.bf16.msra.mxu1 %v5266_v24  ;;  %v1337_v5 = vshll.u32 %v6035_v63, 16  ;;  %v5275_v47 = vld [vmem:[#allocation10 + $0xf8] sm:$0xff]  }
  0xcf   : > { %v1341_v6 = vshrl.u32 %v6035_v63, 16  ;;  %v1347_v7 = vshll.u32 %v6037_v0, 16  ;;  %v6048_v8 = vcombine.low %v6029_v44, %v6035_v63  ;;  %1092 = vst [vmem:[#allocation2 + $0xac] sm:$0xf] %v912_v3  ;;  %1095 = vst [vmem:[#allocation2 + $0xb0] sm:$0x1] %v1094_v4  ;;  %4730 = vmatprep.subr.bf16.mxu1 %v5267_v16  ;;  %v434_v52 = vadd.f32 %v5843_v33, %v395_v35 }
  0xd0   : > { %v1334_v10 = vor.u32 %v1333_v62, %v1330_v2  ;;  %v713_v11 = vrot.slane %v711_v60, 7  ;;  %v719_v14 = vshrl.u32 %v4374_v57, 16  ;;  %v722_v18 = vshll.u32 %v4374_v57, 16  ;;  %v1012_v32 = vld [vmem:[#allocation2 + $0x24] sm:$0xf]  ;;  %v5273_v16 = vld [vmem:[#allocation10 + $0xb0] sm:$0xff]  }
  0xd1   : > { %v1339_v24 = vrot.slane %v1337_v5, 5  ;;  %v1343_v25 = vrot.slane %v1341_v6, 4  ;;  %v1349_v26 = vrot.slane %v1347_v7, 5  ;;  %v1016_v50 = vld [vmem:[#allocation2 + $0x2c] sm:$0x1]  ;;  %v4448_v17 = vunpack.c.l.bf16 %v6051_v19  ;;  %v5289_v56 = vld [vmem:[#allocation10 + $0x168] sm:$0xff]  }
  0xd2   : > { %v1335_v36 = vrot.slane %v1334_v10, 4  ;;  %v716_v42 = vor.u32 %v714_v61, %v713_v11  ;;  %v717_v43 = vrot.slane %v713_v11, 4  ;;  %v721_v45 = vrot.slane %v719_v14, 7  ;;  %4731 = vmatpush3.bf16.msra.mxu1 %v5268_v23  ;;  %v5276_v2 = vld [vmem:[#allocation10 + $0xb8] sm:$0xff]   ;;  %v5278_v10 = vld [vmem:[#allocation10 + $0x1c0] sm:$0xff]   ;;  %4842 = vmatprep.subr.bf16.mxu0 %v5289_v56  ;;  %v5290_v21 = vld [vmem:[#allocation10 + $0x128] sm:$0xff]  }
  0xd3   : > { %v1344_v48 = vor.u32 %v1343_v25, %v1339_v24  ;;  %4732 = vmatprep.subr.bf16.mxu1 %v5270_v9  ;;  %v465_v61 = vmax.f32 %v433_v51, 0.0  ;;  %v466_v23 = vmax.f32 %v434_v52, 0.0  ;;  %v4449_v37 = vunpack.c.h.bf16 %v6051_v19  ;;  %v489_v9 = vld [vmem:[#allocation2 + $0x30] sm:$0x1]  ;;  %4843 = vmatpush3.bf16.msra.mxu0 %v5290_v21 }
  0xd4   : > { %v1340_v31 = vsel %vm5853_vm10, %v1335_v36, %v1339_v24  ;;  %v724_v22 = vor.u32 %v722_v18, %v721_v45  ;;  %v726_v54 = vrot.slane %v721_v45, 4  ;;  %v1013_v55 = vsel %vm5905_vm14, %v716_v42, %v1012_v32 }
  0xd5   : > { %v1345_v57 = vrot.slane %v1344_v48, 4  ;;  %v1152_v60 = vld [vmem:[#allocation2 + $0xa8] sm:$0xf]  ;;  %1014 = vst [vmem:[#allocation2 + $0x24] sm:$0xf] %v1013_v55  ;;  %v4397_v45 = vpack.c.bf16 %v465_v61, %v465_v61  ;;  %v372_v48 = vmul.f32 %v4448_v17, %v5835_v27 }
  0xd6   : > { %v1153_v62 = vld [vmem:[#allocation2 + $0xac] sm:$0xf]  ;;  %v1154_v3 = vld [vmem:[#allocation2 + $0xb0] sm:$0x1]  ;;  %v1616_v4 = vshrl.u32 %v1152_v60, 16  ;;  %v1619_v5 = vshll.u32 %v1152_v60, 16  ;;  %v725_v6 = vsel %vm5895_vm13, %v717_v43, %v724_v22  ;;  %v1017_v7 = vsel %vm5839_vm8, %v726_v54, %v1016_v50  ;;  %4733 = vmatpush3.bf16.msra.mxu1 %v5273_v16 }
  0xd7   : > { %v1350_v11 = vsel %vm5853_vm10, %v1345_v57, %v1349_v26  ;;  %v1625_v14 = vshll.u32 %v1153_v62, 16  ;;  %v1629_v18 = vshrl.u32 %v1153_v62, 16  ;;  %v1635_v19 = vshll.u32 %v1154_v3, 16  ;;  %1015 = vst [vmem:[#allocation2 + $0x28] sm:$0xf] %v725_v6  ;;  %4734 = vmatprep.subr.bf16.mxu1 %v5275_v47 }
  0xd8   : > { %1018 = vst [vmem:[#allocation2 + $0x2c] sm:$0x1] %v1017_v7  ;;  %v6068_v24 = vcombine.low %v1340_v31, %v1350_v11  ;;  %v1618_v25 = vrot.slane %v1616_v4, 4  ;;  %v1621_v32 = vrot.slane %v1619_v5, 5  ;;  %v6070_v35 = vcombine.low %v1152_v60, %v1153_v62  ;;  %v1096_v3 = vld [vmem:[#allocation2 + $0xb4] sm:$0xf] }
  0xd9   : > { %v1627_v36 = vrot.slane %v1625_v14, 5  ;;  %v1631_v42 = vrot.slane %v1629_v18, 4  ;;  %v1637_v43 = vrot.slane %v1635_v19, 5  ;;  %v4398_v16 = vpack.c.bf16 %v466_v23, %v466_v23  ;;  %v6089_v4 = vld [vmem:[#allocation9] ss:$0 sm:$0xff]  ;;  %v5295_v18 = vld [vmem:[#allocation10 + $0x170] sm:$0xff]  }
  0xda   : > { %2910 = vmatprep.mubr.bf16.mxu0 %v6068_v24  ;;  %v1622_v26 = vor.u32 %v1621_v32, %v1618_v25  ;;  %v373_v47 = vmul.f32 %v4449_v37, %v5835_v27  ;;  %v915_v51 = vshrl.u32 %v4397_v45, 16  ;;  %v918_v52 = vshll.u32 %v4397_v45, 16  ;;  %4735 = vmatpush3.bf16.msra.mxu1 %v5276_v2  ;;  %v539_v6 = vld [vmem:[#allocation2 + $0x38] sm:$0x1]  ;;  %v1100_v14 = vld [vmem:[#allocation2 + $0xbc] sm:$0x1] }
  0xdb   : > { %2911 = vmatmul.mubr.bf16.gmra.mrb[8].mxu0 %v6048_v8  ;;  %v1632_v50 = vor.u32 %v1631_v42, %v1627_v36  ;;  %v490_v31 = vsel %vm5839_vm8, 0, %v489_v9  ;;  %v923_v55 = vshrl.u32 %v4398_v16, 16  ;;  %v926_v56 = vshll.u32 %v4398_v16, 16  ;;  %4944 = vmatprep.subr.bf16.mxu1 %v5278_v10 }
  0xdc   : > { %v1623_v22 = vrot.slane %v1622_v26, 4  ;;  %v6078_v54 = vld [vmem:[#allocation2 + $0x24] sm:$0xf]  ;;  %v411_v57 = vadd.f32 %v5843_v33, %v372_v48  ;;  %491 = vst [vmem:[#allocation2 + $0x30] sm:$0x1] %v490_v31  ;;  %v917_v61 = vrot.slane %v915_v51, 7  ;;  %v412_v33 = vadd.f32 %v6089_v4, %v373_v47  ;;  %4844 = vmatprep.subr.bf16.mxu0 %v5295_v18 }
  0xdd   : > { %v1633_v17 = vrot.slane %v1632_v50, 4  ;;  %v1352_v27 = vshrl.u32 %v6078_v54, 16  ;;  %v1355_v60 = vshll.u32 %v6078_v54, 16  ;;  %v925_v62 = vrot.slane %v923_v55, 7  ;;  %v5296_v51 = vld [vmem:[#allocation10 + $0x130] sm:$0xff]  }
  0xde   : > { %v1628_v23 = vsel %vm5853_vm10, %v1623_v22, %v1627_v36  ;;  %v6085_v37 = vld [vmem:[#allocation2 + $0x28] sm:$0xf]  ;;  %v443_v5 = vmax.f32 %v411_v57, 0.0  ;;  %v4581_v36 = vld [vmem:[%s5804_s15 + $0x20] sm:$0xff]   ;;  %v921_v26 = vrot.slane %v917_v61, 4  ;;  %v444_v55 = vmax.f32 %v412_v33, 0.0  ;;  %4845 = vmatpush3.bf16.msra.mxu0 %v5296_v51 }
  0xdf   : > { %v6087_v2 = vld [vmem:[#allocation2 + $0x2c] sm:$0x1]  ;;  %v1638_v7 = vsel %vm5853_vm10, %v1633_v17, %v1637_v43  ;;  %v1354_v9 = vrot.slane %v1352_v27, 4  ;;  %v1357_v10 = vrot.slane %v1355_v60, 5  ;;  %v1361_v11 = vshll.u32 %v6085_v37, 16 }
  0xe0   : > { %v6095_v19 = vcombine.low %v1628_v23, %v1638_v7  ;;  %v1365_v21 = vshrl.u32 %v6085_v37, 16  ;;  %v1371_v25 = vshll.u32 %v6087_v2, 16  ;;  %v6101_v32 = vcombine.low %v6078_v54, %v6085_v37  ;;  %v6118_v18 = vld [vmem:[#allocation7] ss:$0 sm:$0xff] }
  0xe1   : > { %v1358_v42 = vor.u32 %v1357_v10, %v1354_v9  ;;  %v1363_v45 = vrot.slane %v1361_v11, 5  ;;  %v920_v43 = vor.u32 %v918_v52, %v917_v61  ;;  %v928_v47 = vor.u32 %v926_v56, %v925_v62  ;;  %v492_v52 = vld [vmem:[#allocation2 + $0x3c] sm:$0x1]  ;;  %v542_v61 = vld [vmem:[#allocation2 + $0x44] sm:$0x1] }
  0xe2   : > { %7441 = vst [vmem:[#allocation22_spill] sm:$0xff] %v6095_v19  ;;  %7442 = vst [vmem:[#allocation23_spill] sm:$0xff] %v6101_v32  ;;  %3006 = vmatprep.mubr.bf16.mxu1 %v6095_v19  ;;  %v1367_v16 = vrot.slane %v1365_v21, 4  ;;  %v1373_v48 = vrot.slane %v1371_v25, 5  ;;  %v930_v50 = vrot.slane %v925_v62, 4  ;;  %v540_v57 = vsel %vm5847_vm9, 0, %v539_v6 }
  0xe3   : > { %3007 = vmatmul.mubr.bf16.gmra.mrb[8].mxu1 %v6070_v35  ;;  %v1359_v31 = vrot.slane %v1358_v42, 4  ;;  %v1097_v22 = vsel %vm5905_vm14, %v920_v43, %v1096_v3  ;;  %v929_v27 = vsel %vm5895_vm13, %v921_v26, %v928_v47  ;;  %541 = vst [vmem:[#allocation2 + $0x38] sm:$0x1] %v540_v57  ;;  %v4375_v60 = vpack.c.bf16 %v443_v5, %v443_v5  ;;  %v1019_v5 = vld [vmem:[#allocation2 + $0x30] sm:$0xf]  ;;  %v6128_v26 = vld [vmem:[%s5804_s15 + $0x28] sm:$0xff]  }
  0xe4   : > { %v1368_v17 = vor.u32 %v1367_v16, %v1363_v45  ;;  %1098 = vst [vmem:[#allocation2 + $0xb4] sm:$0xf] %v1097_v22  ;;  %v1101_v56 = vsel %vm5839_vm8, %v930_v50, %v1100_v14  ;;  %1099 = vst [vmem:[#allocation2 + $0xb8] sm:$0xf] %v929_v27  ;;  %v4376_v62 = vpack.c.bf16 %v444_v55, %v444_v55  ;;  %v4452_v3 = vunpack.c.l.bf16 %v4581_v36  ;;  %v5300_v57 = vld [vmem:[#allocation10 + $0x178] sm:$0xff]  }
  0xe5   : > { %v1364_v23 = vsel %vm5853_vm10, %v1359_v31, %v1363_v45  ;;  %1102 = vst [vmem:[#allocation2 + $0xbc] sm:$0x1] %v1101_v56  ;;  %v4453_v33 = vunpack.c.h.bf16 %v4581_v36  ;;  %v728_v7 = vshrl.u32 %v4375_v60, 16  ;;  %v731_v9 = vshll.u32 %v4375_v60, 16  ;;  %4846 = vmatprep.subr.bf16.mxu0 %v5300_v57  ;;  %v5301_v57 = vld [vmem:[#allocation10 + $0x138] sm:$0xff]  }
  0xe6   : > { %v1369_v6 = vrot.slane %v1368_v17, 4  ;;  %v493_v10 = vsel %vm5839_vm8, 0, %v492_v52  ;;  %v736_v11 = vshrl.u32 %v4376_v62, 16  ;;  %v739_v14 = vshll.u32 %v4376_v62, 16  ;;  %4847 = vmatpush3.bf16.msra.mxu0 %v5301_v57 }
  0xe7   : > { %v374_v21 = vmul.f32 %v6118_v18, %v4452_v3  ;;  %v375_v25 = vmul.f32 %v6118_v18, %v4453_v33  ;;  %494 = vst [vmem:[#allocation2 + $0x3c] sm:$0x1] %v493_v10  ;;  %v730_v42 = vrot.slane %v728_v7, 7  ;;  %v543_v45 = vsel %vm5847_vm9, 0, %v542_v61 }
  0xe8   : > { %v1374_v36 = vsel %vm5853_vm10, %v1369_v6, %v1373_v48  ;;  %v4218_v43 = vrot.slane %v5944_v15, 9  ;;  %v738_v47 = vrot.slane %v736_v11, 7  ;;  %544 = vst [vmem:[#allocation2 + $0x44] sm:$0x1] %v543_v45  ;;  %v1771_v48 = vrot.slane %v5952_v12, 5 }
  0xe9   : > { %v6130_v16 = vcombine.low %v1364_v23, %v1374_v36  ;;  %v413_v50 = vadd.f32 %v6089_v4, %v374_v21  ;;  %v414_v51 = vadd.f32 %v6089_v4, %v375_v25  ;;  %v733_v31 = vor.u32 %v731_v9, %v730_v42  ;;  %v495_v25 = vld [vmem:[#allocation2 + $0x48] sm:$0x1] }
  0xea   : > { %v734_v22 = vrot.slane %v730_v42, 4  ;;  %v1774_v55 = vrot.slane %v5954_v13, 5  ;;  %v741_v52 = vor.u32 %v739_v14, %v738_v47  ;;  %v743_v17 = vrot.slane %v738_v47, 4  ;;  %v1023_v27 = vld [vmem:[#allocation2 + $0x38] sm:$0x1] }
  0xeb   : > { %2918 = vmatprep.mubr.bf16.mxu0 %v6130_v16  ;;  %v1155_v15 = vld [vmem:[#allocation2 + $0xb4] sm:$0xf]  ;;  %v445_v56 = vmax.f32 %v413_v50, 0.0  ;;  %v4456_v60 = vunpack.c.l.bf16 %v6128_v26  ;;  %v1156_v61 = vld [vmem:[#allocation2 + $0xb8] sm:$0xf]  ;;  %v1020_v12 = vsel %vm5905_vm14, %v733_v31, %v1019_v5  ;;  %v1772_v13 = vsel %vm5828_vm7, %v4218_v43, %v1771_v48 }
  0xec   : > { %2919 = vmatmul.mubr.bf16.gmra.mrb[12].mxu0 %v6101_v32  ;;  %v1157_v23 = vld [vmem:[#allocation2 + $0xbc] sm:$0x1]  ;;  %v1640_v62 = vshrl.u32 %v1155_v15, 16  ;;  %v1643_v3 = vshll.u32 %v1155_v15, 16  ;;  %v1649_v33 = vshll.u32 %v1156_v61, 16  ;;  %v1653_v6 = vshrl.u32 %v1156_v61, 16 }
  0xed   : > { %v1659_v7 = vshll.u32 %v1157_v23, 16  ;;  %v6143_v9 = vcombine.low %v1155_v15, %v1156_v61  ;;  %1021 = vst [vmem:[#allocation2 + $0x30] sm:$0xf] %v1020_v12  ;;  %v742_v14 = vsel %vm5895_vm13, %v734_v22, %v741_v52  ;;  %v1024_v21 = vsel %vm5839_vm8, %v743_v17, %v1023_v27 }
  0xee   : > { %v1642_v10 = vrot.slane %v1640_v62, 4  ;;  %v1645_v11 = vrot.slane %v1643_v3, 5  ;;  %v1651_v5 = vrot.slane %v1649_v33, 5  ;;  %v1655_v36 = vrot.slane %v1653_v6, 4  ;;  %1022 = vst [vmem:[#allocation2 + $0x34] sm:$0xf] %v742_v14 }
  0xef   : > { %v1661_v42 = vrot.slane %v1659_v7, 5  ;;  %1025 = vst [vmem:[#allocation2 + $0x38] sm:$0x1] %v1024_v21  ;;  %v446_v45 = vmax.f32 %v414_v51, 0.0  ;;  %v4377_v47 = vpack.c.bf16 %v445_v56, %v445_v56  ;;  %v1773_v50 = vrot.slane %v1771_v48, 4  ;;  %v5304_v51 = vld [vmem:[#allocation10 + $0x200] sm:$0xff]  }
  0xf0   : > { %v1646_v43 = vor.u32 %v1645_v11, %v1642_v10  ;;  %v4457_v31 = vunpack.c.h.bf16 %v6128_v26  ;;  %v1656_v15 = vor.u32 %v1655_v36, %v1651_v5  ;;  %v376_v22 = vmul.f32 %v6118_v18, %v4456_v60  ;;  %v1026_v6 = vld [vmem:[#allocation2 + $0x3c] sm:$0xf]  ;;  %5080 = vmatprep.subr.bf16.mxu0 %v5304_v51  ;;  %v1030_v21 = vld [vmem:[#allocation2 + $0x44] sm:$0x1] }
  0xf1   : > { %v4378_v61 = vpack.c.bf16 %v446_v45, %v446_v45  ;;  %v496_v52 = vsel %vm5839_vm8, 0, %v495_v25  ;;  %v745_v27 = vshrl.u32 %v4377_v47, 16  ;;  %v748_v23 = vshll.u32 %v4377_v47, 16 }
  0xf2   : > { %v1647_v17 = vrot.slane %v1646_v43, 4  ;;  %v1775_v62 = vsel %vm5828_vm7, %v1773_v50, %v1774_v55  ;;  %497 = vst [vmem:[#allocation2 + $0x48] sm:$0x1] %v496_v52  ;;  %v1657_v48 = vrot.slane %v1656_v15, 4  ;;  %v377_v7 = vmul.f32 %v6118_v18, %v4457_v31  ;;  %v545_v50 = vld [vmem:[#allocation2 + $0x50] sm:$0x1] }
  0xf3   : > { %v753_v56 = vshrl.u32 %v4378_v61, 16  ;;  %v756_v26 = vshll.u32 %v4378_v61, 16  ;;  %v6155_v3 = vcombine.low %v1772_v13, %v1775_v62  ;;  %v747_v33 = vrot.slane %v745_v27, 7 }
  0xf4   : > { %v1652_v60 = vsel %vm5853_vm10, %v1647_v17, %v1651_v5  ;;  %v6159_v12 = vld [vmem:[#allocation2 + $0x30] sm:$0xf]  ;;  %v415_v10 = vadd.f32 %v6089_v4, %v376_v22  ;;  %v1662_v55 = vsel %vm5853_vm10, %v1657_v48, %v1661_v42  ;;  %v416_v47 = vadd.f32 %v6089_v4, %v377_v7  ;;  %v4583_v48 = vld [vmem:[%s5804_s15 + $0x30] sm:$0xff]  }
  0xf5   : > { %v1376_v11 = vshrl.u32 %v6159_v12, 16  ;;  %v1379_v13 = vshll.u32 %v6159_v12, 16  ;;  %v755_v14 = vrot.slane %v753_v56, 7  ;;  %v6167_v25 = vcombine.low %v1652_v60, %v1662_v55  ;;  %v6169_v5 = vld [vmem:[#allocation2 + $0x34] sm:$0xf] }
  0xf6   : > { %v6171_v36 = vld [vmem:[#allocation2 + $0x38] sm:$0x1]  ;;  %v750_v45 = vor.u32 %v748_v23, %v747_v33  ;;  %v751_v43 = vrot.slane %v747_v33, 4  ;;  %v1385_v57 = vshll.u32 %v6169_v5, 16  ;;  %v1389_v15 = vshrl.u32 %v6169_v5, 16 }
  0xf7   : > { %7443 = vst [vmem:[#allocation24_spill] sm:$0xff] %v6167_v25  ;;  %v1378_v31 = vrot.slane %v1376_v11, 4  ;;  %v1381_v42 = vrot.slane %v1379_v13, 5  ;;  %3014 = vmatprep.mubr.bf16.mxu1 %v6167_v25  ;;  %v1395_v61 = vshll.u32 %v6171_v36, 16  ;;  %v6180_v22 = vcombine.low %v6159_v12, %v6169_v5 }
  0xf8   : > { %v758_v52 = vor.u32 %v756_v26, %v755_v14  ;;  %v760_v17 = vrot.slane %v755_v14, 4  ;;  %3015 = vmatmul.mubr.bf16.gmra.mrb[12].mxu1 %v6143_v9  ;;  %v1387_v23 = vrot.slane %v1385_v57, 5  ;;  %v1391_v62 = vrot.slane %v1389_v15, 4 }
  0xf9   : > { %7444 = vst [vmem:[#allocation25_spill] sm:$0xff] %v6180_v22  ;;  %v1382_v27 = vor.u32 %v1381_v42, %v1378_v31  ;;  %v1027_v51 = vsel %vm5905_vm14, %v750_v45, %v1026_v6  ;;  %v1397_v56 = vrot.slane %v1395_v61, 5  ;;  %3055 = vmatprep.mubr.bf16.mxu1 %v5973_v38  ;;  %v447_v33 = vmax.f32 %v415_v10, 0.0  ;;  %v5279_v31 = vld [vmem:[#allocation10 + $0x180] sm:$0xff]   ;;  %v5285_v61 = vld [vmem:[#allocation10 + $0x1c8] sm:$0xff]  }
  0xfa   : > { %v759_v60 = vsel %vm5895_vm13, %v751_v43, %v758_v52  ;;  %1028 = vst [vmem:[#allocation2 + $0x3c] sm:$0xf] %v1027_v51  ;;  %v1031_v26 = vsel %vm5839_vm8, %v760_v17, %v1030_v21  ;;  %v1392_v55 = vor.u32 %v1391_v62, %v1387_v23  ;;  %v448_v11 = vmax.f32 %v416_v47, 0.0  ;;  %v498_v43 = vld [vmem:[#allocation2 + $0x54] sm:$0x1]  ;;  %v5287_v51 = vld [vmem:[#allocation10 + $0x188] sm:$0xff]  }
  0xfb   : > { %v1383_v7 = vrot.slane %v1382_v27, 4  ;;  %1029 = vst [vmem:[#allocation2 + $0x40] sm:$0xf] %v759_v60  ;;  %1032 = vst [vmem:[#allocation2 + $0x44] sm:$0x1] %v1031_v26  ;;  %v546_v6 = vsel %vm5847_vm9, 0, %v545_v50  ;;  %v4379_v13 = vpack.c.bf16 %v447_v33, %v447_v33  ;;  %v4460_v57 = vunpack.c.l.bf16 %v4583_v48 }
  0xfc   : > { %547 = vst [vmem:[#allocation2 + $0x50] sm:$0x1] %v546_v6  ;;  %v4219_v38 = vrot.slane %v6029_v44, 9  ;;  %v1778_v14 = vrot.slane %v6035_v63, 5  ;;  %v1781_v45 = vrot.slane %v6037_v0, 5  ;;  %v1393_v21 = vrot.slane %v1392_v55, 4 }
  0xfd   : > { %v1388_v10 = vsel %vm5853_vm10, %v1383_v7, %v1387_v23  ;;  %v4380_v42 = vpack.c.bf16 %v448_v11, %v448_v11  ;;  %v762_v47 = vshrl.u32 %v4379_v13, 16  ;;  %v765_v15 = vshll.u32 %v4379_v13, 16  ;;  %v548_v13 = vld [vmem:[#allocation2 + $0x5c] sm:$0x1] }
  0xfe   : > { %v1779_v50 = vsel %vm5828_vm7, %v4219_v38, %v1778_v14  ;;  %v1780_v52 = vrot.slane %v1778_v14, 4  ;;  %v1398_v44 = vsel %vm5853_vm10, %v1393_v21, %v1397_v56  ;;  %v4461_v17 = vunpack.c.h.bf16 %v4583_v48  ;;  %v5292_v21 = vld [vmem:[#allocation10 + $0x1d0] sm:$0xff]  }
  0xff   : > { %v770_v63 = vshrl.u32 %v4380_v42, 16  ;;  %v773_v0 = vshll.u32 %v4380_v42, 16  ;;  %v6202_v27 = vcombine.low %v1388_v10, %v1398_v44  ;;  %v764_v23 = vrot.slane %v762_v47, 7  ;;  %v1033_v10 = vld [vmem:[#allocation2 + $0x48] sm:$0xf] }
 0x100   : > { %v1782_v62 = vsel %vm5828_vm7, %v1780_v52, %v1781_v45  ;;  %v378_v60 = vmul.f32 %v6118_v18, %v4460_v57  ;;  %3056 = vmatmul.mubr.bf16.vlgmr.msra.gmra.mrb[16].mxu1 %v4233_v53  ;;  %v379_v48 = vmul.f32 %v6118_v18, %v4461_v17  ;;  %v499_v7 = vsel %vm5839_vm8, 0, %v498_v43  ;;  %v5293_v52 = vld [vmem:[#allocation10 + $0x190] sm:$0xff]  }
 0x101   : > { %v6210_v26 = vld [vmem:[#allocation2 + $0x3c] sm:$0xf]  ;;  %v772_v33 = vrot.slane %v770_v63, 7  ;;  %v6212_v56 = vcombine.low %v1779_v50, %v1782_v62  ;;  %2926 = vmatprep.mubr.bf16.mxu0 %v6202_v27  ;;  %4945 = vmatpush3.bf16.msra.mxu1 %v5279_v31  ;;  %v767_v53 = vor.u32 %v765_v15, %v764_v23  ;;  %500 = vst [vmem:[#allocation2 + $0x54] sm:$0x1] %v499_v7  ;;  %v768_v57 = vrot.slane %v764_v23, 4 }
 0x102   : > { %v6218_v55 = vld [vmem:[#allocation2 + $0x40] sm:$0xf]  ;;  %v6220_v11 = vld [vmem:[#allocation2 + $0x44] sm:$0x1]  ;;  %v1400_v46 = vshrl.u32 %v6210_v26, 16  ;;  %v1403_v49 = vshll.u32 %v6210_v26, 16  ;;  %v417_v6 = vadd.f32 %v6089_v4, %v378_v60  ;;  %2927 = vmatmul.mubr.bf16.gmra.mrb[16].mxu0 %v6180_v22  ;;  %3063 = vmatprep.mubr.bf16.mxu1 %v6048_v8  ;;  %v418_v23 = vadd.f32 %v6089_v4, %v379_v48 }
 0x103   : > { %v1409_v38 = vshll.u32 %v6218_v55, 16  ;;  %v1413_v14 = vshrl.u32 %v6218_v55, 16  ;;  %v1419_v45 = vshll.u32 %v6220_v11, 16  ;;  %v6231_v43 = vcombine.low %v6210_v26, %v6218_v55  ;;  %v1037_v15 = vld [vmem:[#allocation2 + $0x50] sm:$0x1]  ;;  %4946 = vmatprep.subr.bf16.mxu1 %v5285_v61  ;;  %v5298_v60 = vld [vmem:[#allocation10 + $0x1d8] sm:$0xff]  }
 0x104   : > { %v1402_v31 = vrot.slane %v1400_v46, 4  ;;  %v1405_v42 = vrot.slane %v1403_v49, 5  ;;  %v775_v47 = vor.u32 %v773_v0, %v772_v33  ;;  %v4584_v50 = vld [vmem:[%s5804_s15 + $0x38] sm:$0xff]   ;;  %v777_v62 = vrot.slane %v772_v33, 4 }
 0x105   : > { %7445 = vst [vmem:[#allocation26_spill] sm:$0xff] %v6231_v43  ;;  %v1411_v44 = vrot.slane %v1409_v38, 5  ;;  %v1415_v63 = vrot.slane %v1413_v14, 4  ;;  %v1421_v17 = vrot.slane %v1419_v45, 5  ;;  %v1034_v19 = vsel %vm5905_vm14, %v767_v53, %v1033_v10  ;;  %4947 = vmatpush3.bf16.msra.mxu1 %v5287_v51  ;;  %v6249_v45 = vld [vmem:[%s5804_s15 + $0x40] sm:$0xff]  }
 0x106   : > { %v1406_v7 = vor.u32 %v1405_v42, %v1402_v31  ;;  %v776_v25 = vsel %vm5895_vm13, %v768_v57, %v775_v47  ;;  %1035 = vst [vmem:[#allocation2 + $0x48] sm:$0xf] %v1034_v19  ;;  %v1038_v61 = vsel %vm5839_vm8, %v777_v62, %v1037_v15  ;;  %v449_v46 = vmax.f32 %v417_v6, 0.0  ;;  %4948 = vmatprep.subr.bf16.mxu1 %v5292_v21  ;;  %v501_v6 = vld [vmem:[#allocation2 + $0x60] sm:$0x1] }
 0x107   : > { %v1416_v0 = vor.u32 %v1415_v63, %v1411_v44  ;;  %1036 = vst [vmem:[#allocation2 + $0x4c] sm:$0xf] %v776_v25  ;;  %v549_v33 = vsel %vm5847_vm9, 0, %v548_v13  ;;  %1039 = vst [vmem:[#allocation2 + $0x50] sm:$0x1] %v1038_v61  ;;  %v450_v38 = vmax.f32 %v418_v23, 0.0  ;;  %v4464_v14 = vunpack.c.l.bf16 %v4584_v50 }
 0x108   : > { %v1407_v49 = vrot.slane %v1406_v7, 4  ;;  %550 = vst [vmem:[#allocation2 + $0x5c] sm:$0x1] %v549_v33  ;;  %v4220_v51 = vrot.slane %v6078_v54, 9  ;;  %v1785_v48 = vrot.slane %v6085_v37, 5  ;;  %3064 = vmatmul.mubr.bf16.gmra.mrb[20].mxu1 %v6155_v3  ;;  %v4381_v19 = vpack.c.bf16 %v449_v46, %v449_v46  ;;  %v5299_v13 = vld [vmem:[#allocation10 + $0x198] sm:$0xff]  }
 0x109   : > { %v1417_v53 = vrot.slane %v1416_v0, 4  ;;  %v1788_v25 = vrot.slane %v6087_v2, 5  ;;  %3071 = vmatprep.mubr.bf16.mxu1 %v6101_v32  ;;  %v4382_v21 = vpack.c.bf16 %v450_v38, %v450_v38  ;;  %4949 = vmatpush3.bf16.msra.mxu1 %v5293_v52  ;;  %v5303_v31 = vld [vmem:[#allocation10 + $0x1e0] sm:$0xff]   ;;  %v4465_v47 = vunpack.c.h.bf16 %v4584_v50  ;;  %v1040_v23 = vld [vmem:[#allocation2 + $0x54] sm:$0xf]  ;;  %v5306_v46 = vld [vmem:[#allocation10 + $0x1e8] sm:$0xff]  }
 0x10a   : > { %v1412_v10 = vsel %vm5853_vm10, %v1407_v49, %v1411_v44  ;;  %v1786_v54 = vsel %vm5828_vm7, %v4220_v51, %v1785_v48  ;;  %v1787_v37 = vrot.slane %v1785_v48, 4  ;;  %v779_v42 = vshrl.u32 %v4381_v19, 16  ;;  %4950 = vmatprep.subr.bf16.mxu1 %v5298_v60 }
 0x10b   : > { %v1422_v2 = vsel %vm5853_vm10, %v1417_v53, %v1421_v17  ;;  %v782_v57 = vshll.u32 %v4381_v19, 16  ;;  %v787_v63 = vshrl.u32 %v4382_v21, 16  ;;  %v790_v44 = vshll.u32 %v4382_v21, 16  ;;  %v5305_v17 = vld [vmem:[#allocation10 + $0x1a0] sm:$0xff]   ;;  %v551_v21 = vld [vmem:[#allocation2 + $0x68] sm:$0x1] }
 0x10c   : > { %v6258_v15 = vcombine.low %v1412_v10, %v1422_v2  ;;  %v1789_v62 = vsel %vm5828_vm7, %v1787_v37, %v1788_v25  ;;  %v781_v7 = vrot.slane %v779_v42, 7  ;;  %v380_v52 = vmul.f32 %v6118_v18, %v4464_v14 }
 0x10d   : > { %v6262_v0 = vcombine.low %v1786_v54, %v1789_v62  ;;  %v381_v61 = vmul.f32 %v6118_v18, %v4465_v47  ;;  %v6267_v50 = vld [vmem:[#allocation2 + $0x48] sm:$0xf]  ;;  %v789_v33 = vrot.slane %v787_v63, 7  ;;  %v502_v49 = vsel %vm5839_vm8, 0, %v501_v6  ;;  %4951 = vmatpush3.bf16.msra.mxu1 %v5299_v13 }
 0x10e   : > { %2934 = vmatprep.mubr.bf16.mxu0 %v6258_v15  ;;  %v6269_v60 = vld [vmem:[#allocation2 + $0x4c] sm:$0xf]  ;;  %v4468_v38 = vunpack.c.l.bf16 %v6249_v45  ;;  %v4469_v51 = vunpack.c.h.bf16 %v6249_v45  ;;  %v6276_v48 = vld [vmem:[#allocation2 + $0x50] sm:$0x1]  ;;  %v1424_v53 = vshrl.u32 %v6267_v50, 16  ;;  %v1427_v19 = vshll.u32 %v6267_v50, 16  ;;  %4952 = vmatprep.subr.bf16.mxu1 %v5303_v31 }
 0x10f   : > { %2935 = vmatmul.mubr.bf16.gmra.mrb[20].mxu0 %v6231_v43  ;;  %v1433_v25 = vshll.u32 %v6269_v60, 16  ;;  %v1437_v14 = vshrl.u32 %v6269_v60, 16  ;;  %503 = vst [vmem:[#allocation2 + $0x60] sm:$0x1] %v502_v49  ;;  %v1443_v6 = vshll.u32 %v6276_v48, 16  ;;  %v6285_v45 = vcombine.low %v6267_v50, %v6269_v60 }
 0x110   : > { %v784_v13 = vor.u32 %v782_v57, %v781_v7  ;;  %v785_v10 = vrot.slane %v781_v7, 4  ;;  %v1426_v54 = vrot.slane %v1424_v53, 4  ;;  %v1429_v37 = vrot.slane %v1427_v19, 5  ;;  %3072 = vmatmul.mubr.bf16.gmra.mrb[24].mxu1 %v6212_v56  ;;  %v1044_v47 = vld [vmem:[#allocation2 + $0x5c] sm:$0x1] }
 0x111   : > { %7446 = vst [vmem:[#allocation27_spill] sm:$0xff] %v6285_v45  ;;  %v1435_v2 = vrot.slane %v1433_v25, 5  ;;  %v1439_v42 = vrot.slane %v1437_v14, 4  ;;  %v1445_v63 = vrot.slane %v1443_v6, 5  ;;  %v792_v62 = vor.u32 %v790_v44, %v789_v33  ;;  %3079 = vmatprep.mubr.bf16.mxu1 %v6180_v22  ;;  %4953 = vmatpush3.bf16.msra.mxu1 %v5305_v17  ;;  %v5309_v25 = vld [vmem:[#allocation10 + $0x1f0] sm:$0xff]  }
 0x112   : > { %v794_v49 = vrot.slane %v789_v33, 4  ;;  %v1041_v31 = vsel %vm5905_vm14, %v784_v13, %v1040_v23  ;;  %v1430_v57 = vor.u32 %v1429_v37, %v1426_v54  ;;  %v419_v53 = vadd.f32 %v6089_v4, %v380_v52  ;;  %4954 = vmatprep.subr.bf16.mxu1 %v5306_v46 }
 0x113   : > { %v1440_v7 = vor.u32 %v1439_v42, %v1435_v2  ;;  %1042 = vst [vmem:[#allocation2 + $0x54] sm:$0xf] %v1041_v31  ;;  %v420_v19 = vadd.f32 %v6089_v4, %v381_v61  ;;  %v793_v44 = vsel %vm5895_vm13, %v785_v10, %v792_v62  ;;  %v552_v23 = vsel %vm5847_vm9, 0, %v551_v21  ;;  %v5311_v62 = vld [vmem:[#allocation10 + $0x1b0] sm:$0xff]  }
 0x114   : > { %v1045_v33 = vsel %vm5839_vm8, %v794_v49, %v1044_v47  ;;  %v4221_v17 = vrot.slane %v6159_v12, 9  ;;  %v1431_v14 = vrot.slane %v1430_v57, 4  ;;  %1043 = vst [vmem:[#allocation2 + $0x58] sm:$0xf] %v793_v44  ;;  %v451_v52 = vmax.f32 %v419_v53, 0.0  ;;  %v6315_v57 = vld [vmem:[%s5804_s15 + $0x48] sm:$0xff]  }
 0x115   : > { %v1441_v6 = vrot.slane %v1440_v7, 4  ;;  %1046 = vst [vmem:[#allocation2 + $0x5c] sm:$0x1] %v1045_v33  ;;  %v452_v13 = vmax.f32 %v420_v19, 0.0  ;;  %553 = vst [vmem:[#allocation2 + $0x68] sm:$0x1] %v552_v23  ;;  %v382_v10 = vmul.f32 %v6118_v18, %v4468_v38  ;;  %v383_v54 = vmul.f32 %v6118_v18, %v4469_v51  ;;  %4955 = vmatpush3.bf16.msra.mxu1 %v5308_v59 }
 0x116   : > { %v1792_v61 = vrot.slane %v6169_v5, 5  ;;  %v1795_v46 = vrot.slane %v6171_v36, 5  ;;  %v1436_v21 = vsel %vm5853_vm10, %v1431_v14, %v1435_v2  ;;  %v4383_v37 = vpack.c.bf16 %v451_v52, %v451_v52  ;;  %v504_v47 = vld [vmem:[#allocation2 + $0x6c] sm:$0x1]  ;;  %4956 = vmatprep.subr.bf16.mxu1 %v5309_v25  ;;  %v5312_v51 = vld [vmem:[#allocation10 + $0x1f8] sm:$0xff]  }
 0x117   : > { %v1446_v12 = vsel %vm5853_vm10, %v1441_v6, %v1445_v63  ;;  %v4384_v42 = vpack.c.bf16 %v452_v13, %v452_v13  ;;  %v421_v59 = vadd.f32 %v6089_v4, %v382_v10  ;;  %v422_v19 = vadd.f32 %v6089_v4, %v383_v54  ;;  %v5314_v6 = vld [vmem:[#allocation10 + $0x1b8] sm:$0xff]  }
 0x118   : > { %v6308_v5 = vcombine.low %v1436_v21, %v1446_v12  ;;  %v1793_v36 = vsel %vm5828_vm7, %v4221_v17, %v1792_v61  ;;  %v1794_v38 = vrot.slane %v1792_v61, 4  ;;  %3080 = vmatmul.mubr.bf16.gmra.mrb[28].mxu1 %v6262_v0  ;;  %v796_v2 = vshrl.u32 %v4383_v37, 16 }
 0x119   : > { %v799_v49 = vshll.u32 %v4383_v37, 16  ;;  %v804_v63 = vshrl.u32 %v4384_v42, 16  ;;  %v807_v31 = vshll.u32 %v4384_v42, 16  ;;  %3087 = vmatprep.mubr.bf16.mxu1 %v6231_v43  ;;  %v453_v25 = vmax.f32 %v421_v59, 0.0  ;;  %4957 = vmatpush3.bf16.msra.mxu1 %v5311_v62 }
 0x11a   : > { %2942 = vmatprep.mubr.bf16.mxu0 %v6308_v5  ;;  %v6318_v7 = vld [vmem:[#allocation2 + $0x54] sm:$0xf]  ;;  %v1796_v53 = vsel %vm5828_vm7, %v1794_v38, %v1795_v46  ;;  %v505_v44 = vsel %vm5839_vm8, 0, %v504_v47  ;;  %v798_v17 = vrot.slane %v796_v2, 7  ;;  %v4472_v10 = vunpack.c.l.bf16 %v6315_v57  ;;  %4958 = vmatprep.subr.bf16.mxu1 %v5312_v51  ;;  %v1047_v47 = vld [vmem:[#allocation2 + $0x60] sm:$0xf] }
 0x11b   : > { %2943 = vmatmul.mubr.bf16.gmra.mrb[24].mxu0 %v6285_v45  ;;  %v1448_v33 = vshrl.u32 %v6318_v7, 16  ;;  %v1451_v23 = vshll.u32 %v6318_v7, 16  ;;  %v806_v14 = vrot.slane %v804_v63, 7  ;;  %506 = vst [vmem:[#allocation2 + $0x6c] sm:$0x1] %v505_v44  ;;  %v6333_v61 = vcombine.low %v1793_v36, %v1796_v53 }
 0x11c   : > { %v6329_v52 = vld [vmem:[#allocation2 + $0x58] sm:$0xf]  ;;  %v6331_v13 = vld [vmem:[#allocation2 + $0x5c] sm:$0x1]  ;;  %v4385_v46 = vpack.c.bf16 %v453_v25, %v453_v25  ;;  %v4473_v54 = vunpack.c.h.bf16 %v6315_v57  ;;  %v801_v36 = vor.u32 %v799_v49, %v798_v17  ;;  %v802_v59 = vrot.slane %v798_v17, 4 }
 0x11d   : > { %v1450_v21 = vrot.slane %v1448_v33, 4  ;;  %v1453_v12 = vrot.slane %v1451_v23, 5  ;;  %v1457_v37 = vshll.u32 %v6329_v52, 16  ;;  %v1461_v42 = vshrl.u32 %v6329_v52, 16  ;;  %v554_v2 = vld [vmem:[#allocation2 + $0x74] sm:$0x1]  ;;  %4959 = vmatpush3.bf16.msra.mxu1 %v5314_v6 }
 0x11e   : > { %v1467_v62 = vshll.u32 %v6331_v13, 16  ;;  %v6342_v38 = vcombine.low %v6318_v7, %v6329_v52  ;;  %v809_v51 = vor.u32 %v807_v31, %v806_v14  ;;  %v1051_v25 = vld [vmem:[#allocation2 + $0x68] sm:$0x1]  ;;  %v811_v33 = vrot.slane %v806_v14, 4 }
 0x11f   : > { %v1454_v63 = vor.u32 %v1453_v12, %v1450_v21  ;;  %v1459_v53 = vrot.slane %v1457_v37, 5  ;;  %v1463_v57 = vrot.slane %v1461_v42, 4  ;;  %v1048_v23 = vsel %vm5905_vm14, %v801_v36, %v1047_v47 }
 0x120   : > { %7447 = vst [vmem:[#allocation28_spill] sm:$0xff] %v6342_v38  ;;  %v1469_v44 = vrot.slane %v1467_v62, 5  ;;  %v454_v41 = vmax.f32 %v422_v19, 0.0  ;;  %v810_v32 = vsel %vm5895_vm13, %v802_v59, %v809_v51  ;;  %1049 = vst [vmem:[#allocation2 + $0x60] sm:$0xf] %v1048_v23  ;;  %3088 = vmatmul.mubr.bf16.gmra.mrb[32].mxu1 %v6333_v61  ;;  %v555_v49 = vsel %vm5847_vm9, 0, %v554_v2 }
 0x121   : > { %v1455_v43 = vrot.slane %v1454_v63, 4  ;;  %v1464_v22 = vor.u32 %v1463_v57, %v1459_v53  ;;  %1050 = vst [vmem:[#allocation2 + $0x64] sm:$0xf] %v810_v32  ;;  %v1052_v31 = vsel %vm5839_vm8, %v811_v33, %v1051_v25  ;;  %556 = vst [vmem:[#allocation2 + $0x74] sm:$0x1] %v555_v49  ;;  %v813_v14 = vshrl.u32 %v4385_v46, 16  ;;  %3095 = vmatprep.mubr.bf16.mxu1 %v6285_v45 }
 0x122   : > { %v4386_v17 = vpack.c.bf16 %v454_v41, %v454_v41  ;;  %v816_v6 = vshll.u32 %v4385_v46, 16  ;;  %1053 = vst [vmem:[#allocation2 + $0x68] sm:$0x1] %v1052_v31  ;;  %v4222_v12 = vrot.slane %v6210_v26, 9  ;;  %v1799_v37 = vrot.slane %v6218_v55, 5  ;;  %v6373_v25 = vld [vmem:[%s5804_s15 + $0x50] sm:$0xff]  }
 0x123   : > { %v1460_v19 = vsel %vm5853_vm10, %v1455_v43, %v1459_v53  ;;  %v1465_v21 = vrot.slane %v1464_v22, 4  ;;  %v815_v42 = vrot.slane %v813_v14, 7  ;;  %v1802_v62 = vrot.slane %v6220_v11, 5  ;;  %v507_v41 = vld [vmem:[#allocation2 + $0x78] sm:$0x1] }
 0x124   : > { %v821_v32 = vshrl.u32 %v4386_v17, 16  ;;  %v824_v47 = vshll.u32 %v4386_v17, 16  ;;  %v1054_v36 = vld [vmem:[#allocation2 + $0x6c] sm:$0xf]  ;;  %v1800_v43 = vsel %vm5828_vm7, %v4222_v12, %v1799_v37  ;;  %v1801_v22 = vrot.slane %v1799_v37, 4 }
 0x125   : > { %v1470_v46 = vsel %vm5853_vm10, %v1465_v21, %v1469_v44  ;;  %v384_v59 = vmul.f32 %v6118_v18, %v4472_v10  ;;  %v818_v55 = vor.u32 %v816_v6, %v815_v42  ;;  %v819_v2 = vrot.slane %v815_v42, 4  ;;  %v557_v42 = vld [vmem:[#allocation2 + $0x80] sm:$0x1] }
 0x126   : > { %v6364_v26 = vcombine.low %v1460_v19, %v1470_v46  ;;  %v823_v63 = vrot.slane %v821_v32, 7  ;;  %v1803_v53 = vsel %vm5828_vm7, %v1801_v22, %v1802_v62  ;;  %v385_v11 = vmul.f32 %v6118_v18, %v4473_v54 }
 0x127   : > { %v423_v57 = vadd.f32 %v6089_v4, %v384_v59  ;;  %v508_v51 = vsel %vm5839_vm8, 0, %v507_v41  ;;  %v6376_v10 = vld [vmem:[#allocation2 + $0x60] sm:$0xf]  ;;  %v1055_v23 = vsel %vm5905_vm14, %v818_v55, %v1054_v36  ;;  %v6380_v49 = vcombine.low %v1800_v43, %v1803_v53 }
 0x128   : > { %2950 = vmatprep.mubr.bf16.mxu0 %v6364_v26  ;;  %v826_v44 = vor.u32 %v824_v47, %v823_v63  ;;  %v828_v33 = vrot.slane %v823_v63, 4  ;;  %509 = vst [vmem:[#allocation2 + $0x78] sm:$0x1] %v508_v51  ;;  %v6383_v54 = vld [vmem:[#allocation2 + $0x64] sm:$0xf]  ;;  %v1472_v31 = vshrl.u32 %v6376_v10, 16  ;;  %v424_v6 = vadd.f32 %v6089_v4, %v385_v11 }
 0x129   : > { %2951 = vmatmul.mubr.bf16.gmra.mrb[28].mxu0 %v6342_v38  ;;  %v1475_v17 = vshll.u32 %v6376_v10, 16  ;;  %1056 = vst [vmem:[#allocation2 + $0x6c] sm:$0xf] %v1055_v23  ;;  %v1058_v14 = vld [vmem:[#allocation2 + $0x74] sm:$0x1]  ;;  %v1481_v21 = vshll.u32 %v6383_v54, 16  ;;  %3096 = vmatmul.mubr.bf16.gmra.mrb[36].mxu1 %v6380_v49  ;;  %v4476_v32 = vunpack.c.l.bf16 %v6373_v25 }
 0x12a   : > { %v6388_v19 = vld [vmem:[#allocation2 + $0x68] sm:$0x1]  ;;  %v1485_v12 = vshrl.u32 %v6383_v54, 16  ;;  %v827_v37 = vsel %vm5895_vm13, %v819_v2, %v826_v44  ;;  %v1474_v47 = vrot.slane %v1472_v31, 4  ;;  %v1059_v4 = vsel %vm5839_vm8, %v828_v33, %v1058_v14  ;;  %3103 = vmatprep.mubr.bf16.mxu1 %v6342_v38 }
 0x12b   : > { %v1477_v62 = vrot.slane %v1475_v17, 5  ;;  %v1491_v41 = vshll.u32 %v6388_v19, 16  ;;  %1057 = vst [vmem:[#allocation2 + $0x70] sm:$0xf] %v827_v37  ;;  %v1483_v46 = vrot.slane %v1481_v21, 5  ;;  %v455_v43 = vmax.f32 %v423_v57, 0.0 }
 0x12c   : > { %v1487_v36 = vrot.slane %v1485_v12, 4  ;;  %1060 = vst [vmem:[#allocation2 + $0x74] sm:$0x1] %v1059_v4  ;;  %v456_v22 = vmax.f32 %v424_v6, 0.0  ;;  %v6402_v2 = vcombine.low %v6376_v10, %v6383_v54  ;;  %v558_v63 = vsel %vm5847_vm9, 0, %v557_v42 }
 0x12d   : > { %v1478_v59 = vor.u32 %v1477_v62, %v1474_v47  ;;  %v1493_v55 = vrot.slane %v1491_v41, 5  ;;  %559 = vst [vmem:[#allocation2 + $0x80] sm:$0x1] %v558_v63  ;;  %v4387_v11 = vpack.c.bf16 %v455_v43, %v455_v43  ;;  %v4223_v44 = vrot.slane %v6267_v50, 9 }
 0x12e   : > { %7448 = vst [vmem:[#allocation29_spill] sm:$0xff] %v6402_v2  ;;  %v1488_v53 = vor.u32 %v1487_v36, %v1483_v46  ;;  %v4388_v51 = vpack.c.bf16 %v456_v22, %v456_v22  ;;  %v1806_v23 = vrot.slane %v6269_v60, 5  ;;  %v1809_v57 = vrot.slane %v6276_v48, 5 }
 0x12f   : > { %v1479_v33 = vrot.slane %v1478_v59, 4  ;;  %v4477_v31 = vunpack.c.h.bf16 %v6373_v25  ;;  %v830_v6 = vshrl.u32 %v4387_v11, 16  ;;  %v833_v21 = vshll.u32 %v4387_v11, 16  ;;  %v1061_v41 = vld [vmem:[#allocation2 + $0x78] sm:$0xf] }
 0x130   : > { %v1489_v17 = vrot.slane %v1488_v53, 4  ;;  %v6410_v14 = vld [vmem:[#allocation2 + $0x6c] sm:$0xf]  ;;  %v838_v12 = vshrl.u32 %v4388_v51, 16  ;;  %v841_v47 = vshll.u32 %v4388_v51, 16  ;;  %v386_v4 = vmul.f32 %v6118_v18, %v4476_v32 }
 0x131   : > { %v1484_v37 = vsel %vm5853_vm10, %v1479_v33, %v1483_v46  ;;  %v1496_v42 = vshrl.u32 %v6410_v14, 16  ;;  %v1499_v50 = vshll.u32 %v6410_v14, 16  ;;  %v832_v25 = vrot.slane %v830_v6, 7 }
 0x132   : > { %v1494_v60 = vsel %vm5853_vm10, %v1489_v17, %v1493_v55  ;;  %v6418_v48 = vld [vmem:[#allocation2 + $0x70] sm:$0xf]  ;;  %v840_v62 = vrot.slane %v838_v12, 7  ;;  %v1807_v11 = vsel %vm5828_vm7, %v4223_v44, %v1806_v23  ;;  %v510_v12 = vld [vmem:[#allocation2 + $0x84] sm:$0x1] }
 0x133   : > { %v6421_v36 = vcombine.low %v1484_v37, %v1494_v60  ;;  %v6423_v43 = vld [vmem:[#allocation2 + $0x74] sm:$0x1]  ;;  %v1498_v46 = vrot.slane %v1496_v42, 4  ;;  %v1501_v22 = vrot.slane %v1499_v50, 5  ;;  %v1505_v59 = vshll.u32 %v6418_v48, 16 }
 0x134   : > { %v1509_v63 = vshrl.u32 %v6418_v48, 16  ;;  %v1515_v53 = vshll.u32 %v6423_v43, 16  ;;  %v835_v55 = vor.u32 %v833_v21, %v832_v25  ;;  %v836_v33 = vrot.slane %v832_v25, 4  ;;  %v1065_v6 = vld [vmem:[#allocation2 + $0x80] sm:$0x1] }
 0x135   : > { %7449 = vst [vmem:[#allocation30_spill] sm:$0xff] %v6421_v36  ;;  %2958 = vmatprep.mubr.bf16.mxu0 %v6421_v36  ;;  %v1502_v51 = vor.u32 %v1501_v22, %v1498_v46  ;;  %v1507_v32 = vrot.slane %v1505_v59, 5  ;;  %v843_v17 = vor.u32 %v841_v47, %v840_v62  ;;  %v845_v50 = vrot.slane %v840_v62, 4  ;;  %v560_v21 = vld [vmem:[#allocation2 + $0x8c] sm:$0x1] }
 0x136   : > { %2959 = vmatmul.mubr.bf16.gmra.mrb[32].mxu0 %v6402_v2  ;;  %v1511_v37 = vrot.slane %v1509_v63, 4  ;;  %v1517_v42 = vrot.slane %v1515_v53, 5  ;;  %v1062_v60 = vsel %vm5905_vm14, %v835_v55, %v1061_v41  ;;  %v1808_v46 = vrot.slane %v1806_v23, 4  ;;  %v6439_v59 = vld [vmem:[#allocation9] ss:$0 sm:$0xff] }
 0x137   : > { %v1503_v38 = vrot.slane %v1502_v51, 4  ;;  %v844_v44 = vsel %vm5895_vm13, %v836_v33, %v843_v17  ;;  %1063 = vst [vmem:[#allocation2 + $0x78] sm:$0xf] %v1062_v60  ;;  %v387_v25 = vmul.f32 %v6118_v18, %v4477_v31  ;;  %v1066_v22 = vsel %vm5839_vm8, %v845_v50, %v1065_v6 }
 0x138   : > { %v1512_v47 = vor.u32 %v1511_v37, %v1507_v32  ;;  %1064 = vst [vmem:[#allocation2 + $0x7c] sm:$0xf] %v844_v44  ;;  %v425_v62 = vadd.f32 %v6439_v59, %v386_v4  ;;  %v511_v41 = vsel %vm5839_vm8, 0, %v510_v12  ;;  %1067 = vst [vmem:[#allocation2 + $0x80] sm:$0x1] %v1066_v22  ;;  %v1810_v23 = vsel %vm5828_vm7, %v1808_v46, %v1809_v57 }
 0x139   : > { %v1508_v63 = vsel %vm5853_vm10, %v1503_v38, %v1507_v32  ;;  %v426_v18 = vadd.f32 %v6439_v59, %v387_v25  ;;  %512 = vst [vmem:[#allocation2 + $0x84] sm:$0x1] %v511_v41  ;;  %v561_v31 = vsel %vm5847_vm9, 0, %v560_v21  ;;  %v6451_v55 = vcombine.low %v1807_v11, %v1810_v23 }
 0x13a   : > { %v1513_v53 = vrot.slane %v1512_v47, 4  ;;  %v457_v4 = vmax.f32 %v425_v62, 0.0  ;;  %562 = vst [vmem:[#allocation2 + $0x8c] sm:$0x1] %v561_v31  ;;  %v4224_v51 = vrot.slane %v6318_v7, 9  ;;  %v6456_v38 = vcombine.low %v6410_v14, %v6418_v48 }
 0x13b   : > { %v458_v32 = vmax.f32 %v426_v18, 0.0  ;;  %3104 = vmatmul.mubr.bf16.gmra.mrb[40].mxu1 %v6451_v55  ;;  %v1813_v17 = vrot.slane %v6329_v52, 5  ;;  %v1816_v11 = vrot.slane %v6331_v13, 5  ;;  %v4225_v7 = vrot.slane %v6376_v10, 9 }
 0x13c   : > { %v1518_v57 = vsel %vm5853_vm10, %v1513_v53, %v1517_v42  ;;  %v4389_v33 = vpack.c.bf16 %v457_v4, %v457_v4  ;;  %3111 = vmatprep.mubr.bf16.mxu1 %v6402_v2  ;;  %v1820_v37 = vrot.slane %v6383_v54, 5  ;;  %v1823_v52 = vrot.slane %v6388_v19, 5 }
 0x13d   : > { %v6463_v6 = vcombine.low %v1508_v63, %v1518_v57  ;;  %v4390_v12 = vpack.c.bf16 %v458_v32, %v458_v32  ;;  %v1814_v21 = vsel %vm5828_vm7, %v4224_v51, %v1813_v17  ;;  %v1815_v19 = vrot.slane %v1813_v17, 4 }
 0x13e   : > { %v6468_v50 = vld [vmem:[#allocation2 + $0x78] sm:$0xf]  ;;  %v847_v60 = vshrl.u32 %v4389_v33, 16  ;;  %v850_v42 = vshll.u32 %v4389_v33, 16  ;;  %v1822_v45 = vrot.slane %v1820_v37, 4 }
 0x13f   : > { %7450 = vst [vmem:[#allocation31_spill] sm:$0xff] %v6463_v6  ;;  %2966 = vmatprep.mubr.bf16.mxu0 %v6463_v6  ;;  %v6474_v13 = vld [vmem:[#allocation2 + $0x7c] sm:$0xf]  ;;  %v1520_v44 = vshrl.u32 %v6468_v50, 16  ;;  %v1523_v46 = vshll.u32 %v6468_v50, 16  ;;  %v855_v10 = vshrl.u32 %v4390_v12, 16 }
 0x140   : > { %v858_v25 = vshll.u32 %v4390_v12, 16  ;;  %2967 = vmatmul.mubr.bf16.gmra.mrb[36].mxu0 %v6456_v38  ;;  %v6479_v54 = vld [vmem:[#allocation2 + $0x80] sm:$0x1]  ;;  %v1529_v47 = vshll.u32 %v6474_v13, 16  ;;  %v1533_v22 = vshrl.u32 %v6474_v13, 16  ;;  %v849_v62 = vrot.slane %v847_v60, 7 }
 0x141   : > { %v1522_v41 = vrot.slane %v1520_v44, 4  ;;  %v1525_v63 = vrot.slane %v1523_v46, 5  ;;  %v1539_v23 = vshll.u32 %v6479_v54, 16  ;;  %v857_v18 = vrot.slane %v855_v10, 7  ;;  %v1068_v31 = vld [vmem:[#allocation2 + $0x84] sm:$0xf] }
 0x142   : > { %v1531_v53 = vrot.slane %v1529_v47, 5  ;;  %v1535_v4 = vrot.slane %v1533_v22, 4  ;;  %v852_v51 = vor.u32 %v850_v42, %v849_v62  ;;  %v853_v32 = vrot.slane %v849_v62, 4  ;;  %v1072_v57 = vld [vmem:[#allocation2 + $0x8c] sm:$0x1] }
 0x143   : > { %v1526_v33 = vor.u32 %v1525_v63, %v1522_v41  ;;  %v860_v12 = vor.u32 %v858_v25, %v857_v18  ;;  %v862_v2 = vrot.slane %v857_v18, 4  ;;  %v1541_v36 = vrot.slane %v1539_v23, 5 }
 0x144   : > { %v1536_v6 = vor.u32 %v1535_v4, %v1531_v53  ;;  %v1069_v17 = vsel %vm5905_vm14, %v852_v51, %v1068_v31  ;;  %v1817_v60 = vsel %vm5828_vm7, %v1815_v19, %v1816_v11  ;;  %v1821_v11 = vsel %vm5828_vm7, %v4225_v7, %v1820_v37 }
 0x145   : > { %v1527_v44 = vrot.slane %v1526_v33, 4  ;;  %v861_v46 = vsel %vm5895_vm13, %v853_v32, %v860_v12  ;;  %1070 = vst [vmem:[#allocation2 + $0x84] sm:$0xf] %v1069_v17  ;;  %v1073_v42 = vsel %vm5839_vm8, %v862_v2, %v1072_v57  ;;  %v6492_v10 = vcombine.low %v1814_v21, %v1817_v60 }
 0x146   : > { %v1537_v25 = vrot.slane %v1536_v6, 4  ;;  %1071 = vst [vmem:[#allocation2 + $0x88] sm:$0xf] %v861_v46  ;;  %1074 = vst [vmem:[#allocation2 + $0x8c] sm:$0x1] %v1073_v42  ;;  %v6503_v62 = vcombine.low %v6468_v50, %v6474_v13  ;;  %v1824_v2 = vsel %vm5828_vm7, %v1822_v45, %v1823_v52  ;;  %v1827_v6 = vrot.slane %v6418_v48, 5 }
 0x147   : > { %v1532_v47 = vsel %vm5853_vm10, %v1527_v44, %v1531_v53  ;;  %3112 = vmatmul.mubr.bf16.gmra.mrb[44].mxu1 %v6492_v10  ;;  %v6512_v7 = vcombine.low %v1821_v11, %v1824_v2  ;;  %v4226_v37 = vrot.slane %v6410_v14, 9  ;;  %v1830_v41 = vrot.slane %v6423_v43, 5  ;;  %v4592_v53 = vld [vmem:[%s5804_s15 + $0x78] sm:$0xff]  }
 0x148   : > { %v1542_v22 = vsel %vm5853_vm10, %v1537_v25, %v1541_v36  ;;  %3119 = vmatprep.mubr.bf16.mxu1 %v6456_v38  ;;  %v1829_v19 = vrot.slane %v1827_v6, 4  ;;  %v1834_v43 = vrot.slane %v6474_v13, 5  ;;  %v4496_v17 = vunpack.c.l.bf16 %v4592_v53 }
 0x149   : > { %v6509_v21 = vcombine.low %v1532_v47, %v1542_v22  ;;  %v1828_v57 = vsel %vm5828_vm7, %v4226_v37, %v1827_v6  ;;  %v4227_v25 = vrot.slane %v6468_v50, 9  ;;  %v4497_v13 = vunpack.c.h.bf16 %v4592_v53  ;;  %v525_v47 = vld [vmem:[#allocation2 + $0xc0] sm:$0x1]  ;;  %v5324_v37 = vld [vmem:[#allocation7] ss:$0 sm:$0xff] }
 0x14a   : > { %v1831_v33 = vsel %vm5828_vm7, %v1829_v19, %v1830_v41  ;;  %v1836_v22 = vrot.slane %v1834_v43, 4  ;;  %v1837_v2 = vrot.slane %v6479_v54, 5  ;;  %v396_v19 = vmul.f32 %v5324_v37, %v4496_v17  ;;  %v575_v41 = vld [vmem:[#allocation2 + $0xc8] sm:$0x1] }
 0x14b   : > { %2974 = vmatprep.mubr.bf16.mxu0 %v6509_v21  ;;  %v6536_v42 = vcombine.low %v1828_v57, %v1831_v33  ;;  %v397_v50 = vmul.f32 %v5324_v37, %v4497_v13  ;;  %v1835_v54 = vsel %vm5828_vm7, %v4227_v25, %v1834_v43  ;;  %v5307_v13 = vld [vmem:[#allocation10 + $0x208] sm:$0xff]  }
 0x14c   : > { %2975 = vmatmul.mubr.bf16.gmra.mrb[40].mxu0 %v6503_v62  ;;  %v6515_v36 = vld [vmem:[#allocation2 + $0x84] sm:$0xf]  ;;  %v1838_v53 = vsel %vm5828_vm7, %v1836_v22, %v1837_v2 }
 0x14d   : > { %v6519_v63 = vld [vmem:[#allocation2 + $0x88] sm:$0xf]  ;;  %v6521_v45 = vld [vmem:[#allocation2 + $0x8c] sm:$0x1]  ;;  %v1544_v48 = vshrl.u32 %v6515_v36, 16  ;;  %v1547_v52 = vshll.u32 %v6515_v36, 16  ;;  %v6566_v57 = vcombine.low %v1835_v54, %v1838_v53 }
 0x14e   : > { %v1553_v23 = vshll.u32 %v6519_v63, 16  ;;  %v1557_v18 = vshrl.u32 %v6519_v63, 16  ;;  %v1563_v31 = vshll.u32 %v6521_v45, 16  ;;  %v5310_v53 = vld [vmem:[#allocation10 + $0x210] sm:$0xff]  }
 0x14f   : > { %v1546_v4 = vrot.slane %v1544_v48, 4  ;;  %v1549_v14 = vrot.slane %v1547_v52, 5  ;;  %3120 = vmatmul.mubr.bf16.gmra.mrb[48].mxu1 %v6512_v7  ;;  %v6546_v52 = vcombine.low %v6515_v36, %v6519_v63 }
 0x150   : > { %v1555_v51 = vrot.slane %v1553_v23, 5  ;;  %v1559_v32 = vrot.slane %v1557_v18, 4  ;;  %3127 = vmatprep.mubr.bf16.mxu1 %v6503_v62  ;;  %v1565_v44 = vrot.slane %v1563_v31, 5  ;;  %v526_v23 = vsel %vm5839_vm8, 0, %v525_v47  ;;  %v5325_v47 = vld [vmem:[#allocation2 + $0x94] sm:$0xf] }
 0x151   : > { %v1550_v12 = vor.u32 %v1549_v14, %v1546_v4  ;;  %v435_v31 = vadd.f32 %v6439_v59, %v396_v19  ;;  %527 = vst [vmem:[#allocation2 + $0xc0] sm:$0x1] %v526_v23  ;;  %v1841_v4 = vrot.slane %v6519_v63, 5  ;;  %v436_v14 = vadd.f32 %v6439_v59, %v397_v50  ;;  %v5327_v23 = vld [vmem:[#allocation2 + $0x90] sm:$0xf] }
 0x152   : > { %v1560_v60 = vor.u32 %v1559_v32, %v1555_v51  ;;  %v1844_v59 = vrot.slane %v6521_v45, 5  ;;  %v4229_v54 = vrot.slane %v5327_v23, 9 }
 0x153   : > { %v1551_v46 = vrot.slane %v1550_v12, 4  ;;  %v467_v32 = vmax.f32 %v435_v31, 0.0  ;;  %v468_v43 = vmax.f32 %v436_v14, 0.0  ;;  %v4228_v12 = vrot.slane %v6515_v36, 9  ;;  %v5328_v14 = vld [vmem:[#allocation2 + $0x98] sm:$0x1] }
 0x154   : > { %v1561_v11 = vrot.slane %v1560_v60, 4  ;;  %v1843_v63 = vrot.slane %v1841_v4, 4 }
 0x155   : > { %v1556_v6 = vsel %vm5853_vm10, %v1551_v46, %v1555_v51  ;;  %v576_v51 = vsel %vm5847_vm9, 0, %v575_v41  ;;  %v4399_v33 = vpack.c.bf16 %v467_v32, %v467_v32  ;;  %v4400_v17 = vpack.c.bf16 %v468_v43, %v468_v43  ;;  %v5329_v43 = vld [vmem:[#allocation2 + $0xa0] sm:$0xf] }
 0x156   : > { %v1566_v48 = vsel %vm5853_vm10, %v1561_v11, %v1565_v44  ;;  %577 = vst [vmem:[#allocation2 + $0xc8] sm:$0x1] %v576_v51  ;;  %v1845_v36 = vsel %vm5828_vm7, %v1843_v63, %v1844_v59  ;;  %v1848_v11 = vrot.slane %v5325_v47, 5  ;;  %v1851_v51 = vrot.slane %v5328_v14, 5  ;;  %v5330_v63 = vld [vmem:[#allocation2 + $0x9c] sm:$0xf] }
 0x157   : > { %v6550_v18 = vcombine.low %v1556_v6, %v1566_v48  ;;  %3128 = vmatmul.mubr.bf16.gmra.mrb[52].mxu1 %v6536_v42  ;;  %v932_v34 = vshrl.u32 %v4399_v33, 16  ;;  %v935_v60 = vshll.u32 %v4399_v33, 16  ;;  %v940_v44 = vshrl.u32 %v4400_v17, 16  ;;  %v5326_v48 = vld [vmem:[#allocation10 + $0x200] sm:$0xff]   ;;  %v5317_v14 = vld [vmem:[#allocation10 + $0x228] sm:$0xff]  }
 0x158   : > { %3135 = vmatprep.mubr.bf16.mxu1 %v6546_v52  ;;  %v943_v46 = vshll.u32 %v4400_v17, 16  ;;  %v1103_v22 = vld [vmem:[#allocation2 + $0xc0] sm:$0xf]  ;;  %v1855_v39 = vrot.slane %v5329_v43, 5  ;;  %v1849_v33 = vsel %vm5828_vm7, %v4229_v54, %v1848_v11  ;;  %v4230_v28 = vrot.slane %v5330_v63, 9 }
 0x159   : > { %2982 = vmatprep.mubr.bf16.mxu0 %v6550_v18  ;;  %v934_v25 = vrot.slane %v932_v34, 7  ;;  %v942_v45 = vrot.slane %v940_v44, 7  ;;  %v5331_v34 = vld [vmem:[#allocation2 + $0xa4] sm:$0x1]  ;;  %v5333_v63 = vld [vmem:[#allocation2 + $0xa8] sm:$0xf] }
 0x15a   : > { %2983 = vmatmul.mubr.bf16.gmra.mrb[44].mxu0 %v6546_v52  ;;  %v1857_v17 = vrot.slane %v1855_v39, 4  ;;  %v1856_v47 = vsel %vm5828_vm7, %v4230_v28, %v1855_v39  ;;  %v4231_v28 = vrot.slane %v5333_v63, 9 }
 0x15b   : > { %3216 = vmatprep.mubr.bf16.mxu0 %v6155_v3  ;;  %v1842_v3 = vsel %vm5828_vm7, %v4228_v12, %v1841_v4  ;;  %v937_v2 = vor.u32 %v935_v60, %v934_v25  ;;  %v938_v6 = vrot.slane %v934_v25, 4  ;;  %v945_v19 = vor.u32 %v943_v46, %v942_v45  ;;  %v5313_v12 = vld [vmem:[#allocation10 + $0x218] sm:$0xff]   ;;  %v5316_v46 = vld [vmem:[#allocation10 + $0x220] sm:$0xff]  }
 0x15c   : > { %v947_v41 = vrot.slane %v942_v45, 4  ;;  %v6578_v50 = vcombine.low %v1842_v3, %v1845_v36  ;;  %v1850_v4 = vrot.slane %v1848_v11, 4  ;;  %v1858_v60 = vrot.slane %v5331_v34, 5  ;;  %v5334_v34 = vld [vmem:[#allocation2 + $0xb0] sm:$0x1] }
 0x15d   : > { %v1107_v37 = vld [vmem:[#allocation2 + $0xc8] sm:$0x1]  ;;  %v1104_v31 = vsel %vm5905_vm14, %v937_v2, %v1103_v22 }
 0x15e   : > { %1105 = vst [vmem:[#allocation2 + $0xc0] sm:$0xf] %v1104_v31  ;;  %v1108_v32 = vsel %vm5839_vm8, %v947_v41, %v1107_v37  ;;  %v1852_v30 = vsel %vm5828_vm7, %v1850_v4, %v1851_v51  ;;  %v1859_v31 = vsel %vm5828_vm7, %v1857_v17, %v1858_v60  ;;  %v1865_v60 = vrot.slane %v5334_v34, 5 }
 0x15f   : > { %3136 = vmatmul.mubr.bf16.gmra.mrb[56].mxu1 %v6566_v57  ;;  %1109 = vst [vmem:[#allocation2 + $0xc8] sm:$0x1] %v1108_v32  ;;  %v6594_v59 = vcombine.low %v1849_v33, %v1852_v30 }
 0x160   : > { %3143 = vmatprep.mubr.bf16.mxu1 %v5933_v58 }
 0x162   : > { %3217 = vmatmul.mubr.bf16.vlgmr.msra.gmra.mrb[48].mxu0 %v5989_v29  ;;  %v946_v29 = vsel %vm5895_vm13, %v938_v6, %v945_v19 }
 0x163   : > { %5081 = vmatpush3.bf16.msra.mxu0 %v5326_v48  ;;  %3224 = vmatprep.mubr.bf16.mxu0 %v6212_v56  ;;  %1106 = vst [vmem:[#allocation2 + $0xc4] sm:$0xf] %v946_v29 }
 0x164   : > { %5082 = vmatprep.subr.bf16.mxu0 %v5307_v13 }
 0x165   : > { %v6596_v44 = vld [vmem:[#allocation2 + $0xc0] sm:$0xf] }
 0x166   : > { %v1980_v3 = vshll.u32 %v6596_v44, 16  ;;  %v1160_v36 = vld [vmem:[#allocation2 + $0xc8] sm:$0x1]  ;;  %v4251_v45 = vrot.slane %v6596_v44, 9 }
 0x167   : > { %5083 = vmatpush3.bf16.msra.mxu0 %v5307_v13  ;;  %3144 = vmatmul.mubr.bf16.gmra.mrb[60].mxu1 %v6578_v50  ;;  %v1977_v13 = vshrl.u32 %v6596_v44, 16  ;;  %v2026_v2 = vrot.slane %v1160_v36, 5  ;;  %v1996_v54 = vshll.u32 %v1160_v36, 16 }
 0x168   : > { %3151 = vmatprep.mubr.bf16.mxu1 %v5980_v1  ;;  %5084 = vmatprep.subr.bf16.mxu0 %v5310_v53  ;;  %v1982_v37 = vrot.slane %v1980_v3, 5 }
 0x169   : > { %v1979_v6 = vrot.slane %v1977_v13, 4  ;;  %v1998_v30 = vrot.slane %v1996_v54, 5  ;;  %v5318_v13 = vld [vmem:[#allocation10 + $0x230] sm:$0xff]   ;;  %v5336_v54 = vld [vmem:[#allocation2 + $0xb4] sm:$0xf] }
 0x16a   : > { %3225 = vmatmul.mubr.bf16.gmra.mrb[52].mxu0 %v6068_v24  ;;  %v6598_v25 = vld [vmem:[#allocation2 + $0xc4] sm:$0xf] }
 0x16b   : > { %3232 = vmatprep.mubr.bf16.mxu0 %v6262_v0  ;;  %5085 = vmatpush3.bf16.msra.mxu0 %v5310_v53  ;;  %v1990_v11 = vshrl.u32 %v6598_v25, 16  ;;  %v2023_v22 = vrot.slane %v6598_v25, 5  ;;  %v1986_v19 = vshll.u32 %v6598_v25, 16  ;;  %v5332_v53 = vld [vmem:[#allocation2 + $0xac] sm:$0xf]  ;;  %v1983_v51 = vor.u32 %v1982_v37, %v1979_v6  ;;  %v5319_v6 = vld [vmem:[#allocation10 + $0x238] sm:$0xff]  }
 0x16c   : > { %5086 = vmatprep.subr.bf16.mxu0 %v5313_v12  ;;  %v1862_v4 = vrot.slane %v5332_v53, 5 }
 0x16d   : > { %v2024_v41 = vsel %vm5828_vm7, %v4251_v45, %v2023_v22  ;;  %v2025_v48 = vrot.slane %v2023_v22, 4  ;;  %v1992_v23 = vrot.slane %v1990_v11, 4  ;;  %v1988_v29 = vrot.slane %v1986_v19, 5  ;;  %v5335_v22 = vld [vmem:[#allocation2 + $0xb8] sm:$0xf] }
 0x16e   : > { %v1984_v39 = vrot.slane %v1983_v51, 4  ;;  %v1864_v17 = vrot.slane %v1862_v4, 4  ;;  %v5337_v51 = vld [vmem:[#allocation2 + $0xbc] sm:$0x1] }
 0x16f   : > { %3152 = vmatmul.mubr.bf16.gmra.mrb[64].mxu1 %v6594_v59  ;;  %5087 = vmatpush3.bf16.msra.mxu0 %v5313_v12  ;;  %v2027_v32 = vsel %vm5828_vm7, %v2025_v48, %v2026_v2  ;;  %v1993_v33 = vor.u32 %v1992_v23, %v1988_v29  ;;  %v6620_v12 = vcombine.low %v1856_v47, %v1859_v31  ;;  %v1869_v2 = vrot.slane %v5335_v22, 5 }
 0x170   : > { %3159 = vmatprep.mubr.bf16.mxu1 %v6070_v35  ;;  %5088 = vmatprep.subr.bf16.mxu0 %v5316_v46  ;;  %v6617_v43 = vcombine.low %v2024_v41, %v2027_v32  ;;  %v1989_v3 = vsel %vm5853_vm10, %v1984_v39, %v1988_v29  ;;  %v1866_v45 = vsel %vm5828_vm7, %v1864_v17, %v1865_v60  ;;  %v4232_v31 = vrot.slane %v5336_v54, 9 }
 0x171   : > { %v1994_v36 = vrot.slane %v1993_v33, 4  ;;  %v1872_v29 = vrot.slane %v5337_v51, 5 }
 0x172   : > { %3233 = vmatmul.mubr.bf16.gmra.mrb[56].mxu0 %v6130_v16  ;;  %v1870_v39 = vsel %vm5828_vm7, %v4232_v31, %v1869_v2  ;;  %v7456_v31 = vld [vmem:[#allocation27_spill] sm:$0xff] }
 0x173   : > { %3240 = vmatprep.mubr.bf16.mxu0 %v6333_v61  ;;  %5089 = vmatpush3.bf16.msra.mxu0 %v5316_v46  ;;  %v1999_v11 = vsel %vm5853_vm10, %v1994_v36, %v1998_v30  ;;  %v1863_v46 = vsel %vm5828_vm7, %v4231_v28, %v1862_v4  ;;  %v6642_v4 = vcombine.low %v6596_v44, %v6598_v25 }
 0x174   : > { %5090 = vmatprep.subr.bf16.mxu0 %v5317_v14  ;;  %v6627_v47 = vcombine.low %v1989_v3, %v1999_v11  ;;  %v6638_v23 = vcombine.low %v1863_v46, %v1866_v45  ;;  %v7452_v3 = vld [vmem:[#allocation30_spill] sm:$0xff] }
 0x177   : > { %3160 = vmatmul.mubr.bf16.gmra.mrb[68].mxu1 %v6620_v12  ;;  %5091 = vmatpush3.bf16.msra.mxu0 %v5317_v14  ;;  %v1871_v14 = vrot.slane %v1869_v2, 4 }
 0x178   : > { %3167 = vmatprep.mubr.bf16.mxu1 %v6143_v9  ;;  %5092 = vmatprep.subr.bf16.mxu0 %v5318_v13 }
 0x179   : > { %v1873_v33 = vsel %vm5828_vm7, %v1871_v14, %v1872_v29 }
 0x17a   : > { %3241 = vmatmul.mubr.bf16.gmra.mrb[60].mxu0 %v6202_v27  ;;  %v6654_v44 = vcombine.low %v1870_v39, %v1873_v33  ;;  %v7457_v39 = vld [vmem:[#allocation28_spill] sm:$0xff] }
 0x17b   : > { %3248 = vmatprep.mubr.bf16.mxu0 %v6380_v49  ;;  %5093 = vmatpush3.bf16.msra.mxu0 %v5318_v13 }
 0x17c   : > { %5094 = vmatprep.subr.bf16.mxu0 %v5319_v6 }
 0x17e   : > { %v4624_v37 = vpop.f32.mrb[0].mxu0 }
 0x17f   : > { %v4625_v19 = vpop.f32.mrb[1].mxu0  ;;  %3168 = vmatmul.mubr.bf16.gmra.mrb[72].mxu1 %v6638_v23  ;;  %5095 = vmatpush3.bf16.msra.mxu0 %v5319_v6 }
 0x180   : > { %v6635_v41 = vadd.f32 %v4625_v19, %v4624_v37  ;;  %v4627_v48 = vpop.f32.mrb[2].mxu0  ;;  %3175 = vmatprep.mubr.bf16.mxu1 %v6642_v4  ;;  %v7453_v37 = vld [vmem:[#allocation25_spill] sm:$0xff]  ;;  %v7454_v19 = vld [vmem:[#allocation31_spill] sm:$0xff] }
 0x181   : > { %v4628_v53 = vpop.f32.mrb[3].mxu0 }
 0x182   : > { %v6644_v32 = vadd.f32 %v4628_v53, %v4627_v48  ;;  %3249 = vmatmul.mubr.bf16.gmra.mrb[64].mxu0 %v6258_v15  ;;  %v7455_v48 = vld [vmem:[#allocation26_spill] sm:$0xff] }
 0x183   : > { %3256 = vmatprep.mubr.bf16.mxu0 %v6451_v55 }
 0x187   : > { %3176 = vmatmul.mubr.bf16.gmra.mrb[76].mxu1 %v6654_v44 }
 0x188   : > { %3377 = vmatprep.mubr.bf16.mxu1 %v6068_v24  ;;  %v7451_v24 = vld [vmem:[#allocation23_spill] sm:$0xff] }
 0x18a   : > { %3257 = vmatmul.mubr.bf16.gmra.mrb[68].mxu0 %v6308_v5 }
 0x18b   : > { %3264 = vmatprep.mubr.bf16.mxu0 %v6492_v10 }
 0x18f   : > { %3378 = vmatmul.mubr.bf16.vlgmr.msra.gmra.mrb[80].mxu1 %v6048_v8 }
 0x190   : > { %3385 = vmatprep.mubr.bf16.mxu1 %v6130_v16  ;;  %v4696_v25 = vpop.f32.mrb[0].mxu1 }
 0x191   : > { %v4697_v30 = vpop.f32.mrb[1].mxu1 }
 0x192   : > { %3265 = vmatmul.mubr.bf16.gmra.mrb[72].mxu0 %v6364_v26  ;;  %v6663_v63 = vadd.f32 %v4697_v30, %v4696_v25  ;;  %v4699_v28 = vpop.f32.mrb[2].mxu1 }
 0x193   : > { %3272 = vmatprep.mubr.bf16.mxu0 %v6512_v7  ;;  %v4700_v17 = vpop.f32.mrb[3].mxu1 }
 0x194   : > { %v6666_v34 = vadd.f32 %v4700_v17, %v4699_v28  ;;  %v7458_v28 = vld [vmem:[#allocation20_spill] sm:$0xff] }
 0x197   : > { %3386 = vmatmul.mubr.bf16.gmra.mrb[84].mxu1 %v7451_v24  ;;  %v7459_v24 = vld [vmem:[#allocation29_spill] sm:$0xff] }
 0x198   : > { %v4630_v60 = vpop.f32.mrb[4].mxu0  ;;  %3393 = vmatprep.mubr.bf16.mxu1 %v6202_v27 }
 0x199   : > { %v4631_v8 = vpop.f32.mrb[5].mxu0 }
 0x19a   : > { %v6670_v13 = vadd.f32 %v4631_v8, %v4630_v60  ;;  %v4633_v16 = vpop.f32.mrb[6].mxu0  ;;  %3273 = vmatmul.mubr.bf16.gmra.mrb[76].mxu0 %v7452_v3 }
 0x19b   : > { %v4634_v36 = vpop.f32.mrb[7].mxu0  ;;  %3280 = vmatprep.mubr.bf16.mxu0 %v6536_v42  ;;  %v4702_v46 = vpop.f32.mrb[4].mxu1 }
 0x19c   : > { %v6674_v11 = vadd.f32 %v4634_v36, %v4633_v16  ;;  %v4703_v45 = vpop.f32.mrb[5].mxu1 }
 0x19d   : > { %v6676_v22 = vadd.f32 %v4703_v45, %v4702_v46  ;;  %v4705_v2 = vpop.f32.mrb[6].mxu1 }
 0x19e   : > { %v4706_v6 = vpop.f32.mrb[7].mxu1 }
 0x19f   : > { %3394 = vmatmul.mubr.bf16.gmra.mrb[88].mxu1 %v7453_v37  ;;  %v6679_v27 = vadd.f32 %v4706_v6, %v4705_v2  ;;  %v7461_v2 = vld [vmem:[#allocation22_spill] sm:$0xff] }
 0x1a0   : > { %3401 = vmatprep.mubr.bf16.mxu1 %v6258_v15 }
 0x1a2   : > { %3281 = vmatmul.mubr.bf16.gmra.mrb[80].mxu0 %v7454_v19 }
 0x1a3   : > { %3288 = vmatprep.mubr.bf16.mxu0 %v6566_v57 }
 0x1a7   : > { %3402 = vmatmul.mubr.bf16.gmra.mrb[92].mxu1 %v7455_v48 }
 0x1a8   : > { %3409 = vmatprep.mubr.bf16.mxu1 %v6308_v5 }
 0x1aa   : > { %3289 = vmatmul.mubr.bf16.gmra.mrb[84].mxu0 %v6509_v21 }
 0x1ab   : > { %3296 = vmatprep.mubr.bf16.mxu0 %v6578_v50 }
 0x1ae   : > { %v4636_v54 = vpop.f32.mrb[8].mxu0 }
 0x1af   : > { %3410 = vmatmul.mubr.bf16.gmra.mrb[96].mxu1 %v7456_v31  ;;  %v4637_v53 = vpop.f32.mrb[9].mxu0 }
 0x1b0   : > { %3417 = vmatprep.mubr.bf16.mxu1 %v6364_v26  ;;  %v6690_v14 = vadd.f32 %v4637_v53, %v4636_v54  ;;  %v4639_v15 = vpop.f32.mrb[10].mxu0  ;;  %v7462_v53 = vld [vmem:[#allocation24_spill] sm:$0xff] }
 0x1b1   : > { %v4640_v51 = vpop.f32.mrb[11].mxu0 }
 0x1b2   : > { %3297 = vmatmul.mubr.bf16.gmra.mrb[88].mxu0 %v6550_v18  ;;  %v6693_v29 = vadd.f32 %v4640_v51, %v4639_v15 }
 0x1b3   : > { %3304 = vmatprep.mubr.bf16.mxu0 %v6594_v59 }
 0x1b6   : > { %v4708_v5 = vpop.f32.mrb[8].mxu1 }
 0x1b7   : > { %3418 = vmatmul.mubr.bf16.gmra.mrb[100].mxu1 %v7457_v39  ;;  %v4709_v33 = vpop.f32.mrb[9].mxu1 }
 0x1b8   : > { %3425 = vmatprep.mubr.bf16.mxu1 %v7452_v3  ;;  %v6698_v25 = vadd.f32 %v4709_v33, %v4708_v5  ;;  %v4711_v30 = vpop.f32.mrb[10].mxu1  ;;  %v7460_v3 = vld [vmem:[#allocation21_spill] sm:$0xff] }
 0x1b9   : > { %v4712_v26 = vpop.f32.mrb[11].mxu1 }
 0x1ba   : > { %3305 = vmatmul.mubr.bf16.gmra.mrb[92].mxu0 %v7458_v28  ;;  %v6701_v17 = vadd.f32 %v4712_v26, %v4711_v30 }
 0x1bb   : > { %3312 = vmatprep.mubr.bf16.mxu0 %v6620_v12 }
 0x1bf   : > { %3426 = vmatmul.mubr.bf16.gmra.mrb[104].mxu1 %v7459_v24  ;;  %v4642_v60 = vpop.f32.mrb[12].mxu0 }
 0x1c0   : > { %3433 = vmatprep.mubr.bf16.mxu1 %v7454_v19  ;;  %v4643_v8 = vpop.f32.mrb[13].mxu0 }
 0x1c1   : > { %v6706_v16 = vadd.f32 %v4643_v8, %v4642_v60  ;;  %v4645_v36 = vpop.f32.mrb[14].mxu0 }
 0x1c2   : > { %3313 = vmatmul.mubr.bf16.gmra.mrb[96].mxu0 %v7460_v3  ;;  %v4646_v46 = vpop.f32.mrb[15].mxu0 }
 0x1c3   : > { %3320 = vmatprep.mubr.bf16.mxu0 %v6638_v23  ;;  %v6710_v45 = vadd.f32 %v4646_v46, %v4645_v36 }
 0x1c7   : > { %3434 = vmatmul.mubr.bf16.gmra.mrb[108].mxu1 %v6456_v38 }
 0x1c8   : > { %3441 = vmatprep.mubr.bf16.mxu1 %v6509_v21 }
 0x1ca   : > { %3321 = vmatmul.mubr.bf16.gmra.mrb[100].mxu0 %v7461_v2 }
 0x1cb   : > { %3328 = vmatprep.mubr.bf16.mxu0 %v6654_v44  ;;  %v4714_v6 = vpop.f32.mrb[12].mxu1 }
 0x1cc   : > { %v4715_v37 = vpop.f32.mrb[13].mxu1 }
 0x1cd   : > { %v6716_v19 = vadd.f32 %v4715_v37, %v4714_v6  ;;  %v4717_v48 = vpop.f32.mrb[14].mxu1 }
 0x1ce   : > { %v4718_v54 = vpop.f32.mrb[15].mxu1 }
 0x1cf   : > { %3442 = vmatmul.mubr.bf16.gmra.mrb[112].mxu1 %v6503_v62  ;;  %v6720_v31 = vadd.f32 %v4718_v54, %v4717_v48 }
 0x1d0   : > { %3449 = vmatprep.mubr.bf16.mxu1 %v6550_v18 }
 0x1d2   : > { %3329 = vmatmul.mubr.bf16.gmra.mrb[104].mxu0 %v7462_v53 }
 0x1d3   : > { %3336 = vmatprep.mubr.bf16.mxu0 %v6617_v43  ;;  %v4736_v38 = vpop.f32.mrb[16].mxu1 }
 0x1d4   : > { %v4737_v21 = vpop.f32.mrb[17].mxu1 }
 0x1d5   : > { %v4648_v15 = vpop.f32.mrb[16].mxu0  ;;  %v4738_v51 = vadd.f32 %v4737_v21, %v4736_v38  ;;  %v4739_v5 = vpop.f32.mrb[18].mxu1 }
 0x1d6   : > { %v4649_v39 = vpop.f32.mrb[17].mxu0  ;;  %v4740_v33 = vpop.f32.mrb[19].mxu1 }
 0x1d7   : > { %3450 = vmatmul.mubr.bf16.gmra.mrb[116].mxu1 %v6546_v52  ;;  %v6726_v62 = vadd.f32 %v4649_v39, %v4648_v15  ;;  %v4651_v18 = vpop.f32.mrb[18].mxu0  ;;  %v6729_v30 = vadd.f32 %v4738_v51, %v6635_v41  ;;  %v4741_v26 = vadd.f32 %v4740_v33, %v4739_v5  ;;  %v6752_v5 = vld [vmem:[#allocation2 + $0xcc] sm:$0xf] }
 0x1d8   : > { %3457 = vmatprep.mubr.bf16.mxu1 %v7458_v28  ;;  %v4652_v24 = vpop.f32.mrb[19].mxu0  ;;  %v2071_v33 = vshrl.u32 %v6752_v5, 16 }
 0x1d9   : > { %v6732_v60 = vadd.f32 %v4652_v24, %v4651_v18  ;;  %v6735_v8 = vadd.f32 %v4741_v26, %v6644_v32  ;;  %v2074_v18 = vshll.u32 %v6752_v5, 16 }
 0x1da   : > { %3337 = vmatmul.mubr.bf16.gmra.mrb[108].mxu0 %v6627_v47 }
 0x1db   : > { %5096 = vmatprep.mubr.bf16.mxu0 %v6212_v56  ;;  %v4742_v52 = vpop.f32.mrb[20].mxu1 }
 0x1dc   : > { %v4743_v36 = vpop.f32.mrb[21].mxu1 }
 0x1dd   : > { %v4744_v28 = vadd.f32 %v4743_v36, %v4742_v52  ;;  %v4745_v46 = vpop.f32.mrb[22].mxu1  ;;  %v2076_v36 = vrot.slane %v2074_v18, 5 }
 0x1de   : > { %v4746_v6 = vpop.f32.mrb[23].mxu1 }
 0x1df   : > { %3458 = vmatmul.mubr.bf16.gmra.mrb[120].mxu1 %v5933_v58  ;;  %v6741_v41 = vadd.f32 %v4744_v28, %v6670_v13  ;;  %v4747_v37 = vadd.f32 %v4746_v6, %v4745_v46 }
 0x1e0   : > { %3465 = vmatprep.mubr.bf16.mxu1 %v7460_v3 }
 0x1e1   : > { %v6745_v32 = vadd.f32 %v4747_v37, %v6674_v11 }
 0x1e2   : > { %5097 = vmatmul.mubr.bf16.vlgmr.msra.gmra.mrb[112].mxu0 %v6262_v0  ;;  %v4654_v48 = vpop.f32.mrb[20].mxu0  ;;  %v6754_v0 = vld [vmem:[#allocation2 + $0xd0] sm:$0xf] }
 0x1e3   : > { %5100 = vmatprep.mubr.bf16.mxu0 %v6333_v61  ;;  %v4655_v56 = vpop.f32.mrb[21].mxu0  ;;  %v4748_v58 = vpop.f32.mrb[24].mxu1  ;;  %v2080_v26 = vshll.u32 %v6754_v0, 16  ;;  %v2084_v24 = vshrl.u32 %v6754_v0, 16 }
 0x1e4   : > { %v6748_v54 = vadd.f32 %v4655_v56, %v4654_v48  ;;  %v4657_v38 = vpop.f32.mrb[22].mxu0  ;;  %v4749_v15 = vpop.f32.mrb[25].mxu1  ;;  %v6770_v56 = vld [vmem:[#allocation2 + $0xd4] sm:$0x1] }
 0x1e5   : > { %v4658_v21 = vpop.f32.mrb[23].mxu0  ;;  %v4750_v13 = vadd.f32 %v4749_v15, %v4748_v58  ;;  %v4751_v51 = vpop.f32.mrb[26].mxu1  ;;  %v2082_v28 = vrot.slane %v2080_v26, 5  ;;  %v2086_v46 = vrot.slane %v2084_v24, 4 }
 0x1e6   : > { %v6750_v3 = vadd.f32 %v4658_v21, %v4657_v38  ;;  %v4752_v11 = vpop.f32.mrb[27].mxu1 }
 0x1e7   : > { %3466 = vmatmul.mubr.bf16.gmra.mrb[124].mxu1 %v5980_v1  ;;  %v6759_v61 = vadd.f32 %v4750_v13, %v6690_v14  ;;  %v4753_v39 = vadd.f32 %v4752_v11, %v4751_v51  ;;  %v2073_v14 = vrot.slane %v2071_v33, 4  ;;  %v2087_v51 = vor.u32 %v2086_v46, %v2082_v28 }
 0x1e8   : > { %3473 = vmatprep.mubr.bf16.mxu1 %v7461_v2  ;;  %v2090_v11 = vshll.u32 %v6770_v56, 16 }
 0x1e9   : > { %v6767_v52 = vadd.f32 %v4753_v39, %v6693_v29  ;;  %v2077_v13 = vor.u32 %v2076_v36, %v2073_v14 }
 0x1ea   : > { %5101 = vmatmul.mubr.bf16.gmra.mrb[116].mxu0 %v6380_v49  ;;  %v2092_v26 = vrot.slane %v2090_v11, 5 }
 0x1eb   : > { %5104 = vmatprep.mubr.bf16.mxu0 %v6451_v55  ;;  %v4754_v1 = vpop.f32.mrb[28].mxu1  ;;  %v2078_v18 = vrot.slane %v2077_v13, 4 }
 0x1ec   : > { %v4755_v2 = vpop.f32.mrb[29].mxu1 }
 0x1ed   : > { %v4756_v37 = vadd.f32 %v4755_v2, %v4754_v1  ;;  %v4757_v48 = vpop.f32.mrb[30].mxu1 }
 0x1ee   : > { %v4660_v6 = vpop.f32.mrb[24].mxu0  ;;  %v4758_v49 = vpop.f32.mrb[31].mxu1 }
 0x1ef   : > { %3474 = vmatmul.mubr.bf16.gmra.mrb[128].mxu1 %v6070_v35  ;;  %v4661_v38 = vpop.f32.mrb[25].mxu0  ;;  %v6777_v55 = vadd.f32 %v4756_v37, %v6706_v16  ;;  %v4759_v21 = vadd.f32 %v4758_v49, %v4757_v48  ;;  %v2088_v16 = vrot.slane %v2087_v51, 4  ;;  %v2117_v51 = vrot.slane %v6754_v0, 5 }
 0x1f0   : > { %v6773_v58 = vadd.f32 %v4661_v38, %v4660_v6  ;;  %v4663_v29 = vpop.f32.mrb[26].mxu0  ;;  %3481 = vmatprep.mubr.bf16.mxu1 %v7462_v53 }
 0x1f1   : > { %v4664_v15 = vpop.f32.mrb[27].mxu0  ;;  %v6784_v35 = vadd.f32 %v4759_v21, %v6710_v45  ;;  %v2083_v45 = vsel %vm5853_vm10, %v2078_v18, %v2082_v28 }
 0x1f2   : > { %5105 = vmatmul.mubr.bf16.gmra.mrb[120].mxu0 %v6492_v10  ;;  %v6781_v39 = vadd.f32 %v4664_v15, %v4663_v29 }
 0x1f3   : > { %5108 = vmatprep.mubr.bf16.mxu0 %v6512_v7  ;;  %v4760_v33 = vpop.f32.mrb[32].mxu1  ;;  %v2093_v7 = vsel %vm5853_vm10, %v2088_v16, %v2092_v26 }
 0x1f4   : > { %v4761_v53 = vpop.f32.mrb[33].mxu1  ;;  %v4254_v46 = vcombine.low %v2083_v45, %v2093_v7 }
 0x1f5   : > { %v4762_v24 = vadd.f32 %v4761_v53, %v4760_v33  ;;  %v4763_v1 = vpop.f32.mrb[34].mxu1  ;;  %v2119_v33 = vrot.slane %v2117_v51, 4  ;;  %v2120_v53 = vrot.slane %v6770_v56, 5 }
 0x1f6   : > { %v4764_v2 = vpop.f32.mrb[35].mxu1 }
 0x1f7   : > { %3482 = vmatmul.mubr.bf16.gmra.mrb[132].mxu1 %v6143_v9  ;;  %v6790_v10 = vadd.f32 %v4762_v24, %v6726_v62  ;;  %v4765_v14 = vadd.f32 %v4764_v2, %v4763_v1 }
 0x1f8   : > { %3489 = vmatprep.mubr.bf16.mxu1 %v6627_v47 }
 0x1f9   : > { %v6798_v36 = vadd.f32 %v4765_v14, %v6732_v60 }
 0x1fa   : > { %5109 = vmatmul.mubr.bf16.gmra.mrb[124].mxu0 %v6536_v42 }
 0x1fb   : > { %5112 = vmatprep.mubr.bf16.mxu0 %v6566_v57  ;;  %v4253_v57 = vcombine.low %v6752_v5, %v6754_v0  ;;  %v2121_v0 = vsel %vm5828_vm7, %v2119_v33, %v2120_v53 }
 0x1fc   : > { %v4666_v9 = vpop.f32.mrb[28].mxu0  ;;  %v4766_v6 = vpop.f32.mrb[36].mxu1 }
 0x1fd   : > { %v4667_v47 = vpop.f32.mrb[29].mxu0  ;;  %v4767_v48 = vpop.f32.mrb[37].mxu1 }
 0x1fe   : > { %v4668_v62 = vadd.f32 %v4667_v47, %v4666_v9  ;;  %v4669_v37 = vpop.f32.mrb[30].mxu0  ;;  %v4768_v28 = vadd.f32 %v4767_v48, %v4766_v6  ;;  %v4769_v40 = vpop.f32.mrb[38].mxu1 }
 0x1ff   : > { %v4670_v38 = vpop.f32.mrb[31].mxu0  ;;  %3490 = vmatmul.mubr.bf16.gmra.mrb[136].mxu1 %v6642_v4  ;;  %v4770_v42 = vpop.f32.mrb[39].mxu1 }
 0x200   : > { %v4671_v49 = vadd.f32 %v4670_v38, %v4669_v37  ;;  %3497 = vmatprep.mubr.bf16.mxu1 %v4254_v46  ;;  %v6803_v60 = vadd.f32 %v4768_v28, %v6748_v54  ;;  %v4771_v29 = vadd.f32 %v4770_v42, %v4769_v40 }
 0x202   : > { %5113 = vmatmul.mubr.bf16.gmra.mrb[128].mxu0 %v6578_v50  ;;  %v6810_v21 = vadd.f32 %v4771_v29, %v6750_v3 }
 0x203   : > { %5116 = vmatprep.mubr.bf16.mxu0 %v6594_v59  ;;  %v4255_v59 = vrot.slane %v6752_v5, 9 }
 0x207   : > { %3498 = vmatmul.mubr.bf16.gmra.mrb[140].mxu1 %v4253_v57 }
 0x209   : > { %v4672_v4 = vpop.f32.mrb[32].mxu0 }
 0x20a   : > { %5117 = vmatmul.mubr.bf16.gmra.mrb[132].mxu0 %v6620_v12  ;;  %v4673_v15 = vpop.f32.mrb[33].mxu0 }
 0x20b   : > { %5120 = vmatprep.mubr.bf16.mxu0 %v6638_v23  ;;  %v4674_v54 = vadd.f32 %v4673_v15, %v4672_v4  ;;  %v4675_v13 = vpop.f32.mrb[34].mxu0  ;;  %v2118_v23 = vsel %vm5828_vm7, %v4255_v59, %v2117_v51 }
 0x20c   : > { %v4676_v50 = vpop.f32.mrb[35].mxu0 }
 0x20d   : > { %v4677_v11 = vadd.f32 %v4676_v50, %v4675_v13 }
 0x20e   : > { %v4772_v3 = vpop.f32.mrb[40].mxu1 }
 0x20f   : > { %v4773_v18 = vpop.f32.mrb[41].mxu1 }
 0x210   : > { %v4774_v16 = vadd.f32 %v4773_v18, %v4772_v3  ;;  %v4775_v26 = vpop.f32.mrb[42].mxu1 }
 0x211   : > { %v4776_v12 = vpop.f32.mrb[43].mxu1 }
 0x212   : > { %5121 = vmatmul.mubr.bf16.gmra.mrb[136].mxu0 %v6654_v44  ;;  %v6824_v5 = vadd.f32 %v4774_v16, %v6773_v58  ;;  %v4777_v56 = vadd.f32 %v4776_v12, %v4775_v26  ;;  %v4256_v44 = vcombine.low %v2118_v23, %v2121_v0 }
 0x213   : > { %5124 = vmatprep.mubr.bf16.mxu0 %v6617_v43  ;;  %v4678_v24 = vpop.f32.mrb[36].mxu0 }
 0x214   : > { %v4679_v1 = vpop.f32.mrb[37].mxu0  ;;  %v6827_v45 = vadd.f32 %v4777_v56, %v6781_v39 }
 0x215   : > { %v4680_v2 = vadd.f32 %v4679_v1, %v4678_v24  ;;  %v4681_v14 = vpop.f32.mrb[38].mxu0 }
 0x216   : > { %v4682_v7 = vpop.f32.mrb[39].mxu0 }
 0x217   : > { %v4683_v43 = vadd.f32 %v4682_v7, %v4681_v14 }
 0x21a   : > { %5125 = vmatmul.mubr.bf16.gmra.mrb[140].mxu0 %v4256_v44  ;;  %v4778_v9 = vpop.f32.mrb[44].mxu1 }
 0x21b   : > { %v4779_v46 = vpop.f32.mrb[45].mxu1 }
 0x21c   : > { %v4780_v47 = vadd.f32 %v4779_v46, %v4778_v9  ;;  %v4781_v20 = vpop.f32.mrb[46].mxu1 }
 0x21d   : > { %v4782_v6 = vpop.f32.mrb[47].mxu1 }
 0x21e   : > { %v6829_v37 = vadd.f32 %v4780_v47, %v4668_v62  ;;  %v4783_v58 = vadd.f32 %v4782_v6, %v4781_v20 }
 0x21f   : > { %v4684_v48 = vpop.f32.mrb[40].mxu0 }
 0x220   : > { %v4685_v38 = vpop.f32.mrb[41].mxu0  ;;  %v6831_v28 = vadd.f32 %v4783_v58, %v4671_v49 }
 0x221   : > { %v4686_v40 = vadd.f32 %v4685_v38, %v4684_v48  ;;  %v4687_v42 = vpop.f32.mrb[42].mxu0 }
 0x222   : > { %v4688_v39 = vpop.f32.mrb[43].mxu0  ;;  %v4784_v29 = vpop.f32.mrb[48].mxu1 }
 0x223   : > { %v4689_v57 = vadd.f32 %v4688_v39, %v4687_v42  ;;  %v4785_v4 = vpop.f32.mrb[49].mxu1 }
 0x224   : > { %v4786_v15 = vadd.f32 %v4785_v4, %v4784_v29  ;;  %v4787_v13 = vpop.f32.mrb[50].mxu1 }
 0x225   : > { %v4788_v51 = vpop.f32.mrb[51].mxu1 }
 0x226   : > { %v6833_v50 = vadd.f32 %v4786_v15, %v4674_v54  ;;  %v4789_v59 = vadd.f32 %v4788_v51, %v4787_v13 }
 0x228   : > { %v6835_v33 = vadd.f32 %v4789_v59, %v4677_v11 }
 0x22a   : > { %v4790_v62 = vpop.f32.mrb[52].mxu1 }
 0x22b   : > { %v4791_v53 = vpop.f32.mrb[53].mxu1 }
 0x22c   : > { %v4792_v3 = vadd.f32 %v4791_v53, %v4790_v62  ;;  %v4793_v18 = vpop.f32.mrb[54].mxu1 }
 0x22d   : > { %v4690_v49 = vpop.f32.mrb[44].mxu0  ;;  %v4794_v16 = vpop.f32.mrb[55].mxu1 }
 0x22e   : > { %v4691_v26 = vpop.f32.mrb[45].mxu0  ;;  %v6837_v12 = vadd.f32 %v4792_v3, %v4680_v2  ;;  %v4795_v23 = vadd.f32 %v4794_v16, %v4793_v18 }
 0x22f   : > { %v4692_v0 = vadd.f32 %v4691_v26, %v4690_v49  ;;  %v4693_v24 = vpop.f32.mrb[46].mxu0 }
 0x230   : > { %v4694_v56 = vpop.f32.mrb[47].mxu0  ;;  %v6839_v1 = vadd.f32 %v4795_v23, %v4683_v43 }
 0x231   : > { %v4695_v54 = vadd.f32 %v4694_v56, %v4693_v24 }
 0x232   : > { %v4796_v14 = vpop.f32.mrb[56].mxu1 }
 0x233   : > { %v4797_v44 = vpop.f32.mrb[57].mxu1 }
 0x234   : > { %v4798_v11 = vadd.f32 %v4797_v44, %v4796_v14  ;;  %v4799_v7 = vpop.f32.mrb[58].mxu1 }
 0x235   : > { %v4848_v9 = vpop.f32.mrb[48].mxu0  ;;  %v4800_v46 = vpop.f32.mrb[59].mxu1 }
 0x236   : > { %v4849_v47 = vpop.f32.mrb[49].mxu0  ;;  %v6841_v20 = vadd.f32 %v4798_v11, %v4686_v40  ;;  %v4801_v6 = vadd.f32 %v4800_v46, %v4799_v7 }
 0x237   : > { %v4850_v58 = vadd.f32 %v4849_v47, %v4848_v9  ;;  %v4851_v2 = vpop.f32.mrb[50].mxu0 }
 0x238   : > { %v4852_v48 = vpop.f32.mrb[51].mxu0  ;;  %v6843_v38 = vadd.f32 %v4801_v6, %v4689_v57 }
 0x239   : > { %v6846_v42 = vadd.f32 %v4850_v58, %v6729_v30  ;;  %v4853_v43 = vadd.f32 %v4852_v48, %v4851_v2 }
 0x23a   : > { %v4802_v39 = vpop.f32.mrb[60].mxu1 }
 0x23b   : > { %v6849_v29 = vadd.f32 %v4853_v43, %v6735_v8  ;;  %v4803_v4 = vpop.f32.mrb[61].mxu1 }
 0x23c   : > { %v4804_v15 = vadd.f32 %v4803_v4, %v4802_v39  ;;  %v4805_v13 = vpop.f32.mrb[62].mxu1 }
 0x23d   : > { %v4854_v51 = vpop.f32.mrb[52].mxu0  ;;  %v4806_v40 = vpop.f32.mrb[63].mxu1 }
 0x23e   : > { %v4855_v59 = vpop.f32.mrb[53].mxu0  ;;  %v6851_v62 = vadd.f32 %v4804_v15, %v4692_v0  ;;  %v4807_v53 = vadd.f32 %v4806_v40, %v4805_v13 }
 0x23f   : > { %v4856_v3 = vadd.f32 %v4855_v59, %v4854_v51  ;;  %v4857_v57 = vpop.f32.mrb[54].mxu0 }
 0x240   : > { %v4858_v18 = vpop.f32.mrb[55].mxu0  ;;  %v6853_v49 = vadd.f32 %v4807_v53, %v4695_v54 }
 0x241   : > { %v6856_v30 = vadd.f32 %v4856_v3, %v6741_v41  ;;  %v4859_v16 = vadd.f32 %v4858_v18, %v4857_v57 }
 0x242   : > { %v4808_v8 = vpop.f32.mrb[64].mxu1 }
 0x243   : > { %v6859_v26 = vadd.f32 %v4859_v16, %v6745_v32  ;;  %v4809_v23 = vpop.f32.mrb[65].mxu1 }
 0x244   : > { %v4810_v24 = vadd.f32 %v4809_v23, %v4808_v8  ;;  %v4811_v56 = vpop.f32.mrb[66].mxu1 }
 0x245   : > { %v4860_v14 = vpop.f32.mrb[56].mxu0  ;;  %v4812_v0 = vpop.f32.mrb[67].mxu1 }
 0x246   : > { %v4861_v44 = vpop.f32.mrb[57].mxu0  ;;  %v6862_v11 = vadd.f32 %v4810_v24, %v6663_v63  ;;  %v4813_v7 = vadd.f32 %v4812_v0, %v4811_v56 }
 0x247   : > { %v4862_v54 = vadd.f32 %v4861_v44, %v4860_v14  ;;  %v4863_v9 = vpop.f32.mrb[58].mxu0 }
 0x248   : > { %v4864_v46 = vpop.f32.mrb[59].mxu0  ;;  %v6865_v41 = vadd.f32 %v4813_v7, %v6666_v34 }
 0x249   : > { %v6868_v47 = vadd.f32 %v4862_v54, %v6759_v61  ;;  %v4865_v32 = vadd.f32 %v4864_v46, %v4863_v9 }
 0x24a   : > { %v4814_v6 = vpop.f32.mrb[68].mxu1 }
 0x24b   : > { %v6871_v58 = vadd.f32 %v4865_v32, %v6767_v52  ;;  %v4815_v2 = vpop.f32.mrb[69].mxu1 }
 0x24c   : > { %v4816_v48 = vadd.f32 %v4815_v2, %v4814_v6  ;;  %v4817_v43 = vpop.f32.mrb[70].mxu1 }
 0x24d   : > { %v4866_v63 = vpop.f32.mrb[60].mxu0  ;;  %v4818_v39 = vpop.f32.mrb[71].mxu1 }
 0x24e   : > { %v4867_v4 = vpop.f32.mrb[61].mxu0  ;;  %v6874_v15 = vadd.f32 %v4816_v48, %v6676_v22  ;;  %v4819_v13 = vadd.f32 %v4818_v39, %v4817_v43 }
 0x24f   : > { %v4868_v34 = vadd.f32 %v4867_v4, %v4866_v63  ;;  %v4869_v51 = vpop.f32.mrb[62].mxu0 }
 0x250   : > { %v4870_v40 = vpop.f32.mrb[63].mxu0  ;;  %v6877_v61 = vadd.f32 %v4819_v13, %v6679_v27 }
 0x251   : > { %v6880_v59 = vadd.f32 %v4868_v34, %v6777_v55  ;;  %v4871_v52 = vadd.f32 %v4870_v40, %v4869_v51 }
 0x252   : > { %v4820_v53 = vpop.f32.mrb[72].mxu1 }
 0x253   : > { %v6883_v3 = vadd.f32 %v4871_v52, %v6784_v35  ;;  %v4821_v57 = vpop.f32.mrb[73].mxu1 }
 0x254   : > { %v4822_v18 = vadd.f32 %v4821_v57, %v4820_v53  ;;  %v4823_v16 = vpop.f32.mrb[74].mxu1 }
 0x255   : > { %v4872_v22 = vpop.f32.mrb[64].mxu0  ;;  %v4824_v8 = vpop.f32.mrb[75].mxu1 }
 0x256   : > { %v4873_v23 = vpop.f32.mrb[65].mxu0  ;;  %v6886_v24 = vadd.f32 %v4822_v18, %v6698_v25  ;;  %v4825_v56 = vadd.f32 %v4824_v8, %v4823_v16 }
 0x257   : > { %v4874_v27 = vadd.f32 %v4873_v23, %v4872_v22  ;;  %v4875_v14 = vpop.f32.mrb[66].mxu0 }
 0x258   : > { %v4876_v0 = vpop.f32.mrb[67].mxu0  ;;  %v6889_v55 = vadd.f32 %v4825_v56, %v6701_v17 }
 0x259   : > { %v6892_v44 = vadd.f32 %v4874_v27, %v6790_v10  ;;  %v4877_v35 = vadd.f32 %v4876_v0, %v4875_v14 }
 0x25a   : > { %v4826_v7 = vpop.f32.mrb[76].mxu1 }
 0x25b   : > { %v6895_v54 = vadd.f32 %v4877_v35, %v6798_v36  ;;  %v4827_v9 = vpop.f32.mrb[77].mxu1 }
 0x25c   : > { %v4828_v46 = vadd.f32 %v4827_v9, %v4826_v7  ;;  %v4829_v32 = vpop.f32.mrb[78].mxu1 }
 0x25d   : > { %v4878_v25 = vpop.f32.mrb[68].mxu0  ;;  %v4830_v6 = vpop.f32.mrb[79].mxu1 }
 0x25e   : > { %v4879_v2 = vpop.f32.mrb[69].mxu0  ;;  %v6898_v48 = vadd.f32 %v4828_v46, %v6716_v19  ;;  %v4831_v43 = vadd.f32 %v4830_v6, %v4829_v32 }
 0x25f   : > { %v4880_v17 = vadd.f32 %v4879_v2, %v4878_v25  ;;  %v4881_v63 = vpop.f32.mrb[70].mxu0 }
 0x260   : > { %v4882_v39 = vpop.f32.mrb[71].mxu0  ;;  %v6901_v10 = vadd.f32 %v4831_v43, %v6720_v31 }
 0x261   : > { %v6904_v4 = vadd.f32 %v4880_v17, %v6803_v60  ;;  %v4883_v36 = vadd.f32 %v4882_v39, %v4881_v63 }
 0x262   : > { %v4960_v13 = vpop.f32.mrb[80].mxu1 }
 0x263   : > { %v6907_v34 = vadd.f32 %v4883_v36, %v6810_v21  ;;  %v4961_v51 = vpop.f32.mrb[81].mxu1 }
 0x264   : > { %v4962_v40 = vadd.f32 %v4961_v51, %v4960_v13  ;;  %v4963_v52 = vpop.f32.mrb[82].mxu1 }
 0x265   : > { %v4884_v19 = vpop.f32.mrb[72].mxu0  ;;  %v4964_v53 = vpop.f32.mrb[83].mxu1 }
 0x266   : > { %v4885_v57 = vpop.f32.mrb[73].mxu0  ;;  %v4965_v18 = vadd.f32 %v4964_v53, %v4963_v52  ;;  %v6910_v16 = vadd.f32 %v4962_v40, %v6846_v42 }
 0x267   : > { %v4886_v31 = vadd.f32 %v4885_v57, %v4884_v19  ;;  %v4887_v22 = vpop.f32.mrb[74].mxu0 }
 0x268   : > { %v4888_v8 = vpop.f32.mrb[75].mxu0  ;;  %v6913_v60 = vadd.f32 %v4965_v18, %v6849_v29 }
 0x269   : > { %v6916_v23 = vadd.f32 %v4886_v31, %v6824_v5  ;;  %v4889_v21 = vadd.f32 %v4888_v8, %v4887_v22 }
 0x26a   : > { %v4966_v56 = vpop.f32.mrb[84].mxu1 }
 0x26b   : > { %v6919_v27 = vadd.f32 %v4889_v21, %v6827_v45  ;;  %v4967_v14 = vpop.f32.mrb[85].mxu1 }
 0x26c   : > { %v4968_v0 = vadd.f32 %v4967_v14, %v4966_v56  ;;  %v4969_v35 = vpop.f32.mrb[86].mxu1 }
 0x26d   : > { %v4890_v7 = vpop.f32.mrb[76].mxu0  ;;  %v4970_v42 = vpop.f32.mrb[87].mxu1 }
 0x26e   : > { %v4891_v9 = vpop.f32.mrb[77].mxu0  ;;  %v4971_v46 = vadd.f32 %v4970_v42, %v4969_v35  ;;  %v6922_v32 = vadd.f32 %v4968_v0, %v6856_v30 }
 0x26f   : > { %v4892_v29 = vadd.f32 %v4891_v9, %v4890_v7  ;;  %v4893_v25 = vpop.f32.mrb[78].mxu0 }
 0x270   : > { %v4894_v6 = vpop.f32.mrb[79].mxu0  ;;  %v6925_v5 = vadd.f32 %v4971_v46, %v6859_v26 }
 0x271   : > { %v6928_v2 = vadd.f32 %v4892_v29, %v6829_v37  ;;  %v4895_v45 = vadd.f32 %v4894_v6, %v4893_v25 }
 0x272   : > { %v4972_v43 = vpop.f32.mrb[88].mxu1 }
 0x273   : > { %v6931_v17 = vadd.f32 %v4895_v45, %v6831_v28  ;;  %v4973_v63 = vpop.f32.mrb[89].mxu1 }
 0x274   : > { %v4974_v39 = vadd.f32 %v4973_v63, %v4972_v43  ;;  %v4975_v36 = vpop.f32.mrb[90].mxu1 }
 0x275   : > { %v4896_v13 = vpop.f32.mrb[80].mxu0  ;;  %v4976_v30 = vpop.f32.mrb[91].mxu1 }
 0x276   : > { %v4897_v51 = vpop.f32.mrb[81].mxu0  ;;  %v4977_v40 = vadd.f32 %v4976_v30, %v4975_v36  ;;  %v6934_v52 = vadd.f32 %v4974_v39, %v6868_v47 }
 0x277   : > { %v4898_v26 = vadd.f32 %v4897_v51, %v4896_v13  ;;  %v4899_v19 = vpop.f32.mrb[82].mxu0 }
 0x278   : > { %v4900_v53 = vpop.f32.mrb[83].mxu0  ;;  %v6937_v37 = vadd.f32 %v4977_v40, %v6871_v58 }
 0x279   : > { %v6940_v57 = vadd.f32 %v4898_v26, %v6833_v50  ;;  %v4901_v28 = vadd.f32 %v4900_v53, %v4899_v19 }
 0x27a   : > { %v4978_v18 = vpop.f32.mrb[92].mxu1 }
 0x27b   : > { %v6943_v31 = vadd.f32 %v4901_v28, %v6835_v33  ;;  %v4979_v22 = vpop.f32.mrb[93].mxu1 }
 0x27c   : > { %v4980_v8 = vadd.f32 %v4979_v22, %v4978_v18  ;;  %v4981_v21 = vpop.f32.mrb[94].mxu1 }
 0x27d   : > { %v4902_v56 = vpop.f32.mrb[84].mxu0  ;;  %v4982_v47 = vpop.f32.mrb[95].mxu1 }
 0x27e   : > { %v4903_v14 = vpop.f32.mrb[85].mxu0  ;;  %v4983_v0 = vadd.f32 %v4982_v47, %v4981_v21  ;;  %v6946_v35 = vadd.f32 %v4980_v8, %v6880_v59 }
 0x27f   : > { %v4904_v58 = vadd.f32 %v4903_v14, %v4902_v56  ;;  %v4905_v7 = vpop.f32.mrb[86].mxu0 }
 0x280   : > { %v4906_v42 = vpop.f32.mrb[87].mxu0  ;;  %v6949_v50 = vadd.f32 %v4983_v0, %v6883_v3 }
 0x281   : > { %v6952_v9 = vadd.f32 %v4904_v58, %v6837_v12  ;;  %v4907_v33 = vadd.f32 %v4906_v42, %v4905_v7 }
 0x282   : > { %v4984_v46 = vpop.f32.mrb[96].mxu1 }
 0x283   : > { %v6955_v29 = vadd.f32 %v4907_v33, %v6839_v1  ;;  %v4985_v25 = vpop.f32.mrb[97].mxu1 }
 0x284   : > { %v4986_v6 = vadd.f32 %v4985_v25, %v4984_v46  ;;  %v4987_v45 = vpop.f32.mrb[98].mxu1 }
 0x285   : > { %v4908_v43 = vpop.f32.mrb[88].mxu0  ;;  %v4988_v59 = vpop.f32.mrb[99].mxu1 }
 0x286   : > { %v4909_v63 = vpop.f32.mrb[89].mxu0  ;;  %v4989_v39 = vadd.f32 %v4988_v59, %v4987_v45  ;;  %v6958_v36 = vadd.f32 %v4986_v6, %v6892_v44 }
 0x287   : > { %v4910_v3 = vadd.f32 %v4909_v63, %v4908_v43  ;;  %v4911_v13 = vpop.f32.mrb[90].mxu0 }
 0x288   : > { %v4912_v30 = vpop.f32.mrb[91].mxu0  ;;  %v6961_v12 = vadd.f32 %v4989_v39, %v6895_v54 }
 0x289   : > { %v6964_v51 = vadd.f32 %v4910_v3, %v6841_v20  ;;  %v4913_v1 = vadd.f32 %v4912_v30, %v4911_v13 }
 0x28a   : > { %v4990_v40 = vpop.f32.mrb[100].mxu1 }
 0x28b   : > { %v6967_v26 = vadd.f32 %v4913_v1, %v6843_v38  ;;  %v4991_v19 = vpop.f32.mrb[101].mxu1 }
 0x28c   : > { %v4992_v53 = vadd.f32 %v4991_v19, %v4990_v40  ;;  %v4993_v28 = vpop.f32.mrb[102].mxu1 }
 0x28d   : > { %v4914_v18 = vpop.f32.mrb[92].mxu0  ;;  %v4994_v44 = vpop.f32.mrb[103].mxu1 }
 0x28e   : > { %v4915_v22 = vpop.f32.mrb[93].mxu0  ;;  %v4995_v8 = vadd.f32 %v4994_v44, %v4993_v28  ;;  %v6970_v21 = vadd.f32 %v4992_v53, %v6904_v4 }
 0x28f   : > { %v4916_v54 = vadd.f32 %v4915_v22, %v4914_v18  ;;  %v4917_v56 = vpop.f32.mrb[94].mxu0 }
 0x290   : > { %v4918_v47 = vpop.f32.mrb[95].mxu0  ;;  %v6973_v20 = vadd.f32 %v4995_v8, %v6907_v34 }
 0x291   : > { %v6976_v14 = vadd.f32 %v4916_v54, %v6851_v62  ;;  %v4919_v38 = vadd.f32 %v4918_v47, %v4917_v56 }
 0x292   : > { %v4996_v0 = vpop.f32.mrb[104].mxu1 }
 0x293   : > { %v6979_v58 = vadd.f32 %v4919_v38, %v6853_v49  ;;  %v4997_v7 = vpop.f32.mrb[105].mxu1 }
 0x294   : > { %v4998_v42 = vadd.f32 %v4997_v7, %v4996_v0  ;;  %v4999_v33 = vpop.f32.mrb[106].mxu1 }
 0x295   : > { %v4920_v46 = vpop.f32.mrb[96].mxu0  ;;  %v5000_v4 = vpop.f32.mrb[107].mxu1 }
 0x296   : > { %v4921_v25 = vpop.f32.mrb[97].mxu0  ;;  %v5001_v6 = vadd.f32 %v5000_v4, %v4999_v33  ;;  %v6982_v45 = vadd.f32 %v4998_v42, %v6916_v23 }
 0x297   : > { %v4922_v34 = vadd.f32 %v4921_v25, %v4920_v46  ;;  %v4923_v43 = vpop.f32.mrb[98].mxu0 }
 0x298   : > { %v4924_v59 = vpop.f32.mrb[99].mxu0  ;;  %v6985_v62 = vadd.f32 %v5001_v6, %v6919_v27 }
 0x299   : > { %v6988_v63 = vadd.f32 %v4922_v34, %v6862_v11  ;;  %v4925_v49 = vadd.f32 %v4924_v59, %v4923_v43 }
 0x29a   : > { %v5002_v39 = vpop.f32.mrb[108].mxu1 }
 0x29b   : > { %v6991_v3 = vadd.f32 %v4925_v49, %v6865_v41  ;;  %v5003_v13 = vpop.f32.mrb[109].mxu1 }
 0x29c   : > { %v5004_v30 = vadd.f32 %v5003_v13, %v5002_v39  ;;  %v5005_v1 = vpop.f32.mrb[110].mxu1 }
 0x29d   : > { %v4926_v40 = vpop.f32.mrb[100].mxu0  ;;  %v5006_v23 = vpop.f32.mrb[111].mxu1 }
 0x29e   : > { %v4927_v19 = vpop.f32.mrb[101].mxu0  ;;  %v5007_v53 = vadd.f32 %v5006_v23, %v5005_v1  ;;  %v6994_v28 = vadd.f32 %v5004_v30, %v6928_v2 }
 0x29f   : > { %v4928_v27 = vadd.f32 %v4927_v19, %v4926_v40  ;;  %v4929_v18 = vpop.f32.mrb[102].mxu0 }
 0x2a0   : > { %v4930_v44 = vpop.f32.mrb[103].mxu0  ;;  %v6997_v11 = vadd.f32 %v5007_v53, %v6931_v17 }
 0x2a1   : > { %v7000_v22 = vadd.f32 %v4928_v27, %v6874_v15  ;;  %v4931_v41 = vadd.f32 %v4930_v44, %v4929_v18 }
 0x2a2   : > { %v5008_v8 = vpop.f32.mrb[112].mxu1 }
 0x2a3   : > { %v7003_v54 = vadd.f32 %v4931_v41, %v6877_v61  ;;  %v5009_v56 = vpop.f32.mrb[113].mxu1 }
 0x2a4   : > { %v5010_v47 = vadd.f32 %v5009_v56, %v5008_v8  ;;  %v5011_v38 = vpop.f32.mrb[114].mxu1 }
 0x2a5   : > { %v4932_v0 = vpop.f32.mrb[104].mxu0  ;;  %v5012_v2 = vpop.f32.mrb[115].mxu1 }
 0x2a6   : > { %v4933_v7 = vpop.f32.mrb[105].mxu0  ;;  %v5013_v42 = vadd.f32 %v5012_v2, %v5011_v38  ;;  %v7006_v33 = vadd.f32 %v5010_v47, %v6940_v57 }
 0x2a7   : > { %v4934_v17 = vadd.f32 %v4933_v7, %v4932_v0  ;;  %v4935_v46 = vpop.f32.mrb[106].mxu0 }
 0x2a8   : > { %v4936_v4 = vpop.f32.mrb[107].mxu0  ;;  %v7009_v15 = vadd.f32 %v5013_v42, %v6943_v31 }
 0x2a9   : > { %v7012_v25 = vadd.f32 %v4934_v17, %v6886_v24  ;;  %v4937_v61 = vadd.f32 %v4936_v4, %v4935_v46 }
 0x2aa   : > { %v5014_v6 = vpop.f32.mrb[116].mxu1 }
 0x2ab   : > { %v7015_v34 = vadd.f32 %v4937_v61, %v6889_v55  ;;  %v5015_v43 = vpop.f32.mrb[117].mxu1 }
 0x2ac   : > { %v5016_v59 = vadd.f32 %v5015_v43, %v5014_v6  ;;  %v5017_v49 = vpop.f32.mrb[118].mxu1 }
 0x2ad   : > { %v4938_v39 = vpop.f32.mrb[108].mxu0  ;;  %v5018_v57 = vpop.f32.mrb[119].mxu1 }
 0x2ae   : > { %v4939_v13 = vpop.f32.mrb[109].mxu0  ;;  %v5019_v30 = vadd.f32 %v5018_v57, %v5017_v49  ;;  %v7018_v1 = vadd.f32 %v5016_v59, %v6952_v9 }
 0x2af   : > { %v4940_v31 = vadd.f32 %v4939_v13, %v4938_v39  ;;  %v4941_v40 = vpop.f32.mrb[110].mxu0 }
 0x2b0   : > { %v4942_v23 = vpop.f32.mrb[111].mxu0  ;;  %v7021_v24 = vadd.f32 %v5019_v30, %v6955_v29 }
 0x2b1   : > { %v7024_v19 = vadd.f32 %v4940_v31, %v6898_v48  ;;  %v4943_v55 = vadd.f32 %v4942_v23, %v4941_v40 }
 0x2b2   : > { %v5020_v53 = vpop.f32.mrb[120].mxu1 }
 0x2b3   : > { %v7027_v27 = vadd.f32 %v4943_v55, %v6901_v10  ;;  %v5021_v18 = vpop.f32.mrb[121].mxu1 }
 0x2b4   : > { %v5022_v44 = vadd.f32 %v5021_v18, %v5020_v53  ;;  %v5023_v41 = vpop.f32.mrb[122].mxu1 }
 0x2b5   : > { %v5098_v8 = vpop.f32.mrb[112].mxu0  ;;  %v5024_v9 = vpop.f32.mrb[123].mxu1 }
 0x2b6   : > { %v7030_v56 = vadd.f32 %v5098_v8, %v6922_v32  ;;  %v3540_v47 = vpop.f32.mrb[113].mxu0  ;;  %v5025_v29 = vadd.f32 %v5024_v9, %v5023_v41  ;;  %v7033_v38 = vadd.f32 %v5022_v44, %v6964_v51 }
 0x2b7   : > { %v7036_v48 = vadd.f32 %v3540_v47, %v6910_v16  ;;  %v5099_v0 = vpop.f32.mrb[114].mxu0 }
 0x2b8   : > { %v7039_v10 = vadd.f32 %v5099_v0, %v6925_v5  ;;  %v3543_v2 = vpop.f32.mrb[115].mxu0  ;;  %v7042_v7 = vadd.f32 %v5025_v29, %v6967_v26 }
 0x2b9   : > { %v7045_v42 = vadd.f32 %v3543_v2, %v6913_v60 }
 0x2ba   : > { %v4506_v32 = vpack.c.bf16 %v7039_v10, %v7030_v56  ;;  %v5026_v17 = vpop.f32.mrb[124].mxu1 }
 0x2bb   : > { %v4501_v51 = vpack.c.bf16 %v7045_v42, %v7036_v48  ;;  %v3827_v16 = vadd.f32 %v7045_v42, %v7036_v48  ;;  %v5027_v46 = vpop.f32.mrb[125].mxu1 }
 0x2bc   : > { %4593 = vst [vmem:[%s7055_s24 + $0x8] sm:$0xff] %v4506_v32   ;;  %v5028_v5 = vadd.f32 %v5027_v46, %v5026_v17  ;;  %v5029_v60 = vpop.f32.mrb[126].mxu1 }
 0x2bd   : > { %4502 = vst [vmem:[%s7055_s24] sm:$0xff] %v4501_v51   ;;  %v3828_v26 = vadd.f32 %v3827_v16, %v7030_v56  ;;  %v5102_v4 = vpop.f32.mrb[116].mxu0  ;;  %v5030_v61 = vpop.f32.mrb[127].mxu1 }
 0x2be   : > { %v7061_v6 = vadd.f32 %v5102_v4, %v6946_v35  ;;  %v3556_v43 = vpop.f32.mrb[117].mxu0  ;;  %v5031_v59 = vadd.f32 %v5030_v61, %v5029_v60  ;;  %v7064_v49 = vadd.f32 %v5028_v5, %v6976_v14 }
 0x2bf   : > { %v7067_v39 = vadd.f32 %v3556_v43, %v6934_v52  ;;  %v3829_v57 = vadd.f32 %v3828_v26, %v7039_v10  ;;  %v5103_v13 = vpop.f32.mrb[118].mxu0 }
 0x2c0   : > { %v7071_v30 = vadd.f32 %v5103_v13, %v6949_v50  ;;  %v3559_v31 = vpop.f32.mrb[119].mxu0  ;;  %v7074_v35 = vadd.f32 %v5031_v59, %v6979_v58 }
 0x2c1   : > { %v3830_v40 = vadd.f32 %v3829_v57, %v7067_v39  ;;  %v7078_v23 = vadd.f32 %v3559_v31, %v6937_v37 }
 0x2c2   : > { %v4516_v52 = vpack.c.bf16 %v7071_v30, %v7061_v6  ;;  %v5032_v14 = vpop.f32.mrb[128].mxu1 }
 0x2c3   : > { %v4511_v55 = vpack.c.bf16 %v7078_v23, %v7067_v39  ;;  %v3831_v53 = vadd.f32 %v3830_v40, %v7078_v23  ;;  %v5033_v50 = vpop.f32.mrb[129].mxu1 }
 0x2c4   : > { %4595 = vst [vmem:[%s7055_s24 + $0x18] sm:$0xff] %v4516_v52   ;;  %v5034_v18 = vadd.f32 %v5033_v50, %v5032_v14  ;;  %v5035_v44 = vpop.f32.mrb[130].mxu1 }
 0x2c5   : > { %4594 = vst [vmem:[%s7055_s24 + $0x10] sm:$0xff] %v4511_v55   ;;  %v3832_v58 = vadd.f32 %v3831_v53, %v7061_v6  ;;  %v5106_v41 = vpop.f32.mrb[120].mxu0  ;;  %v5036_v8 = vpop.f32.mrb[131].mxu1 }
 0x2c6   : > { %v7089_v37 = vadd.f32 %v5106_v41, %v6970_v21  ;;  %v3572_v9 = vpop.f32.mrb[121].mxu0  ;;  %v5037_v47 = vadd.f32 %v5036_v8, %v5035_v44  ;;  %v7092_v29 = vadd.f32 %v5034_v18, %v6988_v63 }
 0x2c7   : > { %v7095_v0 = vadd.f32 %v3572_v9, %v6958_v36  ;;  %v3833_v2 = vadd.f32 %v3832_v58, %v7071_v30  ;;  %v5107_v32 = vpop.f32.mrb[122].mxu0 }
 0x2c8   : > { %v7099_v17 = vadd.f32 %v5107_v32, %v6973_v20  ;;  %v3575_v51 = vpop.f32.mrb[123].mxu0  ;;  %v7102_v21 = vadd.f32 %v5037_v47, %v6991_v3 }
 0x2c9   : > { %v3834_v16 = vadd.f32 %v3833_v2, %v7095_v0  ;;  %v7106_v46 = vadd.f32 %v3575_v51, %v6961_v12 }
 0x2ca   : > { %v4526_v36 = vpack.c.bf16 %v7099_v17, %v7089_v37  ;;  %v5038_v63 = vpop.f32.mrb[132].mxu1 }
 0x2cb   : > { %v4521_v5 = vpack.c.bf16 %v7106_v46, %v7095_v0  ;;  %v3835_v60 = vadd.f32 %v3834_v16, %v7106_v46  ;;  %v5039_v20 = vpop.f32.mrb[133].mxu1 }
 0x2cc   : > { %4597 = vst [vmem:[%s7055_s24 + $0x28] sm:$0xff] %v4526_v36   ;;  %v5040_v26 = vadd.f32 %v5039_v20, %v5038_v63  ;;  %v5041_v4 = vpop.f32.mrb[134].mxu1 }
 0x2cd   : > { %4596 = vst [vmem:[%s7055_s24 + $0x20] sm:$0xff] %v4521_v5   ;;  %v3836_v3 = vadd.f32 %v3835_v60, %v7089_v37  ;;  %v5110_v61 = vpop.f32.mrb[124].mxu0  ;;  %v5042_v43 = vpop.f32.mrb[135].mxu1 }
 0x2ce   : > { %v7117_v12 = vadd.f32 %v5110_v61, %v6994_v28  ;;  %v3588_v59 = vpop.f32.mrb[125].mxu0  ;;  %v5043_v57 = vadd.f32 %v5042_v43, %v5041_v4  ;;  %v7120_v13 = vadd.f32 %v5040_v26, %v7000_v22 }
 0x2cf   : > { %v7123_v31 = vadd.f32 %v3588_v59, %v6982_v45  ;;  %v3837_v40 = vadd.f32 %v3836_v3, %v7099_v17  ;;  %v5111_v52 = vpop.f32.mrb[126].mxu0 }
 0x2d0   : > { %v7127_v14 = vadd.f32 %v5111_v52, %v6997_v11  ;;  %v3591_v55 = vpop.f32.mrb[127].mxu0  ;;  %v7130_v28 = vadd.f32 %v5043_v57, %v7003_v54 }
 0x2d1   : > { %v3838_v53 = vadd.f32 %v3837_v40, %v7123_v31  ;;  %v7134_v50 = vadd.f32 %v3591_v55, %v6985_v62 }
 0x2d2   : > { %v4536_v45 = vpack.c.bf16 %v7127_v14, %v7117_v12  ;;  %v5044_v22 = vpop.f32.mrb[136].mxu1 }
 0x2d3   : > { %v4531_v18 = vpack.c.bf16 %v7134_v50, %v7123_v31  ;;  %v3839_v44 = vadd.f32 %v3838_v53, %v7134_v50  ;;  %v5045_v11 = vpop.f32.mrb[137].mxu1 }
 0x2d4   : > { %4599 = vst [vmem:[%s7055_s24 + $0x38] sm:$0xff] %v4536_v45   ;;  %v5046_v58 = vadd.f32 %v5045_v11, %v5044_v22  ;;  %v5047_v41 = vpop.f32.mrb[138].mxu1 }
 0x2d5   : > { %4598 = vst [vmem:[%s7055_s24 + $0x30] sm:$0xff] %v4531_v18   ;;  %v3840_v54 = vadd.f32 %v3839_v44, %v7117_v12  ;;  %v5114_v8 = vpop.f32.mrb[128].mxu0  ;;  %v5048_v9 = vpop.f32.mrb[139].mxu1 }
 0x2d6   : > { %v7145_v62 = vadd.f32 %v5114_v8, %v7018_v1  ;;  %v3604_v47 = vpop.f32.mrb[129].mxu0  ;;  %v5049_v2 = vadd.f32 %v5048_v9, %v5047_v41  ;;  %v3492_v32 = vadd.f32 %v5046_v58, %v7012_v25 }
 0x2d7   : > { %v7149_v51 = vadd.f32 %v3604_v47, %v7006_v33  ;;  %v3841_v16 = vadd.f32 %v3840_v54, %v7127_v14  ;;  %v5115_v36 = vpop.f32.mrb[130].mxu0 }
 0x2d8   : > { %v7153_v63 = vadd.f32 %v5115_v36, %v7021_v24  ;;  %v3607_v5 = vpop.f32.mrb[131].mxu0  ;;  %v3495_v60 = vadd.f32 %v5049_v2, %v7015_v34 }
 0x2d9   : > { %v3842_v1 = vadd.f32 %v3841_v16, %v7149_v51  ;;  %v7158_v20 = vadd.f32 %v3607_v5, %v7009_v15 }
 0x2da   : > { %v4546_v25 = vpack.c.bf16 %v7153_v63, %v7145_v62  ;;  %v5050_v33 = vpop.f32.mrb[140].mxu1 }
 0x2db   : > { %v4541_v26 = vpack.c.bf16 %v7158_v20, %v7149_v51  ;;  %v3843_v4 = vadd.f32 %v3842_v1, %v7158_v20  ;;  %v5051_v3 = vpop.f32.mrb[141].mxu1 }
 0x2dc   : > { %4601 = vst [vmem:[%s7055_s24 + $0x48] sm:$0xff] %v4546_v25   ;;  %v5052_v24 = vadd.f32 %v5051_v3, %v5050_v33  ;;  %v5053_v61 = vpop.f32.mrb[142].mxu1 }
 0x2dd   : > { %4600 = vst [vmem:[%s7055_s24 + $0x40] sm:$0xff] %v4541_v26   ;;  %v3844_v34 = vadd.f32 %v3843_v4, %v7145_v62  ;;  %v5118_v43 = vpop.f32.mrb[132].mxu0  ;;  %v5054_v59 = vpop.f32.mrb[143].mxu1 }
 0x2de   : > { %v7169_v15 = vadd.f32 %v5118_v43, %v7064_v49  ;;  %v3620_v57 = vpop.f32.mrb[133].mxu0  ;;  %v3500_v40 = vadd.f32 %v5052_v24, %v7024_v19  ;;  %v5055_v52 = vadd.f32 %v5054_v59, %v5053_v61 }
 0x2df   : > { %v7173_v55 = vadd.f32 %v3620_v57, %v7033_v38  ;;  %v3845_v53 = vadd.f32 %v3844_v34, %v7153_v63  ;;  %v5119_v45 = vpop.f32.mrb[134].mxu0 }
 0x2e0   : > { %v7177_v22 = vadd.f32 %v5119_v45, %v7074_v35  ;;  %v3623_v18 = vpop.f32.mrb[135].mxu0  ;;  %v3503_v44 = vadd.f32 %v5055_v52, %v7027_v27 }
 0x2e1   : > { %v3846_v49 = vadd.f32 %v3845_v53, %v7173_v55  ;;  %v7182_v11 = vadd.f32 %v3623_v18, %v7042_v7 }
 0x2e2   : > { %v4556_v19 = vpack.c.bf16 %v7177_v22, %v7169_v15 }
 0x2e3   : > { %v4551_v38 = vpack.c.bf16 %v7182_v11, %v7173_v55  ;;  %v3847_v58 = vadd.f32 %v3846_v49, %v7182_v11 }
 0x2e4   : > { %4603 = vst [vmem:[%s7055_s24 + $0x58] sm:$0xff] %v4556_v19  }
 0x2e5   : > { %4602 = vst [vmem:[%s7055_s24 + $0x50] sm:$0xff] %v4551_v38   ;;  %v3848_v35 = vadd.f32 %v3847_v58, %v7169_v15  ;;  %v5122_v27 = vpop.f32.mrb[136].mxu0 }
 0x2e6   : > { %v7193_v41 = vadd.f32 %v5122_v27, %v7120_v13  ;;  %v3636_v7 = vpop.f32.mrb[137].mxu0 }
 0x2e7   : > { %v7196_v54 = vadd.f32 %v3636_v7, %v7092_v29  ;;  %v3849_v8 = vadd.f32 %v3848_v35, %v7177_v22  ;;  %v5123_v9 = vpop.f32.mrb[138].mxu0 }
 0x2e8   : > { %v7200_v47 = vadd.f32 %v5123_v9, %v7130_v28  ;;  %v3639_v2 = vpop.f32.mrb[139].mxu0 }
 0x2e9   : > { %v3850_v16 = vadd.f32 %v3849_v8, %v7196_v54  ;;  %v7204_v36 = vadd.f32 %v3639_v2, %v7102_v21 }
 0x2ea   : > { %v4566_v13 = vpack.c.bf16 %v7200_v47, %v7193_v41 }
 0x2eb   : > { %v4561_v29 = vpack.c.bf16 %v7204_v36, %v7196_v54  ;;  %v3851_v5 = vadd.f32 %v3850_v16, %v7204_v36 }
 0x2ec   : > { %4605 = vst [vmem:[%s7055_s24 + $0x68] sm:$0xff] %v4566_v13  }
 0x2ed   : > { %4604 = vst [vmem:[%s7055_s24 + $0x60] sm:$0xff] %v4561_v29   ;;  %v3852_v28 = vadd.f32 %v3851_v5, %v7193_v41  ;;  %v5126_v1 = vpop.f32.mrb[140].mxu0 }
 0x2ee   : > { %v3652_v25 = vpop.f32.mrb[141].mxu0  ;;  %v7214_v33 = vadd.f32 %v5126_v1, %v3500_v40 }
 0x2ef   : > { %v7216_v21 = vadd.f32 %v3652_v25, %v3492_v32  ;;  %v3853_v26 = vadd.f32 %v3852_v28, %v7200_v47  ;;  %v5127_v4 = vpop.f32.mrb[142].mxu0 }
 0x2f0   : > { %v3655_v3 = vpop.f32.mrb[143].mxu0  ;;  %v7221_v24 = vadd.f32 %v5127_v4, %v3503_v44 }
 0x2f1   : > { %v3854_v61 = vadd.f32 %v3853_v26, %v7216_v21  ;;  %v7224_v34 = vadd.f32 %v3655_v3, %v3495_v60 }
 0x2f2   : > { %v4576_v43 = vpack.c.bf16 %v7221_v24, %v7214_v33 }
 0x2f3   : > { %v4571_v32 = vpack.c.bf16 %v7224_v34, %v7216_v21  ;;  %v3855_v59 = vadd.f32 %v3854_v61, %v7224_v34 }
 0x2f4   : > { %4607 = vst [vmem:[%s7055_s24 + $0x78] sm:$0xff] %v4576_v43  }
 0x2f5   : > { %4606 = vst [vmem:[%s7055_s24 + $0x70] sm:$0xff] %v4571_v32   ;;  %v3856_v60 = vadd.f32 %v3855_v59, %v7214_v33 }
 0x2f6   : > { %5465 = shalt.err (!%p5462_p13)
}
 0x2f7   : > { %s5466_s7 = scalar_lea.hbm %s7231_s30, 2048  ;;  %s5470_s15 = scalar_lea.hbm %s7390_s4, 4096 }
 0x2f8   : > { %p5467_p0 = scmp.ne.s32.totalorder %s7231_s30, %s5466_s7  ;;  %p5471_p9 = scmp.lt.u32.totalorder %s7231_s30, %s7390_s4 }
 0x2f9   : > { %p5472_p12 = scmp.lt.u32.totalorder %s5470_s15, %s5466_s7  ;;  %p5474_p1 = scmp.lt.u32.totalorder %s5466_s7, %s7231_s30 }
 0x2fa   : > { %p5468_p5 = pnand %p5467_p0, %p5747_p6 }
 0x2fb   : > { %p5473_p2 = por %p5472_p12, %p5471_p9 }
 0x2fc   : > { %p5469_p11 = pneg %p5468_p5 }
 0x2fd   : > { %p5475_p4 = por %p5474_p1, %p5473_p2 }
 0x2ff   : > { %p5476_p8 = pnand %p5475_p4, %p5469_p11 }
 0x301   : > { %5479 = shalt.err (!%p5476_p8)
}
 0x302   : > { %s5568_s14 = smov 64   ;;  %s5569_s11 = smov 4   ;;  %v3857_v57 = vadd.f32 %v3856_v60, %v7221_v24 }
 0x303   : > { %5158 = dma.vmem_to_hbm [thread:$0]  (%p5747_p6), %s7233_s13, 2048, %s7231_s30, %s3970_s28, %s5568_s14, %s5568_s14, %s5569_s11  }
 0x304   : > { %v3858_v40 = vrot.slane %v3857_v57, 4  ;;  %s4150_s13 = sshll.u32 %s5798_s17, 1  ;;  %s4365_s30 = sshll.u32 %s5622_s22, 5 }
 0x305   : > { %s293_s28 = scalar_lea.vmem [#allocation13], %s4150_s13  ;;  %s7340_s23 = scalar_lea.hbm %s7391_s5, %s4365_s30 }
 0x306   : > { %v3859_v52 = vadd.f32 %v3858_v40, %v3857_v57  ;;  %s4004_s10 = sshll.u32 %s293_s28, 4  ;;  %s3975_s7 = scalar_lea.sflag [#allocation14], %s5798_s17  ;;  %s7342_s10 = int_to_ptr.vmem [resolvable:$true] %s4004_s10 }
 0x307   : > { %s5480_s8 = scalar_lea.vmem %s7342_s10, 32  ;;  %s5570_s22 = smov [#allocation13]  }
 0x308   : > { %v3860_v53 = vrot.slane %v3859_v52, 2  ;;  %p5481_p3 = scmp.ne.s32.totalorder %s7342_s10, %s5480_s8  ;;  %s5484_s9 = sshll.u32 %s5570_s22, 4  ;;  %s5485_s9 = int_to_ptr.vmem [resolvable:$false] %s5484_s9 }
 0x309   : > { %s5486_s15 = scalar_lea.vmem %s5485_s9, 64  ;;  %p5487_p13 = scmp.lt.s32.totalorder %s7342_s10, %s5485_s9 }
 0x30a   : > { %v3861_v45 = vadd.f32 %v3860_v53, %v3859_v52  ;;  %p5482_p7 = pnand %p5481_p3, %p5747_p6  ;;  %p5488_p0 = scmp.lt.s32.totalorder %s5486_s15, %s5480_s8 }
 0x30c   : > { %v3862_v18 = vrot.slane %v3861_v45, 1  ;;  %p5483_p10 = pneg %p5482_p7  ;;  %p5489_p5 = por %p5488_p0, %p5487_p13 }
 0x30e   : > { %v7266_v44 = vadd.f32 %v3862_v18, %v3861_v45  ;;  %p5490_p11 = pnand %p5489_p5, %p5483_p10 }
 0x310   : > { %v7269_v49 = vmul.f32 0.00390625, %v7266_v44 }
 0x312   : > { %v3865_v19 = vsub.f32 %v7036_v48, %v7269_v49  ;;  %v3866_v38 = vsub.f32 %v7045_v42, %v7269_v49  ;;  %v3867_v58 = vsub.f32 %v7030_v56, %v7269_v49  ;;  %v3868_v7 = vsub.f32 %v7039_v10, %v7269_v49 }
 0x313   : > { %v3869_v8 = vsub.f32 %v7067_v39, %v7269_v49  ;;  %v3870_v16 = vsub.f32 %v7078_v23, %v7269_v49  ;;  %v3871_v42 = vsub.f32 %v7061_v6, %v7269_v49  ;;  %v3872_v5 = vsub.f32 %v7071_v30, %v7269_v49 }
 0x314   : > { %v3897_v35 = vmul.f32 %v3865_v19, %v3865_v19  ;;  %v3898_v27 = vmul.f32 %v3866_v38, %v3866_v38  ;;  %v3899_v9 = vmul.f32 %v3867_v58, %v3867_v58  ;;  %v3900_v48 = vmul.f32 %v3868_v7, %v3868_v7 }
 0x315   : > { %v3901_v29 = vmul.f32 %v3869_v8, %v3869_v8  ;;  %v3902_v28 = vmul.f32 %v3870_v16, %v3870_v16  ;;  %v3873_v39 = vsub.f32 %v7095_v0, %v7269_v49  ;;  %v3903_v1 = vmul.f32 %v3871_v42, %v3871_v42 }
 0x316   : > { %v3929_v2 = vadd.f32 %v3898_v27, %v3897_v35  ;;  %v3874_v23 = vsub.f32 %v7106_v46, %v7269_v49  ;;  %v3904_v26 = vmul.f32 %v3872_v5, %v3872_v5  ;;  %v3875_v6 = vsub.f32 %v7089_v37, %v7269_v49 }
 0x317   : > { %v3905_v3 = vmul.f32 %v3873_v39, %v3873_v39  ;;  %v3876_v30 = vsub.f32 %v7099_v17, %v7269_v49  ;;  %v3877_v0 = vsub.f32 %v7123_v31, %v7269_v49  ;;  %v3878_v46 = vsub.f32 %v7134_v50, %v7269_v49 }
 0x318   : > { %v3930_v13 = vadd.f32 %v3929_v2, %v3899_v9  ;;  %v3906_v43 = vmul.f32 %v3874_v23, %v3874_v23  ;;  %v3907_v59 = vmul.f32 %v3875_v6, %v3875_v6  ;;  %v3879_v37 = vsub.f32 %v7117_v12, %v7269_v49 }
 0x319   : > { %v3908_v57 = vmul.f32 %v3876_v30, %v3876_v30  ;;  %v3909_v52 = vmul.f32 %v3877_v0, %v3877_v0  ;;  %v3880_v17 = vsub.f32 %v7127_v14, %v7269_v49  ;;  %v3910_v45 = vmul.f32 %v3878_v46, %v3878_v46 }
 0x31a   : > { %v3931_v56 = vadd.f32 %v3930_v13, %v3900_v48  ;;  %v3881_v31 = vsub.f32 %v7149_v51, %v7269_v49  ;;  %v3911_v19 = vmul.f32 %v3879_v37, %v3879_v37  ;;  %v3882_v50 = vsub.f32 %v7158_v20, %v7269_v49 }
 0x31b   : > { %v3912_v58 = vmul.f32 %v3880_v17, %v3880_v17  ;;  %v3883_v12 = vsub.f32 %v7145_v62, %v7269_v49  ;;  %v3884_v14 = vsub.f32 %v7153_v63, %v7269_v49  ;;  %v3885_v51 = vsub.f32 %v7173_v55, %v7269_v49 }
 0x31c   : > { %v3932_v10 = vadd.f32 %v3931_v56, %v3901_v29  ;;  %v3913_v27 = vmul.f32 %v3881_v31, %v3881_v31  ;;  %v3914_v8 = vmul.f32 %v3882_v50, %v3882_v50  ;;  %v3886_v20 = vsub.f32 %v7182_v11, %v7269_v49 }
 0x31d   : > { %v3915_v2 = vmul.f32 %v3883_v12, %v3883_v12  ;;  %v3916_v48 = vmul.f32 %v3884_v14, %v3884_v14  ;;  %v3887_v62 = vsub.f32 %v7169_v15, %v7269_v49  ;;  %v3917_v42 = vmul.f32 %v3885_v51, %v3885_v51 }
 0x31e   : > { %v3933_v25 = vadd.f32 %v3932_v10, %v3902_v28  ;;  %v3888_v63 = vsub.f32 %v7177_v22, %v7269_v49  ;;  %v3918_v56 = vmul.f32 %v3886_v20, %v3886_v20  ;;  %v3889_v55 = vsub.f32 %v7196_v54, %v7269_v49 }
 0x31f   : > { %v3919_v28 = vmul.f32 %v3887_v62, %v3887_v62  ;;  %v3890_v11 = vsub.f32 %v7204_v36, %v7269_v49  ;;  %v3891_v15 = vsub.f32 %v7193_v41, %v7269_v49  ;;  %v3892_v22 = vsub.f32 %v7200_v47, %v7269_v49 }
 0x320   : > { %v3934_v4 = vadd.f32 %v3933_v25, %v3903_v1  ;;  %v3920_v39 = vmul.f32 %v3888_v63, %v3888_v63  ;;  %v3921_v25 = vmul.f32 %v3889_v55, %v3889_v55  ;;  %v3893_v54 = vsub.f32 %v7216_v21, %v7269_v49 }
 0x321   : > { %v3923_v6 = vmul.f32 %v3891_v15, %v3891_v15  ;;  %v3894_v36 = vsub.f32 %v7224_v34, %v7269_v49  ;;  %v3895_v41 = vsub.f32 %v7214_v33, %v7269_v49  ;;  %v3896_v47 = vsub.f32 %v7221_v24, %v7269_v49 }
 0x322   : > { %v3935_v61 = vadd.f32 %v3934_v4, %v3904_v26  ;;  %v3922_v26 = vmul.f32 %v3890_v11, %v3890_v11 }
 0x323   : > { %v3926_v0 = vmul.f32 %v3894_v36, %v3894_v36  ;;  %v3927_v21 = vmul.f32 %v3895_v41, %v3895_v41  ;;  %v3928_v46 = vmul.f32 %v3896_v47, %v3896_v47 }
 0x324   : > { %v3936_v32 = vadd.f32 %v3935_v61, %v3905_v3  ;;  %v3924_v61 = vmul.f32 %v3892_v22, %v3892_v22 }
 0x326   : > { %v3937_v60 = vadd.f32 %v3936_v32, %v3906_v43  ;;  %v3925_v43 = vmul.f32 %v3893_v54, %v3893_v54 }
 0x328   : > { %v3938_v40 = vadd.f32 %v3937_v60, %v3907_v59 }
 0x32a   : > { %v3939_v53 = vadd.f32 %v3938_v40, %v3908_v57 }
 0x32c   : > { %v3940_v18 = vadd.f32 %v3939_v53, %v3909_v52 }
 0x32e   : > { %v3941_v38 = vadd.f32 %v3940_v18, %v3910_v45 }
 0x330   : > { %v3942_v35 = vadd.f32 %v3941_v38, %v3911_v19 }
 0x332   : > { %v3943_v7 = vadd.f32 %v3942_v35, %v3912_v58 }
 0x334   : > { %v3944_v9 = vadd.f32 %v3943_v7, %v3913_v27 }
 0x336   : > { %v3945_v16 = vadd.f32 %v3944_v9, %v3914_v8 }
 0x338   : > { %v3946_v13 = vadd.f32 %v3945_v16, %v3915_v2 }
 0x33a   : > { %v3947_v29 = vadd.f32 %v3946_v13, %v3916_v48 }
 0x33c   : > { %v3948_v5 = vadd.f32 %v3947_v29, %v3917_v42 }
 0x33e   : > { %v3949_v10 = vadd.f32 %v3948_v5, %v3918_v56 }
 0x340   : > { %v3950_v1 = vadd.f32 %v3949_v10, %v3919_v28 }
 0x342   : > { %v3951_v23 = vadd.f32 %v3950_v1, %v3920_v39 }
 0x344   : > { %v3952_v4 = vadd.f32 %v3951_v23, %v3921_v25 }
 0x346   : > { %v3953_v3 = vadd.f32 %v3952_v4, %v3922_v26 }
 0x348   : > { %v3954_v30 = vadd.f32 %v3953_v3, %v3923_v6 }
 0x34a   : > { %v3955_v32 = vadd.f32 %v3954_v30, %v3924_v61 }
 0x34c   : > { %v3956_v59 = vadd.f32 %v3955_v32, %v3925_v43 }
 0x34e   : > { %v3957_v60 = vadd.f32 %v3956_v59, %v3926_v0 }
 0x350   : > { %v3958_v57 = vadd.f32 %v3957_v60, %v3927_v21 }
 0x352   : > { %v3959_v34 = vadd.f32 %v3958_v57, %v3928_v46 }
 0x354   : > { %v3960_v40 = vrot.slane %v3959_v34, 4 }
 0x356   : > { %v3961_v37 = vadd.f32 %v3960_v40, %v3959_v34 }
 0x358   : > { %v3962_v52 = vrot.slane %v3961_v37, 2 }
 0x35a   : > { %v3963_v33 = vadd.f32 %v3962_v52, %v3961_v37 }
 0x35c   : > { %v3964_v53 = vrot.slane %v3963_v33, 1 }
 0x35e   : > { %v3965_v17 = vadd.f32 %v3964_v53, %v3963_v33 }
 0x360   : > { %v3967_v24 = vsel %vm477_vm6, %v7266_v44, %v3965_v17 }
 0x361   : > { %3968 = vst [vmem:[%s293_s28] sm:$0x3] %v3967_v24 }
 0x362   : > { %5493 = shalt.err (!%p5490_p11)
}
 0x363   : > { %s5494_s17 = scalar_lea.hbm %s7340_s23, 32  ;;  %s5498_s14 = scalar_lea.hbm %s7391_s5, 64 }
 0x364   : > { %p5495_p9 = scmp.ne.s32.totalorder %s7340_s23, %s5494_s17  ;;  %p5499_p1 = scmp.lt.u32.totalorder %s7340_s23, %s7391_s5 }
 0x365   : > { %p5500_p4 = scmp.lt.u32.totalorder %s5498_s14, %s5494_s17  ;;  %p5502_p3 = scmp.lt.u32.totalorder %s5494_s17, %s7340_s23 }
 0x366   : > { %p5496_p12 = pnand %p5495_p9, %p5747_p6 }
 0x367   : > { %p5501_p8 = por %p5500_p4, %p5499_p1 }
 0x368   : > { %p5497_p2 = pneg %p5496_p12 }
 0x369   : > { %p5503_p7 = por %p5502_p3, %p5501_p8 }
 0x36b   : > { %p5504_p10 = pnand %p5503_p7, %p5497_p2 }
 0x36d   : > { %5507 = shalt.err (!%p5504_p10)
}
 0x36e   : > { %5159 = dma.vmem_to_hbm [thread:$0]  (%p5747_p6), %s7342_s10, 32, %s7340_s23, %s3975_s7  }
 0x36f PF: > { %s4016_s30 = sand.u32 1, %s5546_s18   ;;  %p7463_p13 = scmp.ne.s32.totalorder %s7414_s25, 0 }
 0x370   : > { %p7464_p0 = scmp.ge.s32.totalorder %s5558_s21, 2  ;;  %s4017_s28 = scalar_lea.sflag [#allocation6], %s4016_s30 }
 0x372   : > { %p5177_p5 = pnand %p7464_p0, %p7463_p13 }
 0x374   : > { %5537 = dma.done.wait (!%p5177_p5), %s4017_s28, 2048  }
 0x375   : > { %5539 = vsyncadd (!%p5177_p5), %s4017_s28, 4294965248  ;;  %s4026_s29 = scalar_lea.sflag [#allocation14], %s4016_s30 }
 0x376   : > { %5541 = dma.done.wait (!%p5177_p5), %s4026_s29, 32  }
 0x377   : > { %5543 = vsyncadd (!%p5177_p5), %s4026_s29, 4294967264  ;;  %p24_p6 = scmp.ge.s32.totalorder %s5733_s16, 4   ;;  %s7465_s18 = smov %s5550_s19 }
 0x378   : > { %s7466_s19 = smov %s5554_s20  ;;  %s7467_s20 = smov %s5743_s27 }
 0x379   : > { %s7468_s21 = smov %s5733_s16  ;;  %26 = sbr.rel (!%p24_p6) target bundleno = 9 (0x9), region = 112 }
 0x380   :  { %4031 = vsyncpa [#allocation5], 1 }
 0x381   :  { %4033 = vsyncpa [#allocation5 + $0x1], 1 }
 0x382   :  { %4034 = vsyncpa [#allocation8], 1 }
 0x383   :  { %4035 = vsyncpa [#allocation11], 1 }
 0x384   :  { %4036 = vsyncpa [#allocation6], 1 }
 0x385   :  { %4038 = vsyncpa [#allocation6 + $0x1], 1 }
 0x386   :  { %4039 = vsyncpa [#allocation14], 1 }
 0x387   :  { %4041 = vsyncpa [#allocation14 + $0x1], 1 }

</bundles_post_ra>
